<compile_context>
chip_gen: v7x
topology: tpu7x:2x2x1
jax: 0.10.0
libtpu: 0.0.40
codegen_flags: <defaults>
</compile_context>

<pallas_src>
import math

import jax
import jax.numpy as jnp
from jax.experimental import pallas as pl
from jax.experimental.pallas import tpu as pltpu

# ---------------------------------------------------------------------------
# Configuration (mirrors the PyTorch module's globals / ctor arguments)
# ---------------------------------------------------------------------------
SLIDING_WINDOW = 10          # sliding_window_size
CNN_OUTPUT_SIZE = 129        # cnn_output_size

IN_C, IN_H, IN_W = 3, 16, 16  # input_shape (C, H, W)
BB_OUT_C = 8                  # backbone.out_channels[-1]
BB_REDUCTION = 4              # backbone.reduction_factor
POOL_CHANNELS = 2             # pool_channels
FC_HIDDEN = 32                # fc_hidden_size
ANCHORS = 32                  # anchors

FEAT_H = math.ceil(IN_H / BB_REDUCTION)                 # 4
FEAT_W = math.ceil(IN_W / BB_REDUCTION)                 # 4
SPATIAL = FEAT_H * FEAT_W                               # 16
NUM_CHANNELS = POOL_CHANNELS * FEAT_H * FEAT_W          # 32
FC_OUT_IN = CNN_OUTPUT_SIZE * SLIDING_WINDOW            # 1290
FC_OUT_MID = FC_OUT_IN // 2                             # 645
OUT_DIM = ANCHORS * 2 + 1                               # 65


# ---------------------------------------------------------------------------
# Fused forward kernel (single grid step; all weights VMEM-resident)
# ---------------------------------------------------------------------------
def _fused_forward_kernel(
    x_ref,                              # (SW*SPATIAL, IN_C)        f32
    bb_w_ref, bb_b_ref,                 # backbone stand-in 1x1 conv
    conv_w_ref, conv_b_ref,             # self.conv (1x1)
    fc1_w_ref, fc1_b_ref,
    fc2_w_ref, fc2_b_ref,
    fc3_w_ref, fc3_b_ref,
    fc4_w_ref, fc4_b_ref,
    w1_ref,                             # (SW, 129, 1290)           bf16
    b1_ref,                             # (1, 1290)                 f32
    w2_ref,                             # (1290, 645)               bf16
    b2_ref,                             # (1, 645)                  f32
    w3_ref,                             # (645, OUT_DIM)            bf16
    b3_ref,                             # (1, OUT_DIM)              f32
    out_ref,                            # (1, OUT_DIM)              f32
):
    # ---- backbone stand-in + conv + AdaptiveMaxPool2d + fc stack -----------
    x = x_ref[...]                                              # (160, 3)
    h = jnp.dot(x, bb_w_ref[...], preferred_element_type=jnp.float32)
    h = jnp.maximum(h + bb_b_ref[...], 0.0)                     # (160, 8)
    c = jnp.dot(h, conv_w_ref[...], preferred_element_type=jnp.float32)
    c = c + conv_b_ref[...]                                     # (160, 32)

    # AdaptiveMaxPool2d((1,1)): max over the 16 spatial positions per frame.
    # Tile-aligned reshape (16 rows == 2 sublane tiles, lane dim unchanged).
    c3 = c.reshape(SLIDING_WINDOW, SPATIAL, NUM_CHANNELS)       # (10, 16, 32)
    f = jnp.max(c3, axis=1)                                     # (10, 32)

    f = jnp.maximum(jnp.dot(f, fc1_w_ref[...],
                            preferred_element_type=jnp.float32)
                    + fc1_b_ref[...], 0.0)                      # (10, 56)
    f = jnp.maximum(jnp.dot(f, fc2_w_ref[...],
                            preferred_element_type=jnp.float32)
                    + fc2_b_ref[...], 0.0)                      # (10, 40)
    f = jnp.maximum(jnp.dot(f, fc3_w_ref[...],
                            preferred_element_type=jnp.float32)
                    + fc3_b_ref[...], 0.0)                      # (10, 32)
    fea = jnp.dot(f, fc4_w_ref[...],
                  preferred_element_type=jnp.float32) + fc4_b_ref[...]  # (10, 129)

    # ---- fc_out layer 1 -----------------------------------------------------
    # The torch `fea.view(N*129)` flatten is replaced by a (T, F) double
    # contraction over w1[t, f, n] == W1[t*129 + f, n], so no cross-lane
    # relayout of the activation is ever materialized.
    fea_bf = fea.astype(jnp.bfloat16)                           # cast once
    acc1 = jnp.zeros((1, FC_OUT_IN), jnp.float32)
    for t in range(SLIDING_WINDOW):
        acc1 = acc1 + jnp.dot(fea_bf[t:t + 1, :], w1_ref[t],
                              preferred_element_type=jnp.float32)
    h1 = jnp.maximum(acc1 + b1_ref[...], 0.0)                   # (1, 1290)

    # ---- fc_out layer 2 -----------------------------------------------------
    h2 = jnp.maximum(
        jnp.dot(h1.astype(jnp.bfloat16), w2_ref[...],
                preferred_element_type=jnp.float32) + b2_ref[...], 0.0)  # (1, 645)

    # ---- fc_out layer 3 -----------------------------------------------------
    reg = jnp.dot(h2.astype(jnp.bfloat16), w3_ref[...],
                  preferred_element_type=jnp.float32) + b3_ref[...]      # (1, 65)
    out_ref[...] = reg


# ---------------------------------------------------------------------------
# Parameter construction (deterministic, PyTorch-Linear-style uniform init).
# Weights are stored as (in_features, out_features), i.e. torch `weight.T`.
# fc_out weights are stored at logical (unpadded) sizes, cast to bf16.
# ---------------------------------------------------------------------------
def _linear_init(key, fan_in, fan_out):
    kw, kb = jax.random.split(key)
    bound = 1.0 / math.sqrt(fan_in)
    w = jax.random.uniform(kw, (fan_in, fan_out), jnp.float32, -bound, bound)
    b = jax.random.uniform(kb, (1, fan_out), jnp.float32, -bound, bound)
    return w, b


def init_params(key):
    ks = jax.random.split(key, 9)
    p = {}
    # backbone stand-in: 1x1 conv C_in -> BB_OUT_C (after stride subsample)
    p["bb_w"], p["bb_b"] = _linear_init(ks[0], IN_C, BB_OUT_C)
    # self.conv: Conv2d(BB_OUT_C, NUM_CHANNELS, kernel_size=1)
    p["conv_w"], p["conv_b"] = _linear_init(ks[1], BB_OUT_C, NUM_CHANNELS)
    # self.fc (headLinearlayers == 3): 32 -> 56 -> 40 -> 32 -> 129
    h1, h2, h3 = int(FC_HIDDEN * 1.75), int(FC_HIDDEN * 1.25), FC_HIDDEN
    p["fc1_w"], p["fc1_b"] = _linear_init(ks[2], NUM_CHANNELS, h1)
    p["fc2_w"], p["fc2_b"] = _linear_init(ks[3], h1, h2)
    p["fc3_w"], p["fc3_b"] = _linear_init(ks[4], h2, h3)
    p["fc4_w"], p["fc4_b"] = _linear_init(ks[5], h3, CNN_OUTPUT_SIZE)

    # self.fc_out — unpadded logical sizes.
    w1, b1 = _linear_init(ks[6], FC_OUT_IN, FC_OUT_IN)       # (1290, 1290)
    w2, b2 = _linear_init(ks[7], FC_OUT_IN, FC_OUT_MID)      # (1290, 645)
    w3, b3 = _linear_init(ks[8], FC_OUT_MID, OUT_DIM)        # (645, 65)

    # out1: reshape rows to (T, F) so w1[t, f, n] == W1[t*129 + f, n].
    w1 = w1.reshape(SLIDING_WINDOW, CNN_OUTPUT_SIZE, FC_OUT_IN)

    p["out1_w"] = w1.astype(jnp.bfloat16)
    p["out1_b"] = b1
    p["out2_w"] = w2.astype(jnp.bfloat16)
    p["out2_b"] = b2
    p["out3_w"] = w3.astype(jnp.bfloat16)
    p["out3_b"] = b3
    return p


# ---------------------------------------------------------------------------
# Forward pass: one fused pallas_call, single grid step, weights resident
# ---------------------------------------------------------------------------
def _const_spec(shape):
    nd = len(shape)
    return pl.BlockSpec(shape, lambda j, _nd=nd: (0,) * _nd)


def forward(x5d, params):
    # x: (B, T, C, H, W) -> (B*T, C, H, W);  B*T must equal the sliding window.
    b, t, c, h, w = x5d.shape
    n = b * t
    assert n == SLIDING_WINDOW, "fc_out input size requires B*T == sliding_window"
    x = x5d.reshape(n, c, h, w)
    x = jnp.transpose(x, (0, 2, 3, 1))                    # NCHW -> NHWC
    # backbone stand-in prep (see TODO above): stride subsample
    x = x[:, ::BB_REDUCTION, ::BB_REDUCTION, :]           # (N, FEAT_H, FEAT_W, C)
    x = x.reshape(n * SPATIAL, c)                         # (160, 3)

    in_specs = [
        _const_spec((n * SPATIAL, c)),                             # x
        _const_spec(params["bb_w"].shape), _const_spec(params["bb_b"].shape),
        _const_spec(params["conv_w"].shape), _const_spec(params["conv_b"].shape),
        _const_spec(params["fc1_w"].shape), _const_spec(params["fc1_b"].shape),
        _const_spec(params["fc2_w"].shape), _const_spec(params["fc2_b"].shape),
        _const_spec(params["fc3_w"].shape), _const_spec(params["fc3_b"].shape),
        _const_spec(params["fc4_w"].shape), _const_spec(params["fc4_b"].shape),
        # fc_out — full-array, VMEM-resident
        _const_spec(params["out1_w"].shape),                       # (10,129,1290)
        _const_spec(params["out1_b"].shape),                       # (1, 1290)
        _const_spec(params["out2_w"].shape),                       # (1290, 645)
        _const_spec(params["out2_b"].shape),                       # (1, 645)
        _const_spec(params["out3_w"].shape),                       # (645, 65)
        _const_spec(params["out3_b"].shape),                       # (1, 65)
    ]

    reg = pl.pallas_call(
        _fused_forward_kernel,
        out_shape=jax.ShapeDtypeStruct((1, OUT_DIM), jnp.float32),
        grid=(1,),
        in_specs=in_specs,
        out_specs=pl.BlockSpec((1, OUT_DIM), lambda j: (0, 0)),
        compiler_params=pltpu.CompilerParams(
            dimension_semantics=("arbitrary",),
            vmem_limit_bytes=32 * 1024 * 1024),
    )(
        x,
        params["bb_w"], params["bb_b"],
        params["conv_w"], params["conv_b"],
        params["fc1_w"], params["fc1_b"],
        params["fc2_w"], params["fc2_b"],
        params["fc3_w"], params["fc3_b"],
        params["fc4_w"], params["fc4_b"],
        params["out1_w"], params["out1_b"],
        params["out2_w"], params["out2_b"],
        params["out3_w"], params["out3_b"],
    )
    return reg


if __name__ == "__main__":
    key = jax.random.PRNGKey(0)
    k_param, k_x = jax.random.split(key)

    params = init_params(k_param)
    # B=1 so that B*T == sliding_window_size == 10, as fc_out's input size requires.
    x = jax.random.normal(k_x, (1, SLIDING_WINDOW, IN_C, IN_H, IN_W), jnp.float32)

    out = jax.jit(forward)(x, params)
    out = jax.block_until_ready(out)

    assert out.shape == (1, ANCHORS * 2 + 1), out.shape
    assert out.dtype == jnp.float32
    assert bool(jnp.all(jnp.isfinite(out)))
    print("KERNEL_OK")
</pallas_src>

<mosaic_0001>
module attributes {stable_mosaic.version = 11 : i64} {
  func.func @_fused_forward_kernel(%arg0: i32, %arg1: memref<160x3xf32, #tpu.memory_space<vmem>>, %arg2: memref<3x8xf32, #tpu.memory_space<vmem>>, %arg3: memref<1x8xf32, #tpu.memory_space<vmem>>, %arg4: memref<8x32xf32, #tpu.memory_space<vmem>>, %arg5: memref<1x32xf32, #tpu.memory_space<vmem>>, %arg6: memref<32x56xf32, #tpu.memory_space<vmem>>, %arg7: memref<1x56xf32, #tpu.memory_space<vmem>>, %arg8: memref<56x40xf32, #tpu.memory_space<vmem>>, %arg9: memref<1x40xf32, #tpu.memory_space<vmem>>, %arg10: memref<40x32xf32, #tpu.memory_space<vmem>>, %arg11: memref<1x32xf32, #tpu.memory_space<vmem>>, %arg12: memref<32x129xf32, #tpu.memory_space<vmem>>, %arg13: memref<1x129xf32, #tpu.memory_space<vmem>>, %arg14: memref<10x129x1290xbf16, #tpu.memory_space<vmem>>, %arg15: memref<1x1290xf32, #tpu.memory_space<vmem>>, %arg16: memref<1290x645xbf16, #tpu.memory_space<vmem>>, %arg17: memref<1x645xf32, #tpu.memory_space<vmem>>, %arg18: memref<645x65xbf16, #tpu.memory_space<vmem>>, %arg19: memref<1x65xf32, #tpu.memory_space<vmem>>, %arg20: memref<1x65xf32, #tpu.memory_space<vmem>>) attributes {dimension_semantics = [#tpu.dimension_semantics<arbitrary>], iteration_bounds = array<i64: 1>, scalar_prefetch = 0 : i64, scratch_operands = 0 : i64, tpu.core_type = #tpu.core_type<tc>, window_params = [{pipeline_mode = #tpu.pipeline_mode<synchronous>, transform_indices = @transform_0, window_bounds = array<i64: 160, 3>}, {pipeline_mode = #tpu.pipeline_mode<synchronous>, transform_indices = @transform_1, window_bounds = array<i64: 3, 8>}, {pipeline_mode = #tpu.pipeline_mode<synchronous>, transform_indices = @transform_2, window_bounds = array<i64: 1, 8>}, {pipeline_mode = #tpu.pipeline_mode<synchronous>, transform_indices = @transform_3, window_bounds = array<i64: 8, 32>}, {pipeline_mode = #tpu.pipeline_mode<synchronous>, transform_indices = @transform_4, window_bounds = array<i64: 1, 32>}, {pipeline_mode = #tpu.pipeline_mode<synchronous>, transform_indices = @transform_5, window_bounds = array<i64: 32, 56>}, {pipeline_mode = #tpu.pipeline_mode<synchronous>, transform_indices = @transform_6, window_bounds = array<i64: 1, 56>}, {pipeline_mode = #tpu.pipeline_mode<synchronous>, transform_indices = @transform_7, window_bounds = array<i64: 56, 40>}, {pipeline_mode = #tpu.pipeline_mode<synchronous>, transform_indices = @transform_8, window_bounds = array<i64: 1, 40>}, {pipeline_mode = #tpu.pipeline_mode<synchronous>, transform_indices = @transform_9, window_bounds = array<i64: 40, 32>}, {pipeline_mode = #tpu.pipeline_mode<synchronous>, transform_indices = @transform_10, window_bounds = array<i64: 1, 32>}, {pipeline_mode = #tpu.pipeline_mode<synchronous>, transform_indices = @transform_11, window_bounds = array<i64: 32, 129>}, {pipeline_mode = #tpu.pipeline_mode<synchronous>, transform_indices = @transform_12, window_bounds = array<i64: 1, 129>}, {pipeline_mode = #tpu.pipeline_mode<synchronous>, transform_indices = @transform_13, window_bounds = array<i64: 10, 129, 1290>}, {pipeline_mode = #tpu.pipeline_mode<synchronous>, transform_indices = @transform_14, window_bounds = array<i64: 1, 1290>}, {pipeline_mode = #tpu.pipeline_mode<synchronous>, transform_indices = @transform_15, window_bounds = array<i64: 1290, 645>}, {pipeline_mode = #tpu.pipeline_mode<synchronous>, transform_indices = @transform_16, window_bounds = array<i64: 1, 645>}, {pipeline_mode = #tpu.pipeline_mode<synchronous>, transform_indices = @transform_17, window_bounds = array<i64: 645, 65>}, {pipeline_mode = #tpu.pipeline_mode<synchronous>, transform_indices = @transform_18, window_bounds = array<i64: 1, 65>}, {pipeline_mode = #tpu.pipeline_mode<synchronous>, transform_indices = @transform_19, window_bounds = array<i64: 1, 65>}]} {
    %c0 = arith.constant 0 : index
    %c0_0 = arith.constant 0 : index
    %0 = vector.load %arg1[%c0, %c0_0] : memref<160x3xf32, #tpu.memory_space<vmem>>, vector<160x3xf32>
    %c0_1 = arith.constant 0 : index
    %c0_2 = arith.constant 0 : index
    %1 = vector.load %arg2[%c0_1, %c0_2] : memref<3x8xf32, #tpu.memory_space<vmem>>, vector<3x8xf32>
    %cst = arith.constant dense<0.000000e+00> : vector<160x8xf32>
    %2 = tpu.matmul %0, %1, %cst {dimension_numbers = #tpu.dot_dimension_numbers<[1], [0], [0], [1], [0, 0, 1, 1], [], []>} : vector<160x3xf32>, vector<3x8xf32>, vector<160x8xf32> -> vector<160x8xf32>
    %c0_3 = arith.constant 0 : index
    %c0_4 = arith.constant 0 : index
    %3 = vector.load %arg3[%c0_3, %c0_4] : memref<1x8xf32, #tpu.memory_space<vmem>>, vector<1x8xf32>
    %4 = vector.broadcast %3 : vector<1x8xf32> to vector<160x8xf32>
    %5 = arith.addf %2, %4 : vector<160x8xf32>
    %cst_5 = arith.constant 0.000000e+00 : f32
    %6 = vector.broadcast %cst_5 : f32 to vector<160x8xf32>
    %7 = arith.maximumf %5, %6 : vector<160x8xf32>
    %c0_6 = arith.constant 0 : index
    %c0_7 = arith.constant 0 : index
    %8 = vector.load %arg4[%c0_6, %c0_7] : memref<8x32xf32, #tpu.memory_space<vmem>>, vector<8x32xf32>
    %cst_8 = arith.constant dense<0.000000e+00> : vector<160x32xf32>
    %9 = tpu.matmul %7, %8, %cst_8 {dimension_numbers = #tpu.dot_dimension_numbers<[1], [0], [0], [1], [0, 0, 1, 1], [], []>} : vector<160x8xf32>, vector<8x32xf32>, vector<160x32xf32> -> vector<160x32xf32>
    %c0_9 = arith.constant 0 : index
    %c0_10 = arith.constant 0 : index
    %10 = vector.load %arg5[%c0_9, %c0_10] : memref<1x32xf32, #tpu.memory_space<vmem>>, vector<1x32xf32>
    %11 = vector.broadcast %10 : vector<1x32xf32> to vector<160x32xf32>
    %12 = arith.addf %9, %11 : vector<160x32xf32>
    %13 = vector.shape_cast %12 : vector<160x32xf32> to vector<10x16x32xf32>
    %cst_11 = arith.constant dense<0xFF800000> : vector<10x32xf32>
    %14 = vector.multi_reduction <maximumf>, %13, %cst_11 [1] : vector<10x16x32xf32> to vector<10x32xf32>
    %c0_12 = arith.constant 0 : index
    %c0_13 = arith.constant 0 : index
    %15 = vector.load %arg6[%c0_12, %c0_13] : memref<32x56xf32, #tpu.memory_space<vmem>>, vector<32x56xf32>
    %cst_14 = arith.constant dense<0.000000e+00> : vector<10x56xf32>
    %16 = tpu.matmul %14, %15, %cst_14 {dimension_numbers = #tpu.dot_dimension_numbers<[1], [0], [0], [1], [0, 0, 1, 1], [], []>} : vector<10x32xf32>, vector<32x56xf32>, vector<10x56xf32> -> vector<10x56xf32>
    %c0_15 = arith.constant 0 : index
    %c0_16 = arith.constant 0 : index
    %17 = vector.load %arg7[%c0_15, %c0_16] : memref<1x56xf32, #tpu.memory_space<vmem>>, vector<1x56xf32>
    %18 = vector.broadcast %17 : vector<1x56xf32> to vector<10x56xf32>
    %19 = arith.addf %16, %18 : vector<10x56xf32>
    %cst_17 = arith.constant 0.000000e+00 : f32
    %20 = vector.broadcast %cst_17 : f32 to vector<10x56xf32>
    %21 = arith.maximumf %19, %20 : vector<10x56xf32>
    %c0_18 = arith.constant 0 : index
    %c0_19 = arith.constant 0 : index
    %22 = vector.load %arg8[%c0_18, %c0_19] : memref<56x40xf32, #tpu.memory_space<vmem>>, vector<56x40xf32>
    %cst_20 = arith.constant dense<0.000000e+00> : vector<10x40xf32>
    %23 = tpu.matmul %21, %22, %cst_20 {dimension_numbers = #tpu.dot_dimension_numbers<[1], [0], [0], [1], [0, 0, 1, 1], [], []>} : vector<10x56xf32>, vector<56x40xf32>, vector<10x40xf32> -> vector<10x40xf32>
    %c0_21 = arith.constant 0 : index
    %c0_22 = arith.constant 0 : index
    %24 = vector.load %arg9[%c0_21, %c0_22] : memref<1x40xf32, #tpu.memory_space<vmem>>, vector<1x40xf32>
    %25 = vector.broadcast %24 : vector<1x40xf32> to vector<10x40xf32>
    %26 = arith.addf %23, %25 : vector<10x40xf32>
    %cst_23 = arith.constant 0.000000e+00 : f32
    %27 = vector.broadcast %cst_23 : f32 to vector<10x40xf32>
    %28 = arith.maximumf %26, %27 : vector<10x40xf32>
    %c0_24 = arith.constant 0 : index
    %c0_25 = arith.constant 0 : index
    %29 = vector.load %arg10[%c0_24, %c0_25] : memref<40x32xf32, #tpu.memory_space<vmem>>, vector<40x32xf32>
    %cst_26 = arith.constant dense<0.000000e+00> : vector<10x32xf32>
    %30 = tpu.matmul %28, %29, %cst_26 {dimension_numbers = #tpu.dot_dimension_numbers<[1], [0], [0], [1], [0, 0, 1, 1], [], []>} : vector<10x40xf32>, vector<40x32xf32>, vector<10x32xf32> -> vector<10x32xf32>
    %c0_27 = arith.constant 0 : index
    %c0_28 = arith.constant 0 : index
    %31 = vector.load %arg11[%c0_27, %c0_28] : memref<1x32xf32, #tpu.memory_space<vmem>>, vector<1x32xf32>
    %32 = vector.broadcast %31 : vector<1x32xf32> to vector<10x32xf32>
    %33 = arith.addf %30, %32 : vector<10x32xf32>
    %cst_29 = arith.constant 0.000000e+00 : f32
    %34 = vector.broadcast %cst_29 : f32 to vector<10x32xf32>
    %35 = arith.maximumf %33, %34 : vector<10x32xf32>
    %c0_30 = arith.constant 0 : index
    %c0_31 = arith.constant 0 : index
    %36 = vector.load %arg12[%c0_30, %c0_31] : memref<32x129xf32, #tpu.memory_space<vmem>>, vector<32x129xf32>
    %cst_32 = arith.constant dense<0.000000e+00> : vector<10x129xf32>
    %37 = tpu.matmul %35, %36, %cst_32 {dimension_numbers = #tpu.dot_dimension_numbers<[1], [0], [0], [1], [0, 0, 1, 1], [], []>} : vector<10x32xf32>, vector<32x129xf32>, vector<10x129xf32> -> vector<10x129xf32>
    %c0_33 = arith.constant 0 : index
    %c0_34 = arith.constant 0 : index
    %38 = vector.load %arg13[%c0_33, %c0_34] : memref<1x129xf32, #tpu.memory_space<vmem>>, vector<1x129xf32>
    %39 = vector.broadcast %38 : vector<1x129xf32> to vector<10x129xf32>
    %40 = arith.addf %37, %39 : vector<10x129xf32>
    %41 = arith.truncf %40 : vector<10x129xf32> to vector<10x129xbf16>
    %cst_35 = arith.constant 0.000000e+00 : f32
    %42 = vector.broadcast %cst_35 : f32 to vector<1x1290xf32>
    %43 = vector.extract_strided_slice %41 {offsets = [0, 0], sizes = [1, 129], strides = [1, 1]} : vector<10x129xbf16> to vector<1x129xbf16>
    %c0_36 = arith.constant 0 : index
    %c0_37 = arith.constant 0 : index
    %c0_38 = arith.constant 0 : index
    %44 = vector.load %arg14[%c0_36, %c0_37, %c0_38] : memref<10x129x1290xbf16, #tpu.memory_space<vmem>>, vector<1x129x1290xbf16>
    %45 = vector.shape_cast %44 : vector<1x129x1290xbf16> to vector<129x1290xbf16>
    %cst_39 = arith.constant dense<0.000000e+00> : vector<1x1290xf32>
    %46 = tpu.matmul %43, %45, %cst_39 {dimension_numbers = #tpu.dot_dimension_numbers<[1], [0], [0], [1], [0, 0, 1, 1], [], []>} : vector<1x129xbf16>, vector<129x1290xbf16>, vector<1x1290xf32> -> vector<1x1290xf32>
    %47 = arith.addf %42, %46 : vector<1x1290xf32>
    %48 = vector.extract_strided_slice %41 {offsets = [1, 0], sizes = [1, 129], strides = [1, 1]} : vector<10x129xbf16> to vector<1x129xbf16>
    %c1 = arith.constant 1 : index
    %c0_40 = arith.constant 0 : index
    %c0_41 = arith.constant 0 : index
    %49 = vector.load %arg14[%c1, %c0_40, %c0_41] : memref<10x129x1290xbf16, #tpu.memory_space<vmem>>, vector<1x129x1290xbf16>
    %50 = vector.shape_cast %49 : vector<1x129x1290xbf16> to vector<129x1290xbf16>
    %cst_42 = arith.constant dense<0.000000e+00> : vector<1x1290xf32>
    %51 = tpu.matmul %48, %50, %cst_42 {dimension_numbers = #tpu.dot_dimension_numbers<[1], [0], [0], [1], [0, 0, 1, 1], [], []>} : vector<1x129xbf16>, vector<129x1290xbf16>, vector<1x1290xf32> -> vector<1x1290xf32>
    %52 = arith.addf %47, %51 : vector<1x1290xf32>
    %53 = vector.extract_strided_slice %41 {offsets = [2, 0], sizes = [1, 129], strides = [1, 1]} : vector<10x129xbf16> to vector<1x129xbf16>
    %c2 = arith.constant 2 : index
    %c0_43 = arith.constant 0 : index
    %c0_44 = arith.constant 0 : index
    %54 = vector.load %arg14[%c2, %c0_43, %c0_44] : memref<10x129x1290xbf16, #tpu.memory_space<vmem>>, vector<1x129x1290xbf16>
    %55 = vector.shape_cast %54 : vector<1x129x1290xbf16> to vector<129x1290xbf16>
    %cst_45 = arith.constant dense<0.000000e+00> : vector<1x1290xf32>
    %56 = tpu.matmul %53, %55, %cst_45 {dimension_numbers = #tpu.dot_dimension_numbers<[1], [0], [0], [1], [0, 0, 1, 1], [], []>} : vector<1x129xbf16>, vector<129x1290xbf16>, vector<1x1290xf32> -> vector<1x1290xf32>
    %57 = arith.addf %52, %56 : vector<1x1290xf32>
    %58 = vector.extract_strided_slice %41 {offsets = [3, 0], sizes = [1, 129], strides = [1, 1]} : vector<10x129xbf16> to vector<1x129xbf16>
    %c3 = arith.constant 3 : index
    %c0_46 = arith.constant 0 : index
    %c0_47 = arith.constant 0 : index
    %59 = vector.load %arg14[%c3, %c0_46, %c0_47] : memref<10x129x1290xbf16, #tpu.memory_space<vmem>>, vector<1x129x1290xbf16>
    %60 = vector.shape_cast %59 : vector<1x129x1290xbf16> to vector<129x1290xbf16>
    %cst_48 = arith.constant dense<0.000000e+00> : vector<1x1290xf32>
    %61 = tpu.matmul %58, %60, %cst_48 {dimension_numbers = #tpu.dot_dimension_numbers<[1], [0], [0], [1], [0, 0, 1, 1], [], []>} : vector<1x129xbf16>, vector<129x1290xbf16>, vector<1x1290xf32> -> vector<1x1290xf32>
    %62 = arith.addf %57, %61 : vector<1x1290xf32>
    %63 = vector.extract_strided_slice %41 {offsets = [4, 0], sizes = [1, 129], strides = [1, 1]} : vector<10x129xbf16> to vector<1x129xbf16>
    %c4 = arith.constant 4 : index
    %c0_49 = arith.constant 0 : index
    %c0_50 = arith.constant 0 : index
    %64 = vector.load %arg14[%c4, %c0_49, %c0_50] : memref<10x129x1290xbf16, #tpu.memory_space<vmem>>, vector<1x129x1290xbf16>
    %65 = vector.shape_cast %64 : vector<1x129x1290xbf16> to vector<129x1290xbf16>
    %cst_51 = arith.constant dense<0.000000e+00> : vector<1x1290xf32>
    %66 = tpu.matmul %63, %65, %cst_51 {dimension_numbers = #tpu.dot_dimension_numbers<[1], [0], [0], [1], [0, 0, 1, 1], [], []>} : vector<1x129xbf16>, vector<129x1290xbf16>, vector<1x1290xf32> -> vector<1x1290xf32>
    %67 = arith.addf %62, %66 : vector<1x1290xf32>
    %68 = vector.extract_strided_slice %41 {offsets = [5, 0], sizes = [1, 129], strides = [1, 1]} : vector<10x129xbf16> to vector<1x129xbf16>
    %c5 = arith.constant 5 : index
    %c0_52 = arith.constant 0 : index
    %c0_53 = arith.constant 0 : index
    %69 = vector.load %arg14[%c5, %c0_52, %c0_53] : memref<10x129x1290xbf16, #tpu.memory_space<vmem>>, vector<1x129x1290xbf16>
    %70 = vector.shape_cast %69 : vector<1x129x1290xbf16> to vector<129x1290xbf16>
    %cst_54 = arith.constant dense<0.000000e+00> : vector<1x1290xf32>
    %71 = tpu.matmul %68, %70, %cst_54 {dimension_numbers = #tpu.dot_dimension_numbers<[1], [0], [0], [1], [0, 0, 1, 1], [], []>} : vector<1x129xbf16>, vector<129x1290xbf16>, vector<1x1290xf32> -> vector<1x1290xf32>
    %72 = arith.addf %67, %71 : vector<1x1290xf32>
    %73 = vector.extract_strided_slice %41 {offsets = [6, 0], sizes = [1, 129], strides = [1, 1]} : vector<10x129xbf16> to vector<1x129xbf16>
    %c6 = arith.constant 6 : index
    %c0_55 = arith.constant 0 : index
    %c0_56 = arith.constant 0 : index
    %74 = vector.load %arg14[%c6, %c0_55, %c0_56] : memref<10x129x1290xbf16, #tpu.memory_space<vmem>>, vector<1x129x1290xbf16>
    %75 = vector.shape_cast %74 : vector<1x129x1290xbf16> to vector<129x1290xbf16>
    %cst_57 = arith.constant dense<0.000000e+00> : vector<1x1290xf32>
    %76 = tpu.matmul %73, %75, %cst_57 {dimension_numbers = #tpu.dot_dimension_numbers<[1], [0], [0], [1], [0, 0, 1, 1], [], []>} : vector<1x129xbf16>, vector<129x1290xbf16>, vector<1x1290xf32> -> vector<1x1290xf32>
    %77 = arith.addf %72, %76 : vector<1x1290xf32>
    %78 = vector.extract_strided_slice %41 {offsets = [7, 0], sizes = [1, 129], strides = [1, 1]} : vector<10x129xbf16> to vector<1x129xbf16>
    %c7 = arith.constant 7 : index
    %c0_58 = arith.constant 0 : index
    %c0_59 = arith.constant 0 : index
    %79 = vector.load %arg14[%c7, %c0_58, %c0_59] : memref<10x129x1290xbf16, #tpu.memory_space<vmem>>, vector<1x129x1290xbf16>
    %80 = vector.shape_cast %79 : vector<1x129x1290xbf16> to vector<129x1290xbf16>
    %cst_60 = arith.constant dense<0.000000e+00> : vector<1x1290xf32>
    %81 = tpu.matmul %78, %80, %cst_60 {dimension_numbers = #tpu.dot_dimension_numbers<[1], [0], [0], [1], [0, 0, 1, 1], [], []>} : vector<1x129xbf16>, vector<129x1290xbf16>, vector<1x1290xf32> -> vector<1x1290xf32>
    %82 = arith.addf %77, %81 : vector<1x1290xf32>
    %83 = vector.extract_strided_slice %41 {offsets = [8, 0], sizes = [1, 129], strides = [1, 1]} : vector<10x129xbf16> to vector<1x129xbf16>
    %c8 = arith.constant 8 : index
    %c0_61 = arith.constant 0 : index
    %c0_62 = arith.constant 0 : index
    %84 = vector.load %arg14[%c8, %c0_61, %c0_62] : memref<10x129x1290xbf16, #tpu.memory_space<vmem>>, vector<1x129x1290xbf16>
    %85 = vector.shape_cast %84 : vector<1x129x1290xbf16> to vector<129x1290xbf16>
    %cst_63 = arith.constant dense<0.000000e+00> : vector<1x1290xf32>
    %86 = tpu.matmul %83, %85, %cst_63 {dimension_numbers = #tpu.dot_dimension_numbers<[1], [0], [0], [1], [0, 0, 1, 1], [], []>} : vector<1x129xbf16>, vector<129x1290xbf16>, vector<1x1290xf32> -> vector<1x1290xf32>
    %87 = arith.addf %82, %86 : vector<1x1290xf32>
    %88 = vector.extract_strided_slice %41 {offsets = [9, 0], sizes = [1, 129], strides = [1, 1]} : vector<10x129xbf16> to vector<1x129xbf16>
    %c9 = arith.constant 9 : index
    %c0_64 = arith.constant 0 : index
    %c0_65 = arith.constant 0 : index
    %89 = vector.load %arg14[%c9, %c0_64, %c0_65] : memref<10x129x1290xbf16, #tpu.memory_space<vmem>>, vector<1x129x1290xbf16>
    %90 = vector.shape_cast %89 : vector<1x129x1290xbf16> to vector<129x1290xbf16>
    %cst_66 = arith.constant dense<0.000000e+00> : vector<1x1290xf32>
    %91 = tpu.matmul %88, %90, %cst_66 {dimension_numbers = #tpu.dot_dimension_numbers<[1], [0], [0], [1], [0, 0, 1, 1], [], []>} : vector<1x129xbf16>, vector<129x1290xbf16>, vector<1x1290xf32> -> vector<1x1290xf32>
    %92 = arith.addf %87, %91 : vector<1x1290xf32>
    %c0_67 = arith.constant 0 : index
    %c0_68 = arith.constant 0 : index
    %93 = vector.load %arg15[%c0_67, %c0_68] : memref<1x1290xf32, #tpu.memory_space<vmem>>, vector<1x1290xf32>
    %94 = arith.addf %92, %93 : vector<1x1290xf32>
    %cst_69 = arith.constant 0.000000e+00 : f32
    %95 = vector.broadcast %cst_69 : f32 to vector<1x1290xf32>
    %96 = arith.maximumf %94, %95 : vector<1x1290xf32>
    %97 = arith.truncf %96 : vector<1x1290xf32> to vector<1x1290xbf16>
    %c0_70 = arith.constant 0 : index
    %c0_71 = arith.constant 0 : index
    %98 = vector.load %arg16[%c0_70, %c0_71] : memref<1290x645xbf16, #tpu.memory_space<vmem>>, vector<1290x645xbf16>
    %cst_72 = arith.constant dense<0.000000e+00> : vector<1x645xf32>
    %99 = tpu.matmul %97, %98, %cst_72 {dimension_numbers = #tpu.dot_dimension_numbers<[1], [0], [0], [1], [0, 0, 1, 1], [], []>} : vector<1x1290xbf16>, vector<1290x645xbf16>, vector<1x645xf32> -> vector<1x645xf32>
    %c0_73 = arith.constant 0 : index
    %c0_74 = arith.constant 0 : index
    %100 = vector.load %arg17[%c0_73, %c0_74] : memref<1x645xf32, #tpu.memory_space<vmem>>, vector<1x645xf32>
    %101 = arith.addf %99, %100 : vector<1x645xf32>
    %cst_75 = arith.constant 0.000000e+00 : f32
    %102 = vector.broadcast %cst_75 : f32 to vector<1x645xf32>
    %103 = arith.maximumf %101, %102 : vector<1x645xf32>
    %104 = arith.truncf %103 : vector<1x645xf32> to vector<1x645xbf16>
    %c0_76 = arith.constant 0 : index
    %c0_77 = arith.constant 0 : index
    %105 = vector.load %arg18[%c0_76, %c0_77] : memref<645x65xbf16, #tpu.memory_space<vmem>>, vector<645x65xbf16>
    %cst_78 = arith.constant dense<0.000000e+00> : vector<1x65xf32>
    %106 = tpu.matmul %104, %105, %cst_78 {dimension_numbers = #tpu.dot_dimension_numbers<[1], [0], [0], [1], [0, 0, 1, 1], [], []>} : vector<1x645xbf16>, vector<645x65xbf16>, vector<1x65xf32> -> vector<1x65xf32>
    %c0_79 = arith.constant 0 : index
    %c0_80 = arith.constant 0 : index
    %107 = vector.load %arg19[%c0_79, %c0_80] : memref<1x65xf32, #tpu.memory_space<vmem>>, vector<1x65xf32>
    %108 = arith.addf %106, %107 : vector<1x65xf32>
    %c0_81 = arith.constant 0 : index
    %c0_82 = arith.constant 0 : index
    %109 = vector.load %arg20[%c0_81, %c0_82] : memref<1x65xf32, #tpu.memory_space<vmem>>, vector<1x65xf32>
    tpu.vector_store %arg20[%c0_81, %c0_82], %108 {strides = array<i32>} : memref<1x65xf32, #tpu.memory_space<vmem>>, vector<1x65xf32>,
    return
  }
  func.func @transform_0(%arg0: i32) -> (i32, i32) {
    %c0_i32 = arith.constant 0 : i32
    %c0_i32_0 = arith.constant 0 : i32
    %c0_i32_1 = arith.constant 0 : i32
    return %c0_i32, %c0_i32_0 : i32, i32
  }
  func.func @transform_1(%arg0: i32) -> (i32, i32) {
    %c0_i32 = arith.constant 0 : i32
    %c0_i32_0 = arith.constant 0 : i32
    %c0_i32_1 = arith.constant 0 : i32
    return %c0_i32, %c0_i32_0 : i32, i32
  }
  func.func @transform_2(%arg0: i32) -> (i32, i32) {
    %c0_i32 = arith.constant 0 : i32
    %c0_i32_0 = arith.constant 0 : i32
    %c0_i32_1 = arith.constant 0 : i32
    return %c0_i32, %c0_i32_0 : i32, i32
  }
  func.func @transform_3(%arg0: i32) -> (i32, i32) {
    %c0_i32 = arith.constant 0 : i32
    %c0_i32_0 = arith.constant 0 : i32
    %c0_i32_1 = arith.constant 0 : i32
    return %c0_i32, %c0_i32_0 : i32, i32
  }
  func.func @transform_4(%arg0: i32) -> (i32, i32) {
    %c0_i32 = arith.constant 0 : i32
    %c0_i32_0 = arith.constant 0 : i32
    %c0_i32_1 = arith.constant 0 : i32
    return %c0_i32, %c0_i32_0 : i32, i32
  }
  func.func @transform_5(%arg0: i32) -> (i32, i32) {
    %c0_i32 = arith.constant 0 : i32
    %c0_i32_0 = arith.constant 0 : i32
    %c0_i32_1 = arith.constant 0 : i32
    return %c0_i32, %c0_i32_0 : i32, i32
  }
  func.func @transform_6(%arg0: i32) -> (i32, i32) {
    %c0_i32 = arith.constant 0 : i32
    %c0_i32_0 = arith.constant 0 : i32
    %c0_i32_1 = arith.constant 0 : i32
    return %c0_i32, %c0_i32_0 : i32, i32
  }
  func.func @transform_7(%arg0: i32) -> (i32, i32) {
    %c0_i32 = arith.constant 0 : i32
    %c0_i32_0 = arith.constant 0 : i32
    %c0_i32_1 = arith.constant 0 : i32
    return %c0_i32, %c0_i32_0 : i32, i32
  }
  func.func @transform_8(%arg0: i32) -> (i32, i32) {
    %c0_i32 = arith.constant 0 : i32
    %c0_i32_0 = arith.constant 0 : i32
    %c0_i32_1 = arith.constant 0 : i32
    return %c0_i32, %c0_i32_0 : i32, i32
  }
  func.func @transform_9(%arg0: i32) -> (i32, i32) {
    %c0_i32 = arith.constant 0 : i32
    %c0_i32_0 = arith.constant 0 : i32
    %c0_i32_1 = arith.constant 0 : i32
    return %c0_i32, %c0_i32_0 : i32, i32
  }
  func.func @transform_10(%arg0: i32) -> (i32, i32) {
    %c0_i32 = arith.constant 0 : i32
    %c0_i32_0 = arith.constant 0 : i32
    %c0_i32_1 = arith.constant 0 : i32
    return %c0_i32, %c0_i32_0 : i32, i32
  }
  func.func @transform_11(%arg0: i32) -> (i32, i32) {
    %c0_i32 = arith.constant 0 : i32
    %c0_i32_0 = arith.constant 0 : i32
    %c0_i32_1 = arith.constant 0 : i32
    return %c0_i32, %c0_i32_0 : i32, i32
  }
  func.func @transform_12(%arg0: i32) -> (i32, i32) {
    %c0_i32 = arith.constant 0 : i32
    %c0_i32_0 = arith.constant 0 : i32
    %c0_i32_1 = arith.constant 0 : i32
    return %c0_i32, %c0_i32_0 : i32, i32
  }
  func.func @transform_13(%arg0: i32) -> (i32, i32, i32) {
    %c0_i32 = arith.constant 0 : i32
    %c0_i32_0 = arith.constant 0 : i32
    %c0_i32_1 = arith.constant 0 : i32
    %c0_i32_2 = arith.constant 0 : i32
    return %c0_i32, %c0_i32_0, %c0_i32_1 : i32, i32, i32
  }
  func.func @transform_14(%arg0: i32) -> (i32, i32) {
    %c0_i32 = arith.constant 0 : i32
    %c0_i32_0 = arith.constant 0 : i32
    %c0_i32_1 = arith.constant 0 : i32
    return %c0_i32, %c0_i32_0 : i32, i32
  }
  func.func @transform_15(%arg0: i32) -> (i32, i32) {
    %c0_i32 = arith.constant 0 : i32
    %c0_i32_0 = arith.constant 0 : i32
    %c0_i32_1 = arith.constant 0 : i32
    return %c0_i32, %c0_i32_0 : i32, i32
  }
  func.func @transform_16(%arg0: i32) -> (i32, i32) {
    %c0_i32 = arith.constant 0 : i32
    %c0_i32_0 = arith.constant 0 : i32
    %c0_i32_1 = arith.constant 0 : i32
    return %c0_i32, %c0_i32_0 : i32, i32
  }
  func.func @transform_17(%arg0: i32) -> (i32, i32) {
    %c0_i32 = arith.constant 0 : i32
    %c0_i32_0 = arith.constant 0 : i32
    %c0_i32_1 = arith.constant 0 : i32
    return %c0_i32, %c0_i32_0 : i32, i32
  }
  func.func @transform_18(%arg0: i32) -> (i32, i32) {
    %c0_i32 = arith.constant 0 : i32
    %c0_i32_0 = arith.constant 0 : i32
    %c0_i32_1 = arith.constant 0 : i32
    return %c0_i32, %c0_i32_0 : i32, i32
  }
  func.func @transform_19(%arg0: i32) -> (i32, i32) {
    %c0_i32 = arith.constant 0 : i32
    %c0_i32_0 = arith.constant 0 : i32
    %c0_i32_1 = arith.constant 0 : i32
    return %c0_i32, %c0_i32_0 : i32, i32
  }
}

</mosaic_0001>

<bundles_post_ra>
// kernel: forward.1
= control target key start
LH: loop header
LB: loop body
LE: loop exit
PB: predicated region body
PF: predicated region fallthrough
CT: control target
= control target key end

     0   :  { %s24845_s0 = inlined_call_operand.vmem [shape: f32[160,3], index: 0, kind: input, shape index: {}]   ;;  %s24846_s1 = inlined_call_operand.vmem [shape: f32[3,8], index: 1, kind: input, shape index: {}]   ;;  %s24847_s2 = inlined_call_operand.vmem [shape: f32[1,8], index: 2, kind: input, shape index: {}]   ;;  %s24848_s3 = inlined_call_operand.vmem [shape: f32[8,32], index: 3, kind: input, shape index: {}]   ;;  %s24849_s4 = inlined_call_operand.vmem [shape: f32[1,32], index: 4, kind: input, shape index: {}]   ;;  %s24850_s5 = inlined_call_operand.vmem [shape: f32[32,56], index: 5, kind: input, shape index: {}]   ;;  %s24851_s6 = inlined_call_operand.vmem [shape: f32[1,56], index: 6, kind: input, shape index: {}]   ;;  %s24852_s7 = inlined_call_operand.vmem [shape: f32[56,40], index: 7, kind: input, shape index: {}]   ;;  %s24853_s8 = inlined_call_operand.vmem [shape: f32[1,40], index: 8, kind: input, shape index: {}]   ;;  %s24854_s9 = inlined_call_operand.vmem [shape: f32[40,32], index: 9, kind: input, shape index: {}]   ;;  %s24855_s10 = inlined_call_operand.vmem [shape: f32[1,32], index: 10, kind: input, shape index: {}]   ;;  %s24856_s11 = inlined_call_operand.vmem [shape: f32[32,129], index: 11, kind: input, shape index: {}]   ;;  %s24857_s12 = inlined_call_operand.vmem [shape: f32[1,129], index: 12, kind: input, shape index: {}]   ;;  %s24858_s13 = inlined_call_operand.vmem [shape: bf16[10,129,1290], index: 13, kind: input, shape index: {}]   ;;  %s24859_s14 = inlined_call_operand.vmem [shape: f32[1,1290], index: 14, kind: input, shape index: {}]   ;;  %s24860_s15 = inlined_call_operand.vmem [shape: bf16[1290,645], index: 15, kind: input, shape index: {}]   ;;  %s24861_s16 = inlined_call_operand.vmem [shape: f32[1,645], index: 16, kind: input, shape index: {}]   ;;  %s24862_s17 = inlined_call_operand.vmem [shape: bf16[645,65], index: 17, kind: input, shape index: {}]   ;;  %s24863_s18 = inlined_call_operand.vmem [shape: f32[1,65], index: 18, kind: input, shape index: {}]   ;;  %s24864_s19 = inlined_call_operand.hbm [shape: f32[1,65], index: 19, kind: output, shape index: {}]  }
   0x1   :  { %24866 = sst [smem:[#allocation5_spill]] %s24845_s0 }
   0x2   :  { %24867 = sst [smem:[#allocation6_spill]] %s24846_s1 }
   0x3   :  { %24868 = sst [smem:[#allocation7_spill]] %s24847_s2 }
   0x4   :  { %24869 = sst [smem:[#allocation8_spill]] %s24848_s3 }
   0x5   :  { %s24870_s20 = sld [smem:[#allocation6_spill]]  ;;  %vm153_vm0 = vcmask 1042432   ;;  %s24871_s22 = sld [smem:[#allocation5_spill]]  ;;  %vm92_vm1 = vcmask 23552   ;;  %vm350_vm2 = vcmask 64512   ;;  %vm576_vm3 = vcmask 261120  }
   0x6   :  { %s24872_s2 = sld [smem:[#allocation8_spill]]  ;;  %s24873_s23 = sld [smem:[#allocation7_spill]]  ;;  %vm688_vm4 = vcmask 1041409   ;;  %vm690_vm5 = vcmask 1042434   ;;  %vm692_vm6 = vcmask 1043459   ;;  %vm694_vm7 = vcmask 1044484  }
   0x7   :  { %vm696_vm8 = vcmask 1045509   ;;  %vm698_vm9 = vcmask 1046534   ;;  %vm700_vm10 = vcmask 1047559  }
   0xb   :  { %v84_v0 = vld [vmem:[%s24870_s20] sm:$0x7]  ;;  %v65_v2 = vld [vmem:[%s24871_s22 + $0x8] sm:$0xff]  ;;  %v66_v3 = vld [vmem:[%s24871_s22 + $0x10] sm:$0xff] }
   0xc   :  { %16748 = vmatprep.subr.msk.mxu0 %vm153_vm0, %v84_v0  ;;  %v64_v1 = vld [vmem:[%s24871_s22] sm:$0xff]  ;;  %v67_v4 = vld [vmem:[%s24871_s22 + $0x18] sm:$0xff]  ;;  %v69_v6 = vld [vmem:[%s24871_s22 + $0x28] sm:$0xff] }
   0xd   :  { %16749 = vmatpush3.msk.msra.mxu0 %vm153_vm0, %v84_v0  ;;  %16750 = vmatprep.mubr.msk.f32.mxu0 %vm92_vm1, %v64_v1  ;;  %v68_v5 = vld [vmem:[%s24871_s22 + $0x20] sm:$0xff]  ;;  %v70_v7 = vld [vmem:[%s24871_s22 + $0x30] sm:$0xff]  ;;  %v71_v9 = vld [vmem:[%s24871_s22 + $0x38] sm:$0xff] }
   0xe   :  { %16751 = vmatmul.mubr.msk.f32.vlgmr.msra.gmra.mrb[0].mxu0 %vm92_vm1, %v65_v2  ;;  %v342_v8 = vld [vmem:[%s24872_s2] sm:$0xff]  ;;  %v73_v11 = vld [vmem:[%s24871_s22 + $0x48] sm:$0xff]  ;;  %v74_v12 = vld [vmem:[%s24871_s22 + $0x50] sm:$0xff] }
   0xf   :  { %16753 = vmatprep.mubr.msk.f32.mxu0 %vm92_vm1, %v66_v3  ;;  %16780 = vmatprep.subr.mxu0 %v342_v8  ;;  %v72_v10 = vld [vmem:[%s24871_s22 + $0x40] sm:$0xff]  ;;  %v75_v13 = vld [vmem:[%s24871_s22 + $0x58] sm:$0xff]  ;;  %v77_v15 = vld [vmem:[%s24871_s22 + $0x68] sm:$0xff] }
  0x10   :  { %16889 = vmatprep.subr.mxu1 %v342_v8  ;;  %16781 = vmatpush3.msra.mxu0 %v342_v8  ;;  %v76_v14 = vld [vmem:[%s24871_s22 + $0x60] sm:$0xff]  ;;  %v78_v16 = vld [vmem:[%s24871_s22 + $0x70] sm:$0xff]  ;;  %v79_v17 = vld [vmem:[%s24871_s22 + $0x78] sm:$0xff] }
  0x11   :  { %16890 = vmatpush3.msra.mxu1 %v342_v8  ;;  %v80_v18 = vld [vmem:[%s24871_s22 + $0x80] sm:$0xff]  ;;  %v81_v19 = vld [vmem:[%s24871_s22 + $0x88] sm:$0xff]  ;;  %v82_v20 = vld [vmem:[%s24871_s22 + $0x90] sm:$0xff] }
  0x12   :  { %16754 = vmatmul.mubr.msk.f32.gmra.mrb[2].mxu0 %vm92_vm1, %v67_v4  ;;  %v83_v21 = vld [vmem:[%s24871_s22 + $0x98] sm:$0xff]  ;;  %v19338_v22 = vld [vmem:[%s24873_s23] ss:$0 sm:$0xff] }
  0x13   :  { %16756 = vmatprep.mubr.msk.f32.mxu0 %vm92_vm1, %v68_v5 }
  0x16   :  { %16757 = vmatmul.mubr.msk.f32.gmra.mrb[4].mxu0 %vm92_vm1, %v69_v6 }
  0x17   :  { %16759 = vmatprep.mubr.msk.f32.mxu0 %vm92_vm1, %v70_v7 }
  0x1a   :  { %16760 = vmatmul.mubr.msk.f32.gmra.mrb[6].mxu0 %vm92_vm1, %v71_v9 }
  0x1b   :  { %16762 = vmatprep.mubr.msk.f32.mxu0 %vm92_vm1, %v72_v10 }
  0x1e   :  { %16763 = vmatmul.mubr.msk.f32.gmra.mrb[8].mxu0 %vm92_vm1, %v73_v11 }
  0x1f   :  { %16765 = vmatprep.mubr.msk.f32.mxu0 %vm92_vm1, %v74_v12 }
  0x22   :  { %16766 = vmatmul.mubr.msk.f32.gmra.mrb[10].mxu0 %vm92_vm1, %v75_v13 }
  0x23   :  { %16768 = vmatprep.mubr.msk.f32.mxu0 %vm92_vm1, %v76_v14 }
  0x26   :  { %16769 = vmatmul.mubr.msk.f32.gmra.mrb[12].mxu0 %vm92_vm1, %v77_v15 }
  0x27   :  { %16771 = vmatprep.mubr.msk.f32.mxu0 %vm92_vm1, %v78_v16 }
  0x2a   :  { %16772 = vmatmul.mubr.msk.f32.gmra.mrb[14].mxu0 %vm92_vm1, %v79_v17 }
  0x2b   :  { %16774 = vmatprep.mubr.msk.f32.mxu0 %vm92_vm1, %v80_v18 }
  0x2e   :  { %16775 = vmatmul.mubr.msk.f32.gmra.mrb[16].mxu0 %vm92_vm1, %v81_v19  ;;  %v667_v19 = vld [vmem:[%s24850_s5] sm:$0xff] }
  0x2f   :  { %16777 = vmatprep.mubr.msk.f32.mxu0 %vm92_vm1, %v82_v20  ;;  %v668_v20 = vld [vmem:[%s24850_s5 + $0x8] sm:$0xff] }
  0x32   :  { %16778 = vmatmul.mubr.msk.f32.gmra.mrb[18].mxu0 %vm92_vm1, %v83_v21  ;;  %v16853_v21 = vpack.c.bf16 %v668_v20, %v667_v19 }
  0x34   :  { %16854 = vmatprep.subr.bf16.mxu0 %v16853_v21 }
  0xe1   :  { %v16752_v23 = vpop.f32.mrb[0].mxu0 }
  0xe2   :  { %v229_v24 = vadd.f32 %v16752_v23, %v19338_v22  ;;  %v223_v25 = vpop.f32.mrb[1].mxu0  ;;  %v670_v23 = vld [vmem:[%s24850_s5 + $0x18] sm:$0xff] }
  0xe3   :  { %v224_v26 = vadd.f32 %v19338_v22, %v223_v25  ;;  %v784_v25 = vld [vmem:[%s24852_s7] sm:$0xff] }
  0xe4   :  { %v323_v29 = vmax.f32 %v229_v24, 0.0 }
  0xe5   :  { %v322_v27 = vmax.f32 %v224_v26, 0.0  ;;  %v16755_v28 = vpop.f32.mrb[2].mxu0  ;;  %v785_v26 = vld [vmem:[%s24852_s7 + $0x8] sm:$0xff] }
  0xe6   :  { %v239_v30 = vadd.f32 %v16755_v28, %v19338_v22  ;;  %v233_v31 = vpop.f32.mrb[3].mxu0  ;;  %v16861_v28 = vpack.c.bf16 %v785_v26, %v784_v25 }
  0xe7   :  { %v234_v32 = vadd.f32 %v19338_v22, %v233_v31  ;;  %16782 = vmatprep.mubr.msk.f32.mxu0 %vm350_vm2, %v322_v27  ;;  %v786_v27 = vld [vmem:[%s24852_s7 + $0x10] sm:$0xff]  ;;  %v789_v31 = vld [vmem:[%s24852_s7 + $0x28] sm:$0xff] }
  0xe8   :  { %16783 = vmatmul.mubr.msk.f32.vlgmr.msra.gmra.mrb[20].mxu0 %vm350_vm2, %v323_v29  ;;  %v325_v35 = vmax.f32 %v239_v30, 0.0  ;;  %v787_v29 = vld [vmem:[%s24852_s7 + $0x18] sm:$0xff]  ;;  %v788_v30 = vld [vmem:[%s24852_s7 + $0x20] sm:$0xff]  ;;  %16862 = vmatprep.subr.bf16.mxu1 %v16861_v28 }
  0xe9   :  { %v324_v33 = vmax.f32 %v234_v32, 0.0  ;;  %v16758_v34 = vpop.f32.mrb[4].mxu0  ;;  %16856 = vmatpush3.bf16.msra.mxu0 %v16853_v21  ;;  %v16865_v32 = vpack.c.bf16 %v787_v29, %v786_v27 }
  0xea   :  { %v249_v36 = vadd.f32 %v16758_v34, %v19338_v22  ;;  %v243_v37 = vpop.f32.mrb[5].mxu0  ;;  %v19413_v34 = vld [vmem:[%s24849_s4] ss:$0 sm:$0xff] }
  0xeb   :  { %v244_v38 = vadd.f32 %v19338_v22, %v243_v37  ;;  %16785 = vmatprep.mubr.msk.f32.mxu0 %vm350_vm2, %v324_v33  ;;  %v16869_v33 = vpack.c.bf16 %v789_v31, %v788_v30 }
  0xec   :  { %16786 = vmatmul.mubr.msk.f32.gmra.mrb[22].mxu0 %vm350_vm2, %v325_v35  ;;  %v327_v41 = vmax.f32 %v249_v36, 0.0 }
  0xed   :  { %v326_v39 = vmax.f32 %v244_v38, 0.0  ;;  %v16761_v40 = vpop.f32.mrb[6].mxu0 }
  0xee   :  { %v259_v42 = vadd.f32 %v16761_v40, %v19338_v22  ;;  %v253_v43 = vpop.f32.mrb[7].mxu0 }
  0xef   :  { %v254_v44 = vadd.f32 %v19338_v22, %v253_v43  ;;  %16788 = vmatprep.mubr.msk.f32.mxu0 %vm350_vm2, %v326_v39 }
  0xf0   :  { %16789 = vmatmul.mubr.msk.f32.gmra.mrb[24].mxu0 %vm350_vm2, %v327_v41  ;;  %v329_v47 = vmax.f32 %v259_v42, 0.0 }
  0xf1   :  { %v328_v45 = vmax.f32 %v254_v44, 0.0  ;;  %v16764_v46 = vpop.f32.mrb[8].mxu0 }
  0xf2   :  { %v269_v48 = vadd.f32 %v16764_v46, %v19338_v22  ;;  %v263_v49 = vpop.f32.mrb[9].mxu0 }
  0xf3   :  { %v264_v50 = vadd.f32 %v19338_v22, %v263_v49  ;;  %16791 = vmatprep.mubr.msk.f32.mxu1 %vm350_vm2, %v328_v45 }
  0xf4   :  { %16792 = vmatmul.mubr.msk.f32.vlgmr.msra.gmra.mrb[0].mxu1 %vm350_vm2, %v329_v47  ;;  %v331_v53 = vmax.f32 %v269_v48, 0.0 }
  0xf5   :  { %v330_v51 = vmax.f32 %v264_v50, 0.0  ;;  %v16767_v52 = vpop.f32.mrb[10].mxu0  ;;  %16864 = vmatpush3.bf16.msra.mxu1 %v16861_v28 }
  0xf6   :  { %v279_v54 = vadd.f32 %v16767_v52, %v19338_v22  ;;  %v273_v55 = vpop.f32.mrb[11].mxu0  ;;  %16866 = vmatprep.subr.bf16.mxu1 %v16865_v32 }
  0xf7   :  { %v274_v56 = vadd.f32 %v19338_v22, %v273_v55  ;;  %16794 = vmatprep.mubr.msk.f32.mxu1 %vm350_vm2, %v330_v51 }
  0xf8   :  { %v333_v57 = vmax.f32 %v279_v54, 0.0  ;;  %16795 = vmatmul.mubr.msk.f32.gmra.mrb[2].mxu1 %vm350_vm2, %v331_v53 }
  0xf9   :  { %v332_v58 = vmax.f32 %v274_v56, 0.0  ;;  %v16770_v59 = vpop.f32.mrb[12].mxu0  ;;  %16868 = vmatpush3.bf16.msra.mxu1 %v16865_v32 }
  0xfa   :  { %v289_v60 = vadd.f32 %v16770_v59, %v19338_v22  ;;  %v283_v61 = vpop.f32.mrb[13].mxu0  ;;  %16870 = vmatprep.subr.bf16.mxu1 %v16869_v33 }
  0xfb   :  { %v284_v62 = vadd.f32 %v19338_v22, %v283_v61  ;;  %16797 = vmatprep.mubr.msk.f32.mxu1 %vm350_vm2, %v332_v58 }
  0xfc   :  { %v335_v63 = vmax.f32 %v289_v60, 0.0  ;;  %16798 = vmatmul.mubr.msk.f32.gmra.mrb[4].mxu1 %vm350_vm2, %v333_v57 }
  0xfd   :  { %v334_v0 = vmax.f32 %v284_v62, 0.0  ;;  %v16773_v1 = vpop.f32.mrb[14].mxu0  ;;  %16872 = vmatpush3.bf16.msra.mxu1 %v16869_v33 }
  0xfe   :  { %v299_v2 = vadd.f32 %v16773_v1, %v19338_v22  ;;  %v293_v3 = vpop.f32.mrb[15].mxu0 }
  0xff   :  { %v294_v4 = vadd.f32 %v19338_v22, %v293_v3  ;;  %16800 = vmatprep.mubr.msk.f32.mxu1 %vm350_vm2, %v334_v0 }
 0x100   :  { %16801 = vmatmul.mubr.msk.f32.gmra.mrb[6].mxu1 %vm350_vm2, %v335_v63  ;;  %v337_v7 = vmax.f32 %v299_v2, 0.0 }
 0x101   :  { %v336_v5 = vmax.f32 %v294_v4, 0.0  ;;  %v16776_v6 = vpop.f32.mrb[16].mxu0 }
 0x102   :  { %v309_v8 = vadd.f32 %v16776_v6, %v19338_v22  ;;  %v303_v9 = vpop.f32.mrb[17].mxu0 }
 0x103   :  { %v304_v10 = vadd.f32 %v19338_v22, %v303_v9  ;;  %16803 = vmatprep.mubr.msk.f32.mxu1 %vm350_vm2, %v336_v5 }
 0x104   :  { %16804 = vmatmul.mubr.msk.f32.gmra.mrb[8].mxu1 %vm350_vm2, %v337_v7  ;;  %v339_v13 = vmax.f32 %v309_v8, 0.0 }
 0x105   :  { %v338_v11 = vmax.f32 %v304_v10, 0.0  ;;  %v16779_v12 = vpop.f32.mrb[18].mxu0 }
 0x106   :  { %v319_v14 = vadd.f32 %v16779_v12, %v19338_v22  ;;  %v313_v15 = vpop.f32.mrb[19].mxu0 }
 0x107   :  { %v314_v16 = vadd.f32 %v19338_v22, %v313_v15  ;;  %16806 = vmatprep.mubr.msk.f32.mxu1 %vm350_vm2, %v338_v11  ;;  %v669_v22 = vld [vmem:[%s24850_s5 + $0x10] sm:$0xff] }
 0x108   :  { %16807 = vmatmul.mubr.msk.f32.gmra.mrb[10].mxu1 %vm350_vm2, %v339_v13  ;;  %v341_v18 = vmax.f32 %v319_v14, 0.0  ;;  %v16857_v24 = vpack.c.bf16 %v670_v23, %v669_v22 }
 0x109   :  { %v340_v17 = vmax.f32 %v314_v16, 0.0 }
 0x10a   :  { %16858 = vmatprep.subr.bf16.mxu0 %v16857_v24 }
 0x10b   :  { %16809 = vmatprep.mubr.msk.f32.mxu1 %vm350_vm2, %v340_v17  ;;  %16860 = vmatpush3.bf16.msra.mxu0 %v16857_v24 }
 0x10c   :  { %16810 = vmatmul.mubr.msk.f32.gmra.mrb[12].mxu1 %vm350_vm2, %v341_v18 }
 0x1bb   :  { %v16784_v35 = vpop.f32.mrb[20].mxu0 }
 0x1bc   :  { %v483_v36 = vadd.f32 %v16784_v35, %v19413_v34  ;;  %v477_v37 = vpop.f32.mrb[21].mxu0 }
 0x1bd   :  { %v478_v38 = vadd.f32 %v19413_v34, %v477_v37 }
 0x1be   :  { %v578_v39 = vsel %vm576_vm3, %v483_v36, -inf }
 0x1bf   :  { %v577_v40 = vsel %vm576_vm3, %v478_v38, -inf  ;;  %v16787_v41 = vpop.f32.mrb[22].mxu0 }
 0x1c0   :  { %v579_v42 = vmax.f32 %v577_v40, %v578_v39  ;;  %v493_v43 = vadd.f32 %v16787_v41, %v19413_v34  ;;  %v487_v44 = vpop.f32.mrb[23].mxu0 }
 0x1c1   :  { %v488_v45 = vadd.f32 %v19413_v34, %v487_v44 }
 0x1c2   :  { %v580_v46 = vrot.slane %v579_v42, 4  ;;  %v587_v47 = vsel %vm576_vm3, %v493_v43, -inf }
 0x1c3   :  { %v586_v48 = vsel %vm576_vm3, %v488_v45, -inf  ;;  %v16790_v49 = vpop.f32.mrb[24].mxu0 }
 0x1c4   :  { %v581_v50 = vmax.f32 %v579_v42, %v580_v46  ;;  %v588_v51 = vmax.f32 %v586_v48, %v587_v47  ;;  %v503_v52 = vadd.f32 %v16790_v49, %v19413_v34  ;;  %v497_v53 = vpop.f32.mrb[25].mxu0 }
 0x1c5   :  { %v498_v54 = vadd.f32 %v19413_v34, %v497_v53 }
 0x1c6   :  { %v582_v55 = vrot.slane %v581_v50, 2  ;;  %v589_v56 = vrot.slane %v588_v51, 4  ;;  %v596_v57 = vsel %vm576_vm3, %v503_v52, -inf }
 0x1c7   :  { %v595_v58 = vsel %vm576_vm3, %v498_v54, -inf  ;;  %v16793_v59 = vpop.f32.mrb[0].mxu1 }
 0x1c8   :  { %v583_v60 = vmax.f32 %v581_v50, %v582_v55  ;;  %v590_v61 = vmax.f32 %v588_v51, %v589_v56  ;;  %v597_v62 = vmax.f32 %v595_v58, %v596_v57  ;;  %v513_v63 = vadd.f32 %v16793_v59, %v19413_v34  ;;  %v507_v0 = vpop.f32.mrb[1].mxu1 }
 0x1c9   :  { %v508_v1 = vadd.f32 %v19413_v34, %v507_v0 }
 0x1ca   :  { %v591_v2 = vrot.slane %v590_v61, 2  ;;  %v598_v3 = vrot.slane %v597_v62, 4  ;;  %v605_v4 = vsel %vm576_vm3, %v513_v63, -inf  ;;  %v584_v5 = vrot.slane %v583_v60, 1 }
 0x1cb   :  { %v604_v6 = vsel %vm576_vm3, %v508_v1, -inf  ;;  %v16796_v7 = vpop.f32.mrb[2].mxu1 }
 0x1cc   :  { %v592_v8 = vmax.f32 %v590_v61, %v591_v2  ;;  %v599_v9 = vmax.f32 %v597_v62, %v598_v3  ;;  %v606_v10 = vmax.f32 %v604_v6, %v605_v4  ;;  %v517_v11 = vpop.f32.mrb[3].mxu1  ;;  %v523_v12 = vadd.f32 %v16796_v7, %v19413_v34 }
 0x1cd   :  { %v518_v13 = vadd.f32 %v19413_v34, %v517_v11  ;;  %v585_v17 = vmax.f32 %v583_v60, %v584_v5 }
 0x1ce   :  { %v593_v14 = vrot.slane %v592_v8, 1  ;;  %v600_v15 = vrot.slane %v599_v9, 2  ;;  %v607_v16 = vrot.slane %v606_v10, 4  ;;  %v614_v18 = vsel %vm576_vm3, %v523_v12, -inf }
 0x1cf   :  { %v613_v19 = vsel %vm576_vm3, %v518_v13, -inf  ;;  %v16799_v20 = vpop.f32.mrb[4].mxu1 }
 0x1d0   :  { %v594_v21 = vmax.f32 %v592_v8, %v593_v14  ;;  %v601_v22 = vmax.f32 %v599_v9, %v600_v15  ;;  %v608_v23 = vmax.f32 %v606_v10, %v607_v16  ;;  %v615_v24 = vmax.f32 %v613_v19, %v614_v18  ;;  %v527_v25 = vpop.f32.mrb[5].mxu1 }
 0x1d1   :  { %v533_v26 = vadd.f32 %v16799_v20, %v19413_v34  ;;  %v528_v27 = vadd.f32 %v19413_v34, %v527_v25 }
 0x1d2   :  { %v689_v28 = vsel %vm688_vm4, %v594_v21, %v585_v17  ;;  %v602_v29 = vrot.slane %v601_v22, 1  ;;  %v609_v30 = vrot.slane %v608_v23, 2  ;;  %v616_v31 = vrot.slane %v615_v24, 4 }
 0x1d3   :  { %v623_v32 = vsel %vm576_vm3, %v533_v26, -inf  ;;  %v622_v33 = vsel %vm576_vm3, %v528_v27, -inf  ;;  %v16802_v35 = vpop.f32.mrb[6].mxu1 }
 0x1d4   :  { %v603_v36 = vmax.f32 %v601_v22, %v602_v29  ;;  %v610_v37 = vmax.f32 %v608_v23, %v609_v30  ;;  %v617_v38 = vmax.f32 %v615_v24, %v616_v31  ;;  %v624_v39 = vmax.f32 %v622_v33, %v623_v32  ;;  %v537_v40 = vpop.f32.mrb[7].mxu1 }
 0x1d5   :  { %v543_v41 = vadd.f32 %v16802_v35, %v19413_v34  ;;  %v538_v42 = vadd.f32 %v19413_v34, %v537_v40 }
 0x1d6   :  { %v691_v43 = vsel %vm690_vm5, %v603_v36, %v689_v28  ;;  %v611_v44 = vrot.slane %v610_v37, 1  ;;  %v618_v45 = vrot.slane %v617_v38, 2  ;;  %v625_v46 = vrot.slane %v624_v39, 4 }
 0x1d7   :  { %v632_v47 = vsel %vm576_vm3, %v543_v41, -inf  ;;  %v631_v48 = vsel %vm576_vm3, %v538_v42, -inf  ;;  %v16805_v49 = vpop.f32.mrb[8].mxu1 }
 0x1d8   :  { %v612_v50 = vmax.f32 %v610_v37, %v611_v44  ;;  %v619_v51 = vmax.f32 %v617_v38, %v618_v45  ;;  %v626_v52 = vmax.f32 %v624_v39, %v625_v46  ;;  %v633_v53 = vmax.f32 %v631_v48, %v632_v47  ;;  %v547_v54 = vpop.f32.mrb[9].mxu1 }
 0x1d9   :  { %v553_v55 = vadd.f32 %v16805_v49, %v19413_v34  ;;  %v548_v56 = vadd.f32 %v19413_v34, %v547_v54 }
 0x1da   :  { %v620_v57 = vrot.slane %v619_v51, 1  ;;  %v627_v58 = vrot.slane %v626_v52, 2  ;;  %v634_v59 = vrot.slane %v633_v53, 4  ;;  %v693_v60 = vsel %vm692_vm6, %v612_v50, %v691_v43 }
 0x1db   :  { %v641_v61 = vsel %vm576_vm3, %v553_v55, -inf  ;;  %v640_v62 = vsel %vm576_vm3, %v548_v56, -inf  ;;  %v16808_v63 = vpop.f32.mrb[10].mxu1 }
 0x1dc   :  { %v621_v0 = vmax.f32 %v619_v51, %v620_v57  ;;  %v628_v1 = vmax.f32 %v626_v52, %v627_v58  ;;  %v635_v2 = vmax.f32 %v633_v53, %v634_v59  ;;  %v642_v3 = vmax.f32 %v640_v62, %v641_v61  ;;  %v557_v4 = vpop.f32.mrb[11].mxu1 }
 0x1dd   :  { %v563_v5 = vadd.f32 %v16808_v63, %v19413_v34  ;;  %v558_v6 = vadd.f32 %v19413_v34, %v557_v4 }
 0x1de   :  { %v629_v7 = vrot.slane %v628_v1, 1  ;;  %v636_v8 = vrot.slane %v635_v2, 2  ;;  %v643_v9 = vrot.slane %v642_v3, 4  ;;  %v695_v10 = vsel %vm694_vm7, %v621_v0, %v693_v60 }
 0x1df   :  { %v650_v11 = vsel %vm576_vm3, %v563_v5, -inf  ;;  %v649_v12 = vsel %vm576_vm3, %v558_v6, -inf  ;;  %v16811_v13 = vpop.f32.mrb[12].mxu1 }
 0x1e0   :  { %v630_v14 = vmax.f32 %v628_v1, %v629_v7  ;;  %v637_v15 = vmax.f32 %v635_v2, %v636_v8  ;;  %v644_v16 = vmax.f32 %v642_v3, %v643_v9  ;;  %v651_v17 = vmax.f32 %v649_v12, %v650_v11  ;;  %v567_v18 = vpop.f32.mrb[13].mxu1 }
 0x1e1   :  { %v573_v19 = vadd.f32 %v16811_v13, %v19413_v34  ;;  %v568_v20 = vadd.f32 %v19413_v34, %v567_v18 }
 0x1e2   :  { %v638_v21 = vrot.slane %v637_v15, 1  ;;  %v645_v22 = vrot.slane %v644_v16, 2  ;;  %v652_v23 = vrot.slane %v651_v17, 4  ;;  %v697_v24 = vsel %vm696_vm8, %v630_v14, %v695_v10 }
 0x1e3   :  { %v659_v25 = vsel %vm576_vm3, %v573_v19, -inf  ;;  %v658_v26 = vsel %vm576_vm3, %v568_v20, -inf }
 0x1e4   :  { %v639_v27 = vmax.f32 %v637_v15, %v638_v21  ;;  %v646_v28 = vmax.f32 %v644_v16, %v645_v22  ;;  %v653_v29 = vmax.f32 %v651_v17, %v652_v23  ;;  %v660_v30 = vmax.f32 %v658_v26, %v659_v25 }
 0x1e6   :  { %v647_v31 = vrot.slane %v646_v28, 1  ;;  %v654_v32 = vrot.slane %v653_v29, 2  ;;  %v661_v33 = vrot.slane %v660_v30, 4  ;;  %v699_v35 = vsel %vm698_vm9, %v639_v27, %v697_v24 }
 0x1e8   :  { %v655_v34 = vmax.f32 %v653_v29, %v654_v32  ;;  %v662_v36 = vmax.f32 %v660_v30, %v661_v33  ;;  %v648_v37 = vmax.f32 %v646_v28, %v647_v31 }
 0x1ea   :  { %v663_v38 = vrot.slane %v662_v36, 2  ;;  %v701_v39 = vsel %vm700_vm10, %v648_v37, %v699_v35  ;;  %v656_v40 = vrot.slane %v655_v34, 1 }
 0x1eb   :  { %16820 = vmatprep.mubr.msk.f32.mxu0 %vm576_vm3, %v701_v39 }
 0x1ec   :  { %v664_v41 = vmax.f32 %v662_v36, %v663_v38  ;;  %v657_v43 = vmax.f32 %v655_v34, %v656_v40 }
 0x1ee   :  { %v665_v42 = vrot.slane %v664_v41, 1 }
 0x1f0   :  { %v666_v44 = vmax.f32 %v664_v41, %v665_v42 }
 0x1f2   :  { %v702_v45 = vsel %vm688_vm4, %v666_v44, %v657_v43 }
 0x1f3   :  { %16821 = vmatmul.mubr.msk.f32.vlgmr.msra.gmra.mrb[26].mxu0 %vm576_vm3, %v702_v45 }
 0x1f4   :  { %24 = vsyncpa [#allocation3], 0  ;;  %v790_v46 = vld [vmem:[%s24852_s7 + $0x30] sm:$0xff]  ;;  %v882_v47 = vld [vmem:[%s24854_s9] sm:$0xff]  ;;  %vm798_vm11 = vcmask 457728   ;;  %vm894_vm12 = vcmask 326656  }
 0x1f5   :  { %16835 = vmatprep.subr.mxu1 %v790_v46  ;;  %v883_v48 = vld [vmem:[%s24854_s9 + $0x8] sm:$0xff]  ;;  %v14127_v50 = vld [vmem:[%s24851_s6] ss:$0 sm:$0xff]  ;;  %v884_v57 = vld [vmem:[%s24854_s9 + $0x10] sm:$0xff]  ;;  %v19143_v16 = vmov 0.0   ;;  %vm1775_vm13 = vcmask 1040384  }
 0x1f6   :  { %16836 = vmatpush3.msra.mxu1 %v790_v46  ;;  %v16873_v49 = vpack.c.bf16 %v883_v48, %v882_v47  ;;  %v885_v58 = vld [vmem:[%s24854_s9 + $0x18] sm:$0xff]  ;;  %v886_v60 = vld [vmem:[%s24854_s9 + $0x20] sm:$0xff]  ;;  %v979_v61 = vld [vmem:[%s24856_s11 + $0x8] sm:$0xff]  ;;  %vm1771_vm14 = vcmask 7168   ;;  %vm12844_vm15 = vcmask 1044480   ;;  %vm12840_vm1 = vcmask 80896  }
 0x1f7   :  { %v16877_v59 = vpack.c.bf16 %v885_v58, %v884_v57  ;;  %v981_v62 = vld [vmem:[%s24856_s11 + $0x18] sm:$0xff]  ;;  %v978_v63 = vld [vmem:[%s24856_s11] sm:$0xff]  ;;  %v980_v1 = vld [vmem:[%s24856_s11 + $0x10] sm:$0xff]  ;;  %vm13942_vm2 = vcmask 1041408  }
 0x1f8   :  { %16874 = vmatprep.subr.bf16.mxu0 %v16873_v49  ;;  %v16881_v0 = vpack.c.bf16 %v981_v62, %v979_v61  ;;  %v16883_v2 = vpack.c.bf16 %v980_v1, %v978_v63  ;;  %v14130_v3 = vld [vmem:[%s24853_s8] ss:$0 sm:$0xff]  ;;  %v983_v10 = vld [vmem:[%s24856_s11 + $0x28] sm:$0xff]  ;;  %v985_v11 = vld [vmem:[%s24856_s11 + $0x38] sm:$0xff] }
 0x1f9   :  { %16876 = vmatpush3.bf16.msra.mxu0 %v16873_v49  ;;  %v16885_v12 = vpack.c.bf16 %v985_v11, %v983_v10  ;;  %v982_v13 = vld [vmem:[%s24856_s11 + $0x20] sm:$0xff]  ;;  %v984_v14 = vld [vmem:[%s24856_s11 + $0x30] sm:$0xff]  ;;  %v16960_v17 = vld [vmem:[%s24858_s13 + $0x2ec] ss:$44 sps:$4 sm:$0xff]  }
 0x1fa   :  { %16878 = vmatprep.subr.bf16.mxu0 %v16877_v59  ;;  %16882 = vmatprep.subr.bf16.mxu1 %v16881_v0  ;;  %v16887_v15 = vpack.c.bf16 %v984_v14, %v982_v13  ;;  %v16962_v18 = vld [vmem:[%s24858_s13 + $0x2f0] ss:$44 sps:$4 sm:$0xff]   ;;  %v16965_v19 = vld [vmem:[%s24858_s13 + $0x300] ss:$44 sps:$4 sm:$0xff]   ;;  %v16968_v20 = vld [vmem:[%s24858_s13 + $0x348] ss:$44 sps:$4 sm:$0xff]  }
 0x1fb   :  { %v16966_v21 = vld [vmem:[%s24858_s13 + $0x344] ss:$44 sps:$4 sm:$0xff]   ;;  %v16974_v22 = vld [vmem:[%s24858_s13 + $0x3a0] ss:$44 sps:$4 sm:$0xff]   ;;  %v16972_v23 = vld [vmem:[%s24858_s13 + $0x39c] ss:$44 sps:$4 sm:$0xff]  }
 0x1fc   :  { %v16980_v24 = vld [vmem:[%s24858_s13 + $0x3f8] ss:$44 sps:$4 sm:$0xff]   ;;  %v16978_v25 = vld [vmem:[%s24858_s13 + $0x3f4] ss:$44 sps:$4 sm:$0xff]   ;;  %v16986_v26 = vld [vmem:[%s24858_s13 + $0x450] ss:$44 sps:$4 sm:$0xff]  }
 0x1fd   :  { %16880 = vmatpush3.bf16.msra.mxu0 %v16877_v59  ;;  %v16984_v27 = vld [vmem:[%s24858_s13 + $0x44c] ss:$44 sps:$4 sm:$0xff]   ;;  %v16992_v28 = vld [vmem:[%s24858_s13 + $0x4a8] ss:$44 sps:$4 sm:$0xff]   ;;  %v16990_v29 = vld [vmem:[%s24858_s13 + $0x4a4] ss:$44 sps:$4 sm:$0xff]  }
 0x1fe   :  { %16848 = vmatprep.subr.mxu0 %v886_v60  ;;  %v14133_v30 = vld [vmem:[%s24855_s10] ss:$0 sm:$0xff]  ;;  %v16963_v35 = vld [vmem:[%s24858_s13 + $0x2fc] ss:$44 sps:$4 sm:$0xff]   ;;  %v16971_v37 = vld [vmem:[%s24858_s13 + $0x358] ss:$44 sps:$4 sm:$0xff]  }
 0x1ff   :  { %v16969_v38 = vld [vmem:[%s24858_s13 + $0x354] ss:$44 sps:$4 sm:$0xff]   ;;  %v16977_v40 = vld [vmem:[%s24858_s13 + $0x3b0] ss:$44 sps:$4 sm:$0xff]   ;;  %v16975_v41 = vld [vmem:[%s24858_s13 + $0x3ac] ss:$44 sps:$4 sm:$0xff]  }
 0x200   :  { %v16983_v42 = vld [vmem:[%s24858_s13 + $0x408] ss:$44 sps:$4 sm:$0xff]   ;;  %v16981_v43 = vld [vmem:[%s24858_s13 + $0x404] ss:$44 sps:$4 sm:$0xff]   ;;  %v16989_v44 = vld [vmem:[%s24858_s13 + $0x460] ss:$44 sps:$4 sm:$0xff]  }
 0x201   :  { %16849 = vmatpush3.msra.mxu0 %v886_v60  ;;  %v16987_v45 = vld [vmem:[%s24858_s13 + $0x45c] ss:$44 sps:$4 sm:$0xff]   ;;  %v16995_v46 = vld [vmem:[%s24858_s13 + $0x4b8] ss:$44 sps:$4 sm:$0xff]   ;;  %v16993_v47 = vld [vmem:[%s24858_s13 + $0x4b4] ss:$44 sps:$4 sm:$0xff]  }
 0x202   :  { %1811 = vmatprep.subr.bf16.mxu0 %v16962_v18  ;;  %v16998_v48 = vld [vmem:[%s24858_s13 + $0x500] ss:$44 sps:$4 sm:$0xff]   ;;  %v17001_v49 = vld [vmem:[%s24858_s13 + $0x510] ss:$44 sps:$4 sm:$0xff]   ;;  %v19144_v60 = vmov 0  }
 0x203   :  { %v14236_v58 = vld [vmem:[%s24858_s13 + $0x5bc] sm:$0x11]  ;;  %v19619_v61 = vsel %vm1775_vm13, 65535, %v19144_v60 }
 0x204   :  { %v14332_v62 = vcombine.low %v14236_v58, %v14236_v58  ;;  %v14333_v63 = vcombine.high %v14236_v58, %v14236_v58  ;;  %v17057_v58 = vld [vmem:[%s24858_s13 + $0x574] ss:$44 sps:$4 sm:$0xff]  }
 0x206   :  { %v1794_v1 = vand.u32 %v14333_v63, %v19619_v61 }
 0x2c6   :  { %v16822_v51 = vpop.f32.mrb[26].mxu0 }
 0x2c7   :  { %v779_v52 = vadd.f32 %v16822_v51, %v14127_v50  ;;  %v773_v53 = vpop.f32.mrb[27].mxu0  ;;  %v16999_v51 = vld [vmem:[%s24858_s13 + $0x50c] ss:$44 sps:$4 sm:$0xff]  }
 0x2c8   :  { %v774_v54 = vadd.f32 %v14127_v50, %v773_v53  ;;  %v16996_v50 = vld [vmem:[%s24858_s13 + $0x4fc] ss:$44 sps:$4 sm:$0xff]  }
 0x2c9   :  { %v783_v56 = vmax.f32 %v779_v52, 0.0  ;;  %v17004_v52 = vld [vmem:[%s24858_s13 + $0x558] ss:$44 sps:$4 sm:$0xff]   ;;  %v17007_v53 = vld [vmem:[%s24858_s13 + $0x568] ss:$44 sps:$4 sm:$0xff]  }
 0x2ca   :  { %v782_v55 = vmax.f32 %v774_v54, 0.0  ;;  %v17002_v54 = vld [vmem:[%s24858_s13 + $0x554] ss:$44 sps:$4 sm:$0xff]  }
 0x2cc   :  { %16837 = vmatprep.mubr.msk.f32.mxu1 %vm798_vm11, %v782_v55  ;;  %v17005_v55 = vld [vmem:[%s24858_s13 + $0x564] ss:$44 sps:$4 sm:$0xff]  }
 0x2cd   :  { %16838 = vmatmul.mubr.msk.f32.vlgmr.msra.gmra.mrb[14].mxu1 %vm798_vm11, %v783_v56  ;;  %v14234_v56 = vld [vmem:[%s24858_s13 + $0x5ac] sm:$0x11] }
 0x2ce   :  { %16884 = vmatpush1.bf16.msra.mxu1 %v16883_v2  ;;  %1068 = vmatprep.mubr.f32.mxu1 %v19143_v16  ;;  %v14329_v57 = vcombine.high %v14234_v56, %v14234_v56  ;;  %v14328_v59 = vcombine.low %v14234_v56, %v14234_v56 }
 0x2cf   :  { %16886 = vmatprep.subr.bf16.mxu1 %v16885_v12 }
 0x2d0   :  { %v1782_v0 = vand.u32 %v14329_v57, %v19619_v61  ;;  %v1779_v2 = vand.u32 %v14328_v59, %v19619_v61  ;;  %v17054_v57 = vld [vmem:[%s24858_s13 + $0x55c] ss:$44 sps:$4 sm:$0xff]  }
 0x2d2   :  { %16888 = vmatpush1.bf16.msra.mxu1 %v16887_v15 }
 0x2d3   :  { %1893 = vmatprep.subr.bf16.mxu1 %v16965_v19 }
 0x3a0   :  { %v16839_v4 = vpop.f32.mrb[14].mxu1 }
 0x3a1   :  { %v877_v5 = vadd.f32 %v16839_v4, %v14130_v3  ;;  %v871_v6 = vpop.f32.mrb[15].mxu1  ;;  %v17014_v4 = vld [vmem:[%s24858_s13 + $0x2f8] ss:$44 sps:$4 sm:$0xff]  }
 0x3a2   :  { %v872_v7 = vadd.f32 %v14130_v3, %v871_v6  ;;  %v1791_v3 = vand.u32 %v14332_v62, %v19619_v61  ;;  %v988_v6 = vlaneseq }
 0x3a3   :  { %v881_v9 = vmax.f32 %v877_v5, 0.0  ;;  %v17017_v5 = vld [vmem:[%s24858_s13 + $0x310] ss:$44 sps:$4 sm:$0xff]  }
 0x3a4   :  { %v880_v8 = vmax.f32 %v872_v7, 0.0  ;;  %v19631_v7 = vshrl.u32 %v988_v6, 7  ;;  %v17067_v6 = vld [vmem:[%s24858_s13] ss:$44 sps:$4 sm:$0xff]  }
 0x3a6   :  { %16850 = vmatprep.mubr.msk.f32.mxu0 %vm894_vm12, %v880_v8  ;;  %v19634_v8 = vsub.s32 0, %v19631_v7  ;;  %v19640_v10 = vsub.s32 1, %v19631_v7 }
 0x3a7   :  { %16851 = vmatmul.mubr.msk.f32.vlgmr.msra.gmra.mrb[28].mxu0 %vm894_vm12, %v881_v9  ;;  %v986_v9 = vld [vmem:[%s24857_s12] sm:$0x3] }
 0x3a8   :  { %1812 = vmatpush1.bf16.msra.mxu0 %v16960_v17  ;;  %v991_v12 = vrot.slane %v986_v9, %v19634_v8  ;;  %v995_v14 = vrot.slane %v986_v9, %v19640_v10  ;;  %v17072_v9 = vld [vmem:[%s24858_s13 + $0x360] ss:$44 sps:$4 sm:$0xff]  }
 0x3a9   :  { %1813 = vmatprep.subr.bf16.mxu0 %v16968_v20 }
 0x3ac   :  { %1814 = vmatpush1.bf16.msra.mxu0 %v16966_v21 }
 0x3ad   :  { %1815 = vmatprep.subr.bf16.mxu0 %v16974_v22 }
 0x3b0   :  { %1816 = vmatpush1.bf16.msra.mxu0 %v16972_v23 }
 0x3b1   :  { %1817 = vmatprep.subr.bf16.mxu0 %v16980_v24  ;;  %v17012_v24 = vld [vmem:[%s24858_s13 + $0x2f4] ss:$44 sps:$4 sm:$0xff]  }
 0x3b4   :  { %1818 = vmatpush1.bf16.msra.mxu0 %v16978_v25  ;;  %v17015_v25 = vld [vmem:[%s24858_s13 + $0x30c] ss:$44 sps:$4 sm:$0xff]  }
 0x3b5   :  { %1819 = vmatprep.subr.bf16.mxu0 %v16986_v26 }
 0x3b8   :  { %1820 = vmatpush1.bf16.msra.mxu0 %v16984_v27  ;;  %v17020_v27 = vld [vmem:[%s24858_s13 + $0x350] ss:$44 sps:$4 sm:$0xff]  }
 0x3b9   :  { %1821 = vmatprep.subr.bf16.mxu0 %v16992_v28  ;;  %v17023_v28 = vld [vmem:[%s24858_s13 + $0x368] ss:$44 sps:$4 sm:$0xff]  }
 0x3bc   :  { %1822 = vmatpush1.bf16.msra.mxu0 %v16990_v29  ;;  %v17018_v29 = vld [vmem:[%s24858_s13 + $0x34c] ss:$44 sps:$4 sm:$0xff]  }
 0x3bd   :  { %1823 = vmatprep.subr.bf16.mxu0 %v16998_v48  ;;  %v17053_v48 = vld [vmem:[%s24858_s13 + $0x520] ss:$44 sps:$4 sm:$0xff]  }
 0x3c0   :  { %1824 = vmatpush1.bf16.msra.mxu0 %v16996_v50  ;;  %v14238_v50 = vld [vmem:[%s24858_s13 + $0x5cc] sm:$0x11] }
 0x3c1   :  { %1825 = vmatprep.subr.bf16.mxu0 %v17004_v52  ;;  %v17051_v52 = vld [vmem:[%s24858_s13 + $0x51c] ss:$44 sps:$4 sm:$0xff]   ;;  %v14337_v56 = vcombine.high %v14238_v50, %v14238_v50  ;;  %v14336_v62 = vcombine.low %v14238_v50, %v14238_v50 }
 0x3c4   :  { %1826 = vmatpush1.bf16.msra.mxu0 %v17002_v54  ;;  %v17059_v54 = vld [vmem:[%s24858_s13 + $0x578] ss:$44 sps:$4 sm:$0xff]  }
 0x3c5   :  { %1827 = vmatprep.subr.bf16.mxu0 %v1782_v0  ;;  %v1806_v0 = vand.u32 %v14337_v56, %v19619_v61  ;;  %v17123_v56 = vld [vmem:[%s24858_s13 + $0x36c] ss:$44 sps:$4 sm:$0xff]  }
 0x3c8   :  { %1828 = vmatpush1.bf16.msra.mxu0 %v1779_v2  ;;  %v1803_v2 = vand.u32 %v14336_v62, %v19619_v61  ;;  %v17124_v62 = vld [vmem:[%s24858_s13 + $0xc0] ss:$44 sps:$4 sm:$0xff]  }
 0x3c9   :  { %1852 = vmatprep.subr.bf16.mxu0 %v17014_v4  ;;  %v17069_v4 = vld [vmem:[%s24858_s13 + $0x4] ss:$44 sps:$4 sm:$0xff]  }
 0x47a   :  { %v16852_v31 = vpop.f32.mrb[28].mxu0 }
 0x47b   :  { %v967_v32 = vpop.f32.mrb[29].mxu0  ;;  %v973_v34 = vadd.f32 %v16852_v31, %v14133_v30  ;;  %v17026_v31 = vld [vmem:[%s24858_s13 + $0x3a8] ss:$44 sps:$4 sm:$0xff]  }
 0x47c   :  { %v968_v33 = vadd.f32 %v14133_v30, %v967_v32  ;;  %v17021_v30 = vld [vmem:[%s24858_s13 + $0x364] ss:$44 sps:$4 sm:$0xff]   ;;  %v17029_v32 = vld [vmem:[%s24858_s13 + $0x3c0] ss:$44 sps:$4 sm:$0xff]  }
 0x47d   :  { %v977_v39 = vmax.f32 %v973_v34, 0.0  ;;  %v17032_v34 = vld [vmem:[%s24858_s13 + $0x400] ss:$44 sps:$4 sm:$0xff]  }
 0x47e   :  { %v976_v36 = vmax.f32 %v968_v33, 0.0  ;;  %v17024_v33 = vld [vmem:[%s24858_s13 + $0x3a4] ss:$44 sps:$4 sm:$0xff]  }
 0x480   :  { %14136 = vmatmul.mubr.msk.f32.vlgmr.msra.gmra.mrb[16].mxu1 %vm576_vm3, %v976_v36  ;;  %v17035_v36 = vld [vmem:[%s24858_s13 + $0x418] ss:$44 sps:$4 sm:$0xff]  }
 0x481   :  { %1074 = vmatprep.mubr.f32.mxu1 %v19143_v16  ;;  %1894 = vmatpush1.bf16.msra.mxu1 %v16963_v35  ;;  %v17027_v35 = vld [vmem:[%s24858_s13 + $0x3bc] ss:$44 sps:$4 sm:$0xff]  }
 0x482   :  { %1895 = vmatprep.subr.bf16.mxu1 %v16971_v37  ;;  %v17030_v37 = vld [vmem:[%s24858_s13 + $0x3fc] ss:$44 sps:$4 sm:$0xff]  }
 0x484   :  { %14137 = vmatmul.mubr.msk.f32.gmra.mrb[18].mxu1 %vm576_vm3, %v977_v39  ;;  %v17038_v39 = vld [vmem:[%s24858_s13 + $0x458] ss:$44 sps:$4 sm:$0xff]   ;;  %vm14068_vm3 = vcmask 524288  }
 0x485   :  { %1896 = vmatpush1.bf16.msra.mxu1 %v16969_v38  ;;  %v17033_v38 = vld [vmem:[%s24858_s13 + $0x414] ss:$44 sps:$4 sm:$0xff]  }
 0x486   :  { %1897 = vmatprep.subr.bf16.mxu1 %v16977_v40  ;;  %v17041_v40 = vld [vmem:[%s24858_s13 + $0x470] ss:$44 sps:$4 sm:$0xff]  }
 0x489   :  { %1898 = vmatpush1.bf16.msra.mxu1 %v16975_v41  ;;  %v17036_v41 = vld [vmem:[%s24858_s13 + $0x454] ss:$44 sps:$4 sm:$0xff]  }
 0x48a   :  { %1899 = vmatprep.subr.bf16.mxu1 %v16983_v42  ;;  %v17039_v42 = vld [vmem:[%s24858_s13 + $0x46c] ss:$44 sps:$4 sm:$0xff]  }
 0x48d   :  { %1900 = vmatpush1.bf16.msra.mxu1 %v16981_v43  ;;  %v17044_v43 = vld [vmem:[%s24858_s13 + $0x4b0] ss:$44 sps:$4 sm:$0xff]  }
 0x48e   :  { %1901 = vmatprep.subr.bf16.mxu1 %v16989_v44  ;;  %v17047_v44 = vld [vmem:[%s24858_s13 + $0x4c8] ss:$44 sps:$4 sm:$0xff]  }
 0x491   :  { %1902 = vmatpush1.bf16.msra.mxu1 %v16987_v45  ;;  %v17042_v45 = vld [vmem:[%s24858_s13 + $0x4ac] ss:$44 sps:$4 sm:$0xff]  }
 0x492   :  { %1903 = vmatprep.subr.bf16.mxu1 %v16995_v46  ;;  %v17045_v46 = vld [vmem:[%s24858_s13 + $0x4c4] ss:$44 sps:$4 sm:$0xff]  }
 0x495   :  { %1904 = vmatpush1.bf16.msra.mxu1 %v16993_v47  ;;  %v17050_v47 = vld [vmem:[%s24858_s13 + $0x508] ss:$44 sps:$4 sm:$0xff]  }
 0x496   :  { %1905 = vmatprep.subr.bf16.mxu1 %v17001_v49  ;;  %v14235_v49 = vld [vmem:[%s24858_s13 + $0x5b4] sm:$0x11] }
 0x497   :  { %v14330_v59 = vcombine.low %v14235_v49, %v14235_v49 }
 0x499   :  { %1906 = vmatpush1.bf16.msra.mxu1 %v16999_v51  ;;  %v17048_v51 = vld [vmem:[%s24858_s13 + $0x504] ss:$44 sps:$4 sm:$0xff]  }
 0x49a   :  { %1907 = vmatprep.subr.bf16.mxu1 %v17007_v53  ;;  %v17056_v53 = vld [vmem:[%s24858_s13 + $0x560] ss:$44 sps:$4 sm:$0xff]  }
 0x49d   :  { %1908 = vmatpush1.bf16.msra.mxu1 %v17005_v55  ;;  %v14331_v55 = vcombine.high %v14235_v49, %v14235_v49 }
 0x49e   :  { %1909 = vmatprep.subr.bf16.mxu1 %v1794_v1  ;;  %v1785_v1 = vand.u32 %v14330_v59, %v19619_v61  ;;  %v17127_v59 = vld [vmem:[%s24858_s13 + $0x3c4] ss:$44 sps:$4 sm:$0xff]  }
 0x49f   :  { %v1788_v63 = vand.u32 %v14331_v55, %v19619_v61  ;;  %v17122_v55 = vld [vmem:[%s24858_s13 + $0x6c] ss:$44 sps:$4 sm:$0xff]  }
 0x4a1   :  { %1910 = vmatpush1.bf16.msra.mxu1 %v1791_v3  ;;  %v17066_v3 = vld [vmem:[%s24858_s13 + $0x308] ss:$44 sps:$4 sm:$0xff]  }
 0x4a2   :  { %1975 = vmatprep.subr.bf16.mxu1 %v17017_v5  ;;  %v17064_v5 = vld [vmem:[%s24858_s13 + $0x304] ss:$44 sps:$4 sm:$0xff]  }
 0x553   :  { %v1070_v11 = vpop.f32.mrb[16].mxu1 }
 0x554   :  { %v1072_v13 = vpop.f32.mrb[17].mxu1  ;;  %v1071_v16 = vadd.f32 %v1070_v11, %v991_v12  ;;  %v17075_v11 = vld [vmem:[%s24858_s13 + $0x5c] ss:$44 sps:$4 sm:$0xff]  }
 0x555   :  { %v1073_v19 = vadd.f32 %v1072_v13, %v995_v14  ;;  %v17073_v13 = vld [vmem:[%s24858_s13 + $0x58] ss:$44 sps:$4 sm:$0xff]  }
 0x557   :  { %v1076_v15 = vpop.f32.mrb[18].mxu1 }
 0x558   :  { %v1077_v17 = vadd.f32 %v1076_v15, %v991_v12  ;;  %v1078_v18 = vpop.f32.mrb[19].mxu1  ;;  %v17070_v12 = vld [vmem:[%s24858_s13 + $0x35c] ss:$44 sps:$4 sm:$0xff]   ;;  %v17081_v15 = vld [vmem:[%s24858_s13 + $0xb4] ss:$44 sps:$4 sm:$0xff]  }
 0x559   :  { %v1079_v20 = vadd.f32 %v1078_v18, %v995_v14  ;;  %v17078_v14 = vld [vmem:[%s24858_s13 + $0x3b8] ss:$44 sps:$4 sm:$0xff]   ;;  %v17084_v18 = vld [vmem:[%s24858_s13 + $0x410] ss:$44 sps:$4 sm:$0xff]  }
 0x55a   :  { %v19644_v21 = vpack.c.bf16 %v1077_v17, %v1071_v16  ;;  %v17076_v16 = vld [vmem:[%s24858_s13 + $0x3b4] ss:$44 sps:$4 sm:$0xff]   ;;  %v17079_v17 = vld [vmem:[%s24858_s13 + $0xb0] ss:$44 sps:$4 sm:$0xff]  }
 0x55b   :  { %v19646_v22 = vpack.c.bf16 %v1079_v20, %v1073_v19  ;;  %v17087_v19 = vld [vmem:[%s24858_s13 + $0x10c] ss:$44 sps:$4 sm:$0xff]  }
 0x55c   :  { %v19658_v26 = vshrl.u32 %v19644_v21, 16  ;;  %v17082_v20 = vld [vmem:[%s24858_s13 + $0x40c] ss:$44 sps:$4 sm:$0xff]  }
 0x55d   :  { %v19649_v23 = vshrl.u32 %v19646_v22, 16 }
 0x55f   :  { %14339 = vmatprep.mubr.msk.bf16.mxu0 %vm1771_vm14, %v19649_v23  ;;  %14341 = vmatprep.mubr.msk.bf16.mxu1 %vm1771_vm14, %v19649_v23 }
 0x560   :  { %1844 = vmatmul.mubr.bf16.vlgmr.msra.gmra.mrb[32].mxu0 %v19658_v26  ;;  %1926 = vmatmul.mubr.bf16.vlgmr.msra.gmra.mrb[20].mxu1 %v19658_v26 }
 0x561   :  { %1853 = vmatpush1.bf16.msra.mxu0 %v17012_v24  ;;  %1976 = vmatpush1.bf16.msra.mxu1 %v17015_v25  ;;  %v17085_v24 = vld [vmem:[%s24858_s13 + $0x108] ss:$44 sps:$4 sm:$0xff]  }
 0x562   :  { %14340 = vmatprep.mubr.msk.bf16.mxu0 %vm1771_vm14, %v19649_v23  ;;  %14343 = vmatprep.mubr.msk.bf16.mxu1 %vm1771_vm14, %v19649_v23  ;;  %v17090_v25 = vld [vmem:[%s24858_s13 + $0x468] ss:$44 sps:$4 sm:$0xff]  }
 0x563   :  { %1854 = vmatprep.subr.bf16.mxu0 %v17020_v27  ;;  %1977 = vmatprep.subr.bf16.mxu1 %v17023_v28  ;;  %v17093_v27 = vld [vmem:[%s24858_s13 + $0x164] ss:$44 sps:$4 sm:$0xff]  }
 0x564   :  { %v17088_v28 = vld [vmem:[%s24858_s13 + $0x464] ss:$44 sps:$4 sm:$0xff]  }
 0x565   :  { %1855 = vmatpush1.bf16.msra.mxu0 %v17018_v29  ;;  %1978 = vmatpush1.bf16.msra.mxu1 %v17021_v30  ;;  %v17091_v29 = vld [vmem:[%s24858_s13 + $0x160] ss:$44 sps:$4 sm:$0xff]  }
 0x566   :  { %1856 = vmatprep.subr.bf16.mxu0 %v17026_v31  ;;  %1979 = vmatprep.subr.bf16.mxu1 %v17029_v32  ;;  %v17096_v30 = vld [vmem:[%s24858_s13 + $0x4c0] ss:$44 sps:$4 sm:$0xff]   ;;  %v17099_v31 = vld [vmem:[%s24858_s13 + $0x1bc] ss:$44 sps:$4 sm:$0xff]  }
 0x567   :  { %v17094_v32 = vld [vmem:[%s24858_s13 + $0x4bc] ss:$44 sps:$4 sm:$0xff]  }
 0x569   :  { %1857 = vmatpush1.bf16.msra.mxu0 %v17024_v33  ;;  %1980 = vmatpush1.bf16.msra.mxu1 %v17027_v35  ;;  %v17097_v33 = vld [vmem:[%s24858_s13 + $0x1b8] ss:$44 sps:$4 sm:$0xff]  }
 0x56a   :  { %1858 = vmatprep.subr.bf16.mxu0 %v17032_v34  ;;  %1981 = vmatprep.subr.bf16.mxu1 %v17035_v36  ;;  %v17102_v35 = vld [vmem:[%s24858_s13 + $0x518] ss:$44 sps:$4 sm:$0xff]   ;;  %v17105_v34 = vld [vmem:[%s24858_s13 + $0x214] ss:$44 sps:$4 sm:$0xff]  }
 0x56b   :  { %v14237_v36 = vld [vmem:[%s24858_s13 + $0x5c4] sm:$0x11] }
 0x56d   :  { %1859 = vmatpush1.bf16.msra.mxu0 %v17030_v37  ;;  %1982 = vmatpush1.bf16.msra.mxu1 %v17033_v38  ;;  %v1179_v37 = vld [vmem:[%s24858_s13 + $0x2c0] sm:$0x11] }
 0x56e   :  { %1860 = vmatprep.subr.bf16.mxu0 %v17038_v39  ;;  %1983 = vmatprep.subr.bf16.mxu1 %v17041_v40  ;;  %v17100_v38 = vld [vmem:[%s24858_s13 + $0x514] ss:$44 sps:$4 sm:$0xff]   ;;  %v17103_v39 = vld [vmem:[%s24858_s13 + $0x210] ss:$44 sps:$4 sm:$0xff]  }
 0x56f   :  { %v17108_v40 = vld [vmem:[%s24858_s13 + $0x570] ss:$44 sps:$4 sm:$0xff]  }
 0x571   :  { %1861 = vmatpush1.bf16.msra.mxu0 %v17036_v41  ;;  %1984 = vmatpush1.bf16.msra.mxu1 %v17039_v42  ;;  %v14335_v41 = vcombine.high %v14237_v36, %v14237_v36  ;;  %v17111_v42 = vld [vmem:[%s24858_s13 + $0x26c] ss:$44 sps:$4 sm:$0xff]  }
 0x572   :  { %1862 = vmatprep.subr.bf16.mxu0 %v17044_v43  ;;  %1985 = vmatprep.subr.bf16.mxu1 %v17047_v44  ;;  %v14434_v43 = vcombine.high %v1179_v37, %v1179_v37  ;;  %v17106_v44 = vld [vmem:[%s24858_s13 + $0x56c] ss:$44 sps:$4 sm:$0xff]  }
 0x574   :  { %v2538_v49 = vand.u32 %v14434_v43, %v19619_v61  ;;  %v17172_v43 = vld [vmem:[%s24858_s13 + $0x128] ss:$44 sps:$4 sm:$0xff]  }
 0x575   :  { %1863 = vmatpush1.bf16.msra.mxu0 %v17042_v45  ;;  %1986 = vmatpush1.bf16.msra.mxu1 %v17045_v46  ;;  %v14334_v45 = vcombine.low %v14237_v36, %v14237_v36  ;;  %v17109_v46 = vld [vmem:[%s24858_s13 + $0x268] ss:$44 sps:$4 sm:$0xff]  }
 0x576   :  { %1864 = vmatprep.subr.bf16.mxu0 %v17050_v47  ;;  %1987 = vmatprep.subr.bf16.mxu1 %v17053_v48  ;;  %v1800_v47 = vand.u32 %v14335_v41, %v19619_v61  ;;  %v14433_v48 = vcombine.low %v1179_v37, %v1179_v37  ;;  %v17165_v36 = vld [vmem:[%s24858_s13 + $0xbc] ss:$44 sps:$4 sm:$0xff]   ;;  %v17168_v37 = vld [vmem:[%s24858_s13 + $0xd4] ss:$44 sps:$4 sm:$0xff]   ;;  %v17174_v41 = vld [vmem:[%s24858_s13 + $0x12c] ss:$44 sps:$4 sm:$0xff]  }
 0x577   :  { %v1797_v50 = vand.u32 %v14334_v45, %v19619_v61  ;;  %v17180_v45 = vld [vmem:[%s24858_s13 + $0x184] ss:$44 sps:$4 sm:$0xff]  }
 0x579   :  { %1865 = vmatpush1.bf16.msra.mxu0 %v17048_v51  ;;  %1988 = vmatpush1.bf16.msra.mxu1 %v17051_v52  ;;  %v2535_v51 = vand.u32 %v14433_v48, %v19619_v61  ;;  %v17118_v52 = vld [vmem:[%s24858_s13 + $0x14] ss:$44 sps:$4 sm:$0xff]   ;;  %v17183_v48 = vld [vmem:[%s24858_s13 + $0x1c4] ss:$44 sps:$4 sm:$0xff]  }
 0x57a   :  { %1866 = vmatprep.subr.bf16.mxu0 %v17056_v53  ;;  %1989 = vmatprep.subr.bf16.mxu1 %v17059_v54  ;;  %v17119_v53 = vld [vmem:[%s24858_s13 + $0x314] ss:$44 sps:$4 sm:$0xff]   ;;  %v17116_v54 = vld [vmem:[%s24858_s13 + $0x10] ss:$44 sps:$4 sm:$0xff]  }
 0x57d   :  { %1867 = vmatpush1.bf16.msra.mxu0 %v17054_v57  ;;  %1990 = vmatpush1.bf16.msra.mxu1 %v17057_v58  ;;  %v17120_v57 = vld [vmem:[%s24858_s13 + $0x68] ss:$44 sps:$4 sm:$0xff]   ;;  %v17126_v58 = vld [vmem:[%s24858_s13 + $0xc4] ss:$44 sps:$4 sm:$0xff]  }
 0x57e   :  { %1868 = vmatprep.subr.bf16.mxu0 %v1788_v63  ;;  %1991 = vmatprep.subr.bf16.mxu1 %v1806_v0  ;;  %v17130_v63 = vld [vmem:[%s24858_s13 + $0x11c] ss:$44 sps:$4 sm:$0xff]  }
 0x57f   :  { %v17131_v0 = vld [vmem:[%s24858_s13 + $0x41c] ss:$44 sps:$4 sm:$0xff]  }
 0x581   :  { %1869 = vmatpush1.bf16.msra.mxu0 %v1785_v1  ;;  %1992 = vmatpush1.bf16.msra.mxu1 %v1803_v2  ;;  %v17128_v1 = vld [vmem:[%s24858_s13 + $0x118] ss:$44 sps:$4 sm:$0xff]   ;;  %v17134_v2 = vld [vmem:[%s24858_s13 + $0x174] ss:$44 sps:$4 sm:$0xff]  }
 0x582   :  { %1934 = vmatprep.subr.bf16.mxu0 %v17066_v3  ;;  %2567 = vmatprep.subr.bf16.mxu1 %v17069_v4  ;;  %v17135_v3 = vld [vmem:[%s24858_s13 + $0x474] ss:$44 sps:$4 sm:$0xff]   ;;  %v17132_v4 = vld [vmem:[%s24858_s13 + $0x170] ss:$44 sps:$4 sm:$0xff]  }
 0x584   :  { %1885 = vmatmul.mubr.bf16.vlgmr.msra.gmra.mrb[36].mxu0 %v19658_v26  ;;  %2008 = vmatmul.mubr.bf16.vlgmr.msra.gmra.mrb[24].mxu1 %v19658_v26 }
 0x585   :  { %1935 = vmatpush1.bf16.msra.mxu0 %v17064_v5  ;;  %14342 = vmatprep.mubr.msk.bf16.mxu0 %vm1771_vm14, %v19649_v23  ;;  %v17138_v5 = vld [vmem:[%s24858_s13 + $0x1cc] ss:$44 sps:$4 sm:$0xff]  }
 0x586   :  { %2568 = vmatpush1.bf16.msra.mxu1 %v17067_v6  ;;  %14444 = vmatprep.mubr.msk.bf16.mxu1 %vm1771_vm14, %v19646_v22  ;;  %v17139_v6 = vld [vmem:[%s24858_s13 + $0x4cc] ss:$44 sps:$4 sm:$0xff]  }
 0x587   :  { %1936 = vmatprep.subr.bf16.mxu0 %v17072_v9  ;;  %2569 = vmatprep.subr.bf16.mxu1 %v17075_v11  ;;  %v17136_v9 = vld [vmem:[%s24858_s13 + $0x1c8] ss:$44 sps:$4 sm:$0xff]   ;;  %v17142_v11 = vld [vmem:[%s24858_s13 + $0x224] ss:$44 sps:$4 sm:$0xff]  }
 0x589   :  { %1937 = vmatpush1.bf16.msra.mxu0 %v17070_v12  ;;  %v1181_v12 = vld [vmem:[%s24858_s13 + $0x2d0] sm:$0x11] }
 0x58a   :  { %2570 = vmatpush1.bf16.msra.mxu1 %v17073_v13  ;;  %1938 = vmatprep.subr.bf16.mxu0 %v17078_v14  ;;  %v17143_v13 = vld [vmem:[%s24858_s13 + $0x524] ss:$44 sps:$4 sm:$0xff]   ;;  %v17140_v14 = vld [vmem:[%s24858_s13 + $0x220] ss:$44 sps:$4 sm:$0xff]  }
 0x58b   :  { %2571 = vmatprep.subr.bf16.mxu1 %v17081_v15  ;;  %v17146_v15 = vld [vmem:[%s24858_s13 + $0x27c] ss:$44 sps:$4 sm:$0xff]  }
 0x58d   :  { %1939 = vmatpush1.bf16.msra.mxu0 %v17076_v16  ;;  %v14438_v16 = vcombine.high %v1181_v12, %v1181_v12 }
 0x58e   :  { %2572 = vmatpush1.bf16.msra.mxu1 %v17079_v17  ;;  %1940 = vmatprep.subr.bf16.mxu0 %v17084_v18  ;;  %v17147_v17 = vld [vmem:[%s24858_s13 + $0x57c] ss:$44 sps:$4 sm:$0xff]   ;;  %v17150_v18 = vld [vmem:[%s24858_s13 + $0x5d4] ss:$0 sps:$4 sm:$0x11]  }
 0x58f   :  { %2573 = vmatprep.subr.bf16.mxu1 %v17087_v19  ;;  %v17144_v19 = vld [vmem:[%s24858_s13 + $0x278] ss:$44 sps:$4 sm:$0xff]  }
 0x591   :  { %1941 = vmatpush1.bf16.msra.mxu0 %v17082_v20  ;;  %v14437_v20 = vcombine.low %v1181_v12, %v1181_v12  ;;  %v17208_v12 = vld [vmem:[%s24858_s13 + $0x5dc] ss:$44 sps:$4 sm:$0xff]  }
 0x592   :  { %2574 = vmatpush1.bf16.msra.mxu1 %v17085_v24  ;;  %1942 = vmatprep.subr.bf16.mxu0 %v17090_v25  ;;  %v2550_v24 = vand.u32 %v14438_v16, %v19619_v61  ;;  %v1809_v25 = vand.u32 %v17150_v18, %v19619_v61  ;;  %v17214_v16 = vld [vmem:[%s24858_s13 + $0x634] ss:$44 sps:$4 sm:$0xff]   ;;  %v17209_v18 = vld [vmem:[%s24858_s13 + $0x70] ss:$44 sps:$4 sm:$0xff]  }
 0x593   :  { %2575 = vmatprep.subr.bf16.mxu1 %v17093_v27  ;;  %v2547_v27 = vand.u32 %v14437_v20, %v19619_v61  ;;  %v17217_v20 = vld [vmem:[%s24858_s13 + $0xcc] ss:$44 sps:$4 sm:$0xff]  }
 0x595   :  { %1943 = vmatpush1.bf16.msra.mxu0 %v17088_v28  ;;  %v17153_v28 = vld [vmem:[%s24858_s13 + $0xc] ss:$44 sps:$4 sm:$0xff]  }
 0x596   :  { %2576 = vmatpush1.bf16.msra.mxu1 %v17091_v29  ;;  %1944 = vmatprep.subr.bf16.mxu0 %v17096_v30  ;;  %v17156_v29 = vld [vmem:[%s24858_s13 + $0x24] ss:$44 sps:$4 sm:$0xff]   ;;  %v17151_v30 = vld [vmem:[%s24858_s13 + $0x8] ss:$44 sps:$4 sm:$0xff]  }
 0x597   :  { %2577 = vmatprep.subr.bf16.mxu1 %v17099_v31  ;;  %v17154_v31 = vld [vmem:[%s24858_s13 + $0x20] ss:$44 sps:$4 sm:$0xff]  }
 0x599   :  { %1945 = vmatpush1.bf16.msra.mxu0 %v17094_v32  ;;  %v17159_v32 = vld [vmem:[%s24858_s13 + $0x64] ss:$44 sps:$4 sm:$0xff]  }
 0x59a   :  { %2578 = vmatpush1.bf16.msra.mxu1 %v17097_v33  ;;  %1946 = vmatprep.subr.bf16.mxu0 %v17102_v35  ;;  %v17162_v33 = vld [vmem:[%s24858_s13 + $0x7c] ss:$44 sps:$4 sm:$0xff]   ;;  %v17157_v35 = vld [vmem:[%s24858_s13 + $0x60] ss:$44 sps:$4 sm:$0xff]  }
 0x59b   :  { %2579 = vmatprep.subr.bf16.mxu1 %v17105_v34  ;;  %v17160_v34 = vld [vmem:[%s24858_s13 + $0x78] ss:$44 sps:$4 sm:$0xff]  }
 0x59d   :  { %1947 = vmatpush1.bf16.msra.mxu0 %v17100_v38  ;;  %v17163_v38 = vld [vmem:[%s24858_s13 + $0xb8] ss:$44 sps:$4 sm:$0xff]  }
 0x59e   :  { %2580 = vmatpush1.bf16.msra.mxu1 %v17103_v39  ;;  %1948 = vmatprep.subr.bf16.mxu0 %v17108_v40  ;;  %v17166_v39 = vld [vmem:[%s24858_s13 + $0xd0] ss:$44 sps:$4 sm:$0xff]   ;;  %v17171_v40 = vld [vmem:[%s24858_s13 + $0x114] ss:$44 sps:$4 sm:$0xff]  }
 0x59f   :  { %2581 = vmatprep.subr.bf16.mxu1 %v17111_v42  ;;  %v17169_v42 = vld [vmem:[%s24858_s13 + $0x110] ss:$44 sps:$4 sm:$0xff]  }
 0x5a1   :  { %1949 = vmatpush1.bf16.msra.mxu0 %v17106_v44  ;;  %v17177_v44 = vld [vmem:[%s24858_s13 + $0x16c] ss:$44 sps:$4 sm:$0xff]  }
 0x5a2   :  { %2582 = vmatpush1.bf16.msra.mxu1 %v17109_v46  ;;  %1950 = vmatprep.subr.bf16.mxu0 %v1800_v47  ;;  %v17175_v46 = vld [vmem:[%s24858_s13 + $0x168] ss:$44 sps:$4 sm:$0xff]   ;;  %v17178_v47 = vld [vmem:[%s24858_s13 + $0x180] ss:$44 sps:$4 sm:$0xff]  }
 0x5a3   :  { %2583 = vmatprep.subr.bf16.mxu1 %v2538_v49  ;;  %v17186_v49 = vld [vmem:[%s24858_s13 + $0x1dc] ss:$44 sps:$4 sm:$0xff]  }
 0x5a5   :  { %1951 = vmatpush1.bf16.msra.mxu0 %v1797_v50  ;;  %v17181_v50 = vld [vmem:[%s24858_s13 + $0x1c0] ss:$44 sps:$4 sm:$0xff]  }
 0x5a6   :  { %2584 = vmatpush1.bf16.msra.mxu1 %v2535_v51  ;;  %2016 = vmatprep.subr.bf16.mxu0 %v19144_v60  ;;  %v17184_v51 = vld [vmem:[%s24858_s13 + $0x1d8] ss:$44 sps:$4 sm:$0xff]  }
 0x5a7   :  { %2649 = vmatprep.subr.bf16.mxu1 %v17118_v52  ;;  %v17189_v52 = vld [vmem:[%s24858_s13 + $0x21c] ss:$44 sps:$4 sm:$0xff]  }
 0x5a8   :  { %1967 = vmatmul.mubr.bf16.vlgmr.msra.gmra.mrb[40].mxu0 %v19658_v26 }
 0x5a9   :  { %2600 = vmatmul.mubr.bf16.vlgmr.msra.gmra.mrb[28].mxu1 %v19644_v21  ;;  %2017 = vmatpush1.bf16.msra.mxu0 %v17119_v53  ;;  %v17192_v53 = vld [vmem:[%s24858_s13 + $0x234] ss:$44 sps:$4 sm:$0xff]  }
 0x5aa   :  { %14344 = vmatprep.mubr.msk.bf16.mxu0 %vm1771_vm14, %v19649_v23  ;;  %2650 = vmatpush1.bf16.msra.mxu1 %v17116_v54  ;;  %v1180_v54 = vld [vmem:[%s24858_s13 + $0x2c8] sm:$0x11] }
 0x5ab   :  { %14446 = vmatprep.mubr.msk.bf16.mxu1 %vm1771_vm14, %v19646_v22  ;;  %2018 = vmatprep.subr.bf16.mxu0 %v19144_v60 }
 0x5ac   :  { %2651 = vmatprep.subr.bf16.mxu1 %v17122_v55  ;;  %v1183_v55 = vld [vmem:[%s24858_s13 + $0x2e0] sm:$0x11] }
 0x5ad   :  { %2019 = vmatpush1.bf16.msra.mxu0 %v17123_v56  ;;  %v17187_v56 = vld [vmem:[%s24858_s13 + $0x218] ss:$44 sps:$4 sm:$0xff]  }
 0x5ae   :  { %2652 = vmatpush1.bf16.msra.mxu1 %v17120_v57  ;;  %2020 = vmatprep.subr.bf16.mxu0 %v19144_v60  ;;  %v17190_v57 = vld [vmem:[%s24858_s13 + $0x230] ss:$44 sps:$4 sm:$0xff]  }
 0x5af   :  { %2653 = vmatprep.subr.bf16.mxu1 %v17126_v58  ;;  %v17195_v58 = vld [vmem:[%s24858_s13 + $0x274] ss:$44 sps:$4 sm:$0xff]  }
 0x5b1   :  { %2021 = vmatpush1.bf16.msra.mxu0 %v17127_v59  ;;  %v14436_v59 = vcombine.high %v1180_v54, %v1180_v54 }
 0x5b2   :  { %2654 = vmatpush1.bf16.msra.mxu1 %v17124_v62  ;;  %2022 = vmatprep.subr.bf16.mxu0 %v19144_v60  ;;  %v17198_v62 = vld [vmem:[%s24858_s13 + $0x28c] ss:$44 sps:$4 sm:$0xff]  }
 0x5b3   :  { %2655 = vmatprep.subr.bf16.mxu1 %v17130_v63  ;;  %v14442_v63 = vcombine.high %v1183_v55, %v1183_v55 }
 0x5b5   :  { %2023 = vmatpush1.bf16.msra.mxu0 %v17131_v0  ;;  %v17193_v0 = vld [vmem:[%s24858_s13 + $0x270] ss:$44 sps:$4 sm:$0xff]  }
 0x5b6   :  { %2656 = vmatpush1.bf16.msra.mxu1 %v17128_v1  ;;  %2024 = vmatprep.subr.bf16.mxu0 %v19144_v60  ;;  %v14435_v1 = vcombine.low %v1180_v54, %v1180_v54 }
 0x5b7   :  { %2657 = vmatprep.subr.bf16.mxu1 %v17134_v2  ;;  %v17196_v2 = vld [vmem:[%s24858_s13 + $0x288] ss:$44 sps:$4 sm:$0xff]  }
 0x5b9   :  { %2025 = vmatpush1.bf16.msra.mxu0 %v17135_v3  ;;  %v2544_v3 = vand.u32 %v14436_v59, %v19619_v61  ;;  %v17258_v59 = vld [vmem:[%s24858_s13 + $0x28] ss:$44 sps:$4 sm:$0xff]  }
 0x5ba   :  { %2658 = vmatpush1.bf16.msra.mxu1 %v17132_v4  ;;  %2026 = vmatprep.subr.bf16.mxu0 %v19144_v60  ;;  %v14441_v4 = vcombine.low %v1183_v55, %v1183_v55 }
 0x5bb   :  { %2659 = vmatprep.subr.bf16.mxu1 %v17138_v5  ;;  %v2562_v5 = vand.u32 %v14442_v63, %v19619_v61  ;;  %v20210_v63 = vrot.slane %v19644_v21, 1 }
 0x5bd   :  { %2027 = vmatpush1.bf16.msra.mxu0 %v17139_v6  ;;  %v2541_v6 = vand.u32 %v14435_v1, %v19619_v61  ;;  %v17262_v1 = vld [vmem:[%s24858_s13 + $0x80] ss:$44 sps:$4 sm:$0xff]  }
 0x5be   :  { %2660 = vmatpush1.bf16.msra.mxu1 %v17136_v9  ;;  %2028 = vmatprep.subr.bf16.mxu0 %v19144_v60  ;;  %v2559_v9 = vand.u32 %v14441_v4, %v19619_v61  ;;  %v17266_v4 = vld [vmem:[%s24858_s13 + $0xd8] ss:$44 sps:$4 sm:$0xff]  }
 0x5bf   :  { %2661 = vmatprep.subr.bf16.mxu1 %v17142_v11  ;;  %v17205_v11 = vld [vmem:[%s24858_s13 + $0x1c] ss:$44 sps:$4 sm:$0xff]  }
 0x5c1   :  { %2029 = vmatpush1.bf16.msra.mxu0 %v17143_v13  ;;  %v17203_v13 = vld [vmem:[%s24858_s13 + $0x18] ss:$44 sps:$4 sm:$0xff]  }
 0x5c2   :  { %2662 = vmatpush1.bf16.msra.mxu1 %v17140_v14  ;;  %2030 = vmatprep.subr.bf16.mxu0 %v19144_v60  ;;  %v17206_v14 = vld [vmem:[%s24858_s13 + $0x5d8] ss:$44 sps:$4 sm:$0xff]  }
 0x5c3   :  { %2663 = vmatprep.subr.bf16.mxu1 %v17146_v15  ;;  %v17211_v15 = vld [vmem:[%s24858_s13 + $0x74] ss:$44 sps:$4 sm:$0xff]  }
 0x5c5   :  { %2031 = vmatpush1.bf16.msra.mxu0 %v17147_v17  ;;  %v20105_v17 = vrot.slane %v19646_v22, 1 }
 0x5c6   :  { %2664 = vmatpush1.bf16.msra.mxu1 %v17144_v19  ;;  %2032 = vmatprep.subr.bf16.mxu0 %v19144_v60  ;;  %v17212_v19 = vld [vmem:[%s24858_s13 + $0x630] ss:$44 sps:$4 sm:$0xff]  }
 0x5c7   :  { %2665 = vmatprep.subr.bf16.mxu1 %v2550_v24  ;;  %v17220_v24 = vld [vmem:[%s24858_s13 + $0x68c] ss:$44 sps:$4 sm:$0xff]  }
 0x5c9   :  { %2033 = vmatpush1.bf16.msra.mxu0 %v1809_v25  ;;  %v17215_v25 = vld [vmem:[%s24858_s13 + $0xc8] ss:$44 sps:$4 sm:$0xff]  }
 0x5ca   :  { %2666 = vmatpush1.bf16.msra.mxu1 %v2547_v27  ;;  %2608 = vmatprep.subr.bf16.mxu0 %v17153_v28  ;;  %v17218_v27 = vld [vmem:[%s24858_s13 + $0x688] ss:$44 sps:$4 sm:$0xff]   ;;  %v17223_v28 = vld [vmem:[%s24858_s13 + $0x124] ss:$44 sps:$4 sm:$0xff]  }
 0x5cb   :  { %2731 = vmatprep.subr.bf16.mxu1 %v17156_v29  ;;  %v17226_v29 = vld [vmem:[%s24858_s13 + $0x6e4] ss:$44 sps:$4 sm:$0xff]  }
 0x5cc   :  { %2049 = vmatmul.mubr.bf16.vlgmr.msra.gmra.mrb[44].mxu0 %v19658_v26 }
 0x5cd   :  { %2682 = vmatmul.mubr.bf16.vlgmr.msra.gmra.mrb[32].mxu1 %v19644_v21  ;;  %2609 = vmatpush1.bf16.msra.mxu0 %v17151_v30  ;;  %v17221_v30 = vld [vmem:[%s24858_s13 + $0x120] ss:$44 sps:$4 sm:$0xff]  }
 0x5ce   :  { %14445 = vmatprep.mubr.msk.bf16.mxu0 %vm1771_vm14, %v19646_v22  ;;  %2732 = vmatpush1.bf16.msra.mxu1 %v17154_v31  ;;  %v17224_v31 = vld [vmem:[%s24858_s13 + $0x6e0] ss:$44 sps:$4 sm:$0xff]  }
 0x5cf   :  { %14448 = vmatprep.mubr.msk.bf16.mxu1 %vm1771_vm14, %v19646_v22  ;;  %2610 = vmatprep.subr.bf16.mxu0 %v17159_v32  ;;  %v17229_v32 = vld [vmem:[%s24858_s13 + $0x17c] ss:$44 sps:$4 sm:$0xff]  }
 0x5d0   :  { %2733 = vmatprep.subr.bf16.mxu1 %v17162_v33  ;;  %v17232_v33 = vld [vmem:[%s24858_s13 + $0x73c] ss:$44 sps:$4 sm:$0xff]  }
 0x5d1   :  { %2611 = vmatpush1.bf16.msra.mxu0 %v17157_v35  ;;  %v17227_v35 = vld [vmem:[%s24858_s13 + $0x178] ss:$44 sps:$4 sm:$0xff]  }
 0x5d2   :  { %2734 = vmatpush1.bf16.msra.mxu1 %v17160_v34  ;;  %2612 = vmatprep.subr.bf16.mxu0 %v17165_v36  ;;  %v17230_v34 = vld [vmem:[%s24858_s13 + $0x738] ss:$44 sps:$4 sm:$0xff]   ;;  %v17235_v36 = vld [vmem:[%s24858_s13 + $0x1d4] ss:$44 sps:$4 sm:$0xff]  }
 0x5d3   :  { %2735 = vmatprep.subr.bf16.mxu1 %v17168_v37  ;;  %v17238_v37 = vld [vmem:[%s24858_s13 + $0x794] ss:$44 sps:$4 sm:$0xff]  }
 0x5d5   :  { %2613 = vmatpush1.bf16.msra.mxu0 %v17163_v38  ;;  %v17233_v38 = vld [vmem:[%s24858_s13 + $0x1d0] ss:$44 sps:$4 sm:$0xff]  }
 0x5d6   :  { %2736 = vmatpush1.bf16.msra.mxu1 %v17166_v39  ;;  %2614 = vmatprep.subr.bf16.mxu0 %v17171_v40  ;;  %v17236_v39 = vld [vmem:[%s24858_s13 + $0x790] ss:$44 sps:$4 sm:$0xff]   ;;  %v17241_v40 = vld [vmem:[%s24858_s13 + $0x22c] ss:$44 sps:$4 sm:$0xff]  }
 0x5d7   :  { %2737 = vmatprep.subr.bf16.mxu1 %v17174_v41  ;;  %v17244_v41 = vld [vmem:[%s24858_s13 + $0x7ec] ss:$44 sps:$4 sm:$0xff]  }
 0x5d9   :  { %2615 = vmatpush1.bf16.msra.mxu0 %v17169_v42  ;;  %v1182_v42 = vld [vmem:[%s24858_s13 + $0x2d8] sm:$0x11] }
 0x5da   :  { %2738 = vmatpush1.bf16.msra.mxu1 %v17172_v43  ;;  %2616 = vmatprep.subr.bf16.mxu0 %v17177_v44  ;;  %v14546_v43 = vld [vmem:[%s24858_s13 + $0x898] sm:$0x11]  ;;  %v17239_v44 = vld [vmem:[%s24858_s13 + $0x228] ss:$44 sps:$4 sm:$0xff]  }
 0x5db   :  { %2739 = vmatprep.subr.bf16.mxu1 %v17180_v45  ;;  %v17242_v45 = vld [vmem:[%s24858_s13 + $0x7e8] ss:$44 sps:$4 sm:$0xff]   ;;  %v14640_v54 = vcombine.low %v14546_v43, %v14546_v43 }
 0x5dd   :  { %2617 = vmatpush1.bf16.msra.mxu0 %v17175_v46  ;;  %v17247_v46 = vld [vmem:[%s24858_s13 + $0x284] ss:$44 sps:$4 sm:$0xff]  }
 0x5de   :  { %2740 = vmatpush1.bf16.msra.mxu1 %v17178_v47  ;;  %2618 = vmatprep.subr.bf16.mxu0 %v17183_v48  ;;  %v14440_v47 = vcombine.high %v1182_v42, %v1182_v42  ;;  %v17250_v48 = vld [vmem:[%s24858_s13 + $0x844] ss:$44 sps:$4 sm:$0xff]  }
 0x5df   :  { %2741 = vmatprep.subr.bf16.mxu1 %v17186_v49  ;;  %v14641_v49 = vcombine.high %v14546_v43, %v14546_v43 }
 0x5e1   :  { %2619 = vmatpush1.bf16.msra.mxu0 %v17181_v50  ;;  %v17245_v50 = vld [vmem:[%s24858_s13 + $0x280] ss:$44 sps:$4 sm:$0xff]   ;;  %v3403_v55 = vand.u32 %v14641_v49, %v19619_v61 }
 0x5e2   :  { %2742 = vmatpush1.bf16.msra.mxu1 %v17184_v51  ;;  %2620 = vmatprep.subr.bf16.mxu0 %v17189_v52  ;;  %v14439_v51 = vcombine.low %v1182_v42, %v1182_v42  ;;  %v17248_v52 = vld [vmem:[%s24858_s13 + $0x840] ss:$44 sps:$4 sm:$0xff]  }
 0x5e3   :  { %2743 = vmatprep.subr.bf16.mxu1 %v17192_v53  ;;  %v2556_v53 = vand.u32 %v14440_v47, %v19619_v61  ;;  %v17293_v47 = vld [vmem:[%s24858_s13 + $0x5f8] ss:$44 sps:$4 sm:$0xff]   ;;  %v17301_v49 = vld [vmem:[%s24858_s13 + $0x654] ss:$44 sps:$4 sm:$0xff]  }
 0x5e5   :  { %2621 = vmatpush1.bf16.msra.mxu0 %v17187_v56  ;;  %v2553_v56 = vand.u32 %v14439_v51, %v19619_v61  ;;  %v17299_v51 = vld [vmem:[%s24858_s13 + $0x650] ss:$44 sps:$4 sm:$0xff]  }
 0x5e6   :  { %2744 = vmatpush1.bf16.msra.mxu1 %v17190_v57  ;;  %2622 = vmatprep.subr.bf16.mxu0 %v17195_v58  ;;  %v3400_v57 = vand.u32 %v14640_v54, %v19619_v61  ;;  %v17257_v58 = vld [vmem:[%s24858_s13 + $0x5ec] ss:$44 sps:$4 sm:$0xff]   ;;  %v17302_v54 = vld [vmem:[%s24858_s13 + $0x690] ss:$44 sps:$4 sm:$0xff]  }
 0x5e7   :  { %2745 = vmatprep.subr.bf16.mxu1 %v17198_v62  ;;  %v17255_v62 = vld [vmem:[%s24858_s13 + $0x5e8] ss:$44 sps:$4 sm:$0xff]  }
 0x5e9   :  { %2623 = vmatpush1.bf16.msra.mxu0 %v17193_v0  ;;  %v17261_v0 = vld [vmem:[%s24858_s13 + $0x644] ss:$44 sps:$4 sm:$0xff]  }
 0x5ea   :  { %2746 = vmatpush1.bf16.msra.mxu1 %v17196_v2  ;;  %2624 = vmatprep.subr.bf16.mxu0 %v2544_v3  ;;  %v17259_v2 = vld [vmem:[%s24858_s13 + $0x640] ss:$44 sps:$4 sm:$0xff]   ;;  %v17265_v3 = vld [vmem:[%s24858_s13 + $0x69c] ss:$44 sps:$4 sm:$0xff]  }
 0x5eb   :  { %2747 = vmatprep.subr.bf16.mxu1 %v2562_v5  ;;  %v17263_v5 = vld [vmem:[%s24858_s13 + $0x698] ss:$44 sps:$4 sm:$0xff]  }
 0x5ed   :  { %2625 = vmatpush1.bf16.msra.mxu0 %v2541_v6  ;;  %v17269_v6 = vld [vmem:[%s24858_s13 + $0x6f4] ss:$44 sps:$4 sm:$0xff]  }
 0x5ee   :  { %2748 = vmatpush1.bf16.msra.mxu1 %v2559_v9  ;;  %2690 = vmatprep.subr.bf16.mxu0 %v17205_v11  ;;  %v17270_v9 = vld [vmem:[%s24858_s13 + $0x130] ss:$44 sps:$4 sm:$0xff]  }
 0x5ef   :  { %3432 = vmatprep.subr.bf16.mxu1 %v17208_v12  ;;  %v17267_v11 = vld [vmem:[%s24858_s13 + $0x6f0] ss:$44 sps:$4 sm:$0xff]   ;;  %v17273_v12 = vld [vmem:[%s24858_s13 + $0x74c] ss:$44 sps:$4 sm:$0xff]  }
 0x5f0   :  { %2641 = vmatmul.mubr.bf16.vlgmr.msra.gmra.mrb[48].mxu0 %v19644_v21 }
 0x5f1   :  { %2764 = vmatmul.mubr.bf16.vlgmr.msra.gmra.mrb[36].mxu1 %v19644_v21  ;;  %2691 = vmatpush1.bf16.msra.mxu0 %v17203_v13  ;;  %v17274_v13 = vld [vmem:[%s24858_s13 + $0x188] ss:$44 sps:$4 sm:$0xff]  }
 0x5f2   :  { %14447 = vmatprep.mubr.msk.bf16.mxu0 %vm1771_vm14, %v19646_v22  ;;  %3433 = vmatpush1.bf16.msra.mxu1 %v17206_v14  ;;  %v17271_v14 = vld [vmem:[%s24858_s13 + $0x748] ss:$44 sps:$4 sm:$0xff]  }
 0x5f3   :  { %14651 = vmatprep.mubr.msk.bf16.mxu1 %vm1771_vm14, %v20105_v17  ;;  %2692 = vmatprep.subr.bf16.mxu0 %v17211_v15  ;;  %v17277_v15 = vld [vmem:[%s24858_s13 + $0x7a4] ss:$44 sps:$4 sm:$0xff]  }
 0x5f4   :  { %3434 = vmatprep.subr.bf16.mxu1 %v17214_v16  ;;  %v17278_v16 = vld [vmem:[%s24858_s13 + $0x1e0] ss:$44 sps:$4 sm:$0xff]  }
 0x5f5   :  { %2693 = vmatpush1.bf16.msra.mxu0 %v17209_v18  ;;  %v17275_v18 = vld [vmem:[%s24858_s13 + $0x7a0] ss:$44 sps:$4 sm:$0xff]  }
 0x5f6   :  { %3435 = vmatpush1.bf16.msra.mxu1 %v17212_v19  ;;  %2694 = vmatprep.subr.bf16.mxu0 %v17217_v20  ;;  %v17281_v19 = vld [vmem:[%s24858_s13 + $0x7fc] ss:$44 sps:$4 sm:$0xff]  }
 0x5f7   :  { %3436 = vmatprep.subr.bf16.mxu1 %v17220_v24  ;;  %v14548_v20 = vld [vmem:[%s24858_s13 + $0x8a8] sm:$0x11]  ;;  %v17282_v24 = vld [vmem:[%s24858_s13 + $0x238] ss:$44 sps:$4 sm:$0xff]  }
 0x5f9   :  { %2695 = vmatpush1.bf16.msra.mxu0 %v17215_v25  ;;  %v17279_v25 = vld [vmem:[%s24858_s13 + $0x7f8] ss:$44 sps:$4 sm:$0xff]  }
 0x5fa   :  { %3437 = vmatpush1.bf16.msra.mxu1 %v17218_v27  ;;  %2696 = vmatprep.subr.bf16.mxu0 %v17223_v28  ;;  %v17285_v27 = vld [vmem:[%s24858_s13 + $0x854] ss:$44 sps:$4 sm:$0xff]   ;;  %v14645_v28 = vcombine.high %v14548_v20, %v14548_v20 }
 0x5fb   :  { %3438 = vmatprep.subr.bf16.mxu1 %v17226_v29  ;;  %v17286_v29 = vld [vmem:[%s24858_s13 + $0x290] ss:$44 sps:$4 sm:$0xff]  }
 0x5fd   :  { %2697 = vmatpush1.bf16.msra.mxu0 %v17221_v30  ;;  %v17289_v30 = vld [vmem:[%s24858_s13 + $0x2e8] ss:$0 sps:$4 sm:$0x11]  }
 0x5fe   :  { %3439 = vmatpush1.bf16.msra.mxu1 %v17224_v31  ;;  %2698 = vmatprep.subr.bf16.mxu0 %v17229_v32  ;;  %v17283_v31 = vld [vmem:[%s24858_s13 + $0x850] ss:$44 sps:$4 sm:$0xff]   ;;  %v14644_v32 = vcombine.low %v14548_v20, %v14548_v20 }
 0x5ff   :  { %3440 = vmatprep.subr.bf16.mxu1 %v17232_v33  ;;  %v3415_v33 = vand.u32 %v14645_v28, %v19619_v61 }
 0x601   :  { %2699 = vmatpush1.bf16.msra.mxu0 %v17227_v35  ;;  %v2565_v35 = vand.u32 %v17289_v30, %v19619_v61 }
 0x602   :  { %3441 = vmatpush1.bf16.msra.mxu1 %v17230_v34  ;;  %2700 = vmatprep.subr.bf16.mxu0 %v17235_v36  ;;  %v3412_v34 = vand.u32 %v14644_v32, %v19619_v61  ;;  %v17292_v36 = vld [vmem:[%s24858_s13 + $0x5e4] ss:$44 sps:$4 sm:$0xff]  }
 0x603   :  { %3442 = vmatprep.subr.bf16.mxu1 %v17238_v37 }
 0x605   :  { %2701 = vmatpush1.bf16.msra.mxu0 %v17233_v38 }
 0x606   :  { %3443 = vmatpush1.bf16.msra.mxu1 %v17236_v39  ;;  %2702 = vmatprep.subr.bf16.mxu0 %v17241_v40  ;;  %v17295_v39 = vld [vmem:[%s24858_s13 + $0x5fc] ss:$44 sps:$4 sm:$0xff]  }
 0x607   :  { %3444 = vmatprep.subr.bf16.mxu1 %v17244_v41 }
 0x609   :  { %2703 = vmatpush1.bf16.msra.mxu0 %v17239_v44  ;;  %v17290_v44 = vld [vmem:[%s24858_s13 + $0x5e0] ss:$44 sps:$4 sm:$0xff]  }
 0x60a   :  { %3445 = vmatpush1.bf16.msra.mxu1 %v17242_v45  ;;  %2704 = vmatprep.subr.bf16.mxu0 %v17247_v46 }
 0x60b   :  { %3446 = vmatprep.subr.bf16.mxu1 %v17250_v48  ;;  %v17298_v48 = vld [vmem:[%s24858_s13 + $0x63c] ss:$44 sps:$4 sm:$0xff]  }
 0x60d   :  { %2705 = vmatpush1.bf16.msra.mxu0 %v17245_v50  ;;  %v17296_v50 = vld [vmem:[%s24858_s13 + $0x638] ss:$44 sps:$4 sm:$0xff]  }
 0x60e   :  { %3447 = vmatpush1.bf16.msra.mxu1 %v17248_v52  ;;  %2706 = vmatprep.subr.bf16.mxu0 %v2556_v53  ;;  %v17304_v52 = vld [vmem:[%s24858_s13 + $0x694] ss:$44 sps:$4 sm:$0xff]   ;;  %v17307_v53 = vld [vmem:[%s24858_s13 + $0x6ac] ss:$44 sps:$4 sm:$0xff]  }
 0x60f   :  { %3448 = vmatprep.subr.bf16.mxu1 %v3403_v55  ;;  %v17305_v55 = vld [vmem:[%s24858_s13 + $0x6a8] ss:$44 sps:$4 sm:$0xff]  }
 0x611   :  { %2707 = vmatpush1.bf16.msra.mxu0 %v2553_v56  ;;  %v17310_v56 = vld [vmem:[%s24858_s13 + $0x6ec] ss:$44 sps:$4 sm:$0xff]  }
 0x612   :  { %3449 = vmatpush1.bf16.msra.mxu1 %v3400_v57  ;;  %2772 = vmatprep.subr.bf16.mxu0 %v19144_v60  ;;  %v17313_v57 = vld [vmem:[%s24858_s13 + $0x704] ss:$44 sps:$4 sm:$0xff]  }
 0x613   :  { %3514 = vmatprep.subr.bf16.mxu1 %v17257_v58  ;;  %v17308_v58 = vld [vmem:[%s24858_s13 + $0x6e8] ss:$44 sps:$4 sm:$0xff]  }
 0x614   :  { %2723 = vmatmul.mubr.bf16.vlgmr.msra.gmra.mrb[52].mxu0 %v19644_v21 }
 0x615   :  { %3465 = vmatmul.mubr.bf16.vlgmr.msra.gmra.mrb[40].mxu1 %v20210_v63  ;;  %2773 = vmatpush1.bf16.msra.mxu0 %v17258_v59  ;;  %v17311_v59 = vld [vmem:[%s24858_s13 + $0x700] ss:$44 sps:$4 sm:$0xff]  }
 0x616   :  { %14449 = vmatprep.mubr.msk.bf16.mxu0 %vm1771_vm14, %v19646_v22  ;;  %3515 = vmatpush1.bf16.msra.mxu1 %v17255_v62  ;;  %v17316_v62 = vld [vmem:[%s24858_s13 + $0x744] ss:$44 sps:$4 sm:$0xff]  }
 0x617   :  { %14653 = vmatprep.mubr.msk.bf16.mxu1 %vm1771_vm14, %v20105_v17  ;;  %2774 = vmatprep.subr.bf16.mxu0 %v19144_v60 }
 0x618   :  { %3516 = vmatprep.subr.bf16.mxu1 %v17261_v0  ;;  %v17319_v0 = vld [vmem:[%s24858_s13 + $0x75c] ss:$44 sps:$4 sm:$0xff]  }
 0x619   :  { %2775 = vmatpush1.bf16.msra.mxu0 %v17262_v1  ;;  %v17314_v1 = vld [vmem:[%s24858_s13 + $0x740] ss:$44 sps:$4 sm:$0xff]  }
 0x61a   :  { %3517 = vmatpush1.bf16.msra.mxu1 %v17259_v2  ;;  %2776 = vmatprep.subr.bf16.mxu0 %v19144_v60  ;;  %v17317_v2 = vld [vmem:[%s24858_s13 + $0x758] ss:$44 sps:$4 sm:$0xff]  }
 0x61b   :  { %3518 = vmatprep.subr.bf16.mxu1 %v17265_v3  ;;  %v17322_v3 = vld [vmem:[%s24858_s13 + $0x79c] ss:$44 sps:$4 sm:$0xff]  }
 0x61d   :  { %2777 = vmatpush1.bf16.msra.mxu0 %v17266_v4  ;;  %v17325_v4 = vld [vmem:[%s24858_s13 + $0x7b4] ss:$44 sps:$4 sm:$0xff]  }
 0x61e   :  { %3519 = vmatpush1.bf16.msra.mxu1 %v17263_v5  ;;  %2778 = vmatprep.subr.bf16.mxu0 %v19144_v60  ;;  %v17320_v5 = vld [vmem:[%s24858_s13 + $0x798] ss:$44 sps:$4 sm:$0xff]  }
 0x61f   :  { %3520 = vmatprep.subr.bf16.mxu1 %v17269_v6  ;;  %v17323_v6 = vld [vmem:[%s24858_s13 + $0x7b0] ss:$44 sps:$4 sm:$0xff]  }
 0x621   :  { %2779 = vmatpush1.bf16.msra.mxu0 %v17270_v9  ;;  %v17328_v9 = vld [vmem:[%s24858_s13 + $0x7f4] ss:$44 sps:$4 sm:$0xff]  }
 0x622   :  { %3521 = vmatpush1.bf16.msra.mxu1 %v17267_v11  ;;  %2780 = vmatprep.subr.bf16.mxu0 %v19144_v60  ;;  %v17331_v11 = vld [vmem:[%s24858_s13 + $0x80c] ss:$44 sps:$4 sm:$0xff]  }
 0x623   :  { %3522 = vmatprep.subr.bf16.mxu1 %v17273_v12  ;;  %v14547_v12 = vld [vmem:[%s24858_s13 + $0x8a0] sm:$0x11] }
 0x625   :  { %2781 = vmatpush1.bf16.msra.mxu0 %v17274_v13  ;;  %v14550_v13 = vld [vmem:[%s24858_s13 + $0x8b8] sm:$0x11] }
 0x626   :  { %3523 = vmatpush1.bf16.msra.mxu1 %v17271_v14  ;;  %2782 = vmatprep.subr.bf16.mxu0 %v19144_v60  ;;  %v17326_v14 = vld [vmem:[%s24858_s13 + $0x7f0] ss:$44 sps:$4 sm:$0xff]   ;;  %v14649_v20 = vcombine.high %v14550_v13, %v14550_v13 }
 0x627   :  { %3524 = vmatprep.subr.bf16.mxu1 %v17277_v15  ;;  %v17329_v15 = vld [vmem:[%s24858_s13 + $0x808] ss:$44 sps:$4 sm:$0xff]  }
 0x628   :  { %v3427_v30 = vand.u32 %v14649_v20, %v19619_v61 }
 0x629   :  { %2783 = vmatpush1.bf16.msra.mxu0 %v17278_v16  ;;  %v17334_v16 = vld [vmem:[%s24858_s13 + $0x84c] ss:$44 sps:$4 sm:$0xff]  }
 0x62a   :  { %3525 = vmatpush1.bf16.msra.mxu1 %v17275_v18  ;;  %2784 = vmatprep.subr.bf16.mxu0 %v19144_v60  ;;  %v14643_v18 = vcombine.high %v14547_v12, %v14547_v12 }
 0x62b   :  { %3526 = vmatprep.subr.bf16.mxu1 %v17281_v19  ;;  %v17337_v19 = vld [vmem:[%s24858_s13 + $0x864] ss:$44 sps:$4 sm:$0xff]  }
 0x62c   :  { %v3409_v28 = vand.u32 %v14643_v18, %v19619_v61  ;;  %v17381_v18 = vld [vmem:[%s24858_s13 + $0xad4] ss:$44 sps:$4 sm:$0xff]  }
 0x62d   :  { %2785 = vmatpush1.bf16.msra.mxu0 %v17282_v24  ;;  %v17332_v24 = vld [vmem:[%s24858_s13 + $0x848] ss:$44 sps:$4 sm:$0xff]  }
 0x62e   :  { %3527 = vmatpush1.bf16.msra.mxu1 %v17279_v25  ;;  %2786 = vmatprep.subr.bf16.mxu0 %v19144_v60  ;;  %v14642_v25 = vcombine.low %v14547_v12, %v14547_v12  ;;  %v17380_v12 = vld [vmem:[%s24858_s13 + $0x804] ss:$44 sps:$4 sm:$0xff]  }
 0x62f   :  { %3528 = vmatprep.subr.bf16.mxu1 %v17285_v27  ;;  %v17335_v27 = vld [vmem:[%s24858_s13 + $0x860] ss:$44 sps:$4 sm:$0xff]  }
 0x631   :  { %2787 = vmatpush1.bf16.msra.mxu0 %v17286_v29  ;;  %v14648_v29 = vcombine.low %v14550_v13, %v14550_v13  ;;  %v17383_v13 = vld [vmem:[%s24858_s13 + $0xad8] ss:$44 sps:$4 sm:$0xff]  }
 0x632   :  { %3529 = vmatpush1.bf16.msra.mxu1 %v17283_v31  ;;  %2788 = vmatprep.subr.bf16.mxu0 %v19144_v60  ;;  %v3406_v31 = vand.u32 %v14642_v25, %v19619_v61 }
 0x633   :  { %v20301_v37 = vpop.f32.mrb[32].mxu0  ;;  %v20303_v38 = vpop.f32.mrb[20].mxu1  ;;  %3530 = vmatprep.subr.bf16.mxu1 %v3415_v33  ;;  %v3424_v32 = vand.u32 %v14648_v29, %v19619_v61  ;;  %v17344_v33 = vld [vmem:[%s24858_s13 + $0x5f4] ss:$44 sps:$4 sm:$0xff]   ;;  %v17387_v29 = vld [vmem:[%s24858_s13 + $0xb2c] ss:$44 sps:$4 sm:$0xff]  }
 0x634   :  { %v20308_v40 = vpop.f32.mrb[33].mxu0  ;;  %v20310_v41 = vpop.f32.mrb[21].mxu1 }
 0x635   :  { %2789 = vmatpush1.bf16.msra.mxu0 %v2565_v35  ;;  %v1849_v42 = vpop.f32.mrb[34].mxu0  ;;  %v1931_v43 = vpop.f32.mrb[22].mxu1 }
 0x636   :  { %3531 = vmatpush1.bf16.msra.mxu1 %v3412_v34  ;;  %v1850_v45 = vpop.f32.mrb[35].mxu0  ;;  %v1932_v46 = vpop.f32.mrb[23].mxu1  ;;  %3473 = vmatprep.subr.bf16.mxu0 %v17292_v36  ;;  %v17347_v36 = vld [vmem:[%s24858_s13 + $0x8c8] ss:$44 sps:$4 sm:$0xff]  }
 0x637   :  { %3596 = vmatprep.subr.bf16.mxu1 %v17295_v39  ;;  %v17342_v45 = vld [vmem:[%s24858_s13 + $0x5f0] ss:$44 sps:$4 sm:$0xff]  }
 0x638   :  { %2805 = vmatmul.mubr.bf16.vlgmr.msra.gmra.mrb[56].mxu0 %v19644_v21 }
 0x639   :  { %3547 = vmatmul.mubr.bf16.vlgmr.msra.gmra.mrb[44].mxu1 %v20210_v63  ;;  %3474 = vmatpush1.bf16.msra.mxu0 %v17290_v44 }
 0x63a   :  { %14652 = vmatprep.mubr.msk.bf16.mxu0 %vm1771_vm14, %v20105_v17  ;;  %3597 = vmatpush1.bf16.msra.mxu1 %v17293_v47 }
 0x63b   :  { %14655 = vmatprep.mubr.msk.bf16.mxu1 %vm1771_vm14, %v20105_v17  ;;  %3475 = vmatprep.subr.bf16.mxu0 %v17298_v48  ;;  %v17345_v48 = vld [vmem:[%s24858_s13 + $0x8c4] ss:$44 sps:$4 sm:$0xff]  }
 0x63c   :  { %3598 = vmatprep.subr.bf16.mxu1 %v17301_v49  ;;  %v17350_v49 = vld [vmem:[%s24858_s13 + $0x64c] ss:$44 sps:$4 sm:$0xff]  }
 0x63d   :  { %3476 = vmatpush1.bf16.msra.mxu0 %v17296_v50  ;;  %v17353_v50 = vld [vmem:[%s24858_s13 + $0x920] ss:$44 sps:$4 sm:$0xff]  }
 0x63e   :  { %3599 = vmatpush1.bf16.msra.mxu1 %v17299_v51  ;;  %3477 = vmatprep.subr.bf16.mxu0 %v17304_v52  ;;  %v20447_v51 = vrot.slane %v19649_v23, 1  ;;  %v17348_v52 = vld [vmem:[%s24858_s13 + $0x648] ss:$44 sps:$4 sm:$0xff]  }
 0x63f   :  { %3600 = vmatprep.subr.bf16.mxu1 %v17307_v53  ;;  %v17351_v53 = vld [vmem:[%s24858_s13 + $0x91c] ss:$44 sps:$4 sm:$0xff]  }
 0x641   :  { %3478 = vmatpush1.bf16.msra.mxu0 %v17302_v54  ;;  %v17356_v54 = vld [vmem:[%s24858_s13 + $0x6a4] ss:$44 sps:$4 sm:$0xff]  }
 0x642   :  { %3601 = vmatpush1.bf16.msra.mxu1 %v17305_v55  ;;  %3479 = vmatprep.subr.bf16.mxu0 %v17310_v56  ;;  %v17359_v55 = vld [vmem:[%s24858_s13 + $0x978] ss:$44 sps:$4 sm:$0xff]   ;;  %v17354_v56 = vld [vmem:[%s24858_s13 + $0x6a0] ss:$44 sps:$4 sm:$0xff]  }
 0x643   :  { %3602 = vmatprep.subr.bf16.mxu1 %v17313_v57  ;;  %v17357_v57 = vld [vmem:[%s24858_s13 + $0x974] ss:$44 sps:$4 sm:$0xff]  }
 0x645   :  { %3480 = vmatpush1.bf16.msra.mxu0 %v17308_v58  ;;  %v17362_v58 = vld [vmem:[%s24858_s13 + $0x6fc] ss:$44 sps:$4 sm:$0xff]  }
 0x646   :  { %3603 = vmatpush1.bf16.msra.mxu1 %v17311_v59  ;;  %3481 = vmatprep.subr.bf16.mxu0 %v17316_v62  ;;  %v17365_v59 = vld [vmem:[%s24858_s13 + $0x9d0] ss:$44 sps:$4 sm:$0xff]   ;;  %v17360_v62 = vld [vmem:[%s24858_s13 + $0x6f8] ss:$44 sps:$4 sm:$0xff]  }
 0x647   :  { %3604 = vmatprep.subr.bf16.mxu1 %v17319_v0  ;;  %v17363_v0 = vld [vmem:[%s24858_s13 + $0x9cc] ss:$44 sps:$4 sm:$0xff]  }
 0x649   :  { %3482 = vmatpush1.bf16.msra.mxu0 %v17314_v1  ;;  %v17368_v1 = vld [vmem:[%s24858_s13 + $0x754] ss:$44 sps:$4 sm:$0xff]  }
 0x64a   :  { %3605 = vmatpush1.bf16.msra.mxu1 %v17317_v2  ;;  %3483 = vmatprep.subr.bf16.mxu0 %v17322_v3  ;;  %v17371_v2 = vld [vmem:[%s24858_s13 + $0xa28] ss:$44 sps:$4 sm:$0xff]   ;;  %v17366_v3 = vld [vmem:[%s24858_s13 + $0x750] ss:$44 sps:$4 sm:$0xff]  }
 0x64b   :  { %3606 = vmatprep.subr.bf16.mxu1 %v17325_v4  ;;  %v17369_v4 = vld [vmem:[%s24858_s13 + $0xa24] ss:$44 sps:$4 sm:$0xff]  }
 0x64d   :  { %3484 = vmatpush1.bf16.msra.mxu0 %v17320_v5  ;;  %v17374_v5 = vld [vmem:[%s24858_s13 + $0x7ac] ss:$44 sps:$4 sm:$0xff]  }
 0x64e   :  { %3607 = vmatpush1.bf16.msra.mxu1 %v17323_v6  ;;  %3485 = vmatprep.subr.bf16.mxu0 %v17328_v9  ;;  %v17377_v6 = vld [vmem:[%s24858_s13 + $0xa80] ss:$44 sps:$4 sm:$0xff]   ;;  %v17372_v9 = vld [vmem:[%s24858_s13 + $0x7a8] ss:$44 sps:$4 sm:$0xff]  }
 0x64f   :  { %3608 = vmatprep.subr.bf16.mxu1 %v17331_v11  ;;  %v17375_v11 = vld [vmem:[%s24858_s13 + $0xa7c] ss:$44 sps:$4 sm:$0xff]  }
 0x651   :  { %3486 = vmatpush1.bf16.msra.mxu0 %v17326_v14  ;;  %v14549_v14 = vld [vmem:[%s24858_s13 + $0x8b0] sm:$0x11] }
 0x652   :  { %3609 = vmatpush1.bf16.msra.mxu1 %v17329_v15  ;;  %3487 = vmatprep.subr.bf16.mxu0 %v17334_v16  ;;  %v14753_v15 = vld [vmem:[%s24858_s13 + $0xb84] sm:$0x11]  ;;  %v17378_v16 = vld [vmem:[%s24858_s13 + $0x800] ss:$44 sps:$4 sm:$0xff]   ;;  %v14647_v20 = vcombine.high %v14549_v14, %v14549_v14 }
 0x653   :  { %3610 = vmatprep.subr.bf16.mxu1 %v17337_v19  ;;  %v17386_v19 = vld [vmem:[%s24858_s13 + $0x85c] ss:$44 sps:$4 sm:$0xff]   ;;  %v14848_v25 = vcombine.high %v14753_v15, %v14753_v15 }
 0x655   :  { %3488 = vmatpush1.bf16.msra.mxu0 %v17332_v24  ;;  %v17389_v24 = vld [vmem:[%s24858_s13 + $0xb30] ss:$44 sps:$4 sm:$0xff]  }
 0x656   :  { %3611 = vmatpush1.bf16.msra.mxu1 %v17335_v27  ;;  %3489 = vmatprep.subr.bf16.mxu0 %v3409_v28  ;;  %v17384_v27 = vld [vmem:[%s24858_s13 + $0x858] ss:$44 sps:$4 sm:$0xff]   ;;  %v14646_v28 = vcombine.low %v14549_v14, %v14549_v14  ;;  %v17421_v14 = vld [vmem:[%s24858_s13 + $0x810] ss:$44 sps:$4 sm:$0xff]  }
 0x657   :  { %v20421_v35 = vpop.f32.mrb[36].mxu0  ;;  %v20423_v34 = vpop.f32.mrb[24].mxu1  ;;  %3612 = vmatprep.subr.bf16.mxu1 %v3427_v30  ;;  %v3421_v30 = vand.u32 %v14647_v20, %v19619_v61  ;;  %v17428_v20 = vld [vmem:[%s24858_s13 + $0x8c0] ss:$0 sps:$4 sm:$0x11]  }
 0x658   :  { %v20428_v39 = vpop.f32.mrb[37].mxu0  ;;  %v20430_v42 = vpop.f32.mrb[25].mxu1 }
 0x659   :  { %v1890_v43 = vpop.f32.mrb[38].mxu0  ;;  %v2013_v44 = vpop.f32.mrb[26].mxu1  ;;  %3490 = vmatpush1.bf16.msra.mxu0 %v3406_v31  ;;  %v14847_v31 = vcombine.low %v14753_v15, %v14753_v15  ;;  %v17418_v15 = vld [vmem:[%s24858_s13 + $0xae4] ss:$44 sps:$4 sm:$0xff]  }
 0x65a   :  { %3613 = vmatpush1.bf16.msra.mxu1 %v3424_v32  ;;  %v1891_v46 = vpop.f32.mrb[39].mxu0  ;;  %v2014_v47 = vpop.f32.mrb[27].mxu1  ;;  %3555 = vmatprep.subr.bf16.mxu0 %v17344_v33  ;;  %v4277_v32 = vand.u32 %v14848_v25, %v19619_v61  ;;  %v3418_v33 = vand.u32 %v14646_v28, %v19619_v61  ;;  %v17396_v44 = vld [vmem:[%s24858_s13 + $0x8d8] ss:$44 sps:$4 sm:$0xff]   ;;  %v3430_v28 = vand.u32 %v17428_v20, %v19619_v61  ;;  %v17468_v20 = vld [vmem:[%s24858_s13 + $0xaf4] ss:$44 sps:$4 sm:$0xff]  }
 0x65b   :  { %4306 = vmatprep.subr.bf16.mxu1 %v17347_v36  ;;  %v4274_v36 = vand.u32 %v14847_v31, %v19619_v61 }
 0x65c   :  { %3506 = vmatmul.mubr.bf16.vlgmr.msra.gmra.mrb[60].mxu0 %v20210_v63 }
 0x65d   :  { %3629 = vmatmul.mubr.bf16.vlgmr.msra.gmra.mrb[48].mxu1 %v20210_v63  ;;  %3556 = vmatpush1.bf16.msra.mxu0 %v17342_v45 }
 0x65e   :  { %14654 = vmatprep.mubr.msk.bf16.mxu0 %vm1771_vm14, %v20105_v17  ;;  %4307 = vmatpush1.bf16.msra.mxu1 %v17345_v48 }
 0x65f   :  { %14858 = vmatprep.mubr.msk.bf16.mxu1 %vm1771_vm14, %v20447_v51  ;;  %3557 = vmatprep.subr.bf16.mxu0 %v17350_v49 }
 0x660   :  { %4308 = vmatprep.subr.bf16.mxu1 %v17353_v50  ;;  %v17397_v50 = vld [vmem:[%s24858_s13 + $0x600] ss:$44 sps:$4 sm:$0xff]  }
 0x661   :  { %3558 = vmatpush1.bf16.msra.mxu0 %v17348_v52 }
 0x662   :  { %4309 = vmatpush1.bf16.msra.mxu1 %v17351_v53  ;;  %3559 = vmatprep.subr.bf16.mxu0 %v17356_v54 }
 0x663   :  { %4310 = vmatprep.subr.bf16.mxu1 %v17359_v55 }
 0x665   :  { %3560 = vmatpush1.bf16.msra.mxu0 %v17354_v56  ;;  %v20562_v56 = vrot.slane %v19658_v26, 1 }
 0x666   :  { %4311 = vmatpush1.bf16.msra.mxu1 %v17357_v57  ;;  %3561 = vmatprep.subr.bf16.mxu0 %v17362_v58  ;;  %v17401_v57 = vld [vmem:[%s24858_s13 + $0x658] ss:$44 sps:$4 sm:$0xff]  }
 0x667   :  { %4312 = vmatprep.subr.bf16.mxu1 %v17365_v59  ;;  %v17398_v58 = vld [vmem:[%s24858_s13 + $0x92c] ss:$44 sps:$4 sm:$0xff]   ;;  %v17404_v59 = vld [vmem:[%s24858_s13 + $0x988] ss:$44 sps:$4 sm:$0xff]  }
 0x669   :  { %3562 = vmatpush1.bf16.msra.mxu0 %v17360_v62  ;;  %v17402_v62 = vld [vmem:[%s24858_s13 + $0x984] ss:$44 sps:$4 sm:$0xff]  }
 0x66a   :  { %4313 = vmatpush1.bf16.msra.mxu1 %v17363_v0  ;;  %3563 = vmatprep.subr.bf16.mxu0 %v17368_v1  ;;  %v17408_v0 = vld [vmem:[%s24858_s13 + $0x9e0] ss:$44 sps:$4 sm:$0xff]   ;;  %v17409_v1 = vld [vmem:[%s24858_s13 + $0x708] ss:$44 sps:$4 sm:$0xff]  }
 0x66b   :  { %4314 = vmatprep.subr.bf16.mxu1 %v17371_v2  ;;  %v17406_v2 = vld [vmem:[%s24858_s13 + $0x9dc] ss:$44 sps:$4 sm:$0xff]  }
 0x66d   :  { %3564 = vmatpush1.bf16.msra.mxu0 %v17366_v3  ;;  %v17412_v3 = vld [vmem:[%s24858_s13 + $0xa38] ss:$44 sps:$4 sm:$0xff]  }
 0x66e   :  { %4315 = vmatpush1.bf16.msra.mxu1 %v17369_v4  ;;  %3565 = vmatprep.subr.bf16.mxu0 %v17374_v5  ;;  %v17413_v4 = vld [vmem:[%s24858_s13 + $0x760] ss:$44 sps:$4 sm:$0xff]  }
 0x66f   :  { %4316 = vmatprep.subr.bf16.mxu1 %v17377_v6  ;;  %v17410_v5 = vld [vmem:[%s24858_s13 + $0xa34] ss:$44 sps:$4 sm:$0xff]   ;;  %v17416_v6 = vld [vmem:[%s24858_s13 + $0xa90] ss:$44 sps:$4 sm:$0xff]  }
 0x671   :  { %3566 = vmatpush1.bf16.msra.mxu0 %v17372_v9  ;;  %v17417_v9 = vld [vmem:[%s24858_s13 + $0x7b8] ss:$44 sps:$4 sm:$0xff]  }
 0x672   :  { %4317 = vmatpush1.bf16.msra.mxu1 %v17375_v11  ;;  %3567 = vmatprep.subr.bf16.mxu0 %v17380_v12  ;;  %v17414_v11 = vld [vmem:[%s24858_s13 + $0xa8c] ss:$44 sps:$4 sm:$0xff]   ;;  %v17420_v12 = vld [vmem:[%s24858_s13 + $0xae8] ss:$44 sps:$4 sm:$0xff]  }
 0x673   :  { %4318 = vmatprep.subr.bf16.mxu1 %v17383_v13  ;;  %v14755_v13 = vld [vmem:[%s24858_s13 + $0xb94] sm:$0x11] }
 0x674   :  { %v14851_v25 = vcombine.low %v14755_v13, %v14755_v13 }
 0x675   :  { %3568 = vmatpush1.bf16.msra.mxu0 %v17378_v16  ;;  %v17424_v16 = vld [vmem:[%s24858_s13 + $0xb40] ss:$44 sps:$4 sm:$0xff]  }
 0x676   :  { %4319 = vmatpush1.bf16.msra.mxu1 %v17381_v18  ;;  %3569 = vmatprep.subr.bf16.mxu0 %v17386_v19  ;;  %v14852_v18 = vcombine.high %v14755_v13, %v14755_v13  ;;  %v17425_v19 = vld [vmem:[%s24858_s13 + $0x868] ss:$44 sps:$4 sm:$0xff]  }
 0x677   :  { %4320 = vmatprep.subr.bf16.mxu1 %v17389_v24  ;;  %v17422_v24 = vld [vmem:[%s24858_s13 + $0xb3c] ss:$44 sps:$4 sm:$0xff]  }
 0x678   :  { %v17462_v13 = vld [vmem:[%s24858_s13 + $0xa9c] ss:$44 sps:$4 sm:$0xff]  }
 0x679   :  { %3570 = vmatpush1.bf16.msra.mxu0 %v17384_v27  ;;  %v4289_v27 = vand.u32 %v14852_v18, %v19619_v61  ;;  %v14757_v18 = vld [vmem:[%s24858_s13 + $0xba4] sm:$0x11] }
 0x67a   :  { %4321 = vmatpush1.bf16.msra.mxu1 %v17387_v29  ;;  %3571 = vmatprep.subr.bf16.mxu0 %v3421_v30  ;;  %v4286_v29 = vand.u32 %v14851_v25, %v19619_v61  ;;  %v17431_v30 = vld [vmem:[%s24858_s13 + $0x8d0] ss:$44 sps:$4 sm:$0xff]  }
 0x67b   :  { %v20541_v43 = vpop.f32.mrb[40].mxu0  ;;  %4322 = vmatprep.subr.bf16.mxu1 %v4277_v32  ;;  %v17434_v32 = vld [vmem:[%s24858_s13 + $0x8e8] ss:$44 sps:$4 sm:$0xff]  }
 0x67c   :  { %v2601_v45 = vpop.f32.mrb[28].mxu1  ;;  %v20546_v46 = vpop.f32.mrb[41].mxu0 }
 0x67d   :  { %v20549_v47 = vadd.f32 %v2601_v45, %v20301_v37  ;;  %v2603_v48 = vpop.f32.mrb[29].mxu1  ;;  %v1972_v49 = vpop.f32.mrb[42].mxu0  ;;  %3572 = vmatpush1.bf16.msra.mxu0 %v3418_v33  ;;  %v17394_v37 = vld [vmem:[%s24858_s13 + $0x8d4] ss:$44 sps:$4 sm:$0xff]  }
 0x67e   :  { %v20555_v52 = vadd.f32 %v2603_v48, %v20308_v40  ;;  %v2605_v53 = vpop.f32.mrb[30].mxu1  ;;  %4323 = vmatpush1.bf16.msra.mxu1 %v4274_v36  ;;  %v1973_v54 = vpop.f32.mrb[43].mxu0  ;;  %3637 = vmatprep.subr.bf16.mxu0 %v19144_v60  ;;  %v17400_v40 = vld [vmem:[%s24858_s13 + $0x930] ss:$44 sps:$4 sm:$0xff]   ;;  %v17429_v49 = vld [vmem:[%s24858_s13 + $0x8cc] ss:$44 sps:$4 sm:$0xff]  }
 0x67f   :  { %v2606_v55 = vpop.f32.mrb[31].mxu1  ;;  %4388 = vmatprep.subr.bf16.mxu1 %v17396_v44 }
 0x680   :  { %3588 = vmatmul.mubr.bf16.vlgmr.msra.gmra.mrb[64].mxu0 %v20210_v63  ;;  %v17437_v55 = vld [vmem:[%s24858_s13 + $0x928] ss:$44 sps:$4 sm:$0xff]  }
 0x681   :  { %4339 = vmatmul.mubr.bf16.vlgmr.msra.gmra.mrb[52].mxu1 %v20562_v56  ;;  %3638 = vmatpush1.bf16.msra.mxu0 %v17397_v50 }
 0x682   :  { %14656 = vmatprep.mubr.msk.bf16.mxu0 %vm1771_vm14, %v20105_v17  ;;  %4389 = vmatpush1.bf16.msra.mxu1 %v17394_v37  ;;  %v17405_v17 = vld [vmem:[%s24858_s13 + $0x6b0] ss:$44 sps:$4 sm:$0xff]  }
 0x683   :  { %14860 = vmatprep.mubr.msk.bf16.mxu1 %vm1771_vm14, %v20447_v51  ;;  %3639 = vmatprep.subr.bf16.mxu0 %v19144_v60  ;;  %v17432_v37 = vld [vmem:[%s24858_s13 + $0x8e4] ss:$44 sps:$4 sm:$0xff]  }
 0x684   :  { %4390 = vmatprep.subr.bf16.mxu1 %v17400_v40  ;;  %v17435_v40 = vld [vmem:[%s24858_s13 + $0x924] ss:$44 sps:$4 sm:$0xff]  }
 0x685   :  { %3640 = vmatpush1.bf16.msra.mxu0 %v17401_v57  ;;  %v17438_v57 = vld [vmem:[%s24858_s13 + $0x93c] ss:$44 sps:$4 sm:$0xff]  }
 0x686   :  { %4391 = vmatpush1.bf16.msra.mxu1 %v17398_v58  ;;  %3641 = vmatprep.subr.bf16.mxu0 %v19144_v60  ;;  %v17446_v58 = vld [vmem:[%s24858_s13 + $0x998] ss:$44 sps:$4 sm:$0xff]  }
 0x687   :  { %4392 = vmatprep.subr.bf16.mxu1 %v17404_v59  ;;  %v17441_v59 = vld [vmem:[%s24858_s13 + $0x97c] ss:$44 sps:$4 sm:$0xff]  }
 0x689   :  { %3642 = vmatpush1.bf16.msra.mxu0 %v17405_v17  ;;  %v17444_v17 = vld [vmem:[%s24858_s13 + $0x994] ss:$44 sps:$4 sm:$0xff]  }
 0x68a   :  { %4393 = vmatpush1.bf16.msra.mxu1 %v17402_v62  ;;  %3643 = vmatprep.subr.bf16.mxu0 %v19144_v60  ;;  %v17449_v62 = vld [vmem:[%s24858_s13 + $0x9d8] ss:$44 sps:$4 sm:$0xff]  }
 0x68b   :  { %4394 = vmatprep.subr.bf16.mxu1 %v17408_v0  ;;  %v17452_v0 = vld [vmem:[%s24858_s13 + $0x9f0] ss:$44 sps:$4 sm:$0xff]  }
 0x68d   :  { %3644 = vmatpush1.bf16.msra.mxu0 %v17409_v1  ;;  %v17447_v1 = vld [vmem:[%s24858_s13 + $0x9d4] ss:$44 sps:$4 sm:$0xff]  }
 0x68e   :  { %4395 = vmatpush1.bf16.msra.mxu1 %v17406_v2  ;;  %3645 = vmatprep.subr.bf16.mxu0 %v19144_v60  ;;  %v17450_v2 = vld [vmem:[%s24858_s13 + $0x9ec] ss:$44 sps:$4 sm:$0xff]  }
 0x68f   :  { %4396 = vmatprep.subr.bf16.mxu1 %v17412_v3  ;;  %v17455_v3 = vld [vmem:[%s24858_s13 + $0xa30] ss:$44 sps:$4 sm:$0xff]  }
 0x691   :  { %3646 = vmatpush1.bf16.msra.mxu0 %v17413_v4  ;;  %v17458_v4 = vld [vmem:[%s24858_s13 + $0xa48] ss:$44 sps:$4 sm:$0xff]  }
 0x692   :  { %4397 = vmatpush1.bf16.msra.mxu1 %v17410_v5  ;;  %3647 = vmatprep.subr.bf16.mxu0 %v19144_v60  ;;  %v17453_v5 = vld [vmem:[%s24858_s13 + $0xa2c] ss:$44 sps:$4 sm:$0xff]  }
 0x693   :  { %4398 = vmatprep.subr.bf16.mxu1 %v17416_v6  ;;  %v17456_v6 = vld [vmem:[%s24858_s13 + $0xa44] ss:$44 sps:$4 sm:$0xff]  }
 0x695   :  { %3648 = vmatpush1.bf16.msra.mxu0 %v17417_v9  ;;  %v17461_v9 = vld [vmem:[%s24858_s13 + $0xa88] ss:$44 sps:$4 sm:$0xff]  }
 0x696   :  { %4399 = vmatpush1.bf16.msra.mxu1 %v17414_v11  ;;  %3649 = vmatprep.subr.bf16.mxu0 %v19144_v60  ;;  %v17464_v11 = vld [vmem:[%s24858_s13 + $0xaa0] ss:$44 sps:$4 sm:$0xff]  }
 0x697   :  { %4400 = vmatprep.subr.bf16.mxu1 %v17420_v12  ;;  %v17459_v12 = vld [vmem:[%s24858_s13 + $0xa84] ss:$44 sps:$4 sm:$0xff]  }
 0x699   :  { %3650 = vmatpush1.bf16.msra.mxu0 %v17421_v14  ;;  %v17467_v14 = vld [vmem:[%s24858_s13 + $0xae0] ss:$44 sps:$4 sm:$0xff]  }
 0x69a   :  { %4401 = vmatpush1.bf16.msra.mxu1 %v17418_v15  ;;  %3651 = vmatprep.subr.bf16.mxu0 %v19144_v60  ;;  %v17470_v15 = vld [vmem:[%s24858_s13 + $0xaf8] ss:$44 sps:$4 sm:$0xff]  }
 0x69b   :  { %4402 = vmatprep.subr.bf16.mxu1 %v17424_v16  ;;  %v14754_v16 = vld [vmem:[%s24858_s13 + $0xb8c] sm:$0x11] }
 0x69c   :  { %v14850_v25 = vcombine.high %v14754_v16, %v14754_v16 }
 0x69d   :  { %3652 = vmatpush1.bf16.msra.mxu0 %v17425_v19  ;;  %v17465_v19 = vld [vmem:[%s24858_s13 + $0xadc] ss:$44 sps:$4 sm:$0xff]  }
 0x69e   :  { %4403 = vmatpush1.bf16.msra.mxu1 %v17422_v24  ;;  %3653 = vmatprep.subr.bf16.mxu0 %v19144_v60  ;;  %v17473_v24 = vld [vmem:[%s24858_s13 + $0xb38] ss:$44 sps:$4 sm:$0xff]  }
 0x69f   :  { %v20653_v31 = vpop.f32.mrb[44].mxu0  ;;  %4404 = vmatprep.subr.bf16.mxu1 %v4289_v27  ;;  %v17476_v27 = vld [vmem:[%s24858_s13 + $0xb50] ss:$44 sps:$4 sm:$0xff]  }
 0x6a0   :  { %v2683_v33 = vpop.f32.mrb[32].mxu1  ;;  %v2052_v36 = vpop.f32.mrb[45].mxu0 }
 0x6a1   :  { %v20659_v44 = vadd.f32 %v2683_v33, %v20303_v38  ;;  %v2685_v45 = vpop.f32.mrb[33].mxu1  ;;  %v2053_v48 = vpop.f32.mrb[46].mxu0  ;;  %3654 = vmatpush1.bf16.msra.mxu0 %v3430_v28  ;;  %v14856_v28 = vcombine.high %v14757_v18, %v14757_v18  ;;  %v4283_v33 = vand.u32 %v14850_v25, %v19619_v61  ;;  %v14855_v36 = vcombine.low %v14757_v18, %v14757_v18  ;;  %v17505_v18 = vld [vmem:[%s24858_s13 + $0xa3c] ss:$44 sps:$4 sm:$0xff]   ;;  %v17511_v25 = vld [vmem:[%s24858_s13 + $0xa94] ss:$44 sps:$4 sm:$0xff]  }
 0x6a2   :  { %v20665_v50 = vadd.f32 %v2685_v45, %v20310_v41  ;;  %v2687_v53 = vpop.f32.mrb[34].mxu1  ;;  %4405 = vmatpush1.bf16.msra.mxu1 %v4286_v29  ;;  %v2054_v54 = vpop.f32.mrb[47].mxu0  ;;  %4347 = vmatprep.subr.bf16.mxu0 %v17431_v30  ;;  %v17440_v41 = vld [vmem:[%s24858_s13 + $0x940] ss:$44 sps:$4 sm:$0xff]   ;;  %v14849_v30 = vcombine.low %v14754_v16, %v14754_v16 }
 0x6a3   :  { %v2688_v38 = vpop.f32.mrb[35].mxu1  ;;  %4470 = vmatprep.subr.bf16.mxu1 %v17434_v32  ;;  %v17471_v29 = vld [vmem:[%s24858_s13 + $0xb34] ss:$44 sps:$4 sm:$0xff]   ;;  %v17474_v32 = vld [vmem:[%s24858_s13 + $0xb4c] ss:$44 sps:$4 sm:$0xff]   ;;  %v4301_v45 = vand.u32 %v14856_v28, %v19619_v61 }
 0x6a4   :  { %3670 = vmatmul.mubr.bf16.vlgmr.msra.gmra.mrb[68].mxu0 %v20210_v63  ;;  %v17443_v63 = vld [vmem:[%s24858_s13 + $0x980] ss:$44 sps:$4 sm:$0xff]   ;;  %v4280_v48 = vand.u32 %v14849_v30, %v19619_v61  ;;  %v17519_v28 = vld [vmem:[%s24858_s13 + $0xaf0] ss:$44 sps:$4 sm:$0xff]  }
 0x6a5   :  { %4421 = vmatmul.mubr.bf16.vlgmr.msra.gmra.mrb[56].mxu1 %v20562_v56  ;;  %4348 = vmatpush1.bf16.msra.mxu0 %v17429_v49  ;;  %v4298_v49 = vand.u32 %v14855_v36, %v19619_v61  ;;  %v17483_v53 = vld [vmem:[%s24858_s13 + $0x8e0] ss:$44 sps:$4 sm:$0xff]  }
 0x6a6   :  { %14859 = vmatprep.mubr.msk.bf16.mxu0 %vm1771_vm14, %v20447_v51  ;;  %4471 = vmatpush1.bf16.msra.mxu1 %v17432_v37  ;;  %v17486_v37 = vld [vmem:[%s24858_s13 + $0xbb4] ss:$44 sps:$4 sm:$0xff]  }
 0x6a7   :  { %14862 = vmatprep.mubr.msk.bf16.mxu1 %vm1771_vm14, %v20447_v51  ;;  %4349 = vmatprep.subr.bf16.mxu0 %v17437_v55  ;;  %v17510_v16 = vld [vmem:[%s24858_s13 + $0xd14] ss:$44 sps:$4 sm:$0xff]  }
 0x6a8   :  { %4472 = vmatprep.subr.bf16.mxu1 %v17440_v41  ;;  %v14756_v30 = vld [vmem:[%s24858_s13 + $0xb9c] sm:$0x11] }
 0x6a9   :  { %4350 = vmatpush1.bf16.msra.mxu0 %v17435_v40  ;;  %v17520_v36 = vld [vmem:[%s24858_s13 + $0xdc0] ss:$44 sps:$4 sm:$0xff]  }
 0x6aa   :  { %4473 = vmatpush1.bf16.msra.mxu1 %v17438_v57  ;;  %4351 = vmatprep.subr.bf16.mxu0 %v17443_v63 }
 0x6ab   :  { %4474 = vmatprep.subr.bf16.mxu1 %v17446_v58 }
 0x6ad   :  { %4352 = vmatpush1.bf16.msra.mxu0 %v17441_v59  ;;  %v17481_v59 = vld [vmem:[%s24858_s13 + $0x8dc] ss:$44 sps:$4 sm:$0xff]  }
 0x6ae   :  { %4475 = vmatpush1.bf16.msra.mxu1 %v17444_v17  ;;  %4353 = vmatprep.subr.bf16.mxu0 %v17449_v62 }
 0x6af   :  { %4476 = vmatprep.subr.bf16.mxu1 %v17452_v0  ;;  %v17489_v0 = vld [vmem:[%s24858_s13 + $0x938] ss:$44 sps:$4 sm:$0xff]  }
 0x6b1   :  { %4354 = vmatpush1.bf16.msra.mxu0 %v17447_v1  ;;  %v20803_v1 = vrot.slane %v19646_v22, 2 }
 0x6b2   :  { %4477 = vmatpush1.bf16.msra.mxu1 %v17450_v2  ;;  %4355 = vmatprep.subr.bf16.mxu0 %v17455_v3  ;;  %v17487_v2 = vld [vmem:[%s24858_s13 + $0x934] ss:$44 sps:$4 sm:$0xff]  }
 0x6b3   :  { %4478 = vmatprep.subr.bf16.mxu1 %v17458_v4  ;;  %v17490_v3 = vld [vmem:[%s24858_s13 + $0xc08] ss:$44 sps:$4 sm:$0xff]   ;;  %v17495_v4 = vld [vmem:[%s24858_s13 + $0x990] ss:$44 sps:$4 sm:$0xff]  }
 0x6b5   :  { %4356 = vmatpush1.bf16.msra.mxu0 %v17453_v5  ;;  %v17498_v5 = vld [vmem:[%s24858_s13 + $0xc64] ss:$44 sps:$4 sm:$0xff]  }
 0x6b6   :  { %4479 = vmatpush1.bf16.msra.mxu1 %v17456_v6  ;;  %4357 = vmatprep.subr.bf16.mxu0 %v17461_v9  ;;  %v17493_v6 = vld [vmem:[%s24858_s13 + $0x98c] ss:$44 sps:$4 sm:$0xff]  }
 0x6b7   :  { %4480 = vmatprep.subr.bf16.mxu1 %v17464_v11  ;;  %v17496_v9 = vld [vmem:[%s24858_s13 + $0xc60] ss:$44 sps:$4 sm:$0xff]   ;;  %v17501_v11 = vld [vmem:[%s24858_s13 + $0x9e8] ss:$44 sps:$4 sm:$0xff]  }
 0x6b9   :  { %4358 = vmatpush1.bf16.msra.mxu0 %v17459_v12  ;;  %v17504_v12 = vld [vmem:[%s24858_s13 + $0xcbc] ss:$44 sps:$4 sm:$0xff]  }
 0x6ba   :  { %4481 = vmatpush1.bf16.msra.mxu1 %v17462_v13  ;;  %4359 = vmatprep.subr.bf16.mxu0 %v17467_v14  ;;  %v17499_v13 = vld [vmem:[%s24858_s13 + $0x9e4] ss:$44 sps:$4 sm:$0xff]  }
 0x6bb   :  { %4482 = vmatprep.subr.bf16.mxu1 %v17470_v15  ;;  %v17502_v14 = vld [vmem:[%s24858_s13 + $0xcb8] ss:$44 sps:$4 sm:$0xff]   ;;  %v17507_v15 = vld [vmem:[%s24858_s13 + $0xa40] ss:$44 sps:$4 sm:$0xff]  }
 0x6bd   :  { %4360 = vmatpush1.bf16.msra.mxu0 %v17465_v19  ;;  %v17508_v19 = vld [vmem:[%s24858_s13 + $0xd10] ss:$44 sps:$4 sm:$0xff]  }
 0x6be   :  { %4483 = vmatpush1.bf16.msra.mxu1 %v17468_v20  ;;  %4361 = vmatprep.subr.bf16.mxu0 %v17473_v24  ;;  %v17513_v20 = vld [vmem:[%s24858_s13 + $0xa98] ss:$44 sps:$4 sm:$0xff]  }
 0x6bf   :  { %4484 = vmatprep.subr.bf16.mxu1 %v17476_v27  ;;  %v17516_v24 = vld [vmem:[%s24858_s13 + $0xd6c] ss:$44 sps:$4 sm:$0xff]   ;;  %v17514_v27 = vld [vmem:[%s24858_s13 + $0xd68] ss:$44 sps:$4 sm:$0xff]  }
 0x6c1   :  { %4362 = vmatpush1.bf16.msra.mxu0 %v17471_v29  ;;  %v17522_v29 = vld [vmem:[%s24858_s13 + $0xdc4] ss:$44 sps:$4 sm:$0xff]  }
 0x6c2   :  { %4485 = vmatpush1.bf16.msra.mxu1 %v17474_v32  ;;  %4363 = vmatprep.subr.bf16.mxu0 %v4283_v33  ;;  %v14960_v32 = vld [vmem:[%s24858_s13 + $0xe70] sm:$0x11]  ;;  %v17517_v33 = vld [vmem:[%s24858_s13 + $0xaec] ss:$44 sps:$4 sm:$0xff]  }
 0x6c3   :  { %v2642_v54 = vpop.f32.mrb[48].mxu0  ;;  %4486 = vmatprep.subr.bf16.mxu1 %v4301_v45  ;;  %v17525_v45 = vld [vmem:[%s24858_s13 + $0xb48] ss:$44 sps:$4 sm:$0xff]  }
 0x6c4   :  { %v20777_v38 = vadd.f32 %v2642_v54, %v20421_v35  ;;  %v2765_v55 = vpop.f32.mrb[36].mxu1  ;;  %v2644_v41 = vpop.f32.mrb[49].mxu0  ;;  %v17523_v54 = vld [vmem:[%s24858_s13 + $0xb44] ss:$44 sps:$4 sm:$0xff]  }
 0x6c5   :  { %v20780_v40 = vadd.f32 %v2765_v55, %v20423_v34  ;;  %v20783_v57 = vadd.f32 %v2644_v41, %v20428_v39  ;;  %v2767_v63 = vpop.f32.mrb[37].mxu1  ;;  %v2646_v58 = vpop.f32.mrb[50].mxu0  ;;  %4364 = vmatpush1.bf16.msra.mxu0 %v4280_v48  ;;  %v17484_v34 = vld [vmem:[%s24858_s13 + $0xbb0] ss:$44 sps:$4 sm:$0xff]   ;;  %v14854_v48 = vcombine.high %v14756_v30, %v14756_v30  ;;  %v17526_v55 = vld [vmem:[%s24858_s13 + $0xe18] ss:$44 sps:$4 sm:$0xff]  }
 0x6c6   :  { %v20789_v17 = vadd.f32 %v2767_v63, %v20430_v42  ;;  %v2769_v35 = vpop.f32.mrb[38].mxu1  ;;  %4487 = vmatpush1.bf16.msra.mxu1 %v4298_v49  ;;  %v2647_v62 = vpop.f32.mrb[51].mxu0  ;;  %4429 = vmatprep.subr.bf16.mxu0 %v17483_v53  ;;  %v17492_v42 = vld [vmem:[%s24858_s13 + $0xc0c] ss:$44 sps:$4 sm:$0xff]   ;;  %v17528_v49 = vld [vmem:[%s24858_s13 + $0xe1c] ss:$44 sps:$4 sm:$0xff]   ;;  %v15055_v53 = vcombine.high %v14960_v32, %v14960_v32  ;;  %v15054_v63 = vcombine.low %v14960_v32, %v14960_v32 }
 0x6c7   :  { %v2770_v39 = vpop.f32.mrb[39].mxu1  ;;  %5180 = vmatprep.subr.bf16.mxu1 %v17486_v37  ;;  %v14853_v37 = vcombine.low %v14756_v30, %v14756_v30  ;;  %v4295_v41 = vand.u32 %v14854_v48, %v19619_v61  ;;  %v17553_v30 = vld [vmem:[%s24858_s13 + $0xd78] ss:$44 sps:$4 sm:$0xff]   ;;  %v17559_v32 = vld [vmem:[%s24858_s13 + $0xdd4] ss:$44 sps:$4 sm:$0xff]  }
 0x6c8   :  { %4380 = vmatmul.mubr.bf16.vlgmr.msra.gmra.mrb[72].mxu0 %v20562_v56  ;;  %v5151_v58 = vand.u32 %v15055_v53, %v19619_v61  ;;  %v5148_v35 = vand.u32 %v15054_v63, %v19619_v61  ;;  %v17563_v48 = vld [vmem:[%s24858_s13 + $0xe2c] ss:$44 sps:$4 sm:$0xff]   ;;  %v17564_v53 = vld [vmem:[%s24858_s13 + $0xb54] ss:$44 sps:$4 sm:$0xff]  }
 0x6c9   :  { %4503 = vmatmul.mubr.bf16.vlgmr.msra.gmra.mrb[60].mxu1 %v20562_v56  ;;  %4430 = vmatpush1.bf16.msra.mxu0 %v17481_v59  ;;  %v4292_v59 = vand.u32 %v14853_v37, %v19619_v61  ;;  %v17561_v37 = vld [vmem:[%s24858_s13 + $0xe28] ss:$44 sps:$4 sm:$0xff]  }
 0x6ca   :  { %14861 = vmatprep.mubr.msk.bf16.mxu0 %vm1771_vm14, %v20447_v51  ;;  %5181 = vmatpush1.bf16.msra.mxu1 %v17484_v34  ;;  %v17535_v34 = vld [vmem:[%s24858_s13 + $0xbc4] ss:$44 sps:$4 sm:$0xff]  }
 0x6cb   :  { %15065 = vmatprep.mubr.msk.bf16.mxu1 %vm1771_vm14, %v20803_v1  ;;  %4431 = vmatprep.subr.bf16.mxu0 %v17489_v0 }
 0x6cc   :  { %5182 = vmatprep.subr.bf16.mxu1 %v17492_v42 }
 0x6cd   :  { %4432 = vmatpush1.bf16.msra.mxu0 %v17487_v2 }
 0x6ce   :  { %5183 = vmatpush1.bf16.msra.mxu1 %v17490_v3  ;;  %4433 = vmatprep.subr.bf16.mxu0 %v17495_v4 }
 0x6cf   :  { %5184 = vmatprep.subr.bf16.mxu1 %v17498_v5 }
 0x6d1   :  { %4434 = vmatpush1.bf16.msra.mxu0 %v17493_v6  ;;  %v17536_v6 = vld [vmem:[%s24858_s13 + $0x8ec] ss:$44 sps:$4 sm:$0xff]  }
 0x6d2   :  { %5185 = vmatpush1.bf16.msra.mxu1 %v17496_v9  ;;  %4435 = vmatprep.subr.bf16.mxu0 %v17501_v11 }
 0x6d3   :  { %5186 = vmatprep.subr.bf16.mxu1 %v17504_v12  ;;  %v20920_v12 = vrot.slane %v19644_v21, 2 }
 0x6d5   :  { %4436 = vmatpush1.bf16.msra.mxu0 %v17499_v13  ;;  %v17540_v13 = vld [vmem:[%s24858_s13 + $0x944] ss:$44 sps:$4 sm:$0xff]  }
 0x6d6   :  { %5187 = vmatpush1.bf16.msra.mxu1 %v17502_v14  ;;  %4437 = vmatprep.subr.bf16.mxu0 %v17507_v15  ;;  %v17537_v14 = vld [vmem:[%s24858_s13 + $0xc18] ss:$44 sps:$4 sm:$0xff]   ;;  %v17543_v15 = vld [vmem:[%s24858_s13 + $0xc74] ss:$44 sps:$4 sm:$0xff]  }
 0x6d7   :  { %5188 = vmatprep.subr.bf16.mxu1 %v17510_v16  ;;  %v17541_v16 = vld [vmem:[%s24858_s13 + $0xc70] ss:$44 sps:$4 sm:$0xff]  }
 0x6d9   :  { %4438 = vmatpush1.bf16.msra.mxu0 %v17505_v18  ;;  %v17547_v18 = vld [vmem:[%s24858_s13 + $0xccc] ss:$44 sps:$4 sm:$0xff]  }
 0x6da   :  { %5189 = vmatpush1.bf16.msra.mxu1 %v17508_v19  ;;  %4439 = vmatprep.subr.bf16.mxu0 %v17513_v20  ;;  %v17548_v19 = vld [vmem:[%s24858_s13 + $0x9f4] ss:$44 sps:$4 sm:$0xff]  }
 0x6db   :  { %5190 = vmatprep.subr.bf16.mxu1 %v17516_v24  ;;  %v17545_v20 = vld [vmem:[%s24858_s13 + $0xcc8] ss:$44 sps:$4 sm:$0xff]   ;;  %v17551_v24 = vld [vmem:[%s24858_s13 + $0xd24] ss:$44 sps:$4 sm:$0xff]  }
 0x6dd   :  { %4440 = vmatpush1.bf16.msra.mxu0 %v17511_v25  ;;  %v17552_v25 = vld [vmem:[%s24858_s13 + $0xa4c] ss:$44 sps:$4 sm:$0xff]  }
 0x6de   :  { %5191 = vmatpush1.bf16.msra.mxu1 %v17514_v27  ;;  %4441 = vmatprep.subr.bf16.mxu0 %v17519_v28  ;;  %v17549_v27 = vld [vmem:[%s24858_s13 + $0xd20] ss:$44 sps:$4 sm:$0xff]   ;;  %v17555_v28 = vld [vmem:[%s24858_s13 + $0xd7c] ss:$44 sps:$4 sm:$0xff]  }
 0x6df   :  { %5192 = vmatprep.subr.bf16.mxu1 %v17522_v29  ;;  %v17556_v29 = vld [vmem:[%s24858_s13 + $0xaa4] ss:$44 sps:$4 sm:$0xff]  }
 0x6e1   :  { %4442 = vmatpush1.bf16.msra.mxu0 %v17517_v33  ;;  %v14962_v33 = vld [vmem:[%s24858_s13 + $0xe80] sm:$0x11] }
 0x6e2   :  { %5193 = vmatpush1.bf16.msra.mxu1 %v17520_v36  ;;  %4443 = vmatprep.subr.bf16.mxu0 %v17525_v45  ;;  %v17560_v36 = vld [vmem:[%s24858_s13 + $0xafc] ss:$44 sps:$4 sm:$0xff]  }
 0x6e3   :  { %5194 = vmatprep.subr.bf16.mxu1 %v17528_v49  ;;  %v17557_v45 = vld [vmem:[%s24858_s13 + $0xdd0] ss:$44 sps:$4 sm:$0xff]   ;;  %v15059_v49 = vcombine.high %v14962_v33, %v14962_v33 }
 0x6e5   :  { %4444 = vmatpush1.bf16.msra.mxu0 %v17523_v54  ;;  %v17567_v54 = vld [vmem:[%s24858_s13 + $0xbac] ss:$0 sps:$4 sm:$0x11]  }
 0x6e6   :  { %5195 = vmatpush1.bf16.msra.mxu1 %v17526_v55  ;;  %4445 = vmatprep.subr.bf16.mxu0 %v4295_v41  ;;  %v15058_v55 = vcombine.low %v14962_v33, %v14962_v33  ;;  %v5163_v41 = vand.u32 %v15059_v49, %v19619_v61  ;;  %v4304_v63 = vand.u32 %v17567_v54, %v19619_v61  ;;  %v17598_v33 = vld [vmem:[%s24858_s13 + $0xd70] ss:$44 sps:$4 sm:$0xff]   ;;  %v17604_v54 = vld [vmem:[%s24858_s13 + $0xdc8] ss:$44 sps:$4 sm:$0xff]  }
 0x6e7   :  { %v2724_v62 = vpop.f32.mrb[52].mxu0  ;;  %5196 = vmatprep.subr.bf16.mxu1 %v5151_v58  ;;  %v14961_v49 = vld [vmem:[%s24858_s13 + $0xe78] sm:$0x11] }
 0x6e8   :  { %v20901_v39 = vadd.f32 %v2724_v62, %v20541_v43  ;;  %v3466_v0 = vpop.f32.mrb[40].mxu1  ;;  %v2726_v42 = vpop.f32.mrb[53].mxu0  ;;  %v5160_v58 = vand.u32 %v15058_v55, %v19619_v61  ;;  %v17573_v62 = vld [vmem:[%s24858_s13 + $0xbd4] ss:$44 sps:$4 sm:$0xff]   ;;  %v17612_v55 = vld [vmem:[%s24858_s13 + $0xe24] ss:$44 sps:$4 sm:$0xff]  }
 0x6e9   :  { %v20904_v2 = vadd.f32 %v3466_v0, %v20549_v47  ;;  %v20907_v3 = vadd.f32 %v2726_v42, %v20546_v46  ;;  %v3468_v4 = vpop.f32.mrb[41].mxu1  ;;  %v2728_v5 = vpop.f32.mrb[54].mxu0  ;;  %4446 = vmatpush1.bf16.msra.mxu0 %v4292_v59  ;;  %v17533_v46 = vld [vmem:[%s24858_s13 + $0xbc0] ss:$44 sps:$4 sm:$0xff]   ;;  %v17570_v59 = vld [vmem:[%s24858_s13 + $0xbbc] ss:$44 sps:$4 sm:$0xff]  }
 0x6ea   :  { %v20913_v9 = vadd.f32 %v3468_v4, %v20555_v52  ;;  %v3470_v43 = vpop.f32.mrb[42].mxu1  ;;  %5197 = vmatpush1.bf16.msra.mxu1 %v5148_v35  ;;  %v2729_v11 = vpop.f32.mrb[55].mxu0  ;;  %4511 = vmatprep.subr.bf16.mxu0 %v19144_v60  ;;  %v17539_v52 = vld [vmem:[%s24858_s13 + $0xc1c] ss:$44 sps:$4 sm:$0xff]  }
 0x6eb   :  { %v3471_v47 = vpop.f32.mrb[43].mxu1  ;;  %5262 = vmatprep.subr.bf16.mxu1 %v17535_v34  ;;  %v17568_v43 = vld [vmem:[%s24858_s13 + $0xbb8] ss:$44 sps:$4 sm:$0xff]  }
 0x6ec   :  { %4462 = vmatmul.mubr.bf16.vlgmr.msra.gmra.mrb[76].mxu0 %v20562_v56 }
 0x6ed   :  { %5213 = vmatmul.mubr.bf16.vlgmr.msra.gmra.mrb[64].mxu1 %v20920_v12  ;;  %4512 = vmatpush1.bf16.msra.mxu0 %v17536_v6 }
 0x6ee   :  { %14863 = vmatprep.mubr.msk.bf16.mxu0 %vm1771_vm14, %v20447_v51  ;;  %5263 = vmatpush1.bf16.msra.mxu1 %v17533_v46  ;;  %v17544_v51 = vld [vmem:[%s24858_s13 + $0x99c] ss:$44 sps:$4 sm:$0xff]  }
 0x6ef   :  { %15067 = vmatprep.mubr.msk.bf16.mxu1 %vm1771_vm14, %v20803_v1  ;;  %4513 = vmatprep.subr.bf16.mxu0 %v19144_v60 }
 0x6f0   :  { %5264 = vmatprep.subr.bf16.mxu1 %v17539_v52  ;;  %v17576_v52 = vld [vmem:[%s24858_s13 + $0xc14] ss:$44 sps:$4 sm:$0xff]  }
 0x6f1   :  { %4514 = vmatpush1.bf16.msra.mxu0 %v17540_v13  ;;  %v17574_v13 = vld [vmem:[%s24858_s13 + $0xc10] ss:$44 sps:$4 sm:$0xff]  }
 0x6f2   :  { %5265 = vmatpush1.bf16.msra.mxu1 %v17537_v14  ;;  %4515 = vmatprep.subr.bf16.mxu0 %v19144_v60  ;;  %v17577_v14 = vld [vmem:[%s24858_s13 + $0xc28] ss:$44 sps:$4 sm:$0xff]  }
 0x6f3   :  { %5266 = vmatprep.subr.bf16.mxu1 %v17543_v15  ;;  %v17585_v15 = vld [vmem:[%s24858_s13 + $0xc84] ss:$44 sps:$4 sm:$0xff]  }
 0x6f5   :  { %4516 = vmatpush1.bf16.msra.mxu0 %v17544_v51  ;;  %v17580_v51 = vld [vmem:[%s24858_s13 + $0xc68] ss:$44 sps:$4 sm:$0xff]  }
 0x6f6   :  { %5267 = vmatpush1.bf16.msra.mxu1 %v17541_v16  ;;  %4517 = vmatprep.subr.bf16.mxu0 %v19144_v60  ;;  %v17583_v16 = vld [vmem:[%s24858_s13 + $0xc80] ss:$44 sps:$4 sm:$0xff]  }
 0x6f7   :  { %5268 = vmatprep.subr.bf16.mxu1 %v17547_v18  ;;  %v17588_v18 = vld [vmem:[%s24858_s13 + $0xcc4] ss:$44 sps:$4 sm:$0xff]  }
 0x6f9   :  { %4518 = vmatpush1.bf16.msra.mxu0 %v17548_v19  ;;  %v17591_v19 = vld [vmem:[%s24858_s13 + $0xcdc] ss:$44 sps:$4 sm:$0xff]  }
 0x6fa   :  { %5269 = vmatpush1.bf16.msra.mxu1 %v17545_v20  ;;  %4519 = vmatprep.subr.bf16.mxu0 %v19144_v60  ;;  %v17586_v20 = vld [vmem:[%s24858_s13 + $0xcc0] ss:$44 sps:$4 sm:$0xff]  }
 0x6fb   :  { %5270 = vmatprep.subr.bf16.mxu1 %v17551_v24  ;;  %v17589_v24 = vld [vmem:[%s24858_s13 + $0xcd8] ss:$44 sps:$4 sm:$0xff]  }
 0x6fd   :  { %4520 = vmatpush1.bf16.msra.mxu0 %v17552_v25  ;;  %v17594_v25 = vld [vmem:[%s24858_s13 + $0xd1c] ss:$44 sps:$4 sm:$0xff]  }
 0x6fe   :  { %5271 = vmatpush1.bf16.msra.mxu1 %v17549_v27  ;;  %4521 = vmatprep.subr.bf16.mxu0 %v19144_v60  ;;  %v17597_v27 = vld [vmem:[%s24858_s13 + $0xd34] ss:$44 sps:$4 sm:$0xff]  }
 0x6ff   :  { %5272 = vmatprep.subr.bf16.mxu1 %v17555_v28  ;;  %v17592_v28 = vld [vmem:[%s24858_s13 + $0xd18] ss:$44 sps:$4 sm:$0xff]  }
 0x701   :  { %4522 = vmatpush1.bf16.msra.mxu0 %v17556_v29  ;;  %v17595_v29 = vld [vmem:[%s24858_s13 + $0xd30] ss:$44 sps:$4 sm:$0xff]  }
 0x702   :  { %5273 = vmatpush1.bf16.msra.mxu1 %v17553_v30  ;;  %4523 = vmatprep.subr.bf16.mxu0 %v19144_v60  ;;  %v17600_v30 = vld [vmem:[%s24858_s13 + $0xd74] ss:$44 sps:$4 sm:$0xff]  }
 0x703   :  { %5274 = vmatprep.subr.bf16.mxu1 %v17559_v32  ;;  %v17603_v32 = vld [vmem:[%s24858_s13 + $0xd8c] ss:$44 sps:$4 sm:$0xff]  }
 0x705   :  { %4524 = vmatpush1.bf16.msra.mxu0 %v17560_v36  ;;  %v17601_v36 = vld [vmem:[%s24858_s13 + $0xd88] ss:$44 sps:$4 sm:$0xff]  }
 0x706   :  { %5275 = vmatpush1.bf16.msra.mxu1 %v17557_v45  ;;  %4525 = vmatprep.subr.bf16.mxu0 %v19144_v60  ;;  %v17606_v45 = vld [vmem:[%s24858_s13 + $0xdcc] ss:$44 sps:$4 sm:$0xff]  }
 0x707   :  { %5276 = vmatprep.subr.bf16.mxu1 %v17563_v48  ;;  %v17609_v48 = vld [vmem:[%s24858_s13 + $0xde4] ss:$44 sps:$4 sm:$0xff]  }
 0x709   :  { %4526 = vmatpush1.bf16.msra.mxu0 %v17564_v53  ;;  %v14964_v53 = vld [vmem:[%s24858_s13 + $0xe90] sm:$0x11] }
 0x70a   :  { %5277 = vmatpush1.bf16.msra.mxu1 %v17561_v37  ;;  %4527 = vmatprep.subr.bf16.mxu0 %v19144_v60  ;;  %v17607_v37 = vld [vmem:[%s24858_s13 + $0xde0] ss:$44 sps:$4 sm:$0xff]  }
 0x70b   :  { %v2806_v35 = vpop.f32.mrb[56].mxu0  ;;  %5278 = vmatprep.subr.bf16.mxu1 %v5163_v41  ;;  %v15057_v41 = vcombine.high %v14961_v49, %v14961_v49 }
 0x70c   :  { %v21015_v34 = vadd.f32 %v2806_v35, %v20653_v31  ;;  %v3548_v0 = vpop.f32.mrb[44].mxu1  ;;  %v2808_v42 = vpop.f32.mrb[57].mxu0  ;;  %v17571_v31 = vld [vmem:[%s24858_s13 + $0xbd0] ss:$44 sps:$4 sm:$0xff]   ;;  %v15056_v35 = vcombine.low %v14961_v49, %v14961_v49  ;;  %v17649_v49 = vld [vmem:[%s24858_s13 + $0x1000] ss:$44 sps:$4 sm:$0xff]  }
 0x70d   :  { %v21018_v4 = vadd.f32 %v3548_v0, %v20659_v44  ;;  %v3550_v5 = vpop.f32.mrb[45].mxu1  ;;  %v2809_v6 = vpop.f32.mrb[58].mxu0  ;;  %4528 = vmatpush1.bf16.msra.mxu0 %v4304_v63  ;;  %v17615_v63 = vld [vmem:[%s24858_s13 + $0xe3c] ss:$44 sps:$4 sm:$0xff]   ;;  %v5157_v0 = vand.u32 %v15057_v41, %v19619_v61  ;;  %v15062_v42 = vcombine.low %v14964_v53, %v14964_v53  ;;  %v17650_v41 = vld [vmem:[%s24858_s13 + $0xd80] ss:$44 sps:$4 sm:$0xff]  }
 0x70e   :  { %v21024_v11 = vadd.f32 %v3550_v5, %v20665_v50  ;;  %v3552_v46 = vpop.f32.mrb[46].mxu1  ;;  %5279 = vmatpush1.bf16.msra.mxu1 %v5160_v58  ;;  %v2810_v47 = vpop.f32.mrb[59].mxu0  ;;  %5221 = vmatprep.subr.bf16.mxu0 %v17570_v59  ;;  %v17579_v50 = vld [vmem:[%s24858_s13 + $0xc2c] ss:$44 sps:$4 sm:$0xff]   ;;  %v15063_v58 = vcombine.high %v14964_v53, %v14964_v53  ;;  %v5154_v6 = vand.u32 %v15056_v35, %v19619_v61  ;;  %v17644_v53 = vld [vmem:[%s24858_s13 + $0xd28] ss:$44 sps:$4 sm:$0xff]  }
 0x70f   :  { %v3553_v44 = vpop.f32.mrb[47].mxu1  ;;  %5344 = vmatprep.subr.bf16.mxu1 %v17573_v62  ;;  %v17610_v59 = vld [vmem:[%s24858_s13 + $0xe20] ss:$44 sps:$4 sm:$0xff]   ;;  %v17613_v62 = vld [vmem:[%s24858_s13 + $0xe38] ss:$44 sps:$4 sm:$0xff]  }
 0x710   :  { %4544 = vmatmul.mubr.bf16.vlgmr.msra.gmra.mrb[80].mxu0 %v20562_v56  ;;  %v17582_v56 = vld [vmem:[%s24858_s13 + $0xc6c] ss:$44 sps:$4 sm:$0xff]   ;;  %v5175_v5 = vand.u32 %v15063_v58, %v19619_v61  ;;  %v17658_v58 = vld [vmem:[%s24858_s13 + $0xddc] ss:$44 sps:$4 sm:$0xff]  }
 0x711   :  { %5295 = vmatmul.mubr.bf16.vlgmr.msra.gmra.mrb[68].mxu1 %v20920_v12  ;;  %5222 = vmatpush1.bf16.msra.mxu0 %v17568_v43  ;;  %v5172_v43 = vand.u32 %v15062_v42, %v19619_v61  ;;  %v17622_v46 = vld [vmem:[%s24858_s13 + $0xbcc] ss:$44 sps:$4 sm:$0xff]  }
 0x712   :  { %15066 = vmatprep.mubr.msk.bf16.mxu0 %vm1771_vm14, %v20803_v1  ;;  %5345 = vmatpush1.bf16.msra.mxu1 %v17571_v31  ;;  %v17625_v31 = vld [vmem:[%s24858_s13 + $0xea0] ss:$44 sps:$4 sm:$0xff]  }
 0x713   :  { %15069 = vmatprep.mubr.msk.bf16.mxu1 %vm1771_vm14, %v20803_v1  ;;  %5223 = vmatprep.subr.bf16.mxu0 %v17576_v52  ;;  %v14963_v35 = vld [vmem:[%s24858_s13 + $0xe88] sm:$0x11] }
 0x714   :  { %5346 = vmatprep.subr.bf16.mxu1 %v17579_v50  ;;  %v17659_v42 = vld [vmem:[%s24858_s13 + $0x10ac] ss:$44 sps:$4 sm:$0xff]  }
 0x715   :  { %5224 = vmatpush1.bf16.msra.mxu0 %v17574_v13 }
 0x716   :  { %5347 = vmatpush1.bf16.msra.mxu1 %v17577_v14  ;;  %5225 = vmatprep.subr.bf16.mxu0 %v17582_v56 }
 0x717   :  { %5348 = vmatprep.subr.bf16.mxu1 %v17585_v15 }
 0x719   :  { %5226 = vmatpush1.bf16.msra.mxu0 %v17580_v51  ;;  %v17620_v51 = vld [vmem:[%s24858_s13 + $0xbc8] ss:$44 sps:$4 sm:$0xff]  }
 0x71a   :  { %5349 = vmatpush1.bf16.msra.mxu1 %v17583_v16  ;;  %5227 = vmatprep.subr.bf16.mxu0 %v17588_v18 }
 0x71b   :  { %5350 = vmatprep.subr.bf16.mxu1 %v17591_v19  ;;  %v17628_v19 = vld [vmem:[%s24858_s13 + $0xc24] ss:$44 sps:$4 sm:$0xff]  }
 0x71d   :  { %5228 = vmatpush1.bf16.msra.mxu0 %v17586_v20  ;;  %v21162_v20 = vrot.slane %v19649_v23, 2 }
 0x71e   :  { %5351 = vmatpush1.bf16.msra.mxu1 %v17589_v24  ;;  %5229 = vmatprep.subr.bf16.mxu0 %v17594_v25  ;;  %v17626_v24 = vld [vmem:[%s24858_s13 + $0xc20] ss:$44 sps:$4 sm:$0xff]  }
 0x71f   :  { %5352 = vmatprep.subr.bf16.mxu1 %v17597_v27  ;;  %v17629_v25 = vld [vmem:[%s24858_s13 + $0xef4] ss:$44 sps:$4 sm:$0xff]   ;;  %v17634_v27 = vld [vmem:[%s24858_s13 + $0xc7c] ss:$44 sps:$4 sm:$0xff]  }
 0x721   :  { %5230 = vmatpush1.bf16.msra.mxu0 %v17592_v28  ;;  %v17637_v28 = vld [vmem:[%s24858_s13 + $0xf50] ss:$44 sps:$4 sm:$0xff]  }
 0x722   :  { %5353 = vmatpush1.bf16.msra.mxu1 %v17595_v29  ;;  %5231 = vmatprep.subr.bf16.mxu0 %v17600_v30  ;;  %v17632_v29 = vld [vmem:[%s24858_s13 + $0xc78] ss:$44 sps:$4 sm:$0xff]  }
 0x723   :  { %5354 = vmatprep.subr.bf16.mxu1 %v17603_v32  ;;  %v17635_v30 = vld [vmem:[%s24858_s13 + $0xf4c] ss:$44 sps:$4 sm:$0xff]   ;;  %v17640_v32 = vld [vmem:[%s24858_s13 + $0xcd4] ss:$44 sps:$4 sm:$0xff]  }
 0x725   :  { %5232 = vmatpush1.bf16.msra.mxu0 %v17598_v33  ;;  %v17643_v33 = vld [vmem:[%s24858_s13 + $0xfa8] ss:$44 sps:$4 sm:$0xff]  }
 0x726   :  { %5355 = vmatpush1.bf16.msra.mxu1 %v17601_v36  ;;  %5233 = vmatprep.subr.bf16.mxu0 %v17606_v45  ;;  %v17638_v36 = vld [vmem:[%s24858_s13 + $0xcd0] ss:$44 sps:$4 sm:$0xff]  }
 0x727   :  { %5356 = vmatprep.subr.bf16.mxu1 %v17609_v48  ;;  %v17641_v45 = vld [vmem:[%s24858_s13 + $0xfa4] ss:$44 sps:$4 sm:$0xff]   ;;  %v17646_v48 = vld [vmem:[%s24858_s13 + $0xd2c] ss:$44 sps:$4 sm:$0xff]  }
 0x729   :  { %5234 = vmatpush1.bf16.msra.mxu0 %v17604_v54  ;;  %v17647_v54 = vld [vmem:[%s24858_s13 + $0xffc] ss:$44 sps:$4 sm:$0xff]  }
 0x72a   :  { %5357 = vmatpush1.bf16.msra.mxu1 %v17607_v37  ;;  %5235 = vmatprep.subr.bf16.mxu0 %v17612_v55  ;;  %v17652_v37 = vld [vmem:[%s24858_s13 + $0xd84] ss:$44 sps:$4 sm:$0xff]  }
 0x72b   :  { %5358 = vmatprep.subr.bf16.mxu1 %v17615_v63  ;;  %v17655_v55 = vld [vmem:[%s24858_s13 + $0x1058] ss:$44 sps:$4 sm:$0xff]   ;;  %v17653_v63 = vld [vmem:[%s24858_s13 + $0x1054] ss:$44 sps:$4 sm:$0xff]  }
 0x72d   :  { %5236 = vmatpush1.bf16.msra.mxu0 %v17610_v59  ;;  %v17661_v59 = vld [vmem:[%s24858_s13 + $0x10b0] ss:$44 sps:$4 sm:$0xff]  }
 0x72e   :  { %5359 = vmatpush1.bf16.msra.mxu1 %v17613_v62  ;;  %5237 = vmatprep.subr.bf16.mxu0 %v5157_v0  ;;  %v15167_v62 = vld [vmem:[%s24858_s13 + $0x115c] sm:$0x11]  ;;  %v17656_v0 = vld [vmem:[%s24858_s13 + $0xdd8] ss:$44 sps:$4 sm:$0xff]  }
 0x72f   :  { %v3507_v47 = vpop.f32.mrb[60].mxu0  ;;  %5360 = vmatprep.subr.bf16.mxu1 %v5175_v5  ;;  %v17664_v5 = vld [vmem:[%s24858_s13 + $0xe34] ss:$44 sps:$4 sm:$0xff]  }
 0x730   :  { %v21136_v44 = vadd.f32 %v3507_v47, %v20777_v38  ;;  %v3630_v52 = vpop.f32.mrb[48].mxu1  ;;  %v3509_v50 = vpop.f32.mrb[61].mxu0  ;;  %v17662_v47 = vld [vmem:[%s24858_s13 + $0xe30] ss:$44 sps:$4 sm:$0xff]  }
 0x731   :  { %v21139_v13 = vadd.f32 %v3630_v52, %v20780_v40  ;;  %v21142_v14 = vadd.f32 %v3509_v50, %v20783_v57  ;;  %v3632_v56 = vpop.f32.mrb[49].mxu1  ;;  %v3511_v15 = vpop.f32.mrb[62].mxu0  ;;  %5238 = vmatpush1.bf16.msra.mxu0 %v5154_v6  ;;  %v17623_v40 = vld [vmem:[%s24858_s13 + $0xe9c] ss:$44 sps:$4 sm:$0xff]   ;;  %v15061_v6 = vcombine.high %v14963_v35, %v14963_v35  ;;  %v17665_v52 = vld [vmem:[%s24858_s13 + $0x1104] ss:$44 sps:$4 sm:$0xff]  }
 0x732   :  { %v21148_v16 = vadd.f32 %v3632_v56, %v20789_v17  ;;  %v3634_v38 = vpop.f32.mrb[50].mxu1  ;;  %5361 = vmatpush1.bf16.msra.mxu1 %v5172_v43  ;;  %v3512_v18 = vpop.f32.mrb[63].mxu0  ;;  %5303 = vmatprep.subr.bf16.mxu0 %v17622_v46  ;;  %v17631_v17 = vld [vmem:[%s24858_s13 + $0xef8] ss:$44 sps:$4 sm:$0xff]   ;;  %v17667_v43 = vld [vmem:[%s24858_s13 + $0x1108] ss:$44 sps:$4 sm:$0xff]   ;;  %v15262_v46 = vcombine.high %v15167_v62, %v15167_v62  ;;  %v15261_v56 = vcombine.low %v15167_v62, %v15167_v62 }
 0x733   :  { %v3635_v57 = vpop.f32.mrb[51].mxu1  ;;  %6054 = vmatprep.subr.bf16.mxu1 %v17625_v31  ;;  %v15060_v31 = vcombine.low %v14963_v35, %v14963_v35  ;;  %v5169_v50 = vand.u32 %v15061_v6, %v19619_v61  ;;  %v17692_v35 = vld [vmem:[%s24858_s13 + $0x1064] ss:$44 sps:$4 sm:$0xff]   ;;  %v17698_v62 = vld [vmem:[%s24858_s13 + $0x10c0] ss:$44 sps:$4 sm:$0xff]  }
 0x734   :  { %5254 = vmatmul.mubr.bf16.vlgmr.msra.gmra.mrb[84].mxu0 %v20920_v12  ;;  %v6025_v15 = vand.u32 %v15262_v46, %v19619_v61  ;;  %v6022_v38 = vand.u32 %v15261_v56, %v19619_v61  ;;  %v17702_v6 = vld [vmem:[%s24858_s13 + $0x1118] ss:$44 sps:$4 sm:$0xff]   ;;  %v17703_v46 = vld [vmem:[%s24858_s13 + $0xe40] ss:$44 sps:$4 sm:$0xff]  }
 0x735   :  { %5377 = vmatmul.mubr.bf16.vlgmr.msra.gmra.mrb[72].mxu1 %v20920_v12  ;;  %5304 = vmatpush1.bf16.msra.mxu0 %v17620_v51  ;;  %v5166_v51 = vand.u32 %v15060_v31, %v19619_v61  ;;  %v17700_v31 = vld [vmem:[%s24858_s13 + $0x1114] ss:$44 sps:$4 sm:$0xff]  }
 0x736   :  { %15068 = vmatprep.mubr.msk.bf16.mxu0 %vm1771_vm14, %v20803_v1  ;;  %6055 = vmatpush1.bf16.msra.mxu1 %v17623_v40  ;;  %v17674_v40 = vld [vmem:[%s24858_s13 + $0xeb0] ss:$44 sps:$4 sm:$0xff]  }
 0x737   :  { %15272 = vmatprep.mubr.msk.bf16.mxu1 %vm1771_vm14, %v21162_v20  ;;  %5305 = vmatprep.subr.bf16.mxu0 %v17628_v19 }
 0x738   :  { %6056 = vmatprep.subr.bf16.mxu1 %v17631_v17 }
 0x739   :  { %5306 = vmatpush1.bf16.msra.mxu0 %v17626_v24 }
 0x73a   :  { %6057 = vmatpush1.bf16.msra.mxu1 %v17629_v25  ;;  %5307 = vmatprep.subr.bf16.mxu0 %v17634_v27 }
 0x73b   :  { %6058 = vmatprep.subr.bf16.mxu1 %v17637_v28 }
 0x73d   :  { %5308 = vmatpush1.bf16.msra.mxu0 %v17632_v29  ;;  %v17675_v29 = vld [vmem:[%s24858_s13 + $0xbd8] ss:$44 sps:$4 sm:$0xff]  }
 0x73e   :  { %6059 = vmatpush1.bf16.msra.mxu1 %v17635_v30  ;;  %5309 = vmatprep.subr.bf16.mxu0 %v17640_v32 }
 0x73f   :  { %6060 = vmatprep.subr.bf16.mxu1 %v17643_v33  ;;  %v21279_v33 = vrot.slane %v19658_v26, 2 }
 0x741   :  { %5310 = vmatpush1.bf16.msra.mxu0 %v17638_v36  ;;  %v17679_v36 = vld [vmem:[%s24858_s13 + $0xc30] ss:$44 sps:$4 sm:$0xff]  }
 0x742   :  { %6061 = vmatpush1.bf16.msra.mxu1 %v17641_v45  ;;  %5311 = vmatprep.subr.bf16.mxu0 %v17646_v48  ;;  %v17676_v45 = vld [vmem:[%s24858_s13 + $0xf04] ss:$44 sps:$4 sm:$0xff]   ;;  %v17682_v48 = vld [vmem:[%s24858_s13 + $0xf60] ss:$44 sps:$4 sm:$0xff]  }
 0x743   :  { %6062 = vmatprep.subr.bf16.mxu1 %v17649_v49  ;;  %v17680_v49 = vld [vmem:[%s24858_s13 + $0xf5c] ss:$44 sps:$4 sm:$0xff]  }
 0x745   :  { %5312 = vmatpush1.bf16.msra.mxu0 %v17644_v53  ;;  %v17686_v53 = vld [vmem:[%s24858_s13 + $0xfb8] ss:$44 sps:$4 sm:$0xff]  }
 0x746   :  { %6063 = vmatpush1.bf16.msra.mxu1 %v17647_v54  ;;  %5313 = vmatprep.subr.bf16.mxu0 %v17652_v37  ;;  %v17687_v54 = vld [vmem:[%s24858_s13 + $0xce0] ss:$44 sps:$4 sm:$0xff]  }
 0x747   :  { %6064 = vmatprep.subr.bf16.mxu1 %v17655_v55  ;;  %v17684_v37 = vld [vmem:[%s24858_s13 + $0xfb4] ss:$44 sps:$4 sm:$0xff]   ;;  %v17690_v55 = vld [vmem:[%s24858_s13 + $0x1010] ss:$44 sps:$4 sm:$0xff]  }
 0x749   :  { %5314 = vmatpush1.bf16.msra.mxu0 %v17650_v41  ;;  %v17691_v41 = vld [vmem:[%s24858_s13 + $0xd38] ss:$44 sps:$4 sm:$0xff]  }
 0x74a   :  { %6065 = vmatpush1.bf16.msra.mxu1 %v17653_v63  ;;  %5315 = vmatprep.subr.bf16.mxu0 %v17658_v58  ;;  %v17688_v63 = vld [vmem:[%s24858_s13 + $0x100c] ss:$44 sps:$4 sm:$0xff]   ;;  %v17694_v58 = vld [vmem:[%s24858_s13 + $0x1068] ss:$44 sps:$4 sm:$0xff]  }
 0x74b   :  { %6066 = vmatprep.subr.bf16.mxu1 %v17661_v59  ;;  %v17695_v59 = vld [vmem:[%s24858_s13 + $0xd90] ss:$44 sps:$4 sm:$0xff]  }
 0x74d   :  { %5316 = vmatpush1.bf16.msra.mxu0 %v17656_v0  ;;  %v15169_v0 = vld [vmem:[%s24858_s13 + $0x116c] sm:$0x11] }
 0x74e   :  { %6067 = vmatpush1.bf16.msra.mxu1 %v17659_v42  ;;  %5317 = vmatprep.subr.bf16.mxu0 %v17664_v5  ;;  %v17699_v42 = vld [vmem:[%s24858_s13 + $0xde8] ss:$44 sps:$4 sm:$0xff]  }
 0x74f   :  { %6068 = vmatprep.subr.bf16.mxu1 %v17667_v43  ;;  %v17696_v5 = vld [vmem:[%s24858_s13 + $0x10bc] ss:$44 sps:$4 sm:$0xff]   ;;  %v15266_v43 = vcombine.high %v15169_v0, %v15169_v0 }
 0x751   :  { %5318 = vmatpush1.bf16.msra.mxu0 %v17662_v47  ;;  %v17706_v47 = vld [vmem:[%s24858_s13 + $0xe98] ss:$0 sps:$4 sm:$0x11]  }
 0x752   :  { %6069 = vmatpush1.bf16.msra.mxu1 %v17665_v52  ;;  %5319 = vmatprep.subr.bf16.mxu0 %v5169_v50  ;;  %v15265_v52 = vcombine.low %v15169_v0, %v15169_v0  ;;  %v6037_v50 = vand.u32 %v15266_v43, %v19619_v61  ;;  %v5178_v56 = vand.u32 %v17706_v47, %v19619_v61  ;;  %v17737_v0 = vld [vmem:[%s24858_s13 + $0x105c] ss:$44 sps:$4 sm:$0xff]   ;;  %v17743_v47 = vld [vmem:[%s24858_s13 + $0x10b4] ss:$44 sps:$4 sm:$0xff]  }
 0x753   :  { %v3589_v18 = vpop.f32.mrb[64].mxu0  ;;  %6070 = vmatprep.subr.bf16.mxu1 %v6025_v15  ;;  %v15168_v43 = vld [vmem:[%s24858_s13 + $0x1164] sm:$0x11] }
 0x754   :  { %v21260_v57 = vadd.f32 %v3589_v18, %v20901_v39  ;;  %v4340_v19 = vpop.f32.mrb[52].mxu1  ;;  %v3591_v17 = vpop.f32.mrb[65].mxu0  ;;  %v6034_v15 = vand.u32 %v15265_v52, %v19619_v61  ;;  %v17712_v18 = vld [vmem:[%s24858_s13 + $0xec0] ss:$44 sps:$4 sm:$0xff]   ;;  %v17751_v52 = vld [vmem:[%s24858_s13 + $0x1110] ss:$44 sps:$4 sm:$0xff]  }
 0x755   :  { %v21263_v24 = vadd.f32 %v4340_v19, %v20904_v2  ;;  %v21266_v25 = vadd.f32 %v3591_v17, %v20907_v3  ;;  %v4342_v27 = vpop.f32.mrb[53].mxu1  ;;  %v3593_v28 = vpop.f32.mrb[66].mxu0  ;;  %5320 = vmatpush1.bf16.msra.mxu0 %v5166_v51  ;;  %v17672_v2 = vld [vmem:[%s24858_s13 + $0xeac] ss:$44 sps:$4 sm:$0xff]   ;;  %v17709_v51 = vld [vmem:[%s24858_s13 + $0xea8] ss:$44 sps:$4 sm:$0xff]  }
 0x756   :  { %v21272_v30 = vadd.f32 %v4342_v27, %v20913_v9  ;;  %v4344_v39 = vpop.f32.mrb[54].mxu1  ;;  %6071 = vmatpush1.bf16.msra.mxu1 %v6022_v38  ;;  %v3594_v32 = vpop.f32.mrb[67].mxu0  ;;  %5385 = vmatprep.subr.bf16.mxu0 %v19144_v60  ;;  %v17678_v9 = vld [vmem:[%s24858_s13 + $0xf08] ss:$44 sps:$4 sm:$0xff]  }
 0x757   :  { %v4345_v3 = vpop.f32.mrb[55].mxu1  ;;  %6136 = vmatprep.subr.bf16.mxu1 %v17674_v40  ;;  %v17707_v39 = vld [vmem:[%s24858_s13 + $0xea4] ss:$44 sps:$4 sm:$0xff]  }
 0x758   :  { %5336 = vmatmul.mubr.bf16.vlgmr.msra.gmra.mrb[88].mxu0 %v20920_v12 }
 0x759   :  { %6087 = vmatmul.mubr.bf16.vlgmr.msra.gmra.mrb[76].mxu1 %v21279_v33  ;;  %5386 = vmatpush1.bf16.msra.mxu0 %v17675_v29 }
 0x75a   :  { %15070 = vmatprep.mubr.msk.bf16.mxu0 %vm1771_vm14, %v20803_v1  ;;  %6137 = vmatpush1.bf16.msra.mxu1 %v17672_v2  ;;  %v17683_v1 = vld [vmem:[%s24858_s13 + $0xc88] ss:$44 sps:$4 sm:$0xff]  }
 0x75b   :  { %15274 = vmatprep.mubr.msk.bf16.mxu1 %vm1771_vm14, %v21162_v20  ;;  %5387 = vmatprep.subr.bf16.mxu0 %v19144_v60 }
 0x75c   :  { %6138 = vmatprep.subr.bf16.mxu1 %v17678_v9  ;;  %v17715_v9 = vld [vmem:[%s24858_s13 + $0xf00] ss:$44 sps:$4 sm:$0xff]  }
 0x75d   :  { %5388 = vmatpush1.bf16.msra.mxu0 %v17679_v36  ;;  %v17713_v36 = vld [vmem:[%s24858_s13 + $0xefc] ss:$44 sps:$4 sm:$0xff]  }
 0x75e   :  { %6139 = vmatpush1.bf16.msra.mxu1 %v17676_v45  ;;  %5389 = vmatprep.subr.bf16.mxu0 %v19144_v60  ;;  %v17716_v45 = vld [vmem:[%s24858_s13 + $0xf14] ss:$44 sps:$4 sm:$0xff]  }
 0x75f   :  { %6140 = vmatprep.subr.bf16.mxu1 %v17682_v48  ;;  %v17724_v48 = vld [vmem:[%s24858_s13 + $0xf70] ss:$44 sps:$4 sm:$0xff]  }
 0x761   :  { %5390 = vmatpush1.bf16.msra.mxu0 %v17683_v1  ;;  %v17719_v1 = vld [vmem:[%s24858_s13 + $0xf54] ss:$44 sps:$4 sm:$0xff]  }
 0x762   :  { %6141 = vmatpush1.bf16.msra.mxu1 %v17680_v49  ;;  %5391 = vmatprep.subr.bf16.mxu0 %v19144_v60  ;;  %v17722_v49 = vld [vmem:[%s24858_s13 + $0xf6c] ss:$44 sps:$4 sm:$0xff]  }
 0x763   :  { %6142 = vmatprep.subr.bf16.mxu1 %v17686_v53  ;;  %v17727_v53 = vld [vmem:[%s24858_s13 + $0xfb0] ss:$44 sps:$4 sm:$0xff]  }
 0x765   :  { %5392 = vmatpush1.bf16.msra.mxu0 %v17687_v54  ;;  %v17730_v54 = vld [vmem:[%s24858_s13 + $0xfc8] ss:$44 sps:$4 sm:$0xff]  }
 0x766   :  { %6143 = vmatpush1.bf16.msra.mxu1 %v17684_v37  ;;  %5393 = vmatprep.subr.bf16.mxu0 %v19144_v60  ;;  %v17725_v37 = vld [vmem:[%s24858_s13 + $0xfac] ss:$44 sps:$4 sm:$0xff]  }
 0x767   :  { %6144 = vmatprep.subr.bf16.mxu1 %v17690_v55  ;;  %v17728_v55 = vld [vmem:[%s24858_s13 + $0xfc4] ss:$44 sps:$4 sm:$0xff]  }
 0x769   :  { %5394 = vmatpush1.bf16.msra.mxu0 %v17691_v41  ;;  %v17733_v41 = vld [vmem:[%s24858_s13 + $0x1008] ss:$44 sps:$4 sm:$0xff]  }
 0x76a   :  { %6145 = vmatpush1.bf16.msra.mxu1 %v17688_v63  ;;  %5395 = vmatprep.subr.bf16.mxu0 %v19144_v60  ;;  %v17736_v63 = vld [vmem:[%s24858_s13 + $0x1020] ss:$44 sps:$4 sm:$0xff]  }
 0x76b   :  { %6146 = vmatprep.subr.bf16.mxu1 %v17694_v58  ;;  %v17731_v58 = vld [vmem:[%s24858_s13 + $0x1004] ss:$44 sps:$4 sm:$0xff]  }
 0x76d   :  { %5396 = vmatpush1.bf16.msra.mxu0 %v17695_v59  ;;  %v17734_v59 = vld [vmem:[%s24858_s13 + $0x101c] ss:$44 sps:$4 sm:$0xff]  }
 0x76e   :  { %6147 = vmatpush1.bf16.msra.mxu1 %v17692_v35  ;;  %5397 = vmatprep.subr.bf16.mxu0 %v19144_v60  ;;  %v17739_v35 = vld [vmem:[%s24858_s13 + $0x1060] ss:$44 sps:$4 sm:$0xff]  }
 0x76f   :  { %6148 = vmatprep.subr.bf16.mxu1 %v17698_v62  ;;  %v17742_v62 = vld [vmem:[%s24858_s13 + $0x1078] ss:$44 sps:$4 sm:$0xff]  }
 0x771   :  { %5398 = vmatpush1.bf16.msra.mxu0 %v17699_v42  ;;  %v17740_v42 = vld [vmem:[%s24858_s13 + $0x1074] ss:$44 sps:$4 sm:$0xff]  }
 0x772   :  { %6149 = vmatpush1.bf16.msra.mxu1 %v17696_v5  ;;  %5399 = vmatprep.subr.bf16.mxu0 %v19144_v60  ;;  %v17745_v5 = vld [vmem:[%s24858_s13 + $0x10b8] ss:$44 sps:$4 sm:$0xff]  }
 0x773   :  { %6150 = vmatprep.subr.bf16.mxu1 %v17702_v6  ;;  %v17748_v6 = vld [vmem:[%s24858_s13 + $0x10d0] ss:$44 sps:$4 sm:$0xff]  }
 0x775   :  { %5400 = vmatpush1.bf16.msra.mxu0 %v17703_v46  ;;  %v15171_v46 = vld [vmem:[%s24858_s13 + $0x117c] sm:$0x11] }
 0x776   :  { %6151 = vmatpush1.bf16.msra.mxu1 %v17700_v31  ;;  %5401 = vmatprep.subr.bf16.mxu0 %v19144_v60  ;;  %v17746_v31 = vld [vmem:[%s24858_s13 + $0x10cc] ss:$44 sps:$4 sm:$0xff]  }
 0x777   :  { %v3671_v38 = vpop.f32.mrb[68].mxu0  ;;  %6152 = vmatprep.subr.bf16.mxu1 %v6037_v50  ;;  %v15264_v50 = vcombine.high %v15168_v43, %v15168_v43 }
 0x778   :  { %v21374_v40 = vadd.f32 %v3671_v38, %v21015_v34  ;;  %v4422_v19 = vpop.f32.mrb[56].mxu1  ;;  %v3673_v17 = vpop.f32.mrb[69].mxu0  ;;  %v17710_v34 = vld [vmem:[%s24858_s13 + $0xebc] ss:$44 sps:$4 sm:$0xff]   ;;  %v15263_v38 = vcombine.low %v15168_v43, %v15168_v43  ;;  %v17788_v43 = vld [vmem:[%s24858_s13 + $0x12ec] ss:$44 sps:$4 sm:$0xff]  }
 0x779   :  { %v21377_v27 = vadd.f32 %v4422_v19, %v21018_v4  ;;  %v4424_v28 = vpop.f32.mrb[57].mxu1  ;;  %v3674_v29 = vpop.f32.mrb[70].mxu0  ;;  %5402 = vmatpush1.bf16.msra.mxu0 %v5178_v56  ;;  %v17754_v56 = vld [vmem:[%s24858_s13 + $0x1128] ss:$44 sps:$4 sm:$0xff]   ;;  %v6031_v19 = vand.u32 %v15264_v50, %v19619_v61  ;;  %v15269_v17 = vcombine.low %v15171_v46, %v15171_v46  ;;  %v17789_v50 = vld [vmem:[%s24858_s13 + $0x106c] ss:$44 sps:$4 sm:$0xff]  }
 0x77a   :  { %v21383_v32 = vadd.f32 %v4424_v28, %v21024_v11  ;;  %v4426_v2 = vpop.f32.mrb[58].mxu1  ;;  %6153 = vmatpush1.bf16.msra.mxu1 %v6034_v15  ;;  %v3675_v3 = vpop.f32.mrb[71].mxu0  ;;  %6095 = vmatprep.subr.bf16.mxu0 %v17709_v51  ;;  %v17718_v11 = vld [vmem:[%s24858_s13 + $0xf18] ss:$44 sps:$4 sm:$0xff]   ;;  %v15270_v15 = vcombine.high %v15171_v46, %v15171_v46  ;;  %v6028_v29 = vand.u32 %v15263_v38, %v19619_v61  ;;  %v17783_v46 = vld [vmem:[%s24858_s13 + $0x1014] ss:$44 sps:$4 sm:$0xff]  }
 0x77b   :  { %v4427_v4 = vpop.f32.mrb[59].mxu1  ;;  %6218 = vmatprep.subr.bf16.mxu1 %v17712_v18  ;;  %v17749_v51 = vld [vmem:[%s24858_s13 + $0x110c] ss:$44 sps:$4 sm:$0xff]   ;;  %v17752_v18 = vld [vmem:[%s24858_s13 + $0x1124] ss:$44 sps:$4 sm:$0xff]  }
 0x77c   :  { %5418 = vmatmul.mubr.bf16.vlgmr.msra.gmra.mrb[92].mxu0 %v20920_v12  ;;  %v17721_v12 = vld [vmem:[%s24858_s13 + $0xf58] ss:$44 sps:$4 sm:$0xff]   ;;  %v6049_v28 = vand.u32 %v15270_v15, %v19619_v61  ;;  %v17797_v15 = vld [vmem:[%s24858_s13 + $0x10c8] ss:$44 sps:$4 sm:$0xff]  }
 0x77d   :  { %6169 = vmatmul.mubr.bf16.vlgmr.msra.gmra.mrb[80].mxu1 %v21279_v33  ;;  %6096 = vmatpush1.bf16.msra.mxu0 %v17707_v39  ;;  %v6046_v39 = vand.u32 %v15269_v17, %v19619_v61  ;;  %v17761_v2 = vld [vmem:[%s24858_s13 + $0xeb8] ss:$44 sps:$4 sm:$0xff]  }
 0x77e   :  { %15273 = vmatprep.mubr.msk.bf16.mxu0 %vm1771_vm14, %v21162_v20  ;;  %6219 = vmatpush1.bf16.msra.mxu1 %v17710_v34  ;;  %v17764_v34 = vld [vmem:[%s24858_s13 + $0x118c] ss:$44 sps:$4 sm:$0xff]  }
 0x77f   :  { %15276 = vmatprep.mubr.msk.bf16.mxu1 %vm1771_vm14, %v21162_v20  ;;  %6097 = vmatprep.subr.bf16.mxu0 %v17715_v9  ;;  %v15170_v38 = vld [vmem:[%s24858_s13 + $0x1174] sm:$0x11] }
 0x780   :  { %6220 = vmatprep.subr.bf16.mxu1 %v17718_v11  ;;  %v17798_v17 = vld [vmem:[%s24858_s13 + $0x1398] ss:$44 sps:$4 sm:$0xff]  }
 0x781   :  { %6098 = vmatpush1.bf16.msra.mxu0 %v17713_v36 }
 0x782   :  { %6221 = vmatpush1.bf16.msra.mxu1 %v17716_v45  ;;  %6099 = vmatprep.subr.bf16.mxu0 %v17721_v12 }
 0x783   :  { %6222 = vmatprep.subr.bf16.mxu1 %v17724_v48 }
 0x785   :  { %6100 = vmatpush1.bf16.msra.mxu0 %v17719_v1  ;;  %v17759_v1 = vld [vmem:[%s24858_s13 + $0xeb4] ss:$44 sps:$4 sm:$0xff]  }
 0x786   :  { %6223 = vmatpush1.bf16.msra.mxu1 %v17722_v49  ;;  %6101 = vmatprep.subr.bf16.mxu0 %v17727_v53 }
 0x787   :  { %6224 = vmatprep.subr.bf16.mxu1 %v17730_v54  ;;  %v17767_v54 = vld [vmem:[%s24858_s13 + $0xf10] ss:$44 sps:$4 sm:$0xff]  }
 0x789   :  { %6102 = vmatpush1.bf16.msra.mxu0 %v17725_v37  ;;  %v21521_v37 = vrot.slane %v19646_v22, 3 }
 0x78a   :  { %6225 = vmatpush1.bf16.msra.mxu1 %v17728_v55  ;;  %6103 = vmatprep.subr.bf16.mxu0 %v17733_v41  ;;  %v17765_v55 = vld [vmem:[%s24858_s13 + $0xf0c] ss:$44 sps:$4 sm:$0xff]  }
 0x78b   :  { %6226 = vmatprep.subr.bf16.mxu1 %v17736_v63  ;;  %v17768_v41 = vld [vmem:[%s24858_s13 + $0x11e0] ss:$44 sps:$4 sm:$0xff]   ;;  %v17773_v63 = vld [vmem:[%s24858_s13 + $0xf68] ss:$44 sps:$4 sm:$0xff]  }
 0x78d   :  { %6104 = vmatpush1.bf16.msra.mxu0 %v17731_v58  ;;  %v17776_v58 = vld [vmem:[%s24858_s13 + $0x123c] ss:$44 sps:$4 sm:$0xff]  }
 0x78e   :  { %6227 = vmatpush1.bf16.msra.mxu1 %v17734_v59  ;;  %6105 = vmatprep.subr.bf16.mxu0 %v17739_v35  ;;  %v17771_v59 = vld [vmem:[%s24858_s13 + $0xf64] ss:$44 sps:$4 sm:$0xff]  }
 0x78f   :  { %6228 = vmatprep.subr.bf16.mxu1 %v17742_v62  ;;  %v17774_v35 = vld [vmem:[%s24858_s13 + $0x1238] ss:$44 sps:$4 sm:$0xff]   ;;  %v17779_v62 = vld [vmem:[%s24858_s13 + $0xfc0] ss:$44 sps:$4 sm:$0xff]  }
 0x791   :  { %6106 = vmatpush1.bf16.msra.mxu0 %v17737_v0  ;;  %v17782_v0 = vld [vmem:[%s24858_s13 + $0x1294] ss:$44 sps:$4 sm:$0xff]  }
 0x792   :  { %6229 = vmatpush1.bf16.msra.mxu1 %v17740_v42  ;;  %6107 = vmatprep.subr.bf16.mxu0 %v17745_v5  ;;  %v17777_v42 = vld [vmem:[%s24858_s13 + $0xfbc] ss:$44 sps:$4 sm:$0xff]  }
 0x793   :  { %6230 = vmatprep.subr.bf16.mxu1 %v17748_v6  ;;  %v17780_v5 = vld [vmem:[%s24858_s13 + $0x1290] ss:$44 sps:$4 sm:$0xff]   ;;  %v17785_v6 = vld [vmem:[%s24858_s13 + $0x1018] ss:$44 sps:$4 sm:$0xff]  }
 0x795   :  { %6108 = vmatpush1.bf16.msra.mxu0 %v17743_v47  ;;  %v17786_v47 = vld [vmem:[%s24858_s13 + $0x12e8] ss:$44 sps:$4 sm:$0xff]  }
 0x796   :  { %6231 = vmatpush1.bf16.msra.mxu1 %v17746_v31  ;;  %6109 = vmatprep.subr.bf16.mxu0 %v17751_v52  ;;  %v17791_v31 = vld [vmem:[%s24858_s13 + $0x1070] ss:$44 sps:$4 sm:$0xff]  }
 0x797   :  { %6232 = vmatprep.subr.bf16.mxu1 %v17754_v56  ;;  %v17794_v52 = vld [vmem:[%s24858_s13 + $0x1344] ss:$44 sps:$4 sm:$0xff]   ;;  %v17792_v56 = vld [vmem:[%s24858_s13 + $0x1340] ss:$44 sps:$4 sm:$0xff]  }
 0x799   :  { %6110 = vmatpush1.bf16.msra.mxu0 %v17749_v51  ;;  %v17800_v51 = vld [vmem:[%s24858_s13 + $0x139c] ss:$44 sps:$4 sm:$0xff]  }
 0x79a   :  { %6233 = vmatpush1.bf16.msra.mxu1 %v17752_v18  ;;  %6111 = vmatprep.subr.bf16.mxu0 %v6031_v19  ;;  %v15374_v18 = vld [vmem:[%s24858_s13 + $0x1448] sm:$0x11]  ;;  %v17795_v19 = vld [vmem:[%s24858_s13 + $0x10c4] ss:$44 sps:$4 sm:$0xff]  }
 0x79b   :  { %v4381_v3 = vpop.f32.mrb[72].mxu0  ;;  %6234 = vmatprep.subr.bf16.mxu1 %v6049_v28  ;;  %v17803_v28 = vld [vmem:[%s24858_s13 + $0x1120] ss:$44 sps:$4 sm:$0xff]  }
 0x79c   :  { %v21495_v4 = vadd.f32 %v4381_v3, %v21136_v44  ;;  %v4504_v9 = vpop.f32.mrb[60].mxu1  ;;  %v4383_v11 = vpop.f32.mrb[73].mxu0  ;;  %v17801_v3 = vld [vmem:[%s24858_s13 + $0x111c] ss:$44 sps:$4 sm:$0xff]  }
 0x79d   :  { %v21498_v36 = vadd.f32 %v4504_v9, %v21139_v13  ;;  %v21501_v45 = vadd.f32 %v4383_v11, %v21142_v14  ;;  %v4506_v12 = vpop.f32.mrb[61].mxu1  ;;  %v4385_v48 = vpop.f32.mrb[74].mxu0  ;;  %6112 = vmatpush1.bf16.msra.mxu0 %v6028_v29  ;;  %v17762_v13 = vld [vmem:[%s24858_s13 + $0x1188] ss:$44 sps:$4 sm:$0xff]   ;;  %v15268_v29 = vcombine.high %v15170_v38, %v15170_v38  ;;  %v17804_v9 = vld [vmem:[%s24858_s13 + $0x13f0] ss:$44 sps:$4 sm:$0xff]  }
 0x79e   :  { %v21507_v49 = vadd.f32 %v4506_v12, %v21148_v16  ;;  %v4508_v44 = vpop.f32.mrb[62].mxu1  ;;  %6235 = vmatpush1.bf16.msra.mxu1 %v6046_v39  ;;  %v4386_v53 = vpop.f32.mrb[75].mxu0  ;;  %6177 = vmatprep.subr.bf16.mxu0 %v17761_v2  ;;  %v17770_v16 = vld [vmem:[%s24858_s13 + $0x11e4] ss:$44 sps:$4 sm:$0xff]   ;;  %v17806_v39 = vld [vmem:[%s24858_s13 + $0x13f4] ss:$44 sps:$4 sm:$0xff]   ;;  %v15469_v2 = vcombine.high %v15374_v18, %v15374_v18  ;;  %v15468_v12 = vcombine.low %v15374_v18, %v15374_v18 }
 0x79f   :  { %v4509_v14 = vpop.f32.mrb[63].mxu1  ;;  %6928 = vmatprep.subr.bf16.mxu1 %v17764_v34  ;;  %v15267_v34 = vcombine.low %v15170_v38, %v15170_v38  ;;  %v6043_v11 = vand.u32 %v15268_v29, %v19619_v61  ;;  %v17831_v38 = vld [vmem:[%s24858_s13 + $0x1350] ss:$44 sps:$4 sm:$0xff]   ;;  %v17837_v18 = vld [vmem:[%s24858_s13 + $0x13ac] ss:$44 sps:$4 sm:$0xff]  }
 0x7a0   :  { %6128 = vmatmul.mubr.bf16.vlgmr.msra.gmra.mrb[96].mxu0 %v21279_v33  ;;  %v6899_v48 = vand.u32 %v15469_v2, %v19619_v61  ;;  %v6896_v44 = vand.u32 %v15468_v12, %v19619_v61  ;;  %v17841_v29 = vld [vmem:[%s24858_s13 + $0x1404] ss:$44 sps:$4 sm:$0xff]   ;;  %v17842_v2 = vld [vmem:[%s24858_s13 + $0x112c] ss:$44 sps:$4 sm:$0xff]  }
 0x7a1   :  { %6251 = vmatmul.mubr.bf16.vlgmr.msra.gmra.mrb[84].mxu1 %v21279_v33  ;;  %6178 = vmatpush1.bf16.msra.mxu0 %v17759_v1  ;;  %v6040_v1 = vand.u32 %v15267_v34, %v19619_v61  ;;  %v17839_v34 = vld [vmem:[%s24858_s13 + $0x1400] ss:$44 sps:$4 sm:$0xff]  }
 0x7a2   :  { %15275 = vmatprep.mubr.msk.bf16.mxu0 %vm1771_vm14, %v21162_v20  ;;  %6929 = vmatpush1.bf16.msra.mxu1 %v17762_v13  ;;  %v17813_v13 = vld [vmem:[%s24858_s13 + $0x119c] ss:$44 sps:$4 sm:$0xff]  }
 0x7a3   :  { %15479 = vmatprep.mubr.msk.bf16.mxu1 %vm1771_vm14, %v21521_v37  ;;  %6179 = vmatprep.subr.bf16.mxu0 %v17767_v54 }
 0x7a4   :  { %6930 = vmatprep.subr.bf16.mxu1 %v17770_v16 }
 0x7a5   :  { %6180 = vmatpush1.bf16.msra.mxu0 %v17765_v55 }
 0x7a6   :  { %6931 = vmatpush1.bf16.msra.mxu1 %v17768_v41  ;;  %6181 = vmatprep.subr.bf16.mxu0 %v17773_v63 }
 0x7a7   :  { %6932 = vmatprep.subr.bf16.mxu1 %v17776_v58 }
 0x7a9   :  { %6182 = vmatpush1.bf16.msra.mxu0 %v17771_v59  ;;  %v17814_v59 = vld [vmem:[%s24858_s13 + $0xec4] ss:$44 sps:$4 sm:$0xff]  }
 0x7aa   :  { %6933 = vmatpush1.bf16.msra.mxu1 %v17774_v35  ;;  %6183 = vmatprep.subr.bf16.mxu0 %v17779_v62 }
 0x7ab   :  { %6934 = vmatprep.subr.bf16.mxu1 %v17782_v0  ;;  %v21638_v0 = vrot.slane %v19644_v21, 3 }
 0x7ad   :  { %6184 = vmatpush1.bf16.msra.mxu0 %v17777_v42  ;;  %v17818_v42 = vld [vmem:[%s24858_s13 + $0xf1c] ss:$44 sps:$4 sm:$0xff]  }
 0x7ae   :  { %6935 = vmatpush1.bf16.msra.mxu1 %v17780_v5  ;;  %6185 = vmatprep.subr.bf16.mxu0 %v17785_v6  ;;  %v17815_v5 = vld [vmem:[%s24858_s13 + $0x11f0] ss:$44 sps:$4 sm:$0xff]   ;;  %v17821_v6 = vld [vmem:[%s24858_s13 + $0x124c] ss:$44 sps:$4 sm:$0xff]  }
 0x7af   :  { %6936 = vmatprep.subr.bf16.mxu1 %v17788_v43  ;;  %v17819_v43 = vld [vmem:[%s24858_s13 + $0x1248] ss:$44 sps:$4 sm:$0xff]  }
 0x7b1   :  { %6186 = vmatpush1.bf16.msra.mxu0 %v17783_v46  ;;  %v17825_v46 = vld [vmem:[%s24858_s13 + $0x12a4] ss:$44 sps:$4 sm:$0xff]  }
 0x7b2   :  { %6937 = vmatpush1.bf16.msra.mxu1 %v17786_v47  ;;  %6187 = vmatprep.subr.bf16.mxu0 %v17791_v31  ;;  %v17826_v47 = vld [vmem:[%s24858_s13 + $0xfcc] ss:$44 sps:$4 sm:$0xff]  }
 0x7b3   :  { %6938 = vmatprep.subr.bf16.mxu1 %v17794_v52  ;;  %v17823_v31 = vld [vmem:[%s24858_s13 + $0x12a0] ss:$44 sps:$4 sm:$0xff]   ;;  %v17829_v52 = vld [vmem:[%s24858_s13 + $0x12fc] ss:$44 sps:$4 sm:$0xff]  }
 0x7b5   :  { %6188 = vmatpush1.bf16.msra.mxu0 %v17789_v50  ;;  %v17830_v50 = vld [vmem:[%s24858_s13 + $0x1024] ss:$44 sps:$4 sm:$0xff]  }
 0x7b6   :  { %6939 = vmatpush1.bf16.msra.mxu1 %v17792_v56  ;;  %6189 = vmatprep.subr.bf16.mxu0 %v17797_v15  ;;  %v17827_v56 = vld [vmem:[%s24858_s13 + $0x12f8] ss:$44 sps:$4 sm:$0xff]   ;;  %v17833_v15 = vld [vmem:[%s24858_s13 + $0x1354] ss:$44 sps:$4 sm:$0xff]  }
 0x7b7   :  { %6940 = vmatprep.subr.bf16.mxu1 %v17800_v51  ;;  %v17834_v51 = vld [vmem:[%s24858_s13 + $0x107c] ss:$44 sps:$4 sm:$0xff]  }
 0x7b9   :  { %6190 = vmatpush1.bf16.msra.mxu0 %v17795_v19  ;;  %v15376_v19 = vld [vmem:[%s24858_s13 + $0x1458] sm:$0x11] }
 0x7ba   :  { %6941 = vmatpush1.bf16.msra.mxu1 %v17798_v17  ;;  %6191 = vmatprep.subr.bf16.mxu0 %v17803_v28  ;;  %v17838_v17 = vld [vmem:[%s24858_s13 + $0x10d4] ss:$44 sps:$4 sm:$0xff]  }
 0x7bb   :  { %6942 = vmatprep.subr.bf16.mxu1 %v17806_v39  ;;  %v17835_v28 = vld [vmem:[%s24858_s13 + $0x13a8] ss:$44 sps:$4 sm:$0xff]   ;;  %v15473_v39 = vcombine.high %v15376_v19, %v15376_v19 }
 0x7bd   :  { %6192 = vmatpush1.bf16.msra.mxu0 %v17801_v3  ;;  %v17845_v3 = vld [vmem:[%s24858_s13 + $0x1184] ss:$0 sps:$4 sm:$0x11]  }
 0x7be   :  { %6943 = vmatpush1.bf16.msra.mxu1 %v17804_v9  ;;  %6193 = vmatprep.subr.bf16.mxu0 %v6043_v11  ;;  %v15472_v9 = vcombine.low %v15376_v19, %v15376_v19  ;;  %v6911_v11 = vand.u32 %v15473_v39, %v19619_v61  ;;  %v6052_v12 = vand.u32 %v17845_v3, %v19619_v61  ;;  %v17876_v19 = vld [vmem:[%s24858_s13 + $0x1348] ss:$44 sps:$4 sm:$0xff]   ;;  %v17882_v3 = vld [vmem:[%s24858_s13 + $0x13a0] ss:$44 sps:$4 sm:$0xff]  }
 0x7bf   :  { %v4463_v53 = vpop.f32.mrb[76].mxu0  ;;  %6944 = vmatprep.subr.bf16.mxu1 %v6899_v48  ;;  %v15375_v39 = vld [vmem:[%s24858_s13 + $0x1450] sm:$0x11] }
 0x7c0   :  { %v21619_v14 = vadd.f32 %v4463_v53, %v21260_v57  ;;  %v5214_v54 = vpop.f32.mrb[64].mxu1  ;;  %v4465_v16 = vpop.f32.mrb[77].mxu0  ;;  %v6908_v48 = vand.u32 %v15472_v9, %v19619_v61  ;;  %v17851_v53 = vld [vmem:[%s24858_s13 + $0x11ac] ss:$44 sps:$4 sm:$0xff]   ;;  %v17890_v9 = vld [vmem:[%s24858_s13 + $0x13fc] ss:$44 sps:$4 sm:$0xff]  }
 0x7c1   :  { %v21622_v55 = vadd.f32 %v5214_v54, %v21263_v24  ;;  %v21625_v41 = vadd.f32 %v4465_v16, %v21266_v25  ;;  %v5216_v63 = vpop.f32.mrb[65].mxu1  ;;  %v4467_v58 = vpop.f32.mrb[78].mxu0  ;;  %6194 = vmatpush1.bf16.msra.mxu0 %v6040_v1  ;;  %v17811_v24 = vld [vmem:[%s24858_s13 + $0x1198] ss:$44 sps:$4 sm:$0xff]   ;;  %v17848_v1 = vld [vmem:[%s24858_s13 + $0x1194] ss:$44 sps:$4 sm:$0xff]  }
 0x7c2   :  { %v21631_v35 = vadd.f32 %v5216_v63, %v21272_v30  ;;  %v5218_v57 = vpop.f32.mrb[66].mxu1  ;;  %6945 = vmatpush1.bf16.msra.mxu1 %v6896_v44  ;;  %v4468_v62 = vpop.f32.mrb[79].mxu0  ;;  %6259 = vmatprep.subr.bf16.mxu0 %v19144_v60  ;;  %v17817_v30 = vld [vmem:[%s24858_s13 + $0x11f4] ss:$44 sps:$4 sm:$0xff]  }
 0x7c3   :  { %v5219_v25 = vpop.f32.mrb[67].mxu1  ;;  %7010 = vmatprep.subr.bf16.mxu1 %v17813_v13  ;;  %v17846_v57 = vld [vmem:[%s24858_s13 + $0x1190] ss:$44 sps:$4 sm:$0xff]  }
 0x7c4   :  { %6210 = vmatmul.mubr.bf16.vlgmr.msra.gmra.mrb[100].mxu0 %v21279_v33 }
 0x7c5   :  { %6961 = vmatmul.mubr.bf16.vlgmr.msra.gmra.mrb[88].mxu1 %v21638_v0  ;;  %6260 = vmatpush1.bf16.msra.mxu0 %v17814_v59 }
 0x7c6   :  { %15277 = vmatprep.mubr.msk.bf16.mxu0 %vm1771_vm14, %v21162_v20  ;;  %7011 = vmatpush1.bf16.msra.mxu1 %v17811_v24  ;;  %v17822_v20 = vld [vmem:[%s24858_s13 + $0xf74] ss:$44 sps:$4 sm:$0xff]  }
 0x7c7   :  { %15481 = vmatprep.mubr.msk.bf16.mxu1 %vm1771_vm14, %v21521_v37  ;;  %6261 = vmatprep.subr.bf16.mxu0 %v19144_v60 }
 0x7c8   :  { %7012 = vmatprep.subr.bf16.mxu1 %v17817_v30  ;;  %v17854_v30 = vld [vmem:[%s24858_s13 + $0x11ec] ss:$44 sps:$4 sm:$0xff]  }
 0x7c9   :  { %6262 = vmatpush1.bf16.msra.mxu0 %v17818_v42  ;;  %v17852_v42 = vld [vmem:[%s24858_s13 + $0x11e8] ss:$44 sps:$4 sm:$0xff]  }
 0x7ca   :  { %7013 = vmatpush1.bf16.msra.mxu1 %v17815_v5  ;;  %6263 = vmatprep.subr.bf16.mxu0 %v19144_v60  ;;  %v17855_v5 = vld [vmem:[%s24858_s13 + $0x1200] ss:$44 sps:$4 sm:$0xff]  }
 0x7cb   :  { %7014 = vmatprep.subr.bf16.mxu1 %v17821_v6  ;;  %v17863_v6 = vld [vmem:[%s24858_s13 + $0x125c] ss:$44 sps:$4 sm:$0xff]  }
 0x7cd   :  { %6264 = vmatpush1.bf16.msra.mxu0 %v17822_v20  ;;  %v17858_v20 = vld [vmem:[%s24858_s13 + $0x1240] ss:$44 sps:$4 sm:$0xff]  }
 0x7ce   :  { %7015 = vmatpush1.bf16.msra.mxu1 %v17819_v43  ;;  %6265 = vmatprep.subr.bf16.mxu0 %v19144_v60  ;;  %v17861_v43 = vld [vmem:[%s24858_s13 + $0x1258] ss:$44 sps:$4 sm:$0xff]  }
 0x7cf   :  { %7016 = vmatprep.subr.bf16.mxu1 %v17825_v46  ;;  %v17866_v46 = vld [vmem:[%s24858_s13 + $0x129c] ss:$44 sps:$4 sm:$0xff]  }
 0x7d1   :  { %6266 = vmatpush1.bf16.msra.mxu0 %v17826_v47  ;;  %v17869_v47 = vld [vmem:[%s24858_s13 + $0x12b4] ss:$44 sps:$4 sm:$0xff]  }
 0x7d2   :  { %7017 = vmatpush1.bf16.msra.mxu1 %v17823_v31  ;;  %6267 = vmatprep.subr.bf16.mxu0 %v19144_v60  ;;  %v17864_v31 = vld [vmem:[%s24858_s13 + $0x1298] ss:$44 sps:$4 sm:$0xff]  }
 0x7d3   :  { %7018 = vmatprep.subr.bf16.mxu1 %v17829_v52  ;;  %v17867_v52 = vld [vmem:[%s24858_s13 + $0x12b0] ss:$44 sps:$4 sm:$0xff]  }
 0x7d5   :  { %6268 = vmatpush1.bf16.msra.mxu0 %v17830_v50  ;;  %v17872_v50 = vld [vmem:[%s24858_s13 + $0x12f4] ss:$44 sps:$4 sm:$0xff]  }
 0x7d6   :  { %7019 = vmatpush1.bf16.msra.mxu1 %v17827_v56  ;;  %6269 = vmatprep.subr.bf16.mxu0 %v19144_v60  ;;  %v17875_v56 = vld [vmem:[%s24858_s13 + $0x130c] ss:$44 sps:$4 sm:$0xff]  }
 0x7d7   :  { %7020 = vmatprep.subr.bf16.mxu1 %v17833_v15  ;;  %v17870_v15 = vld [vmem:[%s24858_s13 + $0x12f0] ss:$44 sps:$4 sm:$0xff]  }
 0x7d9   :  { %6270 = vmatpush1.bf16.msra.mxu0 %v17834_v51  ;;  %v17873_v51 = vld [vmem:[%s24858_s13 + $0x1308] ss:$44 sps:$4 sm:$0xff]  }
 0x7da   :  { %7021 = vmatpush1.bf16.msra.mxu1 %v17831_v38  ;;  %6271 = vmatprep.subr.bf16.mxu0 %v19144_v60  ;;  %v17878_v38 = vld [vmem:[%s24858_s13 + $0x134c] ss:$44 sps:$4 sm:$0xff]  }
 0x7db   :  { %7022 = vmatprep.subr.bf16.mxu1 %v17837_v18  ;;  %v17881_v18 = vld [vmem:[%s24858_s13 + $0x1364] ss:$44 sps:$4 sm:$0xff]  }
 0x7dd   :  { %6272 = vmatpush1.bf16.msra.mxu0 %v17838_v17  ;;  %v17879_v17 = vld [vmem:[%s24858_s13 + $0x1360] ss:$44 sps:$4 sm:$0xff]  }
 0x7de   :  { %7023 = vmatpush1.bf16.msra.mxu1 %v17835_v28  ;;  %6273 = vmatprep.subr.bf16.mxu0 %v19144_v60  ;;  %v17884_v28 = vld [vmem:[%s24858_s13 + $0x13a4] ss:$44 sps:$4 sm:$0xff]  }
 0x7df   :  { %7024 = vmatprep.subr.bf16.mxu1 %v17841_v29  ;;  %v17887_v29 = vld [vmem:[%s24858_s13 + $0x13bc] ss:$44 sps:$4 sm:$0xff]  }
 0x7e1   :  { %6274 = vmatpush1.bf16.msra.mxu0 %v17842_v2  ;;  %v15378_v2 = vld [vmem:[%s24858_s13 + $0x1468] sm:$0x11] }
 0x7e2   :  { %7025 = vmatpush1.bf16.msra.mxu1 %v17839_v34  ;;  %6275 = vmatprep.subr.bf16.mxu0 %v19144_v60  ;;  %v17885_v34 = vld [vmem:[%s24858_s13 + $0x13b8] ss:$44 sps:$4 sm:$0xff]  }
 0x7e3   :  { %v4545_v44 = vpop.f32.mrb[80].mxu0  ;;  %7026 = vmatprep.subr.bf16.mxu1 %v6911_v11  ;;  %v15471_v11 = vcombine.high %v15375_v39, %v15375_v39 }
 0x7e4   :  { %v21733_v13 = vadd.f32 %v4545_v44, %v21374_v40  ;;  %v5296_v54 = vpop.f32.mrb[68].mxu1  ;;  %v4547_v16 = vpop.f32.mrb[81].mxu0  ;;  %v17849_v40 = vld [vmem:[%s24858_s13 + $0x11a8] ss:$44 sps:$4 sm:$0xff]   ;;  %v15470_v44 = vcombine.low %v15375_v39, %v15375_v39  ;;  %v17927_v39 = vld [vmem:[%s24858_s13 + $0x15d8] ss:$44 sps:$4 sm:$0xff]  }
 0x7e5   :  { %v21736_v63 = vadd.f32 %v5296_v54, %v21377_v27  ;;  %v5298_v58 = vpop.f32.mrb[69].mxu1  ;;  %v4548_v59 = vpop.f32.mrb[82].mxu0  ;;  %6276 = vmatpush1.bf16.msra.mxu0 %v6052_v12  ;;  %v17893_v12 = vld [vmem:[%s24858_s13 + $0x1414] ss:$44 sps:$4 sm:$0xff]   ;;  %v6905_v54 = vand.u32 %v15471_v11, %v19619_v61  ;;  %v15476_v16 = vcombine.low %v15378_v2, %v15378_v2  ;;  %v17928_v11 = vld [vmem:[%s24858_s13 + $0x1358] ss:$44 sps:$4 sm:$0xff]  }
 0x7e6   :  { %v21742_v62 = vadd.f32 %v5298_v58, %v21383_v32  ;;  %v5300_v24 = vpop.f32.mrb[70].mxu1  ;;  %7027 = vmatpush1.bf16.msra.mxu1 %v6908_v48  ;;  %v4549_v25 = vpop.f32.mrb[83].mxu0  ;;  %6969 = vmatprep.subr.bf16.mxu0 %v17848_v1  ;;  %v17857_v32 = vld [vmem:[%s24858_s13 + $0x1204] ss:$44 sps:$4 sm:$0xff]   ;;  %v15477_v48 = vcombine.high %v15378_v2, %v15378_v2  ;;  %v6902_v59 = vand.u32 %v15470_v44, %v19619_v61  ;;  %v17922_v2 = vld [vmem:[%s24858_s13 + $0x1300] ss:$44 sps:$4 sm:$0xff]  }
 0x7e7   :  { %v5301_v27 = vpop.f32.mrb[71].mxu1  ;;  %7092 = vmatprep.subr.bf16.mxu1 %v17851_v53  ;;  %v17888_v1 = vld [vmem:[%s24858_s13 + $0x13f8] ss:$44 sps:$4 sm:$0xff]   ;;  %v17891_v53 = vld [vmem:[%s24858_s13 + $0x1410] ss:$44 sps:$4 sm:$0xff]  }
 0x7e8   :  { %6292 = vmatmul.mubr.bf16.vlgmr.msra.gmra.mrb[104].mxu0 %v21279_v33  ;;  %v17860_v33 = vld [vmem:[%s24858_s13 + $0x1244] ss:$44 sps:$4 sm:$0xff]   ;;  %v6923_v58 = vand.u32 %v15477_v48, %v19619_v61  ;;  %v17936_v48 = vld [vmem:[%s24858_s13 + $0x13b4] ss:$44 sps:$4 sm:$0xff]  }
 0x7e9   :  { %7043 = vmatmul.mubr.bf16.vlgmr.msra.gmra.mrb[92].mxu1 %v21638_v0  ;;  %6970 = vmatpush1.bf16.msra.mxu0 %v17846_v57  ;;  %v6920_v57 = vand.u32 %v15476_v16, %v19619_v61  ;;  %v17900_v24 = vld [vmem:[%s24858_s13 + $0x11a4] ss:$44 sps:$4 sm:$0xff]  }
 0x7ea   :  { %15480 = vmatprep.mubr.msk.bf16.mxu0 %vm1771_vm14, %v21521_v37  ;;  %7093 = vmatpush1.bf16.msra.mxu1 %v17849_v40  ;;  %v17903_v40 = vld [vmem:[%s24858_s13 + $0x1478] ss:$44 sps:$4 sm:$0xff]  }
 0x7eb   :  { %15483 = vmatprep.mubr.msk.bf16.mxu1 %vm1771_vm14, %v21521_v37  ;;  %6971 = vmatprep.subr.bf16.mxu0 %v17854_v30  ;;  %v15377_v44 = vld [vmem:[%s24858_s13 + $0x1460] sm:$0x11] }
 0x7ec   :  { %7094 = vmatprep.subr.bf16.mxu1 %v17857_v32  ;;  %v17937_v16 = vld [vmem:[%s24858_s13 + $0x1684] ss:$44 sps:$4 sm:$0xff]  }
 0x7ed   :  { %6972 = vmatpush1.bf16.msra.mxu0 %v17852_v42 }
 0x7ee   :  { %7095 = vmatpush1.bf16.msra.mxu1 %v17855_v5  ;;  %6973 = vmatprep.subr.bf16.mxu0 %v17860_v33 }
 0x7ef   :  { %7096 = vmatprep.subr.bf16.mxu1 %v17863_v6 }
 0x7f1   :  { %6974 = vmatpush1.bf16.msra.mxu0 %v17858_v20  ;;  %v17898_v20 = vld [vmem:[%s24858_s13 + $0x11a0] ss:$44 sps:$4 sm:$0xff]  }
 0x7f2   :  { %7097 = vmatpush1.bf16.msra.mxu1 %v17861_v43  ;;  %6975 = vmatprep.subr.bf16.mxu0 %v17866_v46 }
 0x7f3   :  { %7098 = vmatprep.subr.bf16.mxu1 %v17869_v47  ;;  %v17906_v47 = vld [vmem:[%s24858_s13 + $0x11fc] ss:$44 sps:$4 sm:$0xff]  }
 0x7f5   :  { %6976 = vmatpush1.bf16.msra.mxu0 %v17864_v31  ;;  %v21880_v31 = vrot.slane %v19649_v23, 3 }
 0x7f6   :  { %7099 = vmatpush1.bf16.msra.mxu1 %v17867_v52  ;;  %6977 = vmatprep.subr.bf16.mxu0 %v17872_v50  ;;  %v17904_v52 = vld [vmem:[%s24858_s13 + $0x11f8] ss:$44 sps:$4 sm:$0xff]  }
 0x7f7   :  { %7100 = vmatprep.subr.bf16.mxu1 %v17875_v56  ;;  %v17907_v50 = vld [vmem:[%s24858_s13 + $0x14cc] ss:$44 sps:$4 sm:$0xff]   ;;  %v17912_v56 = vld [vmem:[%s24858_s13 + $0x1254] ss:$44 sps:$4 sm:$0xff]  }
 0x7f9   :  { %6978 = vmatpush1.bf16.msra.mxu0 %v17870_v15  ;;  %v17915_v15 = vld [vmem:[%s24858_s13 + $0x1528] ss:$44 sps:$4 sm:$0xff]  }
 0x7fa   :  { %7101 = vmatpush1.bf16.msra.mxu1 %v17873_v51  ;;  %6979 = vmatprep.subr.bf16.mxu0 %v17878_v38  ;;  %v17910_v51 = vld [vmem:[%s24858_s13 + $0x1250] ss:$44 sps:$4 sm:$0xff]  }
 0x7fb   :  { %7102 = vmatprep.subr.bf16.mxu1 %v17881_v18  ;;  %v17913_v38 = vld [vmem:[%s24858_s13 + $0x1524] ss:$44 sps:$4 sm:$0xff]   ;;  %v17918_v18 = vld [vmem:[%s24858_s13 + $0x12ac] ss:$44 sps:$4 sm:$0xff]  }
 0x7fd   :  { %6980 = vmatpush1.bf16.msra.mxu0 %v17876_v19  ;;  %v17921_v19 = vld [vmem:[%s24858_s13 + $0x1580] ss:$44 sps:$4 sm:$0xff]  }
 0x7fe   :  { %7103 = vmatpush1.bf16.msra.mxu1 %v17879_v17  ;;  %6981 = vmatprep.subr.bf16.mxu0 %v17884_v28  ;;  %v17916_v17 = vld [vmem:[%s24858_s13 + $0x12a8] ss:$44 sps:$4 sm:$0xff]  }
 0x7ff   :  { %7104 = vmatprep.subr.bf16.mxu1 %v17887_v29  ;;  %v17919_v28 = vld [vmem:[%s24858_s13 + $0x157c] ss:$44 sps:$4 sm:$0xff]   ;;  %v17924_v29 = vld [vmem:[%s24858_s13 + $0x1304] ss:$44 sps:$4 sm:$0xff]  }
 0x801   :  { %6982 = vmatpush1.bf16.msra.mxu0 %v17882_v3  ;;  %v17925_v3 = vld [vmem:[%s24858_s13 + $0x15d4] ss:$44 sps:$4 sm:$0xff]  }
 0x802   :  { %7105 = vmatpush1.bf16.msra.mxu1 %v17885_v34  ;;  %6983 = vmatprep.subr.bf16.mxu0 %v17890_v9  ;;  %v17930_v34 = vld [vmem:[%s24858_s13 + $0x135c] ss:$44 sps:$4 sm:$0xff]  }
 0x803   :  { %7106 = vmatprep.subr.bf16.mxu1 %v17893_v12  ;;  %v17933_v9 = vld [vmem:[%s24858_s13 + $0x1630] ss:$44 sps:$4 sm:$0xff]   ;;  %v17931_v12 = vld [vmem:[%s24858_s13 + $0x162c] ss:$44 sps:$4 sm:$0xff]  }
 0x805   :  { %6984 = vmatpush1.bf16.msra.mxu0 %v17888_v1  ;;  %v17939_v1 = vld [vmem:[%s24858_s13 + $0x1688] ss:$44 sps:$4 sm:$0xff]  }
 0x806   :  { %7107 = vmatpush1.bf16.msra.mxu1 %v17891_v53  ;;  %6985 = vmatprep.subr.bf16.mxu0 %v6905_v54  ;;  %v15581_v53 = vld [vmem:[%s24858_s13 + $0x1734] sm:$0x11]  ;;  %v17934_v54 = vld [vmem:[%s24858_s13 + $0x13b0] ss:$44 sps:$4 sm:$0xff]  }
 0x807   :  { %v5255_v25 = vpop.f32.mrb[84].mxu0  ;;  %7108 = vmatprep.subr.bf16.mxu1 %v6923_v58  ;;  %v17942_v58 = vld [vmem:[%s24858_s13 + $0x140c] ss:$44 sps:$4 sm:$0xff]  }
 0x808   :  { %v21854_v27 = vadd.f32 %v5255_v25, %v21495_v4  ;;  %v5378_v30 = vpop.f32.mrb[72].mxu1  ;;  %v5257_v32 = vpop.f32.mrb[85].mxu0  ;;  %v17940_v25 = vld [vmem:[%s24858_s13 + $0x1408] ss:$44 sps:$4 sm:$0xff]  }
 0x809   :  { %v21857_v42 = vadd.f32 %v5378_v30, %v21498_v36  ;;  %v21860_v5 = vadd.f32 %v5257_v32, %v21501_v45  ;;  %v5380_v33 = vpop.f32.mrb[73].mxu1  ;;  %v5259_v6 = vpop.f32.mrb[86].mxu0  ;;  %6986 = vmatpush1.bf16.msra.mxu0 %v6902_v59  ;;  %v17901_v36 = vld [vmem:[%s24858_s13 + $0x1474] ss:$44 sps:$4 sm:$0xff]   ;;  %v15475_v59 = vcombine.high %v15377_v44, %v15377_v44  ;;  %v17943_v30 = vld [vmem:[%s24858_s13 + $0x16dc] ss:$44 sps:$4 sm:$0xff]  }
 0x80a   :  { %v21866_v43 = vadd.f32 %v5380_v33, %v21507_v49  ;;  %v5382_v4 = vpop.f32.mrb[74].mxu1  ;;  %7109 = vmatpush1.bf16.msra.mxu1 %v6920_v57  ;;  %v5260_v46 = vpop.f32.mrb[87].mxu0  ;;  %7051 = vmatprep.subr.bf16.mxu0 %v17900_v24  ;;  %v17909_v49 = vld [vmem:[%s24858_s13 + $0x14d0] ss:$44 sps:$4 sm:$0xff]   ;;  %v17945_v57 = vld [vmem:[%s24858_s13 + $0x16e0] ss:$44 sps:$4 sm:$0xff]   ;;  %v15676_v24 = vcombine.high %v15581_v53, %v15581_v53  ;;  %v15675_v33 = vcombine.low %v15581_v53, %v15581_v53 }
 0x80b   :  { %v5383_v45 = vpop.f32.mrb[75].mxu1  ;;  %7802 = vmatprep.subr.bf16.mxu1 %v17903_v40  ;;  %v15474_v40 = vcombine.low %v15377_v44, %v15377_v44  ;;  %v6917_v32 = vand.u32 %v15475_v59, %v19619_v61  ;;  %v17970_v44 = vld [vmem:[%s24858_s13 + $0x163c] ss:$44 sps:$4 sm:$0xff]   ;;  %v17976_v53 = vld [vmem:[%s24858_s13 + $0x1698] ss:$44 sps:$4 sm:$0xff]  }
 0x80c   :  { %7002 = vmatmul.mubr.bf16.vlgmr.msra.gmra.mrb[108].mxu0 %v21638_v0  ;;  %v7773_v6 = vand.u32 %v15676_v24, %v19619_v61  ;;  %v7770_v4 = vand.u32 %v15675_v33, %v19619_v61  ;;  %v17980_v59 = vld [vmem:[%s24858_s13 + $0x16f0] ss:$44 sps:$4 sm:$0xff]   ;;  %v17981_v24 = vld [vmem:[%s24858_s13 + $0x1418] ss:$44 sps:$4 sm:$0xff]  }
 0x80d   :  { %7125 = vmatmul.mubr.bf16.vlgmr.msra.gmra.mrb[96].mxu1 %v21638_v0  ;;  %7052 = vmatpush1.bf16.msra.mxu0 %v17898_v20  ;;  %v6914_v20 = vand.u32 %v15474_v40, %v19619_v61  ;;  %v17978_v40 = vld [vmem:[%s24858_s13 + $0x16ec] ss:$44 sps:$4 sm:$0xff]  }
 0x80e   :  { %15482 = vmatprep.mubr.msk.bf16.mxu0 %vm1771_vm14, %v21521_v37  ;;  %7803 = vmatpush1.bf16.msra.mxu1 %v17901_v36  ;;  %v17952_v36 = vld [vmem:[%s24858_s13 + $0x1488] ss:$44 sps:$4 sm:$0xff]  }
 0x80f   :  { %15686 = vmatprep.mubr.msk.bf16.mxu1 %vm1771_vm14, %v21880_v31  ;;  %7053 = vmatprep.subr.bf16.mxu0 %v17906_v47 }
 0x810   :  { %7804 = vmatprep.subr.bf16.mxu1 %v17909_v49 }
 0x811   :  { %7054 = vmatpush1.bf16.msra.mxu0 %v17904_v52 }
 0x812   :  { %7805 = vmatpush1.bf16.msra.mxu1 %v17907_v50  ;;  %7055 = vmatprep.subr.bf16.mxu0 %v17912_v56 }
 0x813   :  { %7806 = vmatprep.subr.bf16.mxu1 %v17915_v15 }
 0x815   :  { %7056 = vmatpush1.bf16.msra.mxu0 %v17910_v51  ;;  %v17953_v51 = vld [vmem:[%s24858_s13 + $0x11b0] ss:$44 sps:$4 sm:$0xff]  }
 0x816   :  { %7807 = vmatpush1.bf16.msra.mxu1 %v17913_v38  ;;  %7057 = vmatprep.subr.bf16.mxu0 %v17918_v18 }
 0x817   :  { %7808 = vmatprep.subr.bf16.mxu1 %v17921_v19  ;;  %v21997_v19 = vrot.slane %v19658_v26, 3 }
 0x819   :  { %7058 = vmatpush1.bf16.msra.mxu0 %v17916_v17  ;;  %v17957_v17 = vld [vmem:[%s24858_s13 + $0x1208] ss:$44 sps:$4 sm:$0xff]  }
 0x81a   :  { %7809 = vmatpush1.bf16.msra.mxu1 %v17919_v28  ;;  %7059 = vmatprep.subr.bf16.mxu0 %v17924_v29  ;;  %v17954_v28 = vld [vmem:[%s24858_s13 + $0x14dc] ss:$44 sps:$4 sm:$0xff]   ;;  %v17960_v29 = vld [vmem:[%s24858_s13 + $0x1538] ss:$44 sps:$4 sm:$0xff]  }
 0x81b   :  { %7810 = vmatprep.subr.bf16.mxu1 %v17927_v39  ;;  %v17958_v39 = vld [vmem:[%s24858_s13 + $0x1534] ss:$44 sps:$4 sm:$0xff]  }
 0x81d   :  { %7060 = vmatpush1.bf16.msra.mxu0 %v17922_v2  ;;  %v17964_v2 = vld [vmem:[%s24858_s13 + $0x1590] ss:$44 sps:$4 sm:$0xff]  }
 0x81e   :  { %7811 = vmatpush1.bf16.msra.mxu1 %v17925_v3  ;;  %7061 = vmatprep.subr.bf16.mxu0 %v17930_v34  ;;  %v17965_v3 = vld [vmem:[%s24858_s13 + $0x12b8] ss:$44 sps:$4 sm:$0xff]  }
 0x81f   :  { %7812 = vmatprep.subr.bf16.mxu1 %v17933_v9  ;;  %v17962_v34 = vld [vmem:[%s24858_s13 + $0x158c] ss:$44 sps:$4 sm:$0xff]   ;;  %v17968_v9 = vld [vmem:[%s24858_s13 + $0x15e8] ss:$44 sps:$4 sm:$0xff]  }
 0x821   :  { %7062 = vmatpush1.bf16.msra.mxu0 %v17928_v11  ;;  %v17969_v11 = vld [vmem:[%s24858_s13 + $0x1310] ss:$44 sps:$4 sm:$0xff]  }
 0x822   :  { %7813 = vmatpush1.bf16.msra.mxu1 %v17931_v12  ;;  %7063 = vmatprep.subr.bf16.mxu0 %v17936_v48  ;;  %v17966_v12 = vld [vmem:[%s24858_s13 + $0x15e4] ss:$44 sps:$4 sm:$0xff]   ;;  %v17972_v48 = vld [vmem:[%s24858_s13 + $0x1640] ss:$44 sps:$4 sm:$0xff]  }
 0x823   :  { %7814 = vmatprep.subr.bf16.mxu1 %v17939_v1  ;;  %v17973_v1 = vld [vmem:[%s24858_s13 + $0x1368] ss:$44 sps:$4 sm:$0xff]  }
 0x825   :  { %7064 = vmatpush1.bf16.msra.mxu0 %v17934_v54  ;;  %v15583_v54 = vld [vmem:[%s24858_s13 + $0x1744] sm:$0x11] }
 0x826   :  { %7815 = vmatpush1.bf16.msra.mxu1 %v17937_v16  ;;  %7065 = vmatprep.subr.bf16.mxu0 %v17942_v58  ;;  %v17977_v16 = vld [vmem:[%s24858_s13 + $0x13c0] ss:$44 sps:$4 sm:$0xff]  }
 0x827   :  { %7816 = vmatprep.subr.bf16.mxu1 %v17945_v57  ;;  %v17974_v58 = vld [vmem:[%s24858_s13 + $0x1694] ss:$44 sps:$4 sm:$0xff]   ;;  %v15680_v57 = vcombine.high %v15583_v54, %v15583_v54 }
 0x829   :  { %7066 = vmatpush1.bf16.msra.mxu0 %v17940_v25  ;;  %v17984_v25 = vld [vmem:[%s24858_s13 + $0x1470] ss:$0 sps:$4 sm:$0x11]  }
 0x82a   :  { %7817 = vmatpush1.bf16.msra.mxu1 %v17943_v30  ;;  %7067 = vmatprep.subr.bf16.mxu0 %v6917_v32  ;;  %v15679_v30 = vcombine.low %v15583_v54, %v15583_v54  ;;  %v7785_v32 = vand.u32 %v15680_v57, %v19619_v61  ;;  %v6926_v33 = vand.u32 %v17984_v25, %v19619_v61  ;;  %v18015_v54 = vld [vmem:[%s24858_s13 + $0x1634] ss:$44 sps:$4 sm:$0xff]   ;;  %v18021_v25 = vld [vmem:[%s24858_s13 + $0x168c] ss:$44 sps:$4 sm:$0xff]  }
 0x82b   :  { %v5337_v46 = vpop.f32.mrb[88].mxu0  ;;  %7818 = vmatprep.subr.bf16.mxu1 %v7773_v6  ;;  %v15582_v57 = vld [vmem:[%s24858_s13 + $0x173c] sm:$0x11] }
 0x82c   :  { %v21978_v45 = vadd.f32 %v5337_v46, %v21619_v14  ;;  %v6088_v47 = vpop.f32.mrb[76].mxu1  ;;  %v5339_v49 = vpop.f32.mrb[89].mxu0  ;;  %v7782_v6 = vand.u32 %v15679_v30, %v19619_v61  ;;  %v17990_v46 = vld [vmem:[%s24858_s13 + $0x1498] ss:$44 sps:$4 sm:$0xff]   ;;  %v18029_v30 = vld [vmem:[%s24858_s13 + $0x16e8] ss:$44 sps:$4 sm:$0xff]  }
 0x82d   :  { %v21981_v52 = vadd.f32 %v6088_v47, %v21622_v55  ;;  %v21984_v50 = vadd.f32 %v5339_v49, %v21625_v41  ;;  %v6090_v56 = vpop.f32.mrb[77].mxu1  ;;  %v5341_v15 = vpop.f32.mrb[90].mxu0  ;;  %7068 = vmatpush1.bf16.msra.mxu0 %v6914_v20  ;;  %v17950_v55 = vld [vmem:[%s24858_s13 + $0x1484] ss:$44 sps:$4 sm:$0xff]   ;;  %v17987_v20 = vld [vmem:[%s24858_s13 + $0x1480] ss:$44 sps:$4 sm:$0xff]  }
 0x82e   :  { %v21990_v38 = vadd.f32 %v6090_v56, %v21631_v35  ;;  %v6092_v14 = vpop.f32.mrb[78].mxu1  ;;  %7819 = vmatpush1.bf16.msra.mxu1 %v7770_v4  ;;  %v5342_v18 = vpop.f32.mrb[91].mxu0  ;;  %7133 = vmatprep.subr.bf16.mxu0 %v19144_v60  ;;  %v17956_v35 = vld [vmem:[%s24858_s13 + $0x14e0] ss:$44 sps:$4 sm:$0xff]  }
 0x82f   :  { %v6093_v41 = vpop.f32.mrb[79].mxu1  ;;  %7884 = vmatprep.subr.bf16.mxu1 %v17952_v36  ;;  %v17985_v14 = vld [vmem:[%s24858_s13 + $0x147c] ss:$44 sps:$4 sm:$0xff]  }
 0x830   :  { %7084 = vmatmul.mubr.bf16.vlgmr.msra.gmra.mrb[112].mxu0 %v21638_v0 }
 0x831   :  { %7835 = vmatmul.mubr.bf16.vlgmr.msra.gmra.mrb[100].mxu1 %v21997_v19  ;;  %7134 = vmatpush1.bf16.msra.mxu0 %v17953_v51 }
 0x832   :  { %15484 = vmatprep.mubr.msk.bf16.mxu0 %vm1771_vm14, %v21521_v37  ;;  %7885 = vmatpush1.bf16.msra.mxu1 %v17950_v55  ;;  %v17961_v37 = vld [vmem:[%s24858_s13 + $0x1260] ss:$44 sps:$4 sm:$0xff]  }
 0x833   :  { %15688 = vmatprep.mubr.msk.bf16.mxu1 %vm1771_vm14, %v21880_v31  ;;  %7135 = vmatprep.subr.bf16.mxu0 %v19144_v60 }
 0x834   :  { %7886 = vmatprep.subr.bf16.mxu1 %v17956_v35  ;;  %v17993_v35 = vld [vmem:[%s24858_s13 + $0x14d8] ss:$44 sps:$4 sm:$0xff]  }
 0x835   :  { %7136 = vmatpush1.bf16.msra.mxu0 %v17957_v17  ;;  %v17991_v17 = vld [vmem:[%s24858_s13 + $0x14d4] ss:$44 sps:$4 sm:$0xff]  }
 0x836   :  { %7887 = vmatpush1.bf16.msra.mxu1 %v17954_v28  ;;  %7137 = vmatprep.subr.bf16.mxu0 %v19144_v60  ;;  %v17994_v28 = vld [vmem:[%s24858_s13 + $0x14ec] ss:$44 sps:$4 sm:$0xff]  }
 0x837   :  { %7888 = vmatprep.subr.bf16.mxu1 %v17960_v29  ;;  %v18002_v29 = vld [vmem:[%s24858_s13 + $0x1548] ss:$44 sps:$4 sm:$0xff]  }
 0x839   :  { %7138 = vmatpush1.bf16.msra.mxu0 %v17961_v37  ;;  %v17997_v37 = vld [vmem:[%s24858_s13 + $0x152c] ss:$44 sps:$4 sm:$0xff]  }
 0x83a   :  { %7889 = vmatpush1.bf16.msra.mxu1 %v17958_v39  ;;  %7139 = vmatprep.subr.bf16.mxu0 %v19144_v60  ;;  %v18000_v39 = vld [vmem:[%s24858_s13 + $0x1544] ss:$44 sps:$4 sm:$0xff]  }
 0x83b   :  { %7890 = vmatprep.subr.bf16.mxu1 %v17964_v2  ;;  %v18005_v2 = vld [vmem:[%s24858_s13 + $0x1588] ss:$44 sps:$4 sm:$0xff]  }
 0x83d   :  { %7140 = vmatpush1.bf16.msra.mxu0 %v17965_v3  ;;  %v18008_v3 = vld [vmem:[%s24858_s13 + $0x15a0] ss:$44 sps:$4 sm:$0xff]  }
 0x83e   :  { %7891 = vmatpush1.bf16.msra.mxu1 %v17962_v34  ;;  %7141 = vmatprep.subr.bf16.mxu0 %v19144_v60  ;;  %v18003_v34 = vld [vmem:[%s24858_s13 + $0x1584] ss:$44 sps:$4 sm:$0xff]  }
 0x83f   :  { %7892 = vmatprep.subr.bf16.mxu1 %v17968_v9  ;;  %v18006_v9 = vld [vmem:[%s24858_s13 + $0x159c] ss:$44 sps:$4 sm:$0xff]  }
 0x841   :  { %7142 = vmatpush1.bf16.msra.mxu0 %v17969_v11  ;;  %v18011_v11 = vld [vmem:[%s24858_s13 + $0x15e0] ss:$44 sps:$4 sm:$0xff]  }
 0x842   :  { %7893 = vmatpush1.bf16.msra.mxu1 %v17966_v12  ;;  %7143 = vmatprep.subr.bf16.mxu0 %v19144_v60  ;;  %v18014_v12 = vld [vmem:[%s24858_s13 + $0x15f8] ss:$44 sps:$4 sm:$0xff]  }
 0x843   :  { %7894 = vmatprep.subr.bf16.mxu1 %v17972_v48  ;;  %v18009_v48 = vld [vmem:[%s24858_s13 + $0x15dc] ss:$44 sps:$4 sm:$0xff]  }
 0x845   :  { %7144 = vmatpush1.bf16.msra.mxu0 %v17973_v1  ;;  %v18012_v1 = vld [vmem:[%s24858_s13 + $0x15f4] ss:$44 sps:$4 sm:$0xff]  }
 0x846   :  { %7895 = vmatpush1.bf16.msra.mxu1 %v17970_v44  ;;  %7145 = vmatprep.subr.bf16.mxu0 %v19144_v60  ;;  %v18017_v44 = vld [vmem:[%s24858_s13 + $0x1638] ss:$44 sps:$4 sm:$0xff]  }
 0x847   :  { %7896 = vmatprep.subr.bf16.mxu1 %v17976_v53  ;;  %v18020_v53 = vld [vmem:[%s24858_s13 + $0x1650] ss:$44 sps:$4 sm:$0xff]  }
 0x849   :  { %7146 = vmatpush1.bf16.msra.mxu0 %v17977_v16  ;;  %v18018_v16 = vld [vmem:[%s24858_s13 + $0x164c] ss:$44 sps:$4 sm:$0xff]  }
 0x84a   :  { %7897 = vmatpush1.bf16.msra.mxu1 %v17974_v58  ;;  %7147 = vmatprep.subr.bf16.mxu0 %v19144_v60  ;;  %v18023_v58 = vld [vmem:[%s24858_s13 + $0x1690] ss:$44 sps:$4 sm:$0xff]  }
 0x84b   :  { %7898 = vmatprep.subr.bf16.mxu1 %v17980_v59  ;;  %v18026_v59 = vld [vmem:[%s24858_s13 + $0x16a8] ss:$44 sps:$4 sm:$0xff]  }
 0x84d   :  { %7148 = vmatpush1.bf16.msra.mxu0 %v17981_v24  ;;  %v15585_v24 = vld [vmem:[%s24858_s13 + $0x1754] sm:$0x11] }
 0x84e   :  { %7899 = vmatpush1.bf16.msra.mxu1 %v17978_v40  ;;  %7149 = vmatprep.subr.bf16.mxu0 %v19144_v60  ;;  %v18024_v40 = vld [vmem:[%s24858_s13 + $0x16a4] ss:$44 sps:$4 sm:$0xff]  }
 0x84f   :  { %v5419_v4 = vpop.f32.mrb[92].mxu0  ;;  %7900 = vmatprep.subr.bf16.mxu1 %v7785_v32  ;;  %v15678_v32 = vcombine.high %v15582_v57, %v15582_v57 }
 0x850   :  { %v22092_v36 = vadd.f32 %v5419_v4, %v21733_v13  ;;  %v6170_v47 = vpop.f32.mrb[80].mxu1  ;;  %v5421_v49 = vpop.f32.mrb[93].mxu0  ;;  %v17988_v13 = vld [vmem:[%s24858_s13 + $0x1494] ss:$44 sps:$4 sm:$0xff]   ;;  %v15677_v4 = vcombine.low %v15582_v57, %v15582_v57  ;;  %v18061_v57 = vld [vmem:[%s24858_s13 + $0x15ec] ss:$44 sps:$4 sm:$0xff]  }
 0x851   :  { %v22095_v56 = vadd.f32 %v6170_v47, %v21736_v63  ;;  %v6172_v15 = vpop.f32.mrb[81].mxu1  ;;  %v5422_v51 = vpop.f32.mrb[94].mxu0  ;;  %7150 = vmatpush1.bf16.msra.mxu0 %v6926_v33  ;;  %v18032_v33 = vld [vmem:[%s24858_s13 + $0x1700] ss:$44 sps:$4 sm:$0xff]   ;;  %v7779_v47 = vand.u32 %v15678_v32, %v19619_v61  ;;  %v15683_v49 = vcombine.low %v15585_v24, %v15585_v24  ;;  %v18070_v32 = vld [vmem:[%s24858_s13 + $0x1918] ss:$44 sps:$4 sm:$0xff]  }
 0x852   :  { %v22101_v18 = vadd.f32 %v6172_v15, %v21742_v62  ;;  %v6174_v55 = vpop.f32.mrb[82].mxu1  ;;  %7901 = vmatpush1.bf16.msra.mxu1 %v7782_v6  ;;  %v5423_v41 = vpop.f32.mrb[95].mxu0  ;;  %7843 = vmatprep.subr.bf16.mxu0 %v17987_v20  ;;  %v17996_v62 = vld [vmem:[%s24858_s13 + $0x14f0] ss:$44 sps:$4 sm:$0xff]   ;;  %v15684_v6 = vcombine.high %v15585_v24, %v15585_v24  ;;  %v7776_v51 = vand.u32 %v15677_v4, %v19619_v61  ;;  %v18064_v24 = vld [vmem:[%s24858_s13 + $0x18c0] ss:$44 sps:$4 sm:$0xff]  }
 0x853   :  { %v6175_v63 = vpop.f32.mrb[83].mxu1  ;;  %7966 = vmatprep.subr.bf16.mxu1 %v17990_v46  ;;  %v18027_v20 = vld [vmem:[%s24858_s13 + $0x16e4] ss:$44 sps:$4 sm:$0xff]   ;;  %v18030_v46 = vld [vmem:[%s24858_s13 + $0x16fc] ss:$44 sps:$4 sm:$0xff]  }
 0x854   :  { %7166 = vmatmul.mubr.bf16.vlgmr.msra.gmra.mrb[116].mxu0 %v21638_v0  ;;  %v17999_v0 = vld [vmem:[%s24858_s13 + $0x1530] ss:$44 sps:$4 sm:$0xff]   ;;  %v7797_v15 = vand.u32 %v15684_v6, %v19619_v61  ;;  %v18078_v6 = vld [vmem:[%s24858_s13 + $0x1974] ss:$44 sps:$4 sm:$0xff]  }
 0x855   :  { %7917 = vmatmul.mubr.bf16.vlgmr.msra.gmra.mrb[104].mxu1 %v21997_v19  ;;  %7844 = vmatpush1.bf16.msra.mxu0 %v17985_v14  ;;  %v7794_v14 = vand.u32 %v15683_v49, %v19619_v61  ;;  %v18039_v55 = vld [vmem:[%s24858_s13 + $0x1490] ss:$44 sps:$4 sm:$0xff]   ;;  %v15788_v4 = vld [vmem:[%s24858_s13 + $0x1a20] sm:$0x11] }
 0x856   :  { %15687 = vmatprep.mubr.msk.bf16.mxu0 %vm1771_vm14, %v21880_v31  ;;  %7967 = vmatpush1.bf16.msra.mxu1 %v17988_v13  ;;  %v18042_v13 = vld [vmem:[%s24858_s13 + $0x1764] ss:$44 sps:$4 sm:$0xff]  }
 0x857   :  { %15690 = vmatprep.mubr.msk.bf16.mxu1 %vm1771_vm14, %v21880_v31  ;;  %7845 = vmatprep.subr.bf16.mxu0 %v17993_v35  ;;  %v18081_v49 = vld [vmem:[%s24858_s13 + $0x16f8] ss:$44 sps:$4 sm:$0xff]  }
 0x858   :  { %7968 = vmatprep.subr.bf16.mxu1 %v17996_v62 }
 0x859   :  { %7846 = vmatpush1.bf16.msra.mxu0 %v17991_v17 }
 0x85a   :  { %7969 = vmatpush1.bf16.msra.mxu1 %v17994_v28  ;;  %7847 = vmatprep.subr.bf16.mxu0 %v17999_v0 }
 0x85b   :  { %7970 = vmatprep.subr.bf16.mxu1 %v18002_v29 }
 0x85d   :  { %7848 = vmatpush1.bf16.msra.mxu0 %v17997_v37  ;;  %v18037_v37 = vld [vmem:[%s24858_s13 + $0x148c] ss:$44 sps:$4 sm:$0xff]  }
 0x85e   :  { %7971 = vmatpush1.bf16.msra.mxu1 %v18000_v39  ;;  %7849 = vmatprep.subr.bf16.mxu0 %v18005_v2 }
 0x85f   :  { %7972 = vmatprep.subr.bf16.mxu1 %v18008_v3  ;;  %v18045_v3 = vld [vmem:[%s24858_s13 + $0x14e8] ss:$44 sps:$4 sm:$0xff]  }
 0x861   :  { %7850 = vmatpush1.bf16.msra.mxu0 %v18003_v34  ;;  %v22239_v34 = vrot.slane %v19646_v22, 4  ;;  %v18054_v22 = vld [vmem:[%s24858_s13 + $0x1814] ss:$44 sps:$4 sm:$0xff]  }
 0x862   :  { %7973 = vmatpush1.bf16.msra.mxu1 %v18006_v9  ;;  %7851 = vmatprep.subr.bf16.mxu0 %v18011_v11  ;;  %v18043_v9 = vld [vmem:[%s24858_s13 + $0x14e4] ss:$44 sps:$4 sm:$0xff]  }
 0x863   :  { %7974 = vmatprep.subr.bf16.mxu1 %v18014_v12  ;;  %v18046_v11 = vld [vmem:[%s24858_s13 + $0x17b8] ss:$44 sps:$4 sm:$0xff]   ;;  %v18051_v12 = vld [vmem:[%s24858_s13 + $0x1540] ss:$44 sps:$4 sm:$0xff]  }
 0x865   :  { %7852 = vmatpush1.bf16.msra.mxu0 %v18009_v48  ;;  %v18049_v48 = vld [vmem:[%s24858_s13 + $0x153c] ss:$44 sps:$4 sm:$0xff]  }
 0x866   :  { %7975 = vmatpush1.bf16.msra.mxu1 %v18012_v1  ;;  %7853 = vmatprep.subr.bf16.mxu0 %v18017_v44  ;;  %v18052_v1 = vld [vmem:[%s24858_s13 + $0x1810] ss:$44 sps:$4 sm:$0xff]   ;;  %v18057_v44 = vld [vmem:[%s24858_s13 + $0x1598] ss:$44 sps:$4 sm:$0xff]  }
 0x867   :  { %7976 = vmatprep.subr.bf16.mxu1 %v18020_v53  ;;  %v18060_v53 = vld [vmem:[%s24858_s13 + $0x186c] ss:$44 sps:$4 sm:$0xff]  }
 0x869   :  { %7854 = vmatpush1.bf16.msra.mxu0 %v18015_v54  ;;  %v18055_v54 = vld [vmem:[%s24858_s13 + $0x1594] ss:$44 sps:$4 sm:$0xff]  }
 0x86a   :  { %7977 = vmatpush1.bf16.msra.mxu1 %v18018_v16  ;;  %7855 = vmatprep.subr.bf16.mxu0 %v18023_v58  ;;  %v18058_v16 = vld [vmem:[%s24858_s13 + $0x1868] ss:$44 sps:$4 sm:$0xff]   ;;  %v18063_v58 = vld [vmem:[%s24858_s13 + $0x15f0] ss:$44 sps:$4 sm:$0xff]  }
 0x86b   :  { %7978 = vmatprep.subr.bf16.mxu1 %v18026_v59  ;;  %v18066_v59 = vld [vmem:[%s24858_s13 + $0x18c4] ss:$44 sps:$4 sm:$0xff]  }
 0x86d   :  { %7856 = vmatpush1.bf16.msra.mxu0 %v18021_v25  ;;  %v18069_v25 = vld [vmem:[%s24858_s13 + $0x1648] ss:$44 sps:$4 sm:$0xff]  }
 0x86e   :  { %7979 = vmatpush1.bf16.msra.mxu1 %v18024_v40  ;;  %7857 = vmatprep.subr.bf16.mxu0 %v18029_v30  ;;  %v18072_v40 = vld [vmem:[%s24858_s13 + $0x191c] ss:$44 sps:$4 sm:$0xff]   ;;  %v18067_v30 = vld [vmem:[%s24858_s13 + $0x1644] ss:$44 sps:$4 sm:$0xff]  }
 0x86f   :  { %7980 = vmatprep.subr.bf16.mxu1 %v18032_v33  ;;  %v18075_v33 = vld [vmem:[%s24858_s13 + $0x16a0] ss:$44 sps:$4 sm:$0xff]  }
 0x871   :  { %7858 = vmatpush1.bf16.msra.mxu0 %v18027_v20  ;;  %v15584_v20 = vld [vmem:[%s24858_s13 + $0x174c] sm:$0x11] }
 0x872   :  { %7981 = vmatpush1.bf16.msra.mxu1 %v18030_v46  ;;  %7859 = vmatprep.subr.bf16.mxu0 %v7779_v47  ;;  %v18073_v46 = vld [vmem:[%s24858_s13 + $0x169c] ss:$44 sps:$4 sm:$0xff]  }
 0x873   :  { %v6129_v41 = vpop.f32.mrb[96].mxu0  ;;  %7982 = vmatprep.subr.bf16.mxu1 %v7797_v15  ;;  %v18076_v47 = vld [vmem:[%s24858_s13 + $0x1970] ss:$44 sps:$4 sm:$0xff]   ;;  %v15682_v15 = vcombine.high %v15584_v20, %v15584_v20 }
 0x874   :  { %v22213_v63 = vadd.f32 %v6129_v41, %v21854_v27  ;;  %v6252_v35 = vpop.f32.mrb[84].mxu1  ;;  %v6131_v62 = vpop.f32.mrb[97].mxu0  ;;  %v15681_v41 = vcombine.low %v15584_v20, %v15584_v20  ;;  %v15790_v20 = vld [vmem:[%s24858_s13 + $0x1a30] sm:$0x11] }
 0x875   :  { %v22216_v17 = vadd.f32 %v6252_v35, %v21857_v42  ;;  %v22219_v28 = vadd.f32 %v6131_v62, %v21860_v5  ;;  %v6254_v0 = vpop.f32.mrb[85].mxu1  ;;  %v6133_v29 = vpop.f32.mrb[98].mxu0  ;;  %7860 = vmatpush1.bf16.msra.mxu0 %v7776_v51  ;;  %v18040_v42 = vld [vmem:[%s24858_s13 + $0x1760] ss:$44 sps:$4 sm:$0xff]   ;;  %v7791_v35 = vand.u32 %v15682_v15, %v19619_v61  ;;  %v15882_v62 = vcombine.low %v15788_v4, %v15788_v4  ;;  %v18120_v15 = vld [vmem:[%s24858_s13 + $0x1704] ss:$44 sps:$4 sm:$0xff]  }
 0x876   :  { %v22225_v39 = vadd.f32 %v6254_v0, %v21866_v43  ;;  %v6256_v27 = vpop.f32.mrb[86].mxu1  ;;  %7983 = vmatpush1.bf16.msra.mxu1 %v7794_v14  ;;  %v6134_v2 = vpop.f32.mrb[99].mxu0  ;;  %7925 = vmatprep.subr.bf16.mxu0 %v18039_v55  ;;  %v18048_v43 = vld [vmem:[%s24858_s13 + $0x17bc] ss:$44 sps:$4 sm:$0xff]   ;;  %v18084_v51 = vld [vmem:[%s24858_s13 + $0x19cc] ss:$44 sps:$4 sm:$0xff]   ;;  %v15883_v14 = vcombine.high %v15788_v4, %v15788_v4  ;;  %v7788_v29 = vand.u32 %v15681_v41, %v19619_v61 }
 0x877   :  { %v6257_v5 = vpop.f32.mrb[87].mxu1  ;;  %8676 = vmatprep.subr.bf16.mxu1 %v18042_v13  ;;  %v18079_v55 = vld [vmem:[%s24858_s13 + $0x16f4] ss:$44 sps:$4 sm:$0xff]   ;;  %v18116_v4 = vld [vmem:[%s24858_s13 + $0x16ac] ss:$44 sps:$4 sm:$0xff]  }
 0x878   :  { %7876 = vmatmul.mubr.bf16.vlgmr.msra.gmra.mrb[120].mxu0 %v21997_v19  ;;  %v18082_v13 = vld [vmem:[%s24858_s13 + $0x19c8] ss:$44 sps:$4 sm:$0xff]   ;;  %v8647_v0 = vand.u32 %v15883_v14, %v19619_v61  ;;  %v18117_v14 = vld [vmem:[%s24858_s13 + $0x19d8] ss:$44 sps:$4 sm:$0xff]  }
 0x879   :  { %7999 = vmatmul.mubr.bf16.vlgmr.msra.gmra.mrb[108].mxu1 %v21997_v19  ;;  %7926 = vmatpush1.bf16.msra.mxu0 %v18037_v37  ;;  %v8644_v37 = vand.u32 %v15882_v62, %v19619_v61  ;;  %v18091_v2 = vld [vmem:[%s24858_s13 + $0x1774] ss:$44 sps:$4 sm:$0xff]   ;;  %v18126_v62 = vld [vmem:[%s24858_s13 + $0x176c] ss:$44 sps:$4 sm:$0xff]  }
 0x87a   :  { %15689 = vmatprep.mubr.msk.bf16.mxu0 %vm1771_vm14, %v21880_v31  ;;  %8677 = vmatpush1.bf16.msra.mxu1 %v18040_v42 }
 0x87b   :  { %15893 = vmatprep.mubr.msk.bf16.mxu1 %vm1771_vm14, %v22239_v34  ;;  %7927 = vmatprep.subr.bf16.mxu0 %v18045_v3 }
 0x87c   :  { %8678 = vmatprep.subr.bf16.mxu1 %v18048_v43 }
 0x87d   :  { %7928 = vmatpush1.bf16.msra.mxu0 %v18043_v9 }
 0x87e   :  { %8679 = vmatpush1.bf16.msra.mxu1 %v18046_v11  ;;  %7929 = vmatprep.subr.bf16.mxu0 %v18051_v12 }
 0x87f   :  { %8680 = vmatprep.subr.bf16.mxu1 %v18054_v22  ;;  %v18092_v22 = vld [vmem:[%s24858_s13 + $0x149c] ss:$44 sps:$4 sm:$0xff]  }
 0x881   :  { %7930 = vmatpush1.bf16.msra.mxu0 %v18049_v48 }
 0x882   :  { %8681 = vmatpush1.bf16.msra.mxu1 %v18052_v1  ;;  %7931 = vmatprep.subr.bf16.mxu0 %v18057_v44  ;;  %v22356_v44 = vrot.slane %v19644_v21, 4  ;;  %v18093_v21 = vld [vmem:[%s24858_s13 + $0x17c8] ss:$44 sps:$4 sm:$0xff]  }
 0x883   :  { %8682 = vmatprep.subr.bf16.mxu1 %v18060_v53  ;;  %v18096_v53 = vld [vmem:[%s24858_s13 + $0x14f4] ss:$44 sps:$4 sm:$0xff]  }
 0x885   :  { %7932 = vmatpush1.bf16.msra.mxu0 %v18055_v54  ;;  %v18099_v54 = vld [vmem:[%s24858_s13 + $0x1824] ss:$44 sps:$4 sm:$0xff]  }
 0x886   :  { %8683 = vmatpush1.bf16.msra.mxu1 %v18058_v16  ;;  %7933 = vmatprep.subr.bf16.mxu0 %v18063_v58  ;;  %v18097_v16 = vld [vmem:[%s24858_s13 + $0x1820] ss:$44 sps:$4 sm:$0xff]   ;;  %v18103_v58 = vld [vmem:[%s24858_s13 + $0x187c] ss:$44 sps:$4 sm:$0xff]  }
 0x887   :  { %8684 = vmatprep.subr.bf16.mxu1 %v18066_v59  ;;  %v18104_v59 = vld [vmem:[%s24858_s13 + $0x15a4] ss:$44 sps:$4 sm:$0xff]  }
 0x889   :  { %7934 = vmatpush1.bf16.msra.mxu0 %v18061_v57  ;;  %v18101_v57 = vld [vmem:[%s24858_s13 + $0x1878] ss:$44 sps:$4 sm:$0xff]  }
 0x88a   :  { %8685 = vmatpush1.bf16.msra.mxu1 %v18064_v24  ;;  %7935 = vmatprep.subr.bf16.mxu0 %v18069_v25  ;;  %v18107_v24 = vld [vmem:[%s24858_s13 + $0x18d4] ss:$44 sps:$4 sm:$0xff]   ;;  %v18108_v25 = vld [vmem:[%s24858_s13 + $0x15fc] ss:$44 sps:$4 sm:$0xff]  }
 0x88b   :  { %8686 = vmatprep.subr.bf16.mxu1 %v18072_v40  ;;  %v18105_v40 = vld [vmem:[%s24858_s13 + $0x18d0] ss:$44 sps:$4 sm:$0xff]  }
 0x88d   :  { %7936 = vmatpush1.bf16.msra.mxu0 %v18067_v30  ;;  %v18111_v30 = vld [vmem:[%s24858_s13 + $0x192c] ss:$44 sps:$4 sm:$0xff]  }
 0x88e   :  { %8687 = vmatpush1.bf16.msra.mxu1 %v18070_v32  ;;  %7937 = vmatprep.subr.bf16.mxu0 %v18075_v33  ;;  %v18112_v32 = vld [vmem:[%s24858_s13 + $0x1654] ss:$44 sps:$4 sm:$0xff]  }
 0x88f   :  { %8688 = vmatprep.subr.bf16.mxu1 %v18078_v6  ;;  %v18109_v33 = vld [vmem:[%s24858_s13 + $0x1928] ss:$44 sps:$4 sm:$0xff]   ;;  %v18115_v6 = vld [vmem:[%s24858_s13 + $0x1984] ss:$44 sps:$4 sm:$0xff]  }
 0x891   :  { %7938 = vmatpush1.bf16.msra.mxu0 %v18073_v46  ;;  %v18113_v46 = vld [vmem:[%s24858_s13 + $0x1980] ss:$44 sps:$4 sm:$0xff]  }
 0x892   :  { %8689 = vmatpush1.bf16.msra.mxu1 %v18076_v47  ;;  %7939 = vmatprep.subr.bf16.mxu0 %v18081_v49  ;;  %v18119_v47 = vld [vmem:[%s24858_s13 + $0x19dc] ss:$44 sps:$4 sm:$0xff]   ;;  %v15887_v49 = vcombine.high %v15790_v20, %v15790_v20 }
 0x893   :  { %8690 = vmatprep.subr.bf16.mxu1 %v18084_v51  ;;  %v18123_v51 = vld [vmem:[%s24858_s13 + $0x175c] ss:$0 sps:$4 sm:$0x11]  }
 0x894   :  { %v8659_v41 = vand.u32 %v15887_v49, %v19619_v61  ;;  %v18160_v49 = vld [vmem:[%s24858_s13 + $0x1978] ss:$44 sps:$4 sm:$0xff]  }
 0x895   :  { %7940 = vmatpush1.bf16.msra.mxu0 %v18079_v55  ;;  %v15886_v55 = vcombine.low %v15790_v20, %v15790_v20  ;;  %v18162_v20 = vld [vmem:[%s24858_s13 + $0x197c] ss:$44 sps:$4 sm:$0xff]  }
 0x896   :  { %8691 = vmatpush1.bf16.msra.mxu1 %v18082_v13  ;;  %7941 = vmatprep.subr.bf16.mxu0 %v7791_v35  ;;  %v7800_v13 = vand.u32 %v18123_v51, %v19619_v61  ;;  %v18168_v51 = vld [vmem:[%s24858_s13 + $0x19d4] ss:$44 sps:$4 sm:$0xff]  }
 0x897   :  { %v6211_v27 = vpop.f32.mrb[100].mxu0  ;;  %8692 = vmatprep.subr.bf16.mxu1 %v8647_v0  ;;  %v8656_v35 = vand.u32 %v15886_v55, %v19619_v61  ;;  %v18171_v55 = vld [vmem:[%s24858_s13 + $0x19ec] ss:$44 sps:$4 sm:$0xff]  }
 0x898   :  { %v22337_v42 = vadd.f32 %v6211_v27, %v21978_v45  ;;  %v6962_v5 = vpop.f32.mrb[88].mxu1  ;;  %v6213_v3 = vpop.f32.mrb[101].mxu0 }
 0x899   :  { %v22340_v43 = vadd.f32 %v6962_v5, %v21981_v52  ;;  %v22343_v9 = vadd.f32 %v6213_v3, %v21984_v50  ;;  %v6964_v11 = vpop.f32.mrb[89].mxu1  ;;  %v6215_v12 = vpop.f32.mrb[102].mxu0  ;;  %7942 = vmatpush1.bf16.msra.mxu0 %v7788_v29  ;;  %v18089_v52 = vld [vmem:[%s24858_s13 + $0x1770] ss:$44 sps:$4 sm:$0xff]  }
 0x89a   :  { %v22349_v48 = vadd.f32 %v6964_v11, %v21990_v38  ;;  %v6966_v45 = vpop.f32.mrb[90].mxu1  ;;  %8693 = vmatpush1.bf16.msra.mxu1 %v8644_v37  ;;  %v6216_v1 = vpop.f32.mrb[103].mxu0  ;;  %8007 = vmatprep.subr.bf16.mxu0 %v19144_v60  ;;  %v18095_v38 = vld [vmem:[%s24858_s13 + $0x17cc] ss:$44 sps:$4 sm:$0xff]   ;;  %v18129_v29 = vld [vmem:[%s24858_s13 + $0x1784] ss:$44 sps:$4 sm:$0xff]  }
 0x89b   :  { %v6967_v50 = vpop.f32.mrb[91].mxu1  ;;  %8758 = vmatprep.subr.bf16.mxu1 %v18091_v2  ;;  %v18124_v12 = vld [vmem:[%s24858_s13 + $0x1768] ss:$44 sps:$4 sm:$0xff]  }
 0x89c   :  { %7958 = vmatmul.mubr.bf16.vlgmr.msra.gmra.mrb[124].mxu0 %v21997_v19  ;;  %v18130_v50 = vld [vmem:[%s24858_s13 + $0x17c0] ss:$44 sps:$4 sm:$0xff]  }
 0x89d   :  { %8709 = vmatmul.mubr.bf16.vlgmr.msra.gmra.mrb[112].mxu1 %v22356_v44  ;;  %8008 = vmatpush1.bf16.msra.mxu0 %v18092_v22 }
 0x89e   :  { %15691 = vmatprep.mubr.msk.bf16.mxu0 %vm1771_vm14, %v21880_v31  ;;  %8759 = vmatpush1.bf16.msra.mxu1 %v18089_v52  ;;  %v18100_v31 = vld [vmem:[%s24858_s13 + $0x154c] ss:$44 sps:$4 sm:$0xff]   ;;  %v18132_v52 = vld [vmem:[%s24858_s13 + $0x17c4] ss:$44 sps:$4 sm:$0xff]  }
 0x89f   :  { %15895 = vmatprep.mubr.msk.bf16.mxu1 %vm1771_vm14, %v22239_v34  ;;  %8009 = vmatprep.subr.bf16.mxu0 %v19144_v60 }
 0x8a0   :  { %8760 = vmatprep.subr.bf16.mxu1 %v18095_v38  ;;  %v18133_v38 = vld [vmem:[%s24858_s13 + $0x17d8] ss:$44 sps:$4 sm:$0xff]  }
 0x8a1   :  { %8010 = vmatpush1.bf16.msra.mxu0 %v18096_v53  ;;  %v18141_v53 = vld [vmem:[%s24858_s13 + $0x1834] ss:$44 sps:$4 sm:$0xff]  }
 0x8a2   :  { %8761 = vmatpush1.bf16.msra.mxu1 %v18093_v21  ;;  %8011 = vmatprep.subr.bf16.mxu0 %v19144_v60  ;;  %v18136_v21 = vld [vmem:[%s24858_s13 + $0x1818] ss:$44 sps:$4 sm:$0xff]  }
 0x8a3   :  { %8762 = vmatprep.subr.bf16.mxu1 %v18099_v54  ;;  %v18139_v54 = vld [vmem:[%s24858_s13 + $0x1830] ss:$44 sps:$4 sm:$0xff]  }
 0x8a5   :  { %8012 = vmatpush1.bf16.msra.mxu0 %v18100_v31  ;;  %v18144_v31 = vld [vmem:[%s24858_s13 + $0x1874] ss:$44 sps:$4 sm:$0xff]  }
 0x8a6   :  { %8763 = vmatpush1.bf16.msra.mxu1 %v18097_v16  ;;  %8013 = vmatprep.subr.bf16.mxu0 %v19144_v60  ;;  %v18147_v16 = vld [vmem:[%s24858_s13 + $0x188c] ss:$44 sps:$4 sm:$0xff]  }
 0x8a7   :  { %8764 = vmatprep.subr.bf16.mxu1 %v18103_v58  ;;  %v18142_v58 = vld [vmem:[%s24858_s13 + $0x1870] ss:$44 sps:$4 sm:$0xff]  }
 0x8a9   :  { %8014 = vmatpush1.bf16.msra.mxu0 %v18104_v59  ;;  %v18145_v59 = vld [vmem:[%s24858_s13 + $0x1888] ss:$44 sps:$4 sm:$0xff]  }
 0x8aa   :  { %8765 = vmatpush1.bf16.msra.mxu1 %v18101_v57  ;;  %8015 = vmatprep.subr.bf16.mxu0 %v19144_v60  ;;  %v18150_v57 = vld [vmem:[%s24858_s13 + $0x18cc] ss:$44 sps:$4 sm:$0xff]  }
 0x8ab   :  { %8766 = vmatprep.subr.bf16.mxu1 %v18107_v24  ;;  %v18153_v24 = vld [vmem:[%s24858_s13 + $0x18e4] ss:$44 sps:$4 sm:$0xff]  }
 0x8ad   :  { %8016 = vmatpush1.bf16.msra.mxu0 %v18108_v25  ;;  %v18148_v25 = vld [vmem:[%s24858_s13 + $0x18c8] ss:$44 sps:$4 sm:$0xff]  }
 0x8ae   :  { %8767 = vmatpush1.bf16.msra.mxu1 %v18105_v40  ;;  %8017 = vmatprep.subr.bf16.mxu0 %v19144_v60  ;;  %v18151_v40 = vld [vmem:[%s24858_s13 + $0x18e0] ss:$44 sps:$4 sm:$0xff]  }
 0x8af   :  { %8768 = vmatprep.subr.bf16.mxu1 %v18111_v30  ;;  %v18156_v30 = vld [vmem:[%s24858_s13 + $0x1924] ss:$44 sps:$4 sm:$0xff]  }
 0x8b1   :  { %8018 = vmatpush1.bf16.msra.mxu0 %v18112_v32  ;;  %v18159_v32 = vld [vmem:[%s24858_s13 + $0x193c] ss:$44 sps:$4 sm:$0xff]  }
 0x8b2   :  { %8769 = vmatpush1.bf16.msra.mxu1 %v18109_v33  ;;  %8019 = vmatprep.subr.bf16.mxu0 %v19144_v60  ;;  %v18154_v33 = vld [vmem:[%s24858_s13 + $0x1920] ss:$44 sps:$4 sm:$0xff]  }
 0x8b3   :  { %8770 = vmatprep.subr.bf16.mxu1 %v18115_v6  ;;  %v18157_v6 = vld [vmem:[%s24858_s13 + $0x1938] ss:$44 sps:$4 sm:$0xff]  }
 0x8b5   :  { %8020 = vmatpush1.bf16.msra.mxu0 %v18116_v4  ;;  %v18165_v4 = vld [vmem:[%s24858_s13 + $0x1994] ss:$44 sps:$4 sm:$0xff]  }
 0x8b6   :  { %8771 = vmatpush1.bf16.msra.mxu1 %v18113_v46  ;;  %8021 = vmatprep.subr.bf16.mxu0 %v19144_v60  ;;  %v15789_v46 = vld [vmem:[%s24858_s13 + $0x1a28] sm:$0x11] }
 0x8b7   :  { %8772 = vmatprep.subr.bf16.mxu1 %v18119_v47  ;;  %v15792_v47 = vld [vmem:[%s24858_s13 + $0x1a40] sm:$0x11] }
 0x8b9   :  { %8022 = vmatpush1.bf16.msra.mxu0 %v18120_v15  ;;  %v18163_v15 = vld [vmem:[%s24858_s13 + $0x1990] ss:$44 sps:$4 sm:$0xff]  }
 0x8ba   :  { %8773 = vmatpush1.bf16.msra.mxu1 %v18117_v14  ;;  %8023 = vmatprep.subr.bf16.mxu0 %v19144_v60  ;;  %v15885_v14 = vcombine.high %v15789_v46, %v15789_v46 }
 0x8bb   :  { %v6293_v0 = vpop.f32.mrb[104].mxu0  ;;  %8774 = vmatprep.subr.bf16.mxu1 %v8659_v41  ;;  %v15891_v41 = vcombine.high %v15792_v47, %v15792_v47 }
 0x8bc   :  { %v22451_v37 = vadd.f32 %v6293_v0, %v22092_v36  ;;  %v7044_v27 = vpop.f32.mrb[92].mxu1  ;;  %v6295_v2 = vpop.f32.mrb[105].mxu0  ;;  %v18127_v36 = vld [vmem:[%s24858_s13 + $0x1780] ss:$44 sps:$4 sm:$0xff]   ;;  %v8653_v0 = vand.u32 %v15885_v14, %v19619_v61 }
 0x8bd   :  { %v22454_v5 = vadd.f32 %v7044_v27, %v22095_v56  ;;  %v7046_v3 = vpop.f32.mrb[93].mxu1  ;;  %v6296_v11 = vpop.f32.mrb[106].mxu0  ;;  %8024 = vmatpush1.bf16.msra.mxu0 %v7800_v13  ;;  %v18166_v13 = vld [vmem:[%s24858_s13 + $0x19d0] ss:$44 sps:$4 sm:$0xff]   ;;  %v8671_v27 = vand.u32 %v15891_v41, %v19619_v61  ;;  %v18217_v14 = vld [vmem:[%s24858_s13 + $0x1c60] ss:$44 sps:$4 sm:$0xff]  }
 0x8be   :  { %v22460_v22 = vadd.f32 %v7046_v3, %v22101_v18  ;;  %v7048_v45 = vpop.f32.mrb[94].mxu1  ;;  %8775 = vmatpush1.bf16.msra.mxu1 %v8656_v35  ;;  %v6297_v1 = vpop.f32.mrb[107].mxu0  ;;  %8717 = vmatprep.subr.bf16.mxu0 %v18126_v62  ;;  %v18135_v18 = vld [vmem:[%s24858_s13 + $0x17dc] ss:$44 sps:$4 sm:$0xff]   ;;  %v15884_v35 = vcombine.low %v15789_v46, %v15789_v46  ;;  %v18208_v46 = vld [vmem:[%s24858_s13 + $0x1934] ss:$44 sps:$4 sm:$0xff]  }
 0x8bf   :  { %v7049_v56 = vpop.f32.mrb[95].mxu1  ;;  %8840 = vmatprep.subr.bf16.mxu1 %v18129_v29  ;;  %v18169_v62 = vld [vmem:[%s24858_s13 + $0x19e8] ss:$44 sps:$4 sm:$0xff]   ;;  %v15890_v29 = vcombine.low %v15792_v47, %v15792_v47  ;;  %v18181_v45 = vld [vmem:[%s24858_s13 + $0x1a50] ss:$44 sps:$4 sm:$0xff]  }
 0x8c0   :  { %8040 = vmatmul.mubr.bf16.vlgmr.msra.gmra.mrb[128].mxu0 %v21997_v19  ;;  %v18138_v19 = vld [vmem:[%s24858_s13 + $0x181c] ss:$44 sps:$4 sm:$0xff]   ;;  %v8650_v2 = vand.u32 %v15884_v35, %v19619_v61  ;;  %v15995_v41 = vld [vmem:[%s24858_s13 + $0x1d0c] sm:$0x11] }
 0x8c1   :  { %8791 = vmatmul.mubr.bf16.vlgmr.msra.gmra.mrb[116].mxu1 %v22356_v44  ;;  %8718 = vmatpush1.bf16.msra.mxu0 %v18124_v12  ;;  %v8668_v3 = vand.u32 %v15890_v29, %v19619_v61  ;;  %v18178_v11 = vld [vmem:[%s24858_s13 + $0x177c] ss:$44 sps:$4 sm:$0xff]   ;;  %v18223_v29 = vld [vmem:[%s24858_s13 + $0x1cb8] ss:$44 sps:$4 sm:$0xff]  }
 0x8c2   :  { %15894 = vmatprep.mubr.msk.bf16.mxu0 %vm1771_vm14, %v22239_v34  ;;  %8841 = vmatpush1.bf16.msra.mxu1 %v18127_v36  ;;  %v18211_v47 = vld [vmem:[%s24858_s13 + $0x1c08] ss:$44 sps:$4 sm:$0xff]  }
 0x8c3   :  { %15897 = vmatprep.mubr.msk.bf16.mxu1 %vm1771_vm14, %v22239_v34  ;;  %8719 = vmatprep.subr.bf16.mxu0 %v18132_v52  ;;  %v18215_v35 = vld [vmem:[%s24858_s13 + $0x1c5c] ss:$44 sps:$4 sm:$0xff]  }
 0x8c4   :  { %8842 = vmatprep.subr.bf16.mxu1 %v18135_v18 }
 0x8c5   :  { %8720 = vmatpush1.bf16.msra.mxu0 %v18130_v50 }
 0x8c6   :  { %8843 = vmatpush1.bf16.msra.mxu1 %v18133_v38  ;;  %8721 = vmatprep.subr.bf16.mxu0 %v18138_v19  ;;  %v18176_v19 = vld [vmem:[%s24858_s13 + $0x1778] ss:$44 sps:$4 sm:$0xff]  }
 0x8c7   :  { %8844 = vmatprep.subr.bf16.mxu1 %v18141_v53 }
 0x8c9   :  { %8722 = vmatpush1.bf16.msra.mxu0 %v18136_v21 }
 0x8ca   :  { %8845 = vmatpush1.bf16.msra.mxu1 %v18139_v54  ;;  %8723 = vmatprep.subr.bf16.mxu0 %v18144_v31  ;;  %v18184_v54 = vld [vmem:[%s24858_s13 + $0x17d4] ss:$44 sps:$4 sm:$0xff]   ;;  %v22598_v31 = vrot.slane %v19649_v23, 4 }
 0x8cb   :  { %8846 = vmatprep.subr.bf16.mxu1 %v18147_v16  ;;  %v18182_v16 = vld [vmem:[%s24858_s13 + $0x17d0] ss:$44 sps:$4 sm:$0xff]   ;;  %v18193_v23 = vld [vmem:[%s24858_s13 + $0x1b00] ss:$44 sps:$4 sm:$0xff]  }
 0x8cd   :  { %8724 = vmatpush1.bf16.msra.mxu0 %v18142_v58  ;;  %v18185_v58 = vld [vmem:[%s24858_s13 + $0x1aa4] ss:$44 sps:$4 sm:$0xff]  }
 0x8ce   :  { %8847 = vmatpush1.bf16.msra.mxu1 %v18145_v59  ;;  %8725 = vmatprep.subr.bf16.mxu0 %v18150_v57  ;;  %v18190_v59 = vld [vmem:[%s24858_s13 + $0x182c] ss:$44 sps:$4 sm:$0xff]   ;;  %v18188_v57 = vld [vmem:[%s24858_s13 + $0x1828] ss:$44 sps:$4 sm:$0xff]  }
 0x8cf   :  { %8848 = vmatprep.subr.bf16.mxu1 %v18153_v24  ;;  %v18191_v24 = vld [vmem:[%s24858_s13 + $0x1afc] ss:$44 sps:$4 sm:$0xff]  }
 0x8d1   :  { %8726 = vmatpush1.bf16.msra.mxu0 %v18148_v25  ;;  %v18196_v25 = vld [vmem:[%s24858_s13 + $0x1884] ss:$44 sps:$4 sm:$0xff]  }
 0x8d2   :  { %8849 = vmatpush1.bf16.msra.mxu1 %v18151_v40  ;;  %8727 = vmatprep.subr.bf16.mxu0 %v18156_v30  ;;  %v18199_v40 = vld [vmem:[%s24858_s13 + $0x1b58] ss:$44 sps:$4 sm:$0xff]   ;;  %v18194_v30 = vld [vmem:[%s24858_s13 + $0x1880] ss:$44 sps:$4 sm:$0xff]  }
 0x8d3   :  { %8850 = vmatprep.subr.bf16.mxu1 %v18159_v32  ;;  %v18197_v32 = vld [vmem:[%s24858_s13 + $0x1b54] ss:$44 sps:$4 sm:$0xff]  }
 0x8d5   :  { %8728 = vmatpush1.bf16.msra.mxu0 %v18154_v33  ;;  %v18202_v33 = vld [vmem:[%s24858_s13 + $0x18dc] ss:$44 sps:$4 sm:$0xff]  }
 0x8d6   :  { %8851 = vmatpush1.bf16.msra.mxu1 %v18157_v6  ;;  %8729 = vmatprep.subr.bf16.mxu0 %v18162_v20  ;;  %v18205_v6 = vld [vmem:[%s24858_s13 + $0x1bb0] ss:$44 sps:$4 sm:$0xff]   ;;  %v18200_v20 = vld [vmem:[%s24858_s13 + $0x18d8] ss:$44 sps:$4 sm:$0xff]  }
 0x8d7   :  { %8852 = vmatprep.subr.bf16.mxu1 %v18165_v4  ;;  %v18203_v4 = vld [vmem:[%s24858_s13 + $0x1bac] ss:$44 sps:$4 sm:$0xff]  }
 0x8d9   :  { %8730 = vmatpush1.bf16.msra.mxu0 %v18160_v49  ;;  %v18206_v49 = vld [vmem:[%s24858_s13 + $0x1930] ss:$44 sps:$4 sm:$0xff]  }
 0x8da   :  { %8853 = vmatpush1.bf16.msra.mxu1 %v18163_v15  ;;  %8731 = vmatprep.subr.bf16.mxu0 %v18168_v51  ;;  %v18209_v15 = vld [vmem:[%s24858_s13 + $0x1c04] ss:$44 sps:$4 sm:$0xff]   ;;  %v18214_v51 = vld [vmem:[%s24858_s13 + $0x198c] ss:$44 sps:$4 sm:$0xff]  }
 0x8db   :  { %8854 = vmatprep.subr.bf16.mxu1 %v18171_v55  ;;  %v15791_v55 = vld [vmem:[%s24858_s13 + $0x1a38] sm:$0x11] }
 0x8dd   :  { %8732 = vmatpush1.bf16.msra.mxu0 %v18166_v13  ;;  %v18212_v13 = vld [vmem:[%s24858_s13 + $0x1988] ss:$44 sps:$4 sm:$0xff]  }
 0x8de   :  { %8855 = vmatpush1.bf16.msra.mxu1 %v18169_v62  ;;  %8733 = vmatprep.subr.bf16.mxu0 %v8653_v0  ;;  %v18220_v62 = vld [vmem:[%s24858_s13 + $0x19e4] ss:$44 sps:$4 sm:$0xff]   ;;  %v15889_v0 = vcombine.high %v15791_v55, %v15791_v55 }
 0x8df   :  { %v7003_v12 = vpop.f32.mrb[108].mxu0  ;;  %8856 = vmatprep.subr.bf16.mxu1 %v8671_v27  ;;  %v16090_v27 = vcombine.high %v15995_v41, %v15995_v41 }
 0x8e0   :  { %v22572_v1 = vadd.f32 %v7003_v12, %v22213_v63  ;;  %v7126_v36 = vpop.f32.mrb[96].mxu1  ;;  %v7005_v56 = vpop.f32.mrb[109].mxu0  ;;  %v8665_v12 = vand.u32 %v15889_v0, %v19619_v61  ;;  %v18256_v0 = vld [vmem:[%s24858_s13 + $0x1cc4] ss:$44 sps:$4 sm:$0xff]  }
 0x8e1   :  { %v22575_v52 = vadd.f32 %v7126_v36, %v22216_v17  ;;  %v22578_v18 = vadd.f32 %v7005_v56, %v22219_v28  ;;  %v7128_v50 = vpop.f32.mrb[97].mxu1  ;;  %v7007_v38 = vpop.f32.mrb[110].mxu0  ;;  %8734 = vmatpush1.bf16.msra.mxu0 %v8650_v2  ;;  %v18179_v17 = vld [vmem:[%s24858_s13 + $0x1a4c] ss:$44 sps:$4 sm:$0xff]   ;;  %v9521_v36 = vand.u32 %v16090_v27, %v19619_v61 }
 0x8e2   :  { %v22584_v53 = vadd.f32 %v7128_v50, %v22225_v39  ;;  %v7130_v63 = vpop.f32.mrb[98].mxu1  ;;  %8857 = vmatpush1.bf16.msra.mxu1 %v8668_v3  ;;  %v7008_v21 = vpop.f32.mrb[111].mxu0  ;;  %8799 = vmatprep.subr.bf16.mxu0 %v18178_v11  ;;  %v18187_v39 = vld [vmem:[%s24858_s13 + $0x1aa8] ss:$44 sps:$4 sm:$0xff]   ;;  %v18218_v2 = vld [vmem:[%s24858_s13 + $0x19e0] ss:$44 sps:$4 sm:$0xff]   ;;  %v15888_v3 = vcombine.low %v15791_v55, %v15791_v55 }
 0x8e3   :  { %v7131_v28 = vpop.f32.mrb[99].mxu1  ;;  %9550 = vmatprep.subr.bf16.mxu1 %v18181_v45  ;;  %v18221_v11 = vld [vmem:[%s24858_s13 + $0x1cb4] ss:$44 sps:$4 sm:$0xff]   ;;  %v16089_v45 = vcombine.low %v15995_v41, %v15995_v41  ;;  %v18252_v55 = vld [vmem:[%s24858_s13 + $0x1c6c] ss:$44 sps:$4 sm:$0xff]  }
 0x8e4   :  { %8750 = vmatmul.mubr.bf16.vlgmr.msra.gmra.mrb[132].mxu0 %v22356_v44  ;;  %v8662_v56 = vand.u32 %v15888_v3, %v19619_v61  ;;  %v18258_v41 = vld [vmem:[%s24858_s13 + $0x1cc8] ss:$44 sps:$4 sm:$0xff]  }
 0x8e5   :  { %8873 = vmatmul.mubr.bf16.vlgmr.msra.gmra.mrb[120].mxu1 %v22356_v44  ;;  %8800 = vmatpush1.bf16.msra.mxu0 %v18176_v19  ;;  %v9518_v50 = vand.u32 %v16089_v45, %v19619_v61  ;;  %v18230_v19 = vld [vmem:[%s24858_s13 + $0x1a60] ss:$44 sps:$4 sm:$0xff]   ;;  %v18268_v45 = vld [vmem:[%s24858_s13 + $0x1a70] ss:$44 sps:$4 sm:$0xff]  }
 0x8e6   :  { %15896 = vmatprep.mubr.msk.bf16.mxu0 %vm1771_vm14, %v22239_v34  ;;  %9551 = vmatpush1.bf16.msra.mxu1 %v18179_v17 }
 0x8e7   :  { %16100 = vmatprep.mubr.msk.bf16.mxu1 %vm1771_vm14, %v22598_v31  ;;  %8801 = vmatprep.subr.bf16.mxu0 %v18184_v54 }
 0x8e8   :  { %9552 = vmatprep.subr.bf16.mxu1 %v18187_v39 }
 0x8e9   :  { %8802 = vmatpush1.bf16.msra.mxu0 %v18182_v16 }
 0x8ea   :  { %9553 = vmatpush1.bf16.msra.mxu1 %v18185_v58  ;;  %8803 = vmatprep.subr.bf16.mxu0 %v18190_v59  ;;  %v18231_v58 = vld [vmem:[%s24858_s13 + $0x1788] ss:$44 sps:$4 sm:$0xff]  }
 0x8eb   :  { %9554 = vmatprep.subr.bf16.mxu1 %v18193_v23 }
 0x8ed   :  { %8804 = vmatpush1.bf16.msra.mxu0 %v18188_v57  ;;  %v22715_v57 = vrot.slane %v19658_v26, 4  ;;  %v18232_v26 = vld [vmem:[%s24858_s13 + $0x1ab4] ss:$44 sps:$4 sm:$0xff]  }
 0x8ee   :  { %9555 = vmatpush1.bf16.msra.mxu1 %v18191_v24  ;;  %8805 = vmatprep.subr.bf16.mxu0 %v18196_v25  ;;  %v18235_v24 = vld [vmem:[%s24858_s13 + $0x17e0] ss:$44 sps:$4 sm:$0xff]   ;;  %v18238_v25 = vld [vmem:[%s24858_s13 + $0x1b10] ss:$44 sps:$4 sm:$0xff]  }
 0x8ef   :  { %9556 = vmatprep.subr.bf16.mxu1 %v18199_v40  ;;  %v18236_v40 = vld [vmem:[%s24858_s13 + $0x1b0c] ss:$44 sps:$4 sm:$0xff]  }
 0x8f1   :  { %8806 = vmatpush1.bf16.msra.mxu0 %v18194_v30  ;;  %v18242_v30 = vld [vmem:[%s24858_s13 + $0x1b68] ss:$44 sps:$4 sm:$0xff]  }
 0x8f2   :  { %9557 = vmatpush1.bf16.msra.mxu1 %v18197_v32  ;;  %8807 = vmatprep.subr.bf16.mxu0 %v18202_v33  ;;  %v18243_v32 = vld [vmem:[%s24858_s13 + $0x1890] ss:$44 sps:$4 sm:$0xff]  }
 0x8f3   :  { %9558 = vmatprep.subr.bf16.mxu1 %v18205_v6  ;;  %v18240_v33 = vld [vmem:[%s24858_s13 + $0x1b64] ss:$44 sps:$4 sm:$0xff]   ;;  %v18246_v6 = vld [vmem:[%s24858_s13 + $0x1bc0] ss:$44 sps:$4 sm:$0xff]  }
 0x8f5   :  { %8808 = vmatpush1.bf16.msra.mxu0 %v18200_v20  ;;  %v18247_v20 = vld [vmem:[%s24858_s13 + $0x18e8] ss:$44 sps:$4 sm:$0xff]  }
 0x8f6   :  { %9559 = vmatpush1.bf16.msra.mxu1 %v18203_v4  ;;  %8809 = vmatprep.subr.bf16.mxu0 %v18208_v46  ;;  %v18244_v4 = vld [vmem:[%s24858_s13 + $0x1bbc] ss:$44 sps:$4 sm:$0xff]   ;;  %v18250_v46 = vld [vmem:[%s24858_s13 + $0x1c18] ss:$44 sps:$4 sm:$0xff]  }
 0x8f7   :  { %9560 = vmatprep.subr.bf16.mxu1 %v18211_v47  ;;  %v18251_v47 = vld [vmem:[%s24858_s13 + $0x1940] ss:$44 sps:$4 sm:$0xff]  }
 0x8f9   :  { %8810 = vmatpush1.bf16.msra.mxu0 %v18206_v49  ;;  %v18248_v49 = vld [vmem:[%s24858_s13 + $0x1c14] ss:$44 sps:$4 sm:$0xff]  }
 0x8fa   :  { %9561 = vmatpush1.bf16.msra.mxu1 %v18209_v15  ;;  %8811 = vmatprep.subr.bf16.mxu0 %v18214_v51  ;;  %v18254_v15 = vld [vmem:[%s24858_s13 + $0x1c70] ss:$44 sps:$4 sm:$0xff]  }
 0x8fb   :  { %9562 = vmatprep.subr.bf16.mxu1 %v18217_v14  ;;  %v15997_v51 = vld [vmem:[%s24858_s13 + $0x1d1c] sm:$0x11]  ;;  %v18255_v14 = vld [vmem:[%s24858_s13 + $0x1998] ss:$44 sps:$4 sm:$0xff]  }
 0x8fd   :  { %8812 = vmatpush1.bf16.msra.mxu0 %v18212_v13  ;;  %v16094_v13 = vcombine.high %v15997_v51, %v15997_v51 }
 0x8fe   :  { %9563 = vmatpush1.bf16.msra.mxu1 %v18215_v35  ;;  %8813 = vmatprep.subr.bf16.mxu0 %v18220_v62  ;;  %v18259_v35 = vld [vmem:[%s24858_s13 + $0x19f0] ss:$44 sps:$4 sm:$0xff]   ;;  %v18262_v62 = vld [vmem:[%s24858_s13 + $0x1a48] ss:$0 sps:$4 sm:$0x11]  }
 0x8ff   :  { %9564 = vmatprep.subr.bf16.mxu1 %v18223_v29  ;;  %v16093_v29 = vcombine.low %v15997_v51, %v15997_v51  ;;  %v9533_v27 = vand.u32 %v16094_v13, %v19619_v61  ;;  %v15996_v51 = vld [vmem:[%s24858_s13 + $0x1d14] sm:$0x11]  ;;  %v18307_v13 = vld [vmem:[%s24858_s13 + $0x1cc0] ss:$44 sps:$4 sm:$0xff]  }
 0x901   :  { %8814 = vmatpush1.bf16.msra.mxu0 %v18218_v2  ;;  %v8674_v2 = vand.u32 %v18262_v62, %v19619_v61  ;;  %v9530_v3 = vand.u32 %v16093_v29, %v19619_v61  ;;  %v18310_v62 = vld [vmem:[%s24858_s13 + $0x1cd8] ss:$44 sps:$4 sm:$0xff]   ;;  %v18305_v29 = vld [vmem:[%s24858_s13 + $0x1cbc] ss:$44 sps:$4 sm:$0xff]  }
 0x902   :  { %9565 = vmatpush1.bf16.msra.mxu1 %v18221_v11  ;;  %8815 = vmatprep.subr.bf16.mxu0 %v8665_v12  ;;  %v18265_v11 = vld [vmem:[%s24858_s13 + $0x1a58] ss:$44 sps:$4 sm:$0xff]  }
 0x903   :  { %v7085_v38 = vpop.f32.mrb[112].mxu0  ;;  %9566 = vmatprep.subr.bf16.mxu1 %v9521_v36 }
 0x904   :  { %v22696_v63 = vadd.f32 %v7085_v38, %v22337_v42  ;;  %v7836_v21 = vpop.f32.mrb[100].mxu1  ;;  %v7087_v17 = vpop.f32.mrb[113].mxu0 }
 0x905   :  { %v22699_v28 = vadd.f32 %v7836_v21, %v22340_v43  ;;  %v22702_v54 = vadd.f32 %v7087_v17, %v22343_v9  ;;  %v7838_v39 = vpop.f32.mrb[101].mxu1  ;;  %v7089_v16 = vpop.f32.mrb[114].mxu0  ;;  %8816 = vmatpush1.bf16.msra.mxu0 %v8662_v56  ;;  %v18228_v43 = vld [vmem:[%s24858_s13 + $0x1a5c] ss:$44 sps:$4 sm:$0xff]   ;;  %v18263_v17 = vld [vmem:[%s24858_s13 + $0x1a54] ss:$44 sps:$4 sm:$0xff]  }
 0x906   :  { %v22708_v59 = vadd.f32 %v7838_v39, %v22349_v48  ;;  %v7840_v42 = vpop.f32.mrb[102].mxu1  ;;  %9567 = vmatpush1.bf16.msra.mxu1 %v9518_v50  ;;  %v7090_v23 = vpop.f32.mrb[115].mxu0  ;;  %8881 = vmatprep.subr.bf16.mxu0 %v19144_v60  ;;  %v18234_v48 = vld [vmem:[%s24858_s13 + $0x1ab8] ss:$44 sps:$4 sm:$0xff]  }
 0x907   :  { %v7841_v9 = vpop.f32.mrb[103].mxu1  ;;  %9632 = vmatprep.subr.bf16.mxu1 %v18230_v19  ;;  %v18271_v42 = vld [vmem:[%s24858_s13 + $0x1ab0] ss:$44 sps:$4 sm:$0xff]   ;;  %v18269_v23 = vld [vmem:[%s24858_s13 + $0x1aac] ss:$44 sps:$4 sm:$0xff]  }
 0x908   :  { %8832 = vmatmul.mubr.bf16.vlgmr.msra.gmra.mrb[136].mxu0 %v22356_v44  ;;  %v18280_v9 = vld [vmem:[%s24858_s13 + $0x1b20] ss:$44 sps:$4 sm:$0xff]  }
 0x909   :  { %9583 = vmatmul.mubr.bf16.vlgmr.msra.gmra.mrb[124].mxu1 %v22715_v57  ;;  %8882 = vmatpush1.bf16.msra.mxu0 %v18231_v58 }
 0x90a   :  { %15898 = vmatprep.mubr.msk.bf16.mxu0 %vm1771_vm14, %v22239_v34  ;;  %9633 = vmatpush1.bf16.msra.mxu1 %v18228_v43  ;;  %v18239_v34 = vld [vmem:[%s24858_s13 + $0x1838] ss:$44 sps:$4 sm:$0xff]  }
 0x90b   :  { %16102 = vmatprep.mubr.msk.bf16.mxu1 %vm1771_vm14, %v22598_v31  ;;  %8883 = vmatprep.subr.bf16.mxu0 %v19144_v60  ;;  %v18272_v43 = vld [vmem:[%s24858_s13 + $0x1ac4] ss:$44 sps:$4 sm:$0xff]  }
 0x90c   :  { %9634 = vmatprep.subr.bf16.mxu1 %v18234_v48  ;;  %v18275_v48 = vld [vmem:[%s24858_s13 + $0x1b04] ss:$44 sps:$4 sm:$0xff]  }
 0x90d   :  { %8884 = vmatpush1.bf16.msra.mxu0 %v18235_v24  ;;  %v18278_v24 = vld [vmem:[%s24858_s13 + $0x1b1c] ss:$44 sps:$4 sm:$0xff]  }
 0x90e   :  { %9635 = vmatpush1.bf16.msra.mxu1 %v18232_v26  ;;  %8885 = vmatprep.subr.bf16.mxu0 %v19144_v60  ;;  %v18283_v26 = vld [vmem:[%s24858_s13 + $0x1b60] ss:$44 sps:$4 sm:$0xff]  }
 0x90f   :  { %9636 = vmatprep.subr.bf16.mxu1 %v18238_v25  ;;  %v18286_v25 = vld [vmem:[%s24858_s13 + $0x1b78] ss:$44 sps:$4 sm:$0xff]  }
 0x911   :  { %8886 = vmatpush1.bf16.msra.mxu0 %v18239_v34  ;;  %v18281_v34 = vld [vmem:[%s24858_s13 + $0x1b5c] ss:$44 sps:$4 sm:$0xff]  }
 0x912   :  { %9637 = vmatpush1.bf16.msra.mxu1 %v18236_v40  ;;  %8887 = vmatprep.subr.bf16.mxu0 %v19144_v60  ;;  %v18284_v40 = vld [vmem:[%s24858_s13 + $0x1b74] ss:$44 sps:$4 sm:$0xff]  }
 0x913   :  { %9638 = vmatprep.subr.bf16.mxu1 %v18242_v30  ;;  %v18289_v30 = vld [vmem:[%s24858_s13 + $0x1bb8] ss:$44 sps:$4 sm:$0xff]  }
 0x915   :  { %8888 = vmatpush1.bf16.msra.mxu0 %v18243_v32  ;;  %v18292_v32 = vld [vmem:[%s24858_s13 + $0x1bd0] ss:$44 sps:$4 sm:$0xff]  }
 0x916   :  { %9639 = vmatpush1.bf16.msra.mxu1 %v18240_v33  ;;  %8889 = vmatprep.subr.bf16.mxu0 %v19144_v60  ;;  %v18287_v33 = vld [vmem:[%s24858_s13 + $0x1bb4] ss:$44 sps:$4 sm:$0xff]  }
 0x917   :  { %9640 = vmatprep.subr.bf16.mxu1 %v18246_v6  ;;  %v18290_v6 = vld [vmem:[%s24858_s13 + $0x1bcc] ss:$44 sps:$4 sm:$0xff]  }
 0x919   :  { %8890 = vmatpush1.bf16.msra.mxu0 %v18247_v20  ;;  %v18295_v20 = vld [vmem:[%s24858_s13 + $0x1c10] ss:$44 sps:$4 sm:$0xff]  }
 0x91a   :  { %9641 = vmatpush1.bf16.msra.mxu1 %v18244_v4  ;;  %8891 = vmatprep.subr.bf16.mxu0 %v19144_v60  ;;  %v18298_v4 = vld [vmem:[%s24858_s13 + $0x1c28] ss:$44 sps:$4 sm:$0xff]  }
 0x91b   :  { %9642 = vmatprep.subr.bf16.mxu1 %v18250_v46  ;;  %v18293_v46 = vld [vmem:[%s24858_s13 + $0x1c0c] ss:$44 sps:$4 sm:$0xff]  }
 0x91d   :  { %8892 = vmatpush1.bf16.msra.mxu0 %v18251_v47  ;;  %v18296_v47 = vld [vmem:[%s24858_s13 + $0x1c24] ss:$44 sps:$4 sm:$0xff]  }
 0x91e   :  { %9643 = vmatpush1.bf16.msra.mxu1 %v18248_v49  ;;  %8893 = vmatprep.subr.bf16.mxu0 %v19144_v60  ;;  %v18301_v49 = vld [vmem:[%s24858_s13 + $0x1c68] ss:$44 sps:$4 sm:$0xff]  }
 0x91f   :  { %9644 = vmatprep.subr.bf16.mxu1 %v18254_v15  ;;  %v18304_v15 = vld [vmem:[%s24858_s13 + $0x1c80] ss:$44 sps:$4 sm:$0xff]  }
 0x921   :  { %8894 = vmatpush1.bf16.msra.mxu0 %v18255_v14  ;;  %v15999_v14 = vld [vmem:[%s24858_s13 + $0x1d2c] sm:$0x11] }
 0x922   :  { %9645 = vmatpush1.bf16.msra.mxu1 %v18252_v55  ;;  %8895 = vmatprep.subr.bf16.mxu0 %v19144_v60  ;;  %v18299_v55 = vld [vmem:[%s24858_s13 + $0x1c64] ss:$44 sps:$4 sm:$0xff]  }
 0x923   :  { %9646 = vmatprep.subr.bf16.mxu1 %v18258_v41  ;;  %v18302_v41 = vld [vmem:[%s24858_s13 + $0x1c7c] ss:$44 sps:$4 sm:$0xff]  }
 0x925   :  { %8896 = vmatpush1.bf16.msra.mxu0 %v18259_v35  ;;  %v16092_v35 = vcombine.high %v15996_v51, %v15996_v51 }
 0x926   :  { %9647 = vmatpush1.bf16.msra.mxu1 %v18256_v0  ;;  %8897 = vmatprep.subr.bf16.mxu0 %v19144_v60  ;;  %v16098_v0 = vcombine.high %v15999_v14, %v15999_v14 }
 0x927   :  { %v7167_v12 = vpop.f32.mrb[116].mxu0  ;;  %9648 = vmatprep.subr.bf16.mxu1 %v9533_v27  ;;  %v16091_v27 = vcombine.low %v15996_v51, %v15996_v51 }
 0x928   :  { %v22810_v36 = vadd.f32 %v7167_v12, %v22451_v37  ;;  %v7918_v56 = vpop.f32.mrb[104].mxu1  ;;  %v7169_v50 = vpop.f32.mrb[117].mxu0  ;;  %v18266_v37 = vld [vmem:[%s24858_s13 + $0x1a6c] ss:$44 sps:$4 sm:$0xff]   ;;  %v9545_v12 = vand.u32 %v16098_v0, %v19619_v61 }
 0x929   :  { %v22813_v38 = vadd.f32 %v7918_v56, %v22454_v5  ;;  %v7920_v19 = vpop.f32.mrb[105].mxu1  ;;  %v7170_v21 = vpop.f32.mrb[118].mxu0  ;;  %8898 = vmatpush1.bf16.msra.mxu0 %v8674_v2  ;;  %v18308_v2 = vld [vmem:[%s24858_s13 + $0x1cd4] ss:$44 sps:$4 sm:$0xff]  }
 0x92a   :  { %v22819_v39 = vadd.f32 %v7920_v19, %v22460_v22  ;;  %v7922_v16 = vpop.f32.mrb[106].mxu1  ;;  %9649 = vmatpush1.bf16.msra.mxu1 %v9530_v3  ;;  %v7171_v58 = vpop.f32.mrb[119].mxu0  ;;  %9591 = vmatprep.subr.bf16.mxu0 %v18265_v11  ;;  %v18274_v22 = vld [vmem:[%s24858_s13 + $0x1ac8] ss:$44 sps:$4 sm:$0xff]   ;;  %v9527_v3 = vand.u32 %v16092_v35, %v19619_v61  ;;  %v16097_v11 = vcombine.low %v15999_v14, %v15999_v14 }
 0x92b   :  { %v7923_v5 = vpop.f32.mrb[107].mxu1  ;;  %9714 = vmatprep.subr.bf16.mxu1 %v18268_v45  ;;  %v9524_v45 = vand.u32 %v16091_v27, %v19619_v61  ;;  %v18317_v50 = vld [vmem:[%s24858_s13 + $0x1a68] ss:$44 sps:$4 sm:$0xff]  }
 0x92c   :  { %8914 = vmatmul.mubr.bf16.vlgmr.msra.gmra.mrb[140].mxu0 %v22356_v44  ;;  %v18277_v44 = vld [vmem:[%s24858_s13 + $0x1b08] ss:$44 sps:$4 sm:$0xff]   ;;  %v9542_v56 = vand.u32 %v16097_v11, %v19619_v61 }
 0x92d   :  { %9665 = vmatmul.mubr.bf16.vlgmr.msra.gmra.mrb[128].mxu1 %v22715_v57  ;;  %9592 = vmatpush1.bf16.msra.mxu0 %v18263_v17  ;;  %v18410_v35 = vld [vmem:[%s24860_s15 + $0x330] ss:$24 sps:$4 sm:$0xff]  }
 0x92e   :  { %16101 = vmatprep.mubr.msk.bf16.mxu0 %vm1771_vm14, %v22598_v31  ;;  %9715 = vmatpush1.bf16.msra.mxu1 %v18266_v37 }
 0x92f   :  { %16104 = vmatprep.mubr.msk.bf16.mxu1 %vm1771_vm14, %v22598_v31  ;;  %9593 = vmatprep.subr.bf16.mxu0 %v18271_v42 }
 0x930   :  { %9716 = vmatprep.subr.bf16.mxu1 %v18274_v22  ;;  %v18315_v22 = vld [vmem:[%s24858_s13 + $0x1a64] ss:$44 sps:$4 sm:$0xff]  }
 0x931   :  { %9594 = vmatpush1.bf16.msra.mxu0 %v18269_v23 }
 0x932   :  { %9717 = vmatpush1.bf16.msra.mxu1 %v18272_v43  ;;  %9595 = vmatprep.subr.bf16.mxu0 %v18277_v44  ;;  %v18318_v44 = vld [vmem:[%s24858_s13 + $0x1abc] ss:$44 sps:$4 sm:$0xff]  }
 0x933   :  { %9718 = vmatprep.subr.bf16.mxu1 %v18280_v9  ;;  %v18321_v9 = vld [vmem:[%s24858_s13 + $0x1b14] ss:$44 sps:$4 sm:$0xff]  }
 0x935   :  { %9596 = vmatpush1.bf16.msra.mxu0 %v18275_v48  ;;  %v18326_v48 = vld [vmem:[%s24858_s13 + $0x1b70] ss:$44 sps:$4 sm:$0xff]  }
 0x936   :  { %9719 = vmatpush1.bf16.msra.mxu1 %v18278_v24  ;;  %9597 = vmatprep.subr.bf16.mxu0 %v18283_v26  ;;  %v18324_v24 = vld [vmem:[%s24858_s13 + $0x1b6c] ss:$44 sps:$4 sm:$0xff]   ;;  %v18329_v26 = vld [vmem:[%s24858_s13 + $0x1bc8] ss:$44 sps:$4 sm:$0xff]  }
 0x937   :  { %9720 = vmatprep.subr.bf16.mxu1 %v18286_v25  ;;  %v18327_v25 = vld [vmem:[%s24858_s13 + $0x1bc4] ss:$44 sps:$4 sm:$0xff]  }
 0x939   :  { %9598 = vmatpush1.bf16.msra.mxu0 %v18281_v34  ;;  %v18332_v34 = vld [vmem:[%s24858_s13 + $0x1c20] ss:$44 sps:$4 sm:$0xff]  }
 0x93a   :  { %9721 = vmatpush1.bf16.msra.mxu1 %v18284_v40  ;;  %9599 = vmatprep.subr.bf16.mxu0 %v18289_v30  ;;  %v18330_v40 = vld [vmem:[%s24858_s13 + $0x1c1c] ss:$44 sps:$4 sm:$0xff]   ;;  %v18335_v30 = vld [vmem:[%s24858_s13 + $0x1c78] ss:$44 sps:$4 sm:$0xff]  }
 0x93b   :  { %9722 = vmatprep.subr.bf16.mxu1 %v18292_v32  ;;  %v15998_v32 = vld [vmem:[%s24858_s13 + $0x1d24] sm:$0x11] }
 0x93d   :  { %9600 = vmatpush1.bf16.msra.mxu0 %v18287_v33  ;;  %v18333_v33 = vld [vmem:[%s24858_s13 + $0x1c74] ss:$44 sps:$4 sm:$0xff]  }
 0x93e   :  { %9723 = vmatpush1.bf16.msra.mxu1 %v18290_v6  ;;  %9601 = vmatprep.subr.bf16.mxu0 %v18295_v20  ;;  %v18338_v6 = vld [vmem:[%s24858_s13 + $0x1cd0] ss:$44 sps:$4 sm:$0xff]   ;;  %v16096_v20 = vcombine.high %v15998_v32, %v15998_v32 }
 0x93f   :  { %9724 = vmatprep.subr.bf16.mxu1 %v18298_v4  ;;  %v18336_v4 = vld [vmem:[%s24858_s13 + $0x1ccc] ss:$44 sps:$4 sm:$0xff]  }
 0x941   :  { %9602 = vmatpush1.bf16.msra.mxu0 %v18293_v46  ;;  %v16095_v46 = vcombine.low %v15998_v32, %v15998_v32 }
 0x942   :  { %9725 = vmatpush1.bf16.msra.mxu1 %v18296_v47  ;;  %9603 = vmatprep.subr.bf16.mxu0 %v18301_v49  ;;  %v9539_v47 = vand.u32 %v16096_v20, %v19619_v61  ;;  %v18404_v49 = vld [vmem:[%s24860_s15 + $0x300] ss:$24 sps:$4 sm:$0xff]  }
 0x943   :  { %9726 = vmatprep.subr.bf16.mxu1 %v18304_v15  ;;  %v18406_v15 = vld [vmem:[%s24860_s15 + $0x304] ss:$24 sps:$4 sm:$0xff]   ;;  %v9536_v51 = vand.u32 %v16095_v46, %v19619_v61 }
 0x945   :  { %9604 = vmatpush1.bf16.msra.mxu0 %v18299_v55 }
 0x946   :  { %9727 = vmatpush1.bf16.msra.mxu1 %v18302_v41  ;;  %9605 = vmatprep.subr.bf16.mxu0 %v18307_v13 }
 0x947   :  { %9728 = vmatprep.subr.bf16.mxu1 %v18310_v62  ;;  %v18412_v62 = vld [vmem:[%s24860_s15 + $0x334] ss:$24 sps:$4 sm:$0xff]  }
 0x949   :  { %9606 = vmatpush1.bf16.msra.mxu0 %v18305_v29 }
 0x94a   :  { %9729 = vmatpush1.bf16.msra.mxu1 %v18308_v2  ;;  %9607 = vmatprep.subr.bf16.mxu0 %v9527_v3 }
 0x94b   :  { %v7877_v19 = vpop.f32.mrb[120].mxu0  ;;  %9730 = vmatprep.subr.bf16.mxu1 %v9545_v12 }
 0x94c   :  { %v22928_v21 = vadd.f32 %v7877_v19, %v22572_v1  ;;  %v8000_v17 = vpop.f32.mrb[108].mxu1  ;;  %v7879_v16 = vpop.f32.mrb[121].mxu0  ;;  %v18428_v19 = vld [vmem:[%s24860_s15 + $0x3c0] ss:$24 sps:$4 sm:$0xff]  }
 0x94d   :  { %v22931_v58 = vadd.f32 %v8000_v17, %v22575_v52  ;;  %v22934_v37 = vadd.f32 %v7879_v16, %v22578_v18  ;;  %v8002_v5 = vpop.f32.mrb[109].mxu1  ;;  %v7881_v42 = vpop.f32.mrb[122].mxu0  ;;  %9608 = vmatpush1.bf16.msra.mxu0 %v9524_v45  ;;  %v18320_v52 = vld [vmem:[%s24858_s13 + $0x1ac0] ss:$44 sps:$4 sm:$0xff]   ;;  %v18418_v45 = vld [vmem:[%s24860_s15 + $0x364] ss:$24 sps:$4 sm:$0xff]  }
 0x94e   :  { %v22940_v23 = vadd.f32 %v8002_v5, %v22584_v53  ;;  %v8004_v1 = vpop.f32.mrb[110].mxu1  ;;  %9731 = vmatpush1.bf16.msra.mxu1 %v9542_v56  ;;  %v7882_v43 = vpop.f32.mrb[123].mxu0  ;;  %9673 = vmatprep.subr.bf16.mxu0 %v18317_v50  ;;  %v18323_v53 = vld [vmem:[%s24858_s13 + $0x1b18] ss:$44 sps:$4 sm:$0xff]   ;;  %v18422_v56 = vld [vmem:[%s24860_s15 + $0x390] ss:$24 sps:$4 sm:$0xff]  }
 0x94f   :  { %v8005_v18 = vpop.f32.mrb[111].mxu1  ;;  %12904 = vmatprep.subr.bf16.mxu1 %v18406_v15  ;;  %v18424_v50 = vld [vmem:[%s24860_s15 + $0x394] ss:$24 sps:$4 sm:$0xff]   ;;  %v18430_v17 = vld [vmem:[%s24860_s15 + $0x3c4] ss:$24 sps:$4 sm:$0xff]  }
 0x950   :  { %9624 = vmatmul.mubr.bf16.vlgmr.msra.gmra.mrb[144].mxu0 %v22715_v57  ;;  %v18344_v16 = vld [vmem:[%s24858_s13 + $0x1b7c] ss:$44 sps:$4 sm:$0xff]   ;;  %v18345_v5 = vld [vmem:[%s24858_s13 + $0x1bd4] ss:$44 sps:$4 sm:$0xff]   ;;  %v18346_v1 = vld [vmem:[%s24858_s13 + $0x1c2c] ss:$44 sps:$4 sm:$0xff]  }
 0x951   :  { %9747 = vmatmul.mubr.bf16.vlgmr.msra.gmra.mrb[132].mxu1 %v22715_v57  ;;  %9674 = vmatpush1.bf16.msra.mxu0 %v18315_v22  ;;  %v18436_v42 = vld [vmem:[%s24860_s15 + $0x3f4] ss:$24 sps:$4 sm:$0xff]   ;;  %v18434_v22 = vld [vmem:[%s24860_s15 + $0x3f0] ss:$24 sps:$4 sm:$0xff]   ;;  %v18442_v43 = vld [vmem:[%s24860_s15 + $0x424] ss:$24 sps:$4 sm:$0xff]  }
 0x952   :  { %16103 = vmatprep.mubr.msk.bf16.mxu0 %vm1771_vm14, %v22598_v31  ;;  %9675 = vmatprep.subr.bf16.mxu0 %v18320_v52  ;;  %v18440_v52 = vld [vmem:[%s24860_s15 + $0x420] ss:$24 sps:$4 sm:$0xff]   ;;  %v18448_v18 = vld [vmem:[%s24860_s15 + $0x454] ss:$24 sps:$4 sm:$0xff]  }
 0x953   :  { %12905 = vmatpush1.bf16.msra.mxu1 %v18404_v49  ;;  %v18350_v49 = vld [vmem:[%s24860_s15] ss:$24 sps:$4 sm:$0xff]  }
 0x954   :  { %12906 = vmatprep.subr.bf16.mxu1 %v18412_v62  ;;  %v18358_v62 = vld [vmem:[%s24860_s15 + $0x64] ss:$24 sps:$4 sm:$0xff]  }
 0x955   :  { %9676 = vmatpush1.bf16.msra.mxu0 %v18318_v44  ;;  %v18347_v44 = vld [vmem:[%s24858_s13 + $0x1c84] ss:$44 sps:$4 sm:$0xff]  }
 0x956   :  { %9677 = vmatprep.subr.bf16.mxu0 %v18323_v53  ;;  %v18446_v53 = vld [vmem:[%s24860_s15 + $0x450] ss:$24 sps:$4 sm:$0xff]  }
 0x957   :  { %12907 = vmatpush1.bf16.msra.mxu1 %v18410_v35  ;;  %v18470_v35 = vld [vmem:[%s24860_s15 + $0x510] ss:$24 sps:$4 sm:$0xff]  }
 0x958   :  { %12908 = vmatprep.subr.bf16.mxu1 %v18418_v45  ;;  %v18362_v45 = vld [vmem:[%s24860_s15 + $0xc0] ss:$24 sps:$4 sm:$0xff]  }
 0x959   :  { %9678 = vmatpush1.bf16.msra.mxu0 %v18321_v9  ;;  %v18348_v9 = vld [vmem:[%s24858_s13 + $0x1cdc] ss:$44 sps:$4 sm:$0xff]  }
 0x95a   :  { %9679 = vmatprep.subr.bf16.mxu0 %v18326_v48  ;;  %v18454_v48 = vld [vmem:[%s24860_s15 + $0x484] ss:$24 sps:$4 sm:$0xff]  }
 0x95d   :  { %9680 = vmatpush1.bf16.msra.mxu0 %v18324_v24  ;;  %v18349_v24 = vld [vmem:[%s24858_s13 + $0x1d34] ss:$0 sps:$4 sm:$0x11]  }
 0x95e   :  { %9681 = vmatprep.subr.bf16.mxu0 %v18329_v26  ;;  %v18452_v26 = vld [vmem:[%s24860_s15 + $0x480] ss:$24 sps:$4 sm:$0xff]  }
 0x961   :  { %9682 = vmatpush1.bf16.msra.mxu0 %v18327_v25  ;;  %v18460_v25 = vld [vmem:[%s24860_s15 + $0x4b4] ss:$24 sps:$4 sm:$0xff]  }
 0x962   :  { %9683 = vmatprep.subr.bf16.mxu0 %v18332_v34  ;;  %v9548_v34 = vand.u32 %v18349_v24, %v19619_v61  ;;  %v18466_v61 = vld [vmem:[%s24860_s15 + $0x4e4] ss:$24 sps:$4 sm:$0xff]  }
 0x965   :  { %9684 = vmatpush1.bf16.msra.mxu0 %v18330_v40  ;;  %v18458_v40 = vld [vmem:[%s24860_s15 + $0x4b0] ss:$24 sps:$4 sm:$0xff]  }
 0x966   :  { %9685 = vmatprep.subr.bf16.mxu0 %v18335_v30  ;;  %v18352_v30 = vld [vmem:[%s24860_s15 + $0x4] ss:$24 sps:$4 sm:$0xff]  }
 0x969   :  { %9686 = vmatpush1.bf16.msra.mxu0 %v18333_v33 }
 0x96a   :  { %9687 = vmatprep.subr.bf16.mxu0 %v18338_v6 }
 0x96d   :  { %9688 = vmatpush1.bf16.msra.mxu0 %v18336_v4 }
 0x96e   :  { %9689 = vmatprep.subr.bf16.mxu0 %v9539_v47 }
 0x96f   :  { %v7959_v14 = vpop.f32.mrb[124].mxu0 }
 0x970   :  { %v23000_v55 = vadd.f32 %v7959_v14, %v22696_v63  ;;  %v8710_v41 = vpop.f32.mrb[112].mxu1  ;;  %v7961_v13 = vpop.f32.mrb[125].mxu0  ;;  %v18341_v63 = vld [vmem:[%s24858_s13 + $0x1a74] ss:$44 sps:$4 sm:$0xff]  }
 0x971   :  { %v23009_v0 = vadd.f32 %v8710_v41, %v22699_v28  ;;  %v23012_v29 = vadd.f32 %v7961_v13, %v22702_v54  ;;  %v8712_v27 = vpop.f32.mrb[113].mxu1  ;;  %v7963_v2 = vpop.f32.mrb[126].mxu0  ;;  %9690 = vmatpush1.bf16.msra.mxu0 %v9536_v51  ;;  %v18416_v54 = vld [vmem:[%s24860_s15 + $0x360] ss:$24 sps:$4 sm:$0xff]   ;;  %v18472_v13 = vld [vmem:[%s24860_s15 + $0x514] ss:$24 sps:$4 sm:$0xff]  }
 0x972   :  { %v23018_v3 = vadd.f32 %v8712_v27, %v22708_v59  ;;  %v8714_v11 = vpop.f32.mrb[114].mxu1  ;;  %v7964_v12 = vpop.f32.mrb[127].mxu0  ;;  %9755 = vmatprep.subr.bf16.mxu0 %v19144_v60  ;;  %v18342_v59 = vld [vmem:[%s24858_s13 + $0x1acc] ss:$44 sps:$4 sm:$0xff]   ;;  %12909 = vmatpush1.bf16.msra.mxu1 %v18416_v54  ;;  %v18364_v54 = vld [vmem:[%s24860_s15 + $0xc4] ss:$24 sps:$4 sm:$0xff]  }
 0x973   :  { %v8715_v28 = vpop.f32.mrb[115].mxu1  ;;  %12910 = vmatprep.subr.bf16.mxu1 %v18424_v50  ;;  %v18356_v27 = vld [vmem:[%s24860_s15 + $0x60] ss:$24 sps:$4 sm:$0xff]   ;;  %v18484_v11 = vld [vmem:[%s24860_s15 + $0x574] ss:$24 sps:$4 sm:$0xff]  }
 0x974   :  { %9706 = vmatmul.mubr.bf16.vlgmr.msra.gmra.mrb[148].mxu0 %v22715_v57  ;;  %v18476_v2 = vld [vmem:[%s24860_s15 + $0x540] ss:$24 sps:$4 sm:$0xff]   ;;  %v18359_v12 = vld [vmem:[%s24860_s15 + $0x90] ss:$24 sps:$4 sm:$0xff]  }
 0x975   :  { %9756 = vmatpush1.bf16.msra.mxu0 %v18341_v63  ;;  %16105 = vmatprep.mubr.msk.bf16.mxu0 %vm1771_vm14, %v22598_v31  ;;  %v18343_v31 = vld [vmem:[%s24858_s13 + $0x1b24] ss:$44 sps:$4 sm:$0xff]   ;;  %v18361_v63 = vld [vmem:[%s24860_s15 + $0x94] ss:$24 sps:$4 sm:$0xff]   ;;  %v18488_v50 = vld [vmem:[%s24860_s15 + $0x5a0] ss:$24 sps:$4 sm:$0xff]  }
 0x976   :  { %9757 = vmatprep.subr.bf16.mxu0 %v19144_v60  ;;  %12911 = vmatpush1.bf16.msra.mxu1 %v18422_v56  ;;  %v18482_v28 = vld [vmem:[%s24860_s15 + $0x570] ss:$24 sps:$4 sm:$0xff]   ;;  %v18490_v56 = vld [vmem:[%s24860_s15 + $0x5a4] ss:$24 sps:$4 sm:$0xff]  }
 0x977   :  { %12912 = vmatprep.subr.bf16.mxu1 %v18430_v17  ;;  %v18496_v17 = vld [vmem:[%s24860_s15 + $0x5d4] ss:$24 sps:$4 sm:$0xff]  }
 0x979   :  { %9758 = vmatpush1.bf16.msra.mxu0 %v18342_v59  ;;  %v18367_v59 = vld [vmem:[%s24860_s15 + $0xf4] ss:$24 sps:$4 sm:$0xff]  }
 0x97a   :  { %9759 = vmatprep.subr.bf16.mxu0 %v19144_v60  ;;  %12913 = vmatpush1.bf16.msra.mxu1 %v18428_v19  ;;  %v18370_v19 = vld [vmem:[%s24860_s15 + $0x124] ss:$24 sps:$4 sm:$0xff]  }
 0x97b   :  { %12914 = vmatprep.subr.bf16.mxu1 %v18436_v42  ;;  %v18502_v42 = vld [vmem:[%s24860_s15 + $0x604] ss:$24 sps:$4 sm:$0xff]  }
 0x97d   :  { %9760 = vmatpush1.bf16.msra.mxu0 %v18343_v31  ;;  %v18365_v31 = vld [vmem:[%s24860_s15 + $0xf0] ss:$24 sps:$4 sm:$0xff]  }
 0x97e   :  { %9761 = vmatprep.subr.bf16.mxu0 %v19144_v60  ;;  %12915 = vmatpush1.bf16.msra.mxu1 %v18434_v22  ;;  %v18373_v22 = vld [vmem:[%s24860_s15 + $0x154] ss:$24 sps:$4 sm:$0xff]  }
 0x97f   :  { %12916 = vmatprep.subr.bf16.mxu1 %v18442_v43  ;;  %v18376_v43 = vld [vmem:[%s24860_s15 + $0x184] ss:$24 sps:$4 sm:$0xff]  }
 0x981   :  { %9762 = vmatpush1.bf16.msra.mxu0 %v18344_v16  ;;  %v18494_v16 = vld [vmem:[%s24860_s15 + $0x5d0] ss:$24 sps:$4 sm:$0xff]  }
 0x982   :  { %9763 = vmatprep.subr.bf16.mxu0 %v19144_v60  ;;  %12917 = vmatpush1.bf16.msra.mxu1 %v18440_v52  ;;  %v18374_v52 = vld [vmem:[%s24860_s15 + $0x180] ss:$24 sps:$4 sm:$0xff]  }
 0x983   :  { %12918 = vmatprep.subr.bf16.mxu1 %v18448_v18  ;;  %v18379_v18 = vld [vmem:[%s24860_s15 + $0x1b4] ss:$24 sps:$4 sm:$0xff]  }
 0x985   :  { %9764 = vmatpush1.bf16.msra.mxu0 %v18345_v5  ;;  %v18368_v5 = vld [vmem:[%s24860_s15 + $0x120] ss:$24 sps:$4 sm:$0xff]  }
 0x986   :  { %9765 = vmatprep.subr.bf16.mxu0 %v19144_v60  ;;  %12919 = vmatpush1.bf16.msra.mxu1 %v18446_v53 }
 0x987   :  { %12920 = vmatprep.subr.bf16.mxu1 %v18454_v48 }
 0x989   :  { %9766 = vmatpush1.bf16.msra.mxu0 %v18346_v1  ;;  %v18371_v1 = vld [vmem:[%s24860_s15 + $0x150] ss:$24 sps:$4 sm:$0xff]  }
 0x98a   :  { %9767 = vmatprep.subr.bf16.mxu0 %v19144_v60  ;;  %12921 = vmatpush1.bf16.msra.mxu1 %v18452_v26 }
 0x98b   :  { %12922 = vmatprep.subr.bf16.mxu1 %v18460_v25 }
 0x98d   :  { %9768 = vmatpush1.bf16.msra.mxu0 %v18347_v44 }
 0x98e   :  { %9769 = vmatprep.subr.bf16.mxu0 %v19144_v60  ;;  %12923 = vmatpush1.bf16.msra.mxu1 %v18458_v40  ;;  %v18377_v40 = vld [vmem:[%s24860_s15 + $0x1b0] ss:$24 sps:$4 sm:$0xff]  }
 0x98f   :  { %12924 = vmatprep.subr.bf16.mxu1 %v18466_v61  ;;  %v18388_v61 = vld [vmem:[%s24860_s15 + $0x244] ss:$24 sps:$4 sm:$0xff]  }
 0x991   :  { %9770 = vmatpush1.bf16.msra.mxu0 %v18348_v9 }
 0x992   :  { %9771 = vmatprep.subr.bf16.mxu0 %v19144_v60 }
 0x993   :  { %v8041_v32 = vpop.f32.mrb[128].mxu0 }
 0x994   :  { %v23109_v33 = vadd.f32 %v8041_v32, %v22810_v36  ;;  %v8792_v6 = vpop.f32.mrb[116].mxu1  ;;  %v8043_v20 = vpop.f32.mrb[129].mxu0  ;;  %v18464_v36 = vld [vmem:[%s24860_s15 + $0x4e0] ss:$24 sps:$4 sm:$0xff]  }
 0x995   :  { %v23115_v4 = vadd.f32 %v8792_v6, %v22813_v38  ;;  %v8794_v46 = vpop.f32.mrb[117].mxu1  ;;  %v8044_v47 = vpop.f32.mrb[130].mxu0  ;;  %9772 = vmatpush1.bf16.msra.mxu0 %v9548_v34  ;;  %v18355_v38 = vld [vmem:[%s24860_s15 + $0x34] ss:$24 sps:$4 sm:$0xff]   ;;  %12925 = vmatpush1.bf16.msra.mxu1 %v18464_v36  ;;  %v18394_v36 = vld [vmem:[%s24860_s15 + $0x2a4] ss:$24 sps:$4 sm:$0xff]  }
 0x996   :  { %v23124_v15 = vadd.f32 %v8794_v46, %v22819_v39  ;;  %v8796_v51 = vpop.f32.mrb[118].mxu1  ;;  %v8045_v14 = vpop.f32.mrb[131].mxu0  ;;  %12863 = vmatprep.subr.bf16.mxu0 %v18352_v30  ;;  %v18353_v39 = vld [vmem:[%s24860_s15 + $0x30] ss:$24 sps:$4 sm:$0xff]   ;;  %12926 = vmatprep.subr.bf16.mxu1 %v18472_v13  ;;  %v18385_v20 = vld [vmem:[%s24860_s15 + $0x214] ss:$24 sps:$4 sm:$0xff]  }
 0x997   :  { %v8797_v41 = vpop.f32.mrb[119].mxu1  ;;  %v18386_v46 = vld [vmem:[%s24860_s15 + $0x240] ss:$24 sps:$4 sm:$0xff]   ;;  %v18391_v47 = vld [vmem:[%s24860_s15 + $0x274] ss:$24 sps:$4 sm:$0xff]  }
 0x998   :  { %9788 = vmatmul.mubr.bf16.vlgmr.msra.gmra.mrb[152].mxu0 %v22715_v57  ;;  %v18478_v57 = vld [vmem:[%s24860_s15 + $0x544] ss:$24 sps:$4 sm:$0xff]   ;;  %v18392_v51 = vld [vmem:[%s24860_s15 + $0x2a0] ss:$24 sps:$4 sm:$0xff]   ;;  %v18397_v14 = vld [vmem:[%s24860_s15 + $0x2d4] ss:$24 sps:$4 sm:$0xff]  }
 0x999   :  { %12864 = vmatpush1.bf16.msra.mxu0 %v18350_v49  ;;  %12927 = vmatpush1.bf16.msra.mxu1 %v18470_v35  ;;  %v18389_v49 = vld [vmem:[%s24860_s15 + $0x270] ss:$24 sps:$4 sm:$0xff]   ;;  %v18400_v41 = vld [vmem:[%s24860_s15 + $0xc] ss:$24 sps:$4 sm:$0xff]  }
 0x99a   :  { %12865 = vmatprep.subr.bf16.mxu0 %v18355_v38  ;;  %12928 = vmatprep.subr.bf16.mxu1 %v18478_v57  ;;  %v18395_v38 = vld [vmem:[%s24860_s15 + $0x2d0] ss:$24 sps:$4 sm:$0xff]   ;;  %v23268_v13 = vld [vmem:[%s24859_s14] sm:$0xff] }
 0x99b   :  { %v9813_v35 = vrot.slane %v23268_v13, %v19634_v8 }
 0x99d   :  { %12866 = vmatpush1.bf16.msra.mxu0 %v18353_v39  ;;  %12929 = vmatpush1.bf16.msra.mxu1 %v18476_v2  ;;  %v9817_v2 = vrot.slane %v23268_v13, %v19640_v10 }
 0x99e   :  { %12867 = vmatprep.subr.bf16.mxu0 %v18358_v62  ;;  %12930 = vmatprep.subr.bf16.mxu1 %v18484_v11 }
 0x9a1   :  { %12868 = vmatpush1.bf16.msra.mxu0 %v18356_v27  ;;  %12931 = vmatpush1.bf16.msra.mxu1 %v18482_v28 }
 0x9a2   :  { %12869 = vmatprep.subr.bf16.mxu0 %v18361_v63  ;;  %12932 = vmatprep.subr.bf16.mxu1 %v18490_v56 }
 0x9a5   :  { %12870 = vmatpush1.bf16.msra.mxu0 %v18359_v12  ;;  %12933 = vmatpush1.bf16.msra.mxu1 %v18488_v50 }
 0x9a6   :  { %12871 = vmatprep.subr.bf16.mxu0 %v18364_v54  ;;  %12934 = vmatprep.subr.bf16.mxu1 %v18496_v17 }
 0x9a9   :  { %12872 = vmatpush1.bf16.msra.mxu0 %v18362_v45  ;;  %12935 = vmatpush1.bf16.msra.mxu1 %v18494_v16 }
 0x9aa   :  { %12873 = vmatprep.subr.bf16.mxu0 %v18367_v59  ;;  %12945 = vmatprep.subr.bf16.mxu1 %v18502_v42  ;;  %v18407_v42 = vld [vmem:[%s24860_s15 + $0x68] ss:$24 sps:$4 sm:$0xff]  }
 0x9ad   :  { %12874 = vmatpush1.bf16.msra.mxu0 %v18365_v31 }
 0x9ae   :  { %12875 = vmatprep.subr.bf16.mxu0 %v18370_v19 }
 0x9b1   :  { %12876 = vmatpush1.bf16.msra.mxu0 %v18368_v5  ;;  %v18409_v5 = vld [vmem:[%s24860_s15 + $0x6c] ss:$24 sps:$4 sm:$0xff]  }
 0x9b2   :  { %12877 = vmatprep.subr.bf16.mxu0 %v18373_v22  ;;  %v18415_v22 = vld [vmem:[%s24860_s15 + $0x9c] ss:$24 sps:$4 sm:$0xff]  }
 0x9b5   :  { %12878 = vmatpush1.bf16.msra.mxu0 %v18371_v1  ;;  %v18413_v1 = vld [vmem:[%s24860_s15 + $0x98] ss:$24 sps:$4 sm:$0xff]  }
 0x9b6   :  { %12879 = vmatprep.subr.bf16.mxu0 %v18376_v43  ;;  %v18421_v43 = vld [vmem:[%s24860_s15 + $0xcc] ss:$24 sps:$4 sm:$0xff]  }
 0x9b7   :  { %v8751_v44 = vpop.f32.mrb[132].mxu0 }
 0x9b8   :  { %v23212_v53 = vadd.f32 %v8751_v44, %v22928_v21  ;;  %v8874_v9 = vpop.f32.mrb[120].mxu1  ;;  %v8753_v48 = vpop.f32.mrb[133].mxu0  ;;  %v18425_v44 = vld [vmem:[%s24860_s15 + $0xf8] ss:$24 sps:$4 sm:$0xff]  }
 0x9b9   :  { %v23215_v24 = vadd.f32 %v8874_v9, %v22931_v58  ;;  %v23218_v26 = vadd.f32 %v8753_v48, %v22934_v37  ;;  %v8876_v25 = vpop.f32.mrb[121].mxu1  ;;  %v8755_v34 = vpop.f32.mrb[134].mxu0  ;;  %12880 = vmatpush1.bf16.msra.mxu0 %v18374_v52  ;;  %v18382_v58 = vld [vmem:[%s24860_s15 + $0x1e4] ss:$24 sps:$4 sm:$0xff]   ;;  %v18380_v37 = vld [vmem:[%s24860_s15 + $0x1e0] ss:$24 sps:$4 sm:$0xff]  }
 0x9ba   :  { %v23224_v30 = vadd.f32 %v8876_v25, %v22940_v23  ;;  %v8878_v21 = vpop.f32.mrb[122].mxu1  ;;  %v8756_v32 = vpop.f32.mrb[135].mxu0  ;;  %12881 = vmatprep.subr.bf16.mxu0 %v18379_v18  ;;  %v18383_v23 = vld [vmem:[%s24860_s15 + $0x210] ss:$24 sps:$4 sm:$0xff]   ;;  %v18427_v18 = vld [vmem:[%s24860_s15 + $0xfc] ss:$24 sps:$4 sm:$0xff]  }
 0x9bb   :  { %v8879_v6 = vpop.f32.mrb[123].mxu1  ;;  %v18419_v52 = vld [vmem:[%s24860_s15 + $0xc8] ss:$24 sps:$4 sm:$0xff]   ;;  %v18433_v9 = vld [vmem:[%s24860_s15 + $0x12c] ss:$24 sps:$4 sm:$0xff]  }
 0x9bc   :  { %v18431_v48 = vld [vmem:[%s24860_s15 + $0x128] ss:$24 sps:$4 sm:$0xff]   ;;  %v18439_v25 = vld [vmem:[%s24860_s15 + $0x15c] ss:$24 sps:$4 sm:$0xff]  }
 0x9bd   :  { %12882 = vmatpush1.bf16.msra.mxu0 %v18377_v40 }
 0x9be   :  { %12883 = vmatprep.subr.bf16.mxu0 %v18382_v58  ;;  %v18437_v58 = vld [vmem:[%s24860_s15 + $0x158] ss:$24 sps:$4 sm:$0xff]  }
 0x9c1   :  { %12884 = vmatpush1.bf16.msra.mxu0 %v18380_v37 }
 0x9c2   :  { %12885 = vmatprep.subr.bf16.mxu0 %v18385_v20 }
 0x9c5   :  { %12886 = vmatpush1.bf16.msra.mxu0 %v18383_v23  ;;  %v18445_v23 = vld [vmem:[%s24860_s15 + $0x18c] ss:$24 sps:$4 sm:$0xff]  }
 0x9c6   :  { %12887 = vmatprep.subr.bf16.mxu0 %v18388_v61 }
 0x9c9   :  { %12888 = vmatpush1.bf16.msra.mxu0 %v18386_v46 }
 0x9ca   :  { %12889 = vmatprep.subr.bf16.mxu0 %v18391_v47 }
 0x9cd   :  { %12890 = vmatpush1.bf16.msra.mxu0 %v18389_v49  ;;  %v18443_v49 = vld [vmem:[%s24860_s15 + $0x188] ss:$24 sps:$4 sm:$0xff]  }
 0x9ce   :  { %12891 = vmatprep.subr.bf16.mxu0 %v18394_v36  ;;  %v18449_v36 = vld [vmem:[%s24860_s15 + $0x1b8] ss:$24 sps:$4 sm:$0xff]  }
 0x9d1   :  { %12892 = vmatpush1.bf16.msra.mxu0 %v18392_v51  ;;  %v18455_v51 = vld [vmem:[%s24860_s15 + $0x1e8] ss:$24 sps:$4 sm:$0xff]  }
 0x9d2   :  { %12893 = vmatprep.subr.bf16.mxu0 %v18397_v14  ;;  %v18463_v14 = vld [vmem:[%s24860_s15 + $0x21c] ss:$24 sps:$4 sm:$0xff]  }
 0x9d5   :  { %12894 = vmatpush1.bf16.msra.mxu0 %v18395_v38  ;;  %v18461_v38 = vld [vmem:[%s24860_s15 + $0x218] ss:$24 sps:$4 sm:$0xff]  }
 0x9d6   :  { %13109 = vmatprep.subr.bf16.mxu0 %v18400_v41  ;;  %v18469_v41 = vld [vmem:[%s24860_s15 + $0x24c] ss:$24 sps:$4 sm:$0xff]  }
 0x9db   :  { %v8833_v39 = vpop.f32.mrb[136].mxu0 }
 0x9dc   :  { %v23273_v62 = vadd.f32 %v8833_v39, %v23000_v55  ;;  %v9584_v57 = vpop.f32.mrb[124].mxu1  ;;  %v8835_v27 = vpop.f32.mrb[137].mxu0  ;;  %v18467_v39 = vld [vmem:[%s24860_s15 + $0x248] ss:$24 sps:$4 sm:$0xff]  }
 0x9dd   :  { %v9795_v63 = vadd.f32 %v9584_v57, %v23009_v0  ;;  %v23279_v11 = vadd.f32 %v8835_v27, %v23012_v29  ;;  %v9586_v12 = vpop.f32.mrb[125].mxu1  ;;  %v8837_v28 = vpop.f32.mrb[138].mxu0  ;;  %v18398_v0 = vld [vmem:[%s24860_s15 + $0x8] ss:$24 sps:$4 sm:$0xff]   ;;  %v18403_v29 = vld [vmem:[%s24860_s15 + $0x3c] ss:$24 sps:$4 sm:$0xff]  }
 0x9de   :  { %v9796_v54 = vadd.f32 %v9586_v12, %v23018_v3  ;;  %v9588_v45 = vpop.f32.mrb[126].mxu1  ;;  %v8838_v59 = vpop.f32.mrb[139].mxu0  ;;  %v18401_v3 = vld [vmem:[%s24860_s15 + $0x38] ss:$24 sps:$4 sm:$0xff]   ;;  %v18481_v27 = vld [vmem:[%s24860_s15 + $0x2ac] ss:$24 sps:$4 sm:$0xff]  }
 0x9df   :  { %v9865_v56 = vadd.f32 %v9813_v35, %v9795_v63  ;;  %v9589_v50 = vpop.f32.mrb[127].mxu1  ;;  %v18475_v35 = vld [vmem:[%s24860_s15 + $0x27c] ss:$24 sps:$4 sm:$0xff]   ;;  %v18473_v57 = vld [vmem:[%s24860_s15 + $0x278] ss:$24 sps:$4 sm:$0xff]   ;;  %v9832_v63 = vsub.s32 5, %v19631_v7 }
 0x9e0   :  { %v9866_v55 = vadd.f32 %v9817_v2, %v9796_v54  ;;  %v18479_v2 = vld [vmem:[%s24860_s15 + $0x2a8] ss:$24 sps:$4 sm:$0xff]   ;;  %v18487_v12 = vld [vmem:[%s24860_s15 + $0x2dc] ss:$24 sps:$4 sm:$0xff]   ;;  %v23388_v28 = vsub.s32 2, %v19631_v7  ;;  %v9824_v54 = vsub.s32 3, %v19631_v7 }
 0x9e1   :  { %v9876_v31 = vmax.f32 %v9865_v56, 0.0  ;;  %v18485_v45 = vld [vmem:[%s24860_s15 + $0x2d8] ss:$24 sps:$4 sm:$0xff]   ;;  %v9833_v59 = vrot.slane %v23268_v13, %v9832_v63  ;;  %v18493_v56 = vld [vmem:[%s24860_s15 + $0x30c] ss:$24 sps:$4 sm:$0xff]  }
 0x9e2   :  { %v9877_v19 = vmax.f32 %v9866_v55, 0.0  ;;  %v9821_v50 = vrot.slane %v23268_v13, %v23388_v28 }
 0x9e3   :  { %v23287_v16 = vpack.c.bf16 %v9876_v31, %v9876_v31  ;;  %v9825_v31 = vrot.slane %v23268_v13, %v9824_v54 }
 0x9e4   :  { %v23282_v17 = vpack.c.bf16 %v9877_v19, %v9877_v19 }
 0x9e6   :  { %12895 = vmatprep.mubr.bf16.mxu0 %v23282_v17 }
 0x9e7   :  { %12896 = vmatmul.mubr.bf16.vlgmr.msra.gmra.mrb[156].mxu0 %v23287_v16 }
 0x9e8   :  { %13110 = vmatpush1.bf16.msra.mxu0 %v18398_v0  ;;  %13141 = vmatprep.mubr.bf16.mxu0 %v23282_v17 }
 0x9e9   :  { %13111 = vmatprep.subr.bf16.mxu0 %v18403_v29 }
 0x9ec   :  { %13112 = vmatpush1.bf16.msra.mxu0 %v18401_v3  ;;  %v18491_v3 = vld [vmem:[%s24860_s15 + $0x308] ss:$24 sps:$4 sm:$0xff]  }
 0x9ed   :  { %13113 = vmatprep.subr.bf16.mxu0 %v18409_v5 }
 0x9f0   :  { %13114 = vmatpush1.bf16.msra.mxu0 %v18407_v42 }
 0x9f1   :  { %13115 = vmatprep.subr.bf16.mxu0 %v18415_v22 }
 0x9f4   :  { %13116 = vmatpush1.bf16.msra.mxu0 %v18413_v1 }
 0x9f5   :  { %13117 = vmatprep.subr.bf16.mxu0 %v18421_v43 }
 0x9f8   :  { %13118 = vmatpush1.bf16.msra.mxu0 %v18419_v52  ;;  %v18499_v52 = vld [vmem:[%s24860_s15 + $0x33c] ss:$24 sps:$4 sm:$0xff]  }
 0x9f9   :  { %13119 = vmatprep.subr.bf16.mxu0 %v18427_v18 }
 0x9fc   :  { %13120 = vmatpush1.bf16.msra.mxu0 %v18425_v44 }
 0x9fd   :  { %13121 = vmatprep.subr.bf16.mxu0 %v18433_v9 }
 0x9ff   :  { %v8915_v34 = vpop.f32.mrb[140].mxu0 }
 0xa00   :  { %13122 = vmatpush1.bf16.msra.mxu0 %v18431_v48  ;;  %v23332_v40 = vadd.f32 %v8915_v34, %v23109_v33  ;;  %v9666_v21 = vpop.f32.mrb[128].mxu1  ;;  %v8917_v32 = vpop.f32.mrb[141].mxu0 }
 0xa01   :  { %v23338_v6 = vadd.f32 %v9666_v21, %v23115_v4  ;;  %v9668_v37 = vpop.f32.mrb[129].mxu1  ;;  %v8918_v20 = vpop.f32.mrb[142].mxu0  ;;  %13123 = vmatprep.subr.bf16.mxu0 %v18439_v25  ;;  %v18451_v4 = vld [vmem:[%s24860_s15 + $0x1bc] ss:$24 sps:$4 sm:$0xff]  }
 0xa02   :  { %v9800_v61 = vadd.f32 %v9668_v37, %v23124_v15  ;;  %v9670_v33 = vpop.f32.mrb[130].mxu1  ;;  %v8919_v46 = vpop.f32.mrb[143].mxu0  ;;  %v18457_v15 = vld [vmem:[%s24860_s15 + $0x1ec] ss:$24 sps:$4 sm:$0xff]   ;;  %v18503_v20 = vld [vmem:[%s24860_s15 + $0x368] ss:$24 sps:$4 sm:$0xff]  }
 0xa03   :  { %v9671_v47 = vpop.f32.mrb[131].mxu1  ;;  %v18511_v33 = vld [vmem:[%s24860_s15 + $0x39c] ss:$24 sps:$4 sm:$0xff]   ;;  %v18506_v46 = vld [vmem:[%s24860_s15 + $0x630] ss:$24 sps:$4 sm:$0xff]  }
 0xa04   :  { %13124 = vmatpush1.bf16.msra.mxu0 %v18437_v58  ;;  %v9870_v5 = vadd.f32 %v9833_v59, %v9800_v61  ;;  %v18500_v58 = vld [vmem:[%s24860_s15 + $0x600] ss:$24 sps:$4 sm:$0xff]  }
 0xa05   :  { %13125 = vmatprep.subr.bf16.mxu0 %v18445_v23  ;;  %v18508_v23 = vld [vmem:[%s24860_s15 + $0x634] ss:$24 sps:$4 sm:$0xff]   ;;  %v18509_v47 = vld [vmem:[%s24860_s15 + $0x398] ss:$24 sps:$4 sm:$0xff]  }
 0xa06   :  { %v9881_v34 = vmax.f32 %v9870_v5, 0.0  ;;  %v18533_v59 = vld [vmem:[%s24860_s15 + $0x458] ss:$24 sps:$4 sm:$0xff]  }
 0xa08   :  { %13126 = vmatpush1.bf16.msra.mxu0 %v18443_v49  ;;  %v23439_v61 = vpack.c.bf16 %v9881_v34, %v9881_v34  ;;  %v18514_v49 = vld [vmem:[%s24860_s15 + $0x664] ss:$24 sps:$4 sm:$0xff]  }
 0xa09   :  { %13127 = vmatprep.subr.bf16.mxu0 %v18451_v4  ;;  %v18517_v4 = vld [vmem:[%s24860_s15 + $0x3cc] ss:$24 sps:$4 sm:$0xff]  }
 0xa0a   :  { %v18562_v34 = vld [vmem:[%s24860_s15 + $0x7e4] ss:$24 sps:$4 sm:$0xff]  }
 0xa0c   :  { %13128 = vmatpush1.bf16.msra.mxu0 %v18449_v36  ;;  %v18512_v36 = vld [vmem:[%s24860_s15 + $0x660] ss:$24 sps:$4 sm:$0xff]  }
 0xa0d   :  { %13129 = vmatprep.subr.bf16.mxu0 %v18457_v15  ;;  %v18515_v15 = vld [vmem:[%s24860_s15 + $0x3c8] ss:$24 sps:$4 sm:$0xff]  }
 0xa10   :  { %13130 = vmatpush1.bf16.msra.mxu0 %v18455_v51  ;;  %v18520_v51 = vld [vmem:[%s24860_s15 + $0x694] ss:$24 sps:$4 sm:$0xff]  }
 0xa11   :  { %13131 = vmatprep.subr.bf16.mxu0 %v18463_v14  ;;  %v18523_v14 = vld [vmem:[%s24860_s15 + $0x3fc] ss:$24 sps:$4 sm:$0xff]  }
 0xa14   :  { %13132 = vmatpush1.bf16.msra.mxu0 %v18461_v38  ;;  %v18518_v38 = vld [vmem:[%s24860_s15 + $0x690] ss:$24 sps:$4 sm:$0xff]  }
 0xa15   :  { %13133 = vmatprep.subr.bf16.mxu0 %v18469_v41  ;;  %v18521_v41 = vld [vmem:[%s24860_s15 + $0x3f8] ss:$24 sps:$4 sm:$0xff]  }
 0xa18   :  { %13134 = vmatpush1.bf16.msra.mxu0 %v18467_v39  ;;  %v18526_v39 = vld [vmem:[%s24860_s15 + $0x6c4] ss:$24 sps:$4 sm:$0xff]  }
 0xa19   :  { %13135 = vmatprep.subr.bf16.mxu0 %v18475_v35  ;;  %v18529_v35 = vld [vmem:[%s24860_s15 + $0x42c] ss:$24 sps:$4 sm:$0xff]  }
 0xa1c   :  { %13136 = vmatpush1.bf16.msra.mxu0 %v18473_v57  ;;  %v18524_v57 = vld [vmem:[%s24860_s15 + $0x6c0] ss:$24 sps:$4 sm:$0xff]  }
 0xa1d   :  { %13137 = vmatprep.subr.bf16.mxu0 %v18481_v27  ;;  %v18527_v27 = vld [vmem:[%s24860_s15 + $0x428] ss:$24 sps:$4 sm:$0xff]  }
 0xa20   :  { %13138 = vmatpush1.bf16.msra.mxu0 %v18479_v2  ;;  %v18532_v2 = vld [vmem:[%s24860_s15 + $0x6f4] ss:$24 sps:$4 sm:$0xff]  }
 0xa21   :  { %13139 = vmatprep.subr.bf16.mxu0 %v18487_v12  ;;  %v18535_v12 = vld [vmem:[%s24860_s15 + $0x45c] ss:$24 sps:$4 sm:$0xff]  }
 0xa23   :  { %v9625_v55 = vpop.f32.mrb[144].mxu0 }
 0xa24   :  { %13140 = vmatpush1.bf16.msra.mxu0 %v18485_v45  ;;  %v9797_v19 = vadd.f32 %v9625_v55, %v23212_v53  ;;  %v9748_v0 = vpop.f32.mrb[132].mxu1  ;;  %v9627_v29 = vpop.f32.mrb[145].mxu0  ;;  %v18530_v45 = vld [vmem:[%s24860_s15 + $0x6f0] ss:$24 sps:$4 sm:$0xff]   ;;  %v18536_v55 = vld [vmem:[%s24860_s15 + $0x720] ss:$24 sps:$4 sm:$0xff]  }
 0xa25   :  { %v23410_v42 = vadd.f32 %v9748_v0, %v23215_v24  ;;  %v9798_v22 = vadd.f32 %v9627_v29, %v23218_v26  ;;  %v9750_v1 = vpop.f32.mrb[133].mxu1  ;;  %v9629_v43 = vpop.f32.mrb[146].mxu0  ;;  %13150 = vmatprep.subr.bf16.mxu0 %v18493_v56  ;;  %v18497_v26 = vld [vmem:[%s24860_s15 + $0x338] ss:$24 sps:$4 sm:$0xff]   ;;  %v18538_v56 = vld [vmem:[%s24860_s15 + $0x724] ss:$24 sps:$4 sm:$0xff]  }
 0xa26   :  { %v9867_v53 = vadd.f32 %v9821_v50, %v9797_v19  ;;  %v23417_v18 = vadd.f32 %v9750_v1, %v23224_v30  ;;  %v9752_v44 = vpop.f32.mrb[134].mxu1  ;;  %v9630_v9 = vpop.f32.mrb[147].mxu0  ;;  %v18505_v30 = vld [vmem:[%s24860_s15 + $0x36c] ss:$24 sps:$4 sm:$0xff]   ;;  %v18547_v0 = vld [vmem:[%s24860_s15 + $0x4bc] ss:$24 sps:$4 sm:$0xff]  }
 0xa27   :  { %v9868_v48 = vadd.f32 %v9825_v31, %v9798_v22  ;;  %13142 = vmatmul.mubr.bf16.vlgmr.msra.gmra.mrb[160].mxu0 %v23287_v16  ;;  %v9753_v24 = vpop.f32.mrb[135].mxu1  ;;  %v18541_v50 = vld [vmem:[%s24860_s15 + $0x48c] ss:$24 sps:$4 sm:$0xff]   ;;  %v18539_v31 = vld [vmem:[%s24860_s15 + $0x488] ss:$24 sps:$4 sm:$0xff]  }
 0xa28   :  { %v9878_v25 = vmax.f32 %v9867_v53, 0.0  ;;  %13151 = vmatpush1.bf16.msra.mxu0 %v18491_v3  ;;  %v18544_v19 = vld [vmem:[%s24860_s15 + $0x754] ss:$24 sps:$4 sm:$0xff]   ;;  %v18542_v3 = vld [vmem:[%s24860_s15 + $0x750] ss:$24 sps:$4 sm:$0xff]  }
 0xa29   :  { %v9879_v21 = vmax.f32 %v9868_v48, 0.0  ;;  %13152 = vmatprep.subr.bf16.mxu0 %v18499_v52  ;;  %v18545_v1 = vld [vmem:[%s24860_s15 + $0x4b8] ss:$24 sps:$4 sm:$0xff]   ;;  %v18550_v43 = vld [vmem:[%s24860_s15 + $0x784] ss:$24 sps:$4 sm:$0xff]  }
 0xa2a   :  { %v23431_v37 = vpack.c.bf16 %v9878_v25, %v9878_v25  ;;  %v18548_v9 = vld [vmem:[%s24860_s15 + $0x780] ss:$24 sps:$4 sm:$0xff]   ;;  %v18559_v24 = vld [vmem:[%s24860_s15 + $0x51c] ss:$24 sps:$4 sm:$0xff]   ;;  %v18554_v25 = vld [vmem:[%s24860_s15 + $0x7b0] ss:$24 sps:$4 sm:$0xff]  }
 0xa2b   :  { %v23426_v32 = vpack.c.bf16 %v9879_v21, %v9879_v21  ;;  %v18551_v48 = vld [vmem:[%s24860_s15 + $0x4e8] ss:$24 sps:$4 sm:$0xff]   ;;  %v18565_v21 = vld [vmem:[%s24860_s15 + $0x54c] ss:$24 sps:$4 sm:$0xff]  }
 0xa2c   :  { %13153 = vmatpush1.bf16.msra.mxu0 %v18497_v26  ;;  %v18557_v26 = vld [vmem:[%s24860_s15 + $0x518] ss:$24 sps:$4 sm:$0xff]  }
 0xa2d   :  { %12936 = vmatprep.mubr.bf16.mxu1 %v23426_v32  ;;  %13154 = vmatprep.subr.bf16.mxu0 %v18505_v30  ;;  %v18560_v30 = vld [vmem:[%s24860_s15 + $0x7e0] ss:$24 sps:$4 sm:$0xff]  }
 0xa2e   :  { %13182 = vmatprep.mubr.bf16.mxu0 %v23426_v32  ;;  %12937 = vmatmul.mubr.bf16.vlgmr.msra.gmra.mrb[136].mxu1 %v23431_v37 }
 0xa2f   :  { %12946 = vmatpush1.bf16.msra.mxu1 %v18500_v58  ;;  %12977 = vmatprep.mubr.bf16.mxu1 %v23439_v61  ;;  %v18563_v58 = vld [vmem:[%s24860_s15 + $0x548] ss:$24 sps:$4 sm:$0xff]  }
 0xa30   :  { %13155 = vmatpush1.bf16.msra.mxu0 %v18503_v20  ;;  %12947 = vmatprep.subr.bf16.mxu1 %v18508_v23  ;;  %v18568_v20 = vld [vmem:[%s24860_s15 + $0x814] ss:$24 sps:$4 sm:$0xff]  }
 0xa31   :  { %13156 = vmatprep.subr.bf16.mxu0 %v18511_v33  ;;  %v18571_v23 = vld [vmem:[%s24860_s15 + $0x57c] ss:$24 sps:$4 sm:$0xff]   ;;  %v18566_v33 = vld [vmem:[%s24860_s15 + $0x810] ss:$24 sps:$4 sm:$0xff]  }
 0xa33   :  { %12948 = vmatpush1.bf16.msra.mxu1 %v18506_v46  ;;  %v18569_v46 = vld [vmem:[%s24860_s15 + $0x578] ss:$24 sps:$4 sm:$0xff]  }
 0xa34   :  { %13157 = vmatpush1.bf16.msra.mxu0 %v18509_v47  ;;  %12949 = vmatprep.subr.bf16.mxu1 %v18514_v49  ;;  %v18574_v47 = vld [vmem:[%s24860_s15 + $0x844] ss:$24 sps:$4 sm:$0xff]  }
 0xa35   :  { %13158 = vmatprep.subr.bf16.mxu0 %v18517_v4  ;;  %v18577_v49 = vld [vmem:[%s24860_s15 + $0x5ac] ss:$24 sps:$4 sm:$0xff]   ;;  %v18572_v4 = vld [vmem:[%s24860_s15 + $0x840] ss:$24 sps:$4 sm:$0xff]  }
 0xa37   :  { %12950 = vmatpush1.bf16.msra.mxu1 %v18512_v36  ;;  %v9828_v36 = vsub.s32 4, %v19631_v7 }
 0xa38   :  { %13159 = vmatpush1.bf16.msra.mxu0 %v18515_v15  ;;  %12951 = vmatprep.subr.bf16.mxu1 %v18520_v51  ;;  %v18575_v15 = vld [vmem:[%s24860_s15 + $0x5a8] ss:$24 sps:$4 sm:$0xff]   ;;  %v18580_v51 = vld [vmem:[%s24860_s15 + $0x874] ss:$24 sps:$4 sm:$0xff]  }
 0xa39   :  { %13160 = vmatprep.subr.bf16.mxu0 %v18523_v14  ;;  %v9840_v14 = vsub.s32 7, %v19631_v7 }
 0xa3b   :  { %12952 = vmatpush1.bf16.msra.mxu1 %v18518_v38  ;;  %v18583_v38 = vld [vmem:[%s24860_s15 + $0x5dc] ss:$24 sps:$4 sm:$0xff]  }
 0xa3c   :  { %13161 = vmatpush1.bf16.msra.mxu0 %v18521_v41  ;;  %12953 = vmatprep.subr.bf16.mxu1 %v18526_v39  ;;  %v18578_v41 = vld [vmem:[%s24860_s15 + $0x870] ss:$24 sps:$4 sm:$0xff]   ;;  %v9829_v39 = vrot.slane %v23268_v13, %v9828_v36 }
 0xa3d   :  { %13162 = vmatprep.subr.bf16.mxu0 %v18529_v35  ;;  %v18581_v35 = vld [vmem:[%s24860_s15 + $0x5d8] ss:$24 sps:$4 sm:$0xff]  }
 0xa3f   :  { %12954 = vmatpush1.bf16.msra.mxu1 %v18524_v57  ;;  %v18586_v57 = vld [vmem:[%s24860_s15 + $0x8a4] ss:$24 sps:$4 sm:$0xff]  }
 0xa40   :  { %13163 = vmatpush1.bf16.msra.mxu0 %v18527_v27  ;;  %12955 = vmatprep.subr.bf16.mxu1 %v18532_v2  ;;  %v9841_v27 = vrot.slane %v23268_v13, %v9840_v14  ;;  %v18589_v2 = vld [vmem:[%s24860_s15 + $0x60c] ss:$24 sps:$4 sm:$0xff]   ;;  %v18626_v14 = vld [vmem:[%s24860_s15 + $0x9f0] ss:$24 sps:$4 sm:$0xff]  }
 0xa41   :  { %13164 = vmatprep.subr.bf16.mxu0 %v18535_v12  ;;  %v18584_v12 = vld [vmem:[%s24860_s15 + $0x8a0] ss:$24 sps:$4 sm:$0xff]  }
 0xa43   :  { %12956 = vmatpush1.bf16.msra.mxu1 %v18530_v45  ;;  %v9869_v45 = vadd.f32 %v9829_v39, %v23338_v6  ;;  %v18590_v6 = vld [vmem:[%s24860_s15 + $0x8d0] ss:$24 sps:$4 sm:$0xff]   ;;  %v18637_v39 = vld [vmem:[%s24860_s15 + $0x78c] ss:$24 sps:$4 sm:$0xff]  }
 0xa44   :  { %13165 = vmatpush1.bf16.msra.mxu0 %v18533_v59  ;;  %12957 = vmatprep.subr.bf16.mxu1 %v18538_v56  ;;  %v18587_v59 = vld [vmem:[%s24860_s15 + $0x608] ss:$24 sps:$4 sm:$0xff]  }
 0xa45   :  { %13166 = vmatprep.subr.bf16.mxu0 %v18541_v50  ;;  %v18592_v50 = vld [vmem:[%s24860_s15 + $0x8d4] ss:$24 sps:$4 sm:$0xff]  }
 0xa47   :  { %12958 = vmatpush1.bf16.msra.mxu1 %v18536_v55  ;;  %v9707_v29 = vpop.f32.mrb[148].mxu0  ;;  %v18595_v55 = vld [vmem:[%s24860_s15 + $0x63c] ss:$24 sps:$4 sm:$0xff]  }
 0xa48   :  { %13167 = vmatpush1.bf16.msra.mxu0 %v18539_v31  ;;  %v23524_v5 = vadd.f32 %v9707_v29, %v23273_v62  ;;  %v9709_v22 = vpop.f32.mrb[149].mxu0  ;;  %12959 = vmatprep.subr.bf16.mxu1 %v18544_v19  ;;  %v18553_v62 = vld [vmem:[%s24860_s15 + $0x4ec] ss:$24 sps:$4 sm:$0xff]   ;;  %v9880_v31 = vmax.f32 %v9869_v45, 0.0  ;;  %v18593_v19 = vld [vmem:[%s24860_s15 + $0x638] ss:$24 sps:$4 sm:$0xff]  }
 0xa49   :  { %v23533_v52 = vadd.f32 %v9709_v22, %v23279_v11  ;;  %v9711_v53 = vpop.f32.mrb[150].mxu0  ;;  %13168 = vmatprep.subr.bf16.mxu0 %v18547_v0  ;;  %v18556_v11 = vld [vmem:[%s24860_s15 + $0x7b4] ss:$24 sps:$4 sm:$0xff]   ;;  %v18598_v0 = vld [vmem:[%s24860_s15 + $0x904] ss:$24 sps:$4 sm:$0xff]  }
 0xa4a   :  { %v9712_v44 = vpop.f32.mrb[151].mxu0  ;;  %v18641_v45 = vld [vmem:[%s24860_s15 + $0x7b8] ss:$24 sps:$4 sm:$0xff]  }
 0xa4b   :  { %12960 = vmatpush1.bf16.msra.mxu1 %v18542_v3  ;;  %v9872_v56 = vadd.f32 %v9841_v27, %v23533_v52  ;;  %v18601_v3 = vld [vmem:[%s24860_s15 + $0x66c] ss:$24 sps:$4 sm:$0xff]  }
 0xa4c   :  { %13169 = vmatpush1.bf16.msra.mxu0 %v18545_v1  ;;  %12961 = vmatprep.subr.bf16.mxu1 %v18550_v43  ;;  %v18596_v1 = vld [vmem:[%s24860_s15 + $0x900] ss:$24 sps:$4 sm:$0xff]   ;;  %v23647_v43 = vpack.c.bf16 %v9880_v31, %v9880_v31  ;;  %v18604_v44 = vld [vmem:[%s24860_s15 + $0x934] ss:$24 sps:$4 sm:$0xff]  }
 0xa4d   :  { %13170 = vmatprep.subr.bf16.mxu0 %v18553_v62  ;;  %v9883_v29 = vmax.f32 %v9872_v56, 0.0  ;;  %v18599_v62 = vld [vmem:[%s24860_s15 + $0x668] ss:$24 sps:$4 sm:$0xff]   ;;  %v18640_v27 = vld [vmem:[%s24860_s15 + $0xa54] ss:$24 sps:$4 sm:$0xff]  }
 0xa4e   :  { %v18649_v56 = vld [vmem:[%s24860_s15 + $0x7ec] ss:$24 sps:$4 sm:$0xff]   ;;  %v18655_v31 = vld [vmem:[%s24860_s15 + $0x81c] ss:$24 sps:$4 sm:$0xff]  }
 0xa4f   :  { %12962 = vmatpush1.bf16.msra.mxu1 %v18548_v9  ;;  %v23658_v9 = vpack.c.bf16 %v9883_v29, %v9883_v29  ;;  %v18658_v29 = vld [vmem:[%s24860_s15 + $0xae4] ss:$24 sps:$4 sm:$0xff]  }
 0xa50   :  { %13171 = vmatpush1.bf16.msra.mxu0 %v18551_v48  ;;  %12963 = vmatprep.subr.bf16.mxu1 %v18556_v11  ;;  %v18607_v11 = vld [vmem:[%s24860_s15 + $0x69c] ss:$24 sps:$4 sm:$0xff]  }
 0xa51   :  { %13172 = vmatprep.subr.bf16.mxu0 %v18559_v24  ;;  %v18602_v24 = vld [vmem:[%s24860_s15 + $0x930] ss:$24 sps:$4 sm:$0xff]  }
 0xa53   :  { %12964 = vmatpush1.bf16.msra.mxu1 %v18554_v25  ;;  %v18605_v25 = vld [vmem:[%s24860_s15 + $0x698] ss:$24 sps:$4 sm:$0xff]  }
 0xa54   :  { %13173 = vmatpush1.bf16.msra.mxu0 %v18557_v26  ;;  %12965 = vmatprep.subr.bf16.mxu1 %v18562_v34  ;;  %v18610_v26 = vld [vmem:[%s24860_s15 + $0x964] ss:$24 sps:$4 sm:$0xff]  }
 0xa55   :  { %13174 = vmatprep.subr.bf16.mxu0 %v18565_v21  ;;  %v18613_v34 = vld [vmem:[%s24860_s15 + $0x6cc] ss:$24 sps:$4 sm:$0xff]   ;;  %v18608_v21 = vld [vmem:[%s24860_s15 + $0x960] ss:$24 sps:$4 sm:$0xff]  }
 0xa57   :  { %12966 = vmatpush1.bf16.msra.mxu1 %v18560_v30  ;;  %v18611_v30 = vld [vmem:[%s24860_s15 + $0x6c8] ss:$24 sps:$4 sm:$0xff]  }
 0xa58   :  { %13175 = vmatpush1.bf16.msra.mxu0 %v18563_v58  ;;  %12967 = vmatprep.subr.bf16.mxu1 %v18568_v20  ;;  %v18616_v58 = vld [vmem:[%s24860_s15 + $0x994] ss:$24 sps:$4 sm:$0xff]  }
 0xa59   :  { %13176 = vmatprep.subr.bf16.mxu0 %v18571_v23  ;;  %v18619_v20 = vld [vmem:[%s24860_s15 + $0x6fc] ss:$24 sps:$4 sm:$0xff]   ;;  %v18614_v23 = vld [vmem:[%s24860_s15 + $0x990] ss:$24 sps:$4 sm:$0xff]  }
 0xa5b   :  { %12968 = vmatpush1.bf16.msra.mxu1 %v18566_v33  ;;  %v18617_v33 = vld [vmem:[%s24860_s15 + $0x6f8] ss:$24 sps:$4 sm:$0xff]  }
 0xa5c   :  { %13177 = vmatpush1.bf16.msra.mxu0 %v18569_v46  ;;  %12969 = vmatprep.subr.bf16.mxu1 %v18574_v47  ;;  %v18622_v46 = vld [vmem:[%s24860_s15 + $0x9c4] ss:$24 sps:$4 sm:$0xff]  }
 0xa5d   :  { %13178 = vmatprep.subr.bf16.mxu0 %v18577_v49  ;;  %v18625_v47 = vld [vmem:[%s24860_s15 + $0x72c] ss:$24 sps:$4 sm:$0xff]   ;;  %v18620_v49 = vld [vmem:[%s24860_s15 + $0x9c0] ss:$24 sps:$4 sm:$0xff]  }
 0xa5f   :  { %12970 = vmatpush1.bf16.msra.mxu1 %v18572_v4  ;;  %v18623_v4 = vld [vmem:[%s24860_s15 + $0x728] ss:$24 sps:$4 sm:$0xff]  }
 0xa60   :  { %13179 = vmatpush1.bf16.msra.mxu0 %v18575_v15  ;;  %12971 = vmatprep.subr.bf16.mxu1 %v18580_v51  ;;  %v18628_v15 = vld [vmem:[%s24860_s15 + $0x9f4] ss:$24 sps:$4 sm:$0xff]  }
 0xa61   :  { %13180 = vmatprep.subr.bf16.mxu0 %v18583_v38  ;;  %v18631_v51 = vld [vmem:[%s24860_s15 + $0x75c] ss:$24 sps:$4 sm:$0xff]   ;;  %v18629_v38 = vld [vmem:[%s24860_s15 + $0x758] ss:$24 sps:$4 sm:$0xff]  }
 0xa63   :  { %12972 = vmatpush1.bf16.msra.mxu1 %v18578_v41  ;;  %v18634_v41 = vld [vmem:[%s24860_s15 + $0xa24] ss:$24 sps:$4 sm:$0xff]  }
 0xa64   :  { %13181 = vmatpush1.bf16.msra.mxu0 %v18581_v35  ;;  %12973 = vmatprep.subr.bf16.mxu1 %v18586_v57  ;;  %v18632_v35 = vld [vmem:[%s24860_s15 + $0xa20] ss:$24 sps:$4 sm:$0xff]  }
 0xa65   :  { %13191 = vmatprep.subr.bf16.mxu0 %v18589_v2  ;;  %v18635_v57 = vld [vmem:[%s24860_s15 + $0x788] ss:$24 sps:$4 sm:$0xff]   ;;  %v18643_v2 = vld [vmem:[%s24860_s15 + $0x7bc] ss:$24 sps:$4 sm:$0xff]  }
 0xa67   :  { %13183 = vmatmul.mubr.bf16.vlgmr.msra.gmra.mrb[160].mxu0 %v23431_v37  ;;  %12974 = vmatpush1.bf16.msra.mxu1 %v18584_v12  ;;  %v18638_v12 = vld [vmem:[%s24860_s15 + $0xa50] ss:$24 sps:$4 sm:$0xff]  }
 0xa68   :  { %13192 = vmatpush1.bf16.msra.mxu0 %v18587_v59  ;;  %13223 = vmatprep.mubr.bf16.mxu0 %v23439_v61  ;;  %v18646_v59 = vld [vmem:[%s24860_s15 + $0xa84] ss:$24 sps:$4 sm:$0xff]  }
 0xa69   :  { %12975 = vmatprep.subr.bf16.mxu1 %v18592_v50  ;;  %13193 = vmatprep.subr.bf16.mxu0 %v18595_v55  ;;  %v18644_v50 = vld [vmem:[%s24860_s15 + $0xa80] ss:$24 sps:$4 sm:$0xff]  }
 0xa6a   :  { %v18647_v55 = vld [vmem:[%s24860_s15 + $0x7e8] ss:$24 sps:$4 sm:$0xff]  }
 0xa6b   :  { %12976 = vmatpush1.bf16.msra.mxu1 %v18590_v6  ;;  %v9789_v22 = vpop.f32.mrb[152].mxu0  ;;  %v18652_v6 = vld [vmem:[%s24860_s15 + $0xab4] ss:$24 sps:$4 sm:$0xff]  }
 0xa6c   :  { %13194 = vmatpush1.bf16.msra.mxu0 %v18593_v19  ;;  %v23650_v52 = vadd.f32 %v9789_v22, %v23332_v40  ;;  %v9791_v53 = vpop.f32.mrb[153].mxu0  ;;  %12986 = vmatprep.subr.bf16.mxu1 %v18598_v0  ;;  %v18650_v19 = vld [vmem:[%s24860_s15 + $0xab0] ss:$24 sps:$4 sm:$0xff]   ;;  %v18656_v22 = vld [vmem:[%s24860_s15 + $0xae0] ss:$24 sps:$4 sm:$0xff]  }
 0xa6d   :  { %v9792_v48 = vpop.f32.mrb[154].mxu0  ;;  %13195 = vmatprep.subr.bf16.mxu0 %v18601_v3  ;;  %v18653_v0 = vld [vmem:[%s24860_s15 + $0x818] ss:$24 sps:$4 sm:$0xff]   ;;  %v18661_v3 = vld [vmem:[%s24860_s15 + $0x84c] ss:$24 sps:$4 sm:$0xff]  }
 0xa6e   :  { %12978 = vmatmul.mubr.bf16.vlgmr.msra.gmra.mrb[136].mxu1 %v23647_v43  ;;  %v9793_v40 = vpop.f32.mrb[155].mxu0  ;;  %v18664_v53 = vld [vmem:[%s24860_s15 + $0xb14] ss:$24 sps:$4 sm:$0xff]   ;;  %v18665_v48 = vld [vmem:[%s24860_s15 + $0x878] ss:$24 sps:$4 sm:$0xff]  }
 0xa6f   :  { %12987 = vmatpush1.bf16.msra.mxu1 %v18596_v1  ;;  %13018 = vmatprep.mubr.bf16.mxu1 %v23658_v9  ;;  %v18659_v1 = vld [vmem:[%s24860_s15 + $0x848] ss:$24 sps:$4 sm:$0xff]   ;;  %v18673_v40 = vld [vmem:[%s24860_s15 + $0x8ac] ss:$24 sps:$4 sm:$0xff]  }
 0xa70   :  { %13196 = vmatpush1.bf16.msra.mxu0 %v18599_v62  ;;  %12988 = vmatprep.subr.bf16.mxu1 %v18604_v44  ;;  %v18667_v62 = vld [vmem:[%s24860_s15 + $0x87c] ss:$24 sps:$4 sm:$0xff]   ;;  %v18662_v44 = vld [vmem:[%s24860_s15 + $0xb10] ss:$24 sps:$4 sm:$0xff]  }
 0xa71   :  { %13197 = vmatprep.subr.bf16.mxu0 %v18607_v11  ;;  %v18670_v11 = vld [vmem:[%s24860_s15 + $0xb44] ss:$24 sps:$4 sm:$0xff]  }
 0xa73   :  { %12989 = vmatpush1.bf16.msra.mxu1 %v18602_v24  ;;  %v18668_v24 = vld [vmem:[%s24860_s15 + $0xb40] ss:$24 sps:$4 sm:$0xff]  }
 0xa74   :  { %13198 = vmatpush1.bf16.msra.mxu0 %v18605_v25  ;;  %12990 = vmatprep.subr.bf16.mxu1 %v18610_v26  ;;  %v9836_v25 = vsub.s32 6, %v19631_v7  ;;  %v18671_v26 = vld [vmem:[%s24860_s15 + $0x8a8] ss:$24 sps:$4 sm:$0xff]  }
 0xa75   :  { %13199 = vmatprep.subr.bf16.mxu0 %v18613_v34  ;;  %v18676_v34 = vld [vmem:[%s24860_s15 + $0xb74] ss:$24 sps:$4 sm:$0xff]  }
 0xa77   :  { %12991 = vmatpush1.bf16.msra.mxu1 %v18608_v21  ;;  %v18679_v21 = vld [vmem:[%s24860_s15 + $0x8dc] ss:$24 sps:$4 sm:$0xff]  }
 0xa78   :  { %13200 = vmatpush1.bf16.msra.mxu0 %v18611_v30  ;;  %12992 = vmatprep.subr.bf16.mxu1 %v18616_v58  ;;  %v23813_v30 = vld [vmem:[%s24859_s14 + $0x8] sm:$0x7] }
 0xa79   :  { %13201 = vmatprep.subr.bf16.mxu0 %v18619_v20  ;;  %v18674_v58 = vld [vmem:[%s24860_s15 + $0xb70] ss:$24 sps:$4 sm:$0xff]   ;;  %v9837_v20 = vrot.slane %v23268_v13, %v9836_v25  ;;  %v18680_v13 = vld [vmem:[%s24860_s15 + $0xba0] ss:$24 sps:$4 sm:$0xff]  }
 0xa7b   :  { %12993 = vmatpush1.bf16.msra.mxu1 %v18614_v23  ;;  %v18677_v23 = vld [vmem:[%s24860_s15 + $0x8d8] ss:$24 sps:$4 sm:$0xff]  }
 0xa7c   :  { %13202 = vmatpush1.bf16.msra.mxu0 %v18617_v33  ;;  %12994 = vmatprep.subr.bf16.mxu1 %v18622_v46  ;;  %v18682_v33 = vld [vmem:[%s24860_s15 + $0xba4] ss:$24 sps:$4 sm:$0xff]   ;;  %v9849_v46 = vrot.slane %v23813_v30, %v19640_v10 }
 0xa7d   :  { %13203 = vmatprep.subr.bf16.mxu0 %v18625_v47  ;;  %v18685_v47 = vld [vmem:[%s24860_s15 + $0x90c] ss:$24 sps:$4 sm:$0xff]  }
 0xa7f   :  { %12995 = vmatpush1.bf16.msra.mxu1 %v18620_v49  ;;  %v9871_v49 = vadd.f32 %v9837_v20, %v23524_v5  ;;  %v18686_v5 = vld [vmem:[%s24860_s15 + $0xbd0] ss:$24 sps:$4 sm:$0xff]   ;;  %v18733_v20 = vld [vmem:[%s24860_s15 + $0xa8c] ss:$24 sps:$4 sm:$0xff]  }
 0xa80   :  { %13204 = vmatpush1.bf16.msra.mxu0 %v18623_v4  ;;  %12996 = vmatprep.subr.bf16.mxu1 %v18628_v15  ;;  %v18683_v4 = vld [vmem:[%s24860_s15 + $0x908] ss:$24 sps:$4 sm:$0xff]   ;;  %v9874_v15 = vadd.f32 %v9849_v46, %v23417_v18  ;;  %v18689_v18 = vld [vmem:[%s24860_s15 + $0x938] ss:$24 sps:$4 sm:$0xff]   ;;  %v18736_v46 = vld [vmem:[%s24860_s15 + $0xd54] ss:$24 sps:$4 sm:$0xff]  }
 0xa81   :  { %13205 = vmatprep.subr.bf16.mxu0 %v18631_v51  ;;  %v18688_v51 = vld [vmem:[%s24860_s15 + $0xbd4] ss:$24 sps:$4 sm:$0xff]  }
 0xa83   :  { %12997 = vmatpush1.bf16.msra.mxu1 %v18626_v14  ;;  %v18691_v14 = vld [vmem:[%s24860_s15 + $0x93c] ss:$24 sps:$4 sm:$0xff]  }
 0xa84   :  { %13206 = vmatpush1.bf16.msra.mxu0 %v18629_v38  ;;  %12998 = vmatprep.subr.bf16.mxu1 %v18634_v41  ;;  %v9882_v38 = vmax.f32 %v9871_v49, 0.0  ;;  %v18694_v41 = vld [vmem:[%s24860_s15 + $0xc04] ss:$24 sps:$4 sm:$0xff]   ;;  %v18737_v49 = vld [vmem:[%s24860_s15 + $0xab8] ss:$24 sps:$4 sm:$0xff]  }
 0xa85   :  { %13207 = vmatprep.subr.bf16.mxu0 %v18637_v39  ;;  %v9885_v39 = vmax.f32 %v9874_v15, 0.0  ;;  %v18745_v15 = vld [vmem:[%s24860_s15 + $0xaec] ss:$24 sps:$4 sm:$0xff]  }
 0xa87   :  { %12999 = vmatpush1.bf16.msra.mxu1 %v18632_v35  ;;  %v18697_v35 = vld [vmem:[%s24860_s15 + $0x96c] ss:$24 sps:$4 sm:$0xff]  }
 0xa88   :  { %13208 = vmatpush1.bf16.msra.mxu0 %v18635_v57  ;;  %13000 = vmatprep.subr.bf16.mxu1 %v18640_v27  ;;  %v18692_v57 = vld [vmem:[%s24860_s15 + $0xc00] ss:$24 sps:$4 sm:$0xff]   ;;  %v23861_v27 = vpack.c.bf16 %v9882_v38, %v9882_v38  ;;  %v18751_v38 = vld [vmem:[%s24860_s15 + $0xb1c] ss:$24 sps:$4 sm:$0xff]  }
 0xa89   :  { %13209 = vmatprep.subr.bf16.mxu0 %v18643_v2  ;;  %v18695_v2 = vld [vmem:[%s24860_s15 + $0x968] ss:$24 sps:$4 sm:$0xff]  }
 0xa8b   :  { %13001 = vmatpush1.bf16.msra.mxu1 %v18638_v12  ;;  %v18700_v12 = vld [vmem:[%s24860_s15 + $0xc34] ss:$24 sps:$4 sm:$0xff]  }
 0xa8c   :  { %13210 = vmatpush1.bf16.msra.mxu0 %v18641_v45  ;;  %13002 = vmatprep.subr.bf16.mxu1 %v18646_v59  ;;  %v23869_v45 = vpack.c.bf16 %v9885_v39, %v9885_v39  ;;  %v18703_v59 = vld [vmem:[%s24860_s15 + $0x99c] ss:$24 sps:$4 sm:$0xff]  }
 0xa8d   :  { %13211 = vmatprep.subr.bf16.mxu0 %v18649_v56  ;;  %v18698_v56 = vld [vmem:[%s24860_s15 + $0xc30] ss:$24 sps:$4 sm:$0xff]   ;;  %v18754_v39 = vld [vmem:[%s24860_s15 + $0xde4] ss:$24 sps:$4 sm:$0xff]  }
 0xa8f   :  { %13003 = vmatpush1.bf16.msra.mxu1 %v18644_v50  ;;  %v18701_v50 = vld [vmem:[%s24860_s15 + $0x998] ss:$24 sps:$4 sm:$0xff]  }
 0xa90   :  { %13212 = vmatpush1.bf16.msra.mxu0 %v18647_v55  ;;  %13004 = vmatprep.subr.bf16.mxu1 %v18652_v6  ;;  %v18706_v55 = vld [vmem:[%s24860_s15 + $0xc64] ss:$24 sps:$4 sm:$0xff]  }
 0xa91   :  { %13213 = vmatprep.subr.bf16.mxu0 %v18655_v31  ;;  %v18709_v6 = vld [vmem:[%s24860_s15 + $0x9cc] ss:$24 sps:$4 sm:$0xff]   ;;  %v18704_v31 = vld [vmem:[%s24860_s15 + $0xc60] ss:$24 sps:$4 sm:$0xff]  }
 0xa93   :  { %13005 = vmatpush1.bf16.msra.mxu1 %v18650_v19  ;;  %v18707_v19 = vld [vmem:[%s24860_s15 + $0x9c8] ss:$24 sps:$4 sm:$0xff]  }
 0xa94   :  { %13214 = vmatpush1.bf16.msra.mxu0 %v18653_v0  ;;  %13006 = vmatprep.subr.bf16.mxu1 %v18658_v29  ;;  %v18712_v0 = vld [vmem:[%s24860_s15 + $0xc94] ss:$24 sps:$4 sm:$0xff]  }
 0xa95   :  { %13215 = vmatprep.subr.bf16.mxu0 %v18661_v3  ;;  %v18715_v29 = vld [vmem:[%s24860_s15 + $0x9fc] ss:$24 sps:$4 sm:$0xff]   ;;  %v18710_v3 = vld [vmem:[%s24860_s15 + $0xc90] ss:$24 sps:$4 sm:$0xff]  }
 0xa97   :  { %13007 = vmatpush1.bf16.msra.mxu1 %v18656_v22  ;;  %v18713_v22 = vld [vmem:[%s24860_s15 + $0x9f8] ss:$24 sps:$4 sm:$0xff]  }
 0xa98   :  { %13216 = vmatpush1.bf16.msra.mxu0 %v18659_v1  ;;  %13008 = vmatprep.subr.bf16.mxu1 %v18664_v53  ;;  %v18718_v1 = vld [vmem:[%s24860_s15 + $0xcc4] ss:$24 sps:$4 sm:$0xff]  }
 0xa99   :  { %13217 = vmatprep.subr.bf16.mxu0 %v18667_v62  ;;  %v18721_v53 = vld [vmem:[%s24860_s15 + $0xa2c] ss:$24 sps:$4 sm:$0xff]  }
 0xa9b   :  { %13009 = vmatpush1.bf16.msra.mxu1 %v18662_v44 }
 0xa9c   :  { %13218 = vmatpush1.bf16.msra.mxu0 %v18665_v48  ;;  %13010 = vmatprep.subr.bf16.mxu1 %v18670_v11  ;;  %v18716_v48 = vld [vmem:[%s24860_s15 + $0xcc0] ss:$24 sps:$4 sm:$0xff]  }
 0xa9d   :  { %13219 = vmatprep.subr.bf16.mxu0 %v18673_v40  ;;  %v18719_v40 = vld [vmem:[%s24860_s15 + $0xa28] ss:$24 sps:$4 sm:$0xff]  }
 0xa9f   :  { %13011 = vmatpush1.bf16.msra.mxu1 %v18668_v24  ;;  %v18724_v24 = vld [vmem:[%s24860_s15 + $0xcf4] ss:$24 sps:$4 sm:$0xff]  }
 0xaa0   :  { %13220 = vmatpush1.bf16.msra.mxu0 %v18671_v26  ;;  %13012 = vmatprep.subr.bf16.mxu1 %v18676_v34  ;;  %v18727_v26 = vld [vmem:[%s24860_s15 + $0xa5c] ss:$24 sps:$4 sm:$0xff]   ;;  %v18722_v34 = vld [vmem:[%s24860_s15 + $0xcf0] ss:$24 sps:$4 sm:$0xff]  }
 0xaa1   :  { %13221 = vmatprep.subr.bf16.mxu0 %v18679_v21  ;;  %v18725_v21 = vld [vmem:[%s24860_s15 + $0xa58] ss:$24 sps:$4 sm:$0xff]  }
 0xaa3   :  { %13013 = vmatpush1.bf16.msra.mxu1 %v18674_v58  ;;  %v18730_v58 = vld [vmem:[%s24860_s15 + $0xd24] ss:$24 sps:$4 sm:$0xff]  }
 0xaa4   :  { %13222 = vmatpush1.bf16.msra.mxu0 %v18677_v23  ;;  %13014 = vmatprep.subr.bf16.mxu1 %v18682_v33  ;;  %v18728_v23 = vld [vmem:[%s24860_s15 + $0xd20] ss:$24 sps:$4 sm:$0xff]  }
 0xaa5   :  { %13232 = vmatprep.subr.bf16.mxu0 %v18685_v47  ;;  %v18731_v33 = vld [vmem:[%s24860_s15 + $0xa88] ss:$24 sps:$4 sm:$0xff]   ;;  %v18739_v47 = vld [vmem:[%s24860_s15 + $0xabc] ss:$24 sps:$4 sm:$0xff]  }
 0xaa7   :  { %13224 = vmatmul.mubr.bf16.vlgmr.msra.gmra.mrb[160].mxu0 %v23647_v43  ;;  %13015 = vmatpush1.bf16.msra.mxu1 %v18680_v13  ;;  %v18734_v13 = vld [vmem:[%s24860_s15 + $0xd50] ss:$24 sps:$4 sm:$0xff]  }
 0xaa8   :  { %13233 = vmatpush1.bf16.msra.mxu0 %v18683_v4  ;;  %13264 = vmatprep.mubr.bf16.mxu0 %v23658_v9  ;;  %v18742_v4 = vld [vmem:[%s24860_s15 + $0xd84] ss:$24 sps:$4 sm:$0xff]  }
 0xaa9   :  { %13016 = vmatprep.subr.bf16.mxu1 %v18688_v51  ;;  %13234 = vmatprep.subr.bf16.mxu0 %v18691_v14  ;;  %v18740_v51 = vld [vmem:[%s24860_s15 + $0xd80] ss:$24 sps:$4 sm:$0xff]  }
 0xaaa   :  { %v18743_v14 = vld [vmem:[%s24860_s15 + $0xae8] ss:$24 sps:$4 sm:$0xff]  }
 0xaab   :  { %13017 = vmatpush1.bf16.msra.mxu1 %v18686_v5  ;;  %v18748_v5 = vld [vmem:[%s24860_s15 + $0xdb4] ss:$24 sps:$4 sm:$0xff]  }
 0xaac   :  { %13235 = vmatpush1.bf16.msra.mxu0 %v18689_v18  ;;  %13027 = vmatprep.subr.bf16.mxu1 %v18694_v41  ;;  %v18746_v18 = vld [vmem:[%s24860_s15 + $0xdb0] ss:$24 sps:$4 sm:$0xff]  }
 0xaad   :  { %13236 = vmatprep.subr.bf16.mxu0 %v18697_v35  ;;  %v18749_v41 = vld [vmem:[%s24860_s15 + $0xb18] ss:$24 sps:$4 sm:$0xff]   ;;  %v18757_v35 = vld [vmem:[%s24860_s15 + $0xb4c] ss:$24 sps:$4 sm:$0xff]  }
 0xaae   :  { %13019 = vmatmul.mubr.bf16.vlgmr.msra.gmra.mrb[136].mxu1 %v23861_v27 }
 0xaaf   :  { %13028 = vmatpush1.bf16.msra.mxu1 %v18692_v57  ;;  %13059 = vmatprep.mubr.bf16.mxu1 %v23869_v45  ;;  %v18752_v57 = vld [vmem:[%s24860_s15 + $0xde0] ss:$24 sps:$4 sm:$0xff]  }
 0xab0   :  { %13237 = vmatpush1.bf16.msra.mxu0 %v18695_v2  ;;  %13029 = vmatprep.subr.bf16.mxu1 %v18700_v12  ;;  %v18755_v2 = vld [vmem:[%s24860_s15 + $0xb48] ss:$24 sps:$4 sm:$0xff]   ;;  %v18760_v12 = vld [vmem:[%s24860_s15 + $0xe14] ss:$24 sps:$4 sm:$0xff]  }
 0xab1   :  { %13238 = vmatprep.subr.bf16.mxu0 %v18703_v59  ;;  %v18763_v59 = vld [vmem:[%s24860_s15 + $0xb7c] ss:$24 sps:$4 sm:$0xff]  }
 0xab3   :  { %13030 = vmatpush1.bf16.msra.mxu1 %v18698_v56  ;;  %v18758_v56 = vld [vmem:[%s24860_s15 + $0xe10] ss:$24 sps:$4 sm:$0xff]  }
 0xab4   :  { %13239 = vmatpush1.bf16.msra.mxu0 %v18701_v50  ;;  %13031 = vmatprep.subr.bf16.mxu1 %v18706_v55  ;;  %v18761_v50 = vld [vmem:[%s24860_s15 + $0xb78] ss:$24 sps:$4 sm:$0xff]   ;;  %v18766_v55 = vld [vmem:[%s24860_s15 + $0xe44] ss:$24 sps:$4 sm:$0xff]  }
 0xab5   :  { %13240 = vmatprep.subr.bf16.mxu0 %v18709_v6  ;;  %v18769_v6 = vld [vmem:[%s24860_s15 + $0xbac] ss:$24 sps:$4 sm:$0xff]  }
 0xab7   :  { %13032 = vmatpush1.bf16.msra.mxu1 %v18704_v31  ;;  %v18764_v31 = vld [vmem:[%s24860_s15 + $0xe40] ss:$24 sps:$4 sm:$0xff]  }
 0xab8   :  { %13241 = vmatpush1.bf16.msra.mxu0 %v18707_v19  ;;  %13033 = vmatprep.subr.bf16.mxu1 %v18712_v0  ;;  %v18767_v19 = vld [vmem:[%s24860_s15 + $0xba8] ss:$24 sps:$4 sm:$0xff]   ;;  %v18772_v0 = vld [vmem:[%s24860_s15 + $0xe74] ss:$24 sps:$4 sm:$0xff]  }
 0xab9   :  { %13242 = vmatprep.subr.bf16.mxu0 %v18715_v29  ;;  %v18775_v29 = vld [vmem:[%s24860_s15 + $0xbdc] ss:$24 sps:$4 sm:$0xff]  }
 0xaba   :  { %v23912_v62 = vpop.f32.mrb[156].mxu0 }
 0xabb   :  { %v23914_v44 = vpop.f32.mrb[157].mxu0  ;;  %13034 = vmatpush1.bf16.msra.mxu1 %v18710_v3  ;;  %v9845_v3 = vrot.slane %v23813_v30, %v19634_v8 }
 0xabc   :  { %13243 = vmatpush1.bf16.msra.mxu0 %v18713_v22  ;;  %v12901_v11 = vpop.f32.mrb[158].mxu0  ;;  %13035 = vmatprep.subr.bf16.mxu1 %v18718_v1  ;;  %v18770_v22 = vld [vmem:[%s24860_s15 + $0xe70] ss:$24 sps:$4 sm:$0xff]  }
 0xabd   :  { %v12902_v25 = vpop.f32.mrb[159].mxu0  ;;  %13244 = vmatprep.subr.bf16.mxu0 %v18721_v53  ;;  %v18773_v1 = vld [vmem:[%s24860_s15 + $0xbd8] ss:$24 sps:$4 sm:$0xff]   ;;  %v18778_v53 = vld [vmem:[%s24860_s15 + $0xea4] ss:$24 sps:$4 sm:$0xff]   ;;  %v9873_v11 = vadd.f32 %v9845_v3, %v23410_v42 }
 0xabe   :  { %v18784_v25 = vld [vmem:[%s24860_s15 + $0xed4] ss:$24 sps:$4 sm:$0xff]   ;;  %v18827_v3 = vld [vmem:[%s24860_s15 + $0xdb8] ss:$24 sps:$4 sm:$0xff]  }
 0xabf   :  { %13036 = vmatpush1.bf16.msra.mxu1 %v18716_v48  ;;  %v18781_v48 = vld [vmem:[%s24860_s15 + $0xc0c] ss:$24 sps:$4 sm:$0xff]   ;;  %v18787_v42 = vld [vmem:[%s24860_s15 + $0xc3c] ss:$24 sps:$4 sm:$0xff]  }
 0xac0   :  { %13245 = vmatpush1.bf16.msra.mxu0 %v18719_v40  ;;  %13037 = vmatprep.subr.bf16.mxu1 %v18724_v24  ;;  %v18776_v40 = vld [vmem:[%s24860_s15 + $0xea0] ss:$24 sps:$4 sm:$0xff]  }
 0xac1   :  { %13246 = vmatprep.subr.bf16.mxu0 %v18727_v26  ;;  %v18779_v24 = vld [vmem:[%s24860_s15 + $0xc08] ss:$24 sps:$4 sm:$0xff]   ;;  %v9884_v26 = vmax.f32 %v9873_v11, 0.0  ;;  %v18838_v11 = vld [vmem:[%s24860_s15 + $0x134] ss:$24 sps:$4 sm:$0xff]  }
 0xac3   :  { %13038 = vmatpush1.bf16.msra.mxu1 %v18722_v34  ;;  %v18782_v34 = vld [vmem:[%s24860_s15 + $0xed0] ss:$24 sps:$4 sm:$0xff]  }
 0xac4   :  { %13247 = vmatpush1.bf16.msra.mxu0 %v18725_v21  ;;  %13039 = vmatprep.subr.bf16.mxu1 %v18730_v58  ;;  %v18785_v21 = vld [vmem:[%s24860_s15 + $0xc38] ss:$24 sps:$4 sm:$0xff]   ;;  %v18788_v58 = vld [vmem:[%s24860_s15 + $0xf04] ss:$24 sps:$4 sm:$0x1f]  }
 0xac5   :  { %13248 = vmatprep.subr.bf16.mxu0 %v18733_v20  ;;  %v18793_v20 = vld [vmem:[%s24860_s15 + $0xf00] ss:$24 sps:$4 sm:$0x1f]  }
 0xac7   :  { %13040 = vmatpush1.bf16.msra.mxu1 %v18728_v23  ;;  %v18792_v23 = vld [vmem:[%s24860_s15 + $0xc6c] ss:$24 sps:$4 sm:$0xff]  }
 0xac8   :  { %13249 = vmatpush1.bf16.msra.mxu0 %v18731_v33  ;;  %13041 = vmatprep.subr.bf16.mxu1 %v18736_v46  ;;  %v24068_v33 = vpack.c.bf16 %v9884_v26, %v9884_v26  ;;  %v9853_v46 = vrot.slane %v23813_v30, %v23388_v28  ;;  %v18847_v26 = vld [vmem:[%s24860_s15 + $0xe4c] ss:$24 sps:$4 sm:$0xff]  }
 0xac9   :  { %13250 = vmatprep.subr.bf16.mxu0 %v18739_v47  ;;  %v18790_v47 = vld [vmem:[%s24860_s15 + $0xc68] ss:$24 sps:$4 sm:$0xff]  }
 0xaca   :  { %v9875_v30 = vadd.f32 %v9853_v46, %v23650_v52  ;;  %v18805_v52 = vld [vmem:[%s24860_s15 + $0xcfc] ss:$24 sps:$4 sm:$0xff]   ;;  %v18851_v46 = vld [vmem:[%s24860_s15 + $0xe78] ss:$24 sps:$4 sm:$0xff]  }
 0xacb   :  { %13042 = vmatpush1.bf16.msra.mxu1 %v18734_v13  ;;  %v12846_v13 = vsel %vm12844_vm15, %v18793_v20, 0  ;;  %v18853_v20 = vld [vmem:[%s24860_s15 + $0xe7c] ss:$24 sps:$4 sm:$0xff]  }
 0xacc   :  { %13251 = vmatpush1.bf16.msra.mxu0 %v18737_v49  ;;  %13043 = vmatprep.subr.bf16.mxu1 %v18742_v4  ;;  %v18802_v49 = vld [vmem:[%s24860_s15 + $0x14] ss:$24 sps:$4 sm:$0xff]  }
 0xacd   :  { %13252 = vmatprep.subr.bf16.mxu0 %v18745_v15  ;;  %v18796_v4 = vld [vmem:[%s24860_s15 + $0xc9c] ss:$24 sps:$4 sm:$0xff]   ;;  %v18794_v15 = vld [vmem:[%s24860_s15 + $0xc98] ss:$24 sps:$4 sm:$0xff]  }
 0xacf   :  { %13044 = vmatpush1.bf16.msra.mxu1 %v18740_v51  ;;  %v18799_v51 = vld [vmem:[%s24860_s15 + $0xccc] ss:$24 sps:$4 sm:$0xff]  }
 0xad0   :  { %13253 = vmatpush1.bf16.msra.mxu0 %v18743_v14  ;;  %13045 = vmatprep.subr.bf16.mxu1 %v18748_v5  ;;  %v9886_v14 = vmax.f32 %v9875_v30, 0.0  ;;  %v18797_v5 = vld [vmem:[%s24860_s15 + $0xcc8] ss:$24 sps:$4 sm:$0xff]   ;;  %v18862_v30 = vld [vmem:[%s24860_s15 + $0x1f4] ss:$24 sps:$4 sm:$0xff]  }
 0xad1   :  { %13254 = vmatprep.subr.bf16.mxu0 %v18751_v38  ;;  %v18800_v38 = vld [vmem:[%s24860_s15 + $0x10] ss:$24 sps:$4 sm:$0xff]  }
 0xad3   :  { %13046 = vmatpush1.bf16.msra.mxu1 %v18746_v18  ;;  %v24101_v18 = vpack.c.bf16 %v9886_v14, %v9886_v14  ;;  %v18863_v14 = vld [vmem:[%s24860_s15 + $0xed8] ss:$24 sps:$4 sm:$0xff]  }
 0xad4   :  { %13255 = vmatpush1.bf16.msra.mxu0 %v18749_v41  ;;  %13047 = vmatprep.subr.bf16.mxu1 %v18754_v39  ;;  %v18803_v41 = vld [vmem:[%s24860_s15 + $0xcf8] ss:$24 sps:$4 sm:$0xff]   ;;  %v18808_v39 = vld [vmem:[%s24860_s15 + $0x44] ss:$24 sps:$4 sm:$0xff]  }
 0xad5   :  { %13256 = vmatprep.subr.bf16.mxu0 %v18757_v35  ;;  %v18811_v35 = vld [vmem:[%s24860_s15 + $0xd2c] ss:$24 sps:$4 sm:$0xff]  }
 0xad7   :  { %13048 = vmatpush1.bf16.msra.mxu1 %v18752_v57  ;;  %v18806_v57 = vld [vmem:[%s24860_s15 + $0x40] ss:$24 sps:$4 sm:$0xff]  }
 0xad8   :  { %13257 = vmatpush1.bf16.msra.mxu0 %v18755_v2  ;;  %13049 = vmatprep.subr.bf16.mxu1 %v18760_v12  ;;  %v18809_v2 = vld [vmem:[%s24860_s15 + $0xd28] ss:$24 sps:$4 sm:$0xff]   ;;  %v18814_v12 = vld [vmem:[%s24860_s15 + $0x74] ss:$24 sps:$4 sm:$0xff]  }
 0xad9   :  { %13258 = vmatprep.subr.bf16.mxu0 %v18763_v59  ;;  %v18817_v59 = vld [vmem:[%s24860_s15 + $0xd5c] ss:$24 sps:$4 sm:$0xff]  }
 0xadb   :  { %13050 = vmatpush1.bf16.msra.mxu1 %v18758_v56  ;;  %v18815_v56 = vld [vmem:[%s24860_s15 + $0xd58] ss:$24 sps:$4 sm:$0xff]  }
 0xadc   :  { %13259 = vmatpush1.bf16.msra.mxu0 %v18761_v50  ;;  %13051 = vmatprep.subr.bf16.mxu1 %v18766_v55  ;;  %v18820_v50 = vld [vmem:[%s24860_s15 + $0xa4] ss:$24 sps:$4 sm:$0xff]  }
 0xadd   :  { %13260 = vmatprep.subr.bf16.mxu0 %v18769_v6  ;;  %v18823_v55 = vld [vmem:[%s24860_s15 + $0xd8c] ss:$24 sps:$4 sm:$0xff]   ;;  %v18818_v6 = vld [vmem:[%s24860_s15 + $0xa0] ss:$24 sps:$4 sm:$0xff]  }
 0xadf   :  { %13052 = vmatpush1.bf16.msra.mxu1 %v18764_v31  ;;  %v18821_v31 = vld [vmem:[%s24860_s15 + $0xd88] ss:$24 sps:$4 sm:$0xff]  }
 0xae0   :  { %13261 = vmatpush1.bf16.msra.mxu0 %v18767_v19  ;;  %13053 = vmatprep.subr.bf16.mxu1 %v18772_v0  ;;  %v18826_v19 = vld [vmem:[%s24860_s15 + $0xd4] ss:$24 sps:$4 sm:$0xff]  }
 0xae1   :  { %13262 = vmatprep.subr.bf16.mxu0 %v18775_v29  ;;  %v18829_v0 = vld [vmem:[%s24860_s15 + $0xdbc] ss:$24 sps:$4 sm:$0xff]   ;;  %v18824_v29 = vld [vmem:[%s24860_s15 + $0xd0] ss:$24 sps:$4 sm:$0xff]  }
 0xae3   :  { %13054 = vmatpush1.bf16.msra.mxu1 %v18770_v22  ;;  %v18832_v22 = vld [vmem:[%s24860_s15 + $0x104] ss:$24 sps:$4 sm:$0xff]  }
 0xae4   :  { %13263 = vmatpush1.bf16.msra.mxu0 %v18773_v1  ;;  %13055 = vmatprep.subr.bf16.mxu1 %v18778_v53  ;;  %v18835_v1 = vld [vmem:[%s24860_s15 + $0xdec] ss:$24 sps:$4 sm:$0xff]   ;;  %v18830_v53 = vld [vmem:[%s24860_s15 + $0x100] ss:$24 sps:$4 sm:$0xff]  }
 0xae5   :  { %13273 = vmatprep.subr.bf16.mxu0 %v18781_v48  ;;  %v18833_v48 = vld [vmem:[%s24860_s15 + $0xde8] ss:$24 sps:$4 sm:$0xff]  }
 0xae7   :  { %13265 = vmatmul.mubr.bf16.vlgmr.msra.gmra.mrb[160].mxu0 %v23861_v27  ;;  %13056 = vmatpush1.bf16.msra.mxu1 %v18776_v40  ;;  %v18841_v40 = vld [vmem:[%s24860_s15 + $0xe1c] ss:$24 sps:$4 sm:$0xff]  }
 0xae8   :  { %13274 = vmatpush1.bf16.msra.mxu0 %v18779_v24  ;;  %13305 = vmatprep.mubr.bf16.mxu0 %v23869_v45  ;;  %v18836_v24 = vld [vmem:[%s24860_s15 + $0x130] ss:$24 sps:$4 sm:$0xff]  }
 0xae9   :  { %13057 = vmatprep.subr.bf16.mxu1 %v18784_v25  ;;  %13275 = vmatprep.subr.bf16.mxu0 %v18787_v42  ;;  %v18839_v25 = vld [vmem:[%s24860_s15 + $0xe18] ss:$24 sps:$4 sm:$0xff]   ;;  %v18844_v42 = vld [vmem:[%s24860_s15 + $0x164] ss:$24 sps:$4 sm:$0xff]  }
 0xaeb   :  { %13058 = vmatpush1.bf16.msra.mxu1 %v18782_v34  ;;  %v18842_v34 = vld [vmem:[%s24860_s15 + $0x160] ss:$24 sps:$4 sm:$0xff]  }
 0xaec   :  { %13276 = vmatpush1.bf16.msra.mxu0 %v18785_v21  ;;  %16592 = vmatprep.subr.msk.bf16.mxu1 %vm12844_vm15, %v18788_v58  ;;  %v18845_v21 = vld [vmem:[%s24860_s15 + $0xe48] ss:$24 sps:$4 sm:$0xff]   ;;  %v18850_v58 = vld [vmem:[%s24860_s15 + $0x194] ss:$24 sps:$4 sm:$0xff]  }
 0xaed   :  { %13277 = vmatprep.subr.bf16.mxu0 %v18792_v23  ;;  %v18848_v23 = vld [vmem:[%s24860_s15 + $0x190] ss:$24 sps:$4 sm:$0xff]  }
 0xaee   :  { %13060 = vmatmul.mubr.bf16.vlgmr.msra.gmra.mrb[136].mxu1 %v24068_v33 }
 0xaef   :  { %13069 = vmatpush1.bf16.msra.mxu1 %v12846_v13  ;;  %13100 = vmatprep.mubr.bf16.mxu1 %v19144_v60  ;;  %v18859_v13 = vld [vmem:[%s24860_s15 + $0xeac] ss:$24 sps:$4 sm:$0xff]  }
 0xaf0   :  { %13278 = vmatpush1.bf16.msra.mxu0 %v18790_v47  ;;  %13355 = vmatprep.subr.bf16.mxu1 %v18802_v49  ;;  %v18856_v47 = vld [vmem:[%s24860_s15 + $0x1c4] ss:$24 sps:$4 sm:$0xff]   ;;  %v18854_v49 = vld [vmem:[%s24860_s15 + $0x1c0] ss:$24 sps:$4 sm:$0xff]  }
 0xaf1   :  { %13279 = vmatprep.subr.bf16.mxu0 %v18796_v4  ;;  %v18857_v4 = vld [vmem:[%s24860_s15 + $0xea8] ss:$24 sps:$4 sm:$0xff]  }
 0xaf4   :  { %13280 = vmatpush1.bf16.msra.mxu0 %v18794_v15  ;;  %v18865_v15 = vld [vmem:[%s24860_s15 + $0xedc] ss:$24 sps:$4 sm:$0xff]  }
 0xaf5   :  { %13281 = vmatprep.subr.bf16.mxu0 %v18799_v51  ;;  %v18860_v51 = vld [vmem:[%s24860_s15 + $0x1f0] ss:$24 sps:$4 sm:$0xff]  }
 0xaf8   :  { %13282 = vmatpush1.bf16.msra.mxu0 %v18797_v5  ;;  %v18868_v5 = vld [vmem:[%s24860_s15 + $0x224] ss:$24 sps:$4 sm:$0xff]  }
 0xaf9   :  { %13283 = vmatprep.subr.bf16.mxu0 %v18805_v52  ;;  %v18875_v52 = vld [vmem:[%s24860_s15 + $0xf0c] ss:$24 sps:$4 sm:$0x1f]  }
 0xafa   :  { %16593 = vmatmul.mubr.msk.bf16.vlgmr.msra.gmra.mrb[136].mxu1 %vm12840_vm1, %v24101_v18 }
 0xafb   :  { %13356 = vmatpush1.bf16.msra.mxu1 %v18800_v38  ;;  %13387 = vmatprep.mubr.bf16.mxu1 %v23282_v17  ;;  %v18812_v17 = vld [vmem:[%s24860_s15 + $0x70] ss:$24 sps:$4 sm:$0xff]  }
 0xafc   :  { %13284 = vmatpush1.bf16.msra.mxu0 %v18803_v41  ;;  %13357 = vmatprep.subr.bf16.mxu1 %v18808_v39  ;;  %v18877_v38 = vld [vmem:[%s24860_s15 + $0xf08] ss:$24 sps:$4 sm:$0x1f]   ;;  %v18871_v39 = vld [vmem:[%s24860_s15 + $0x254] ss:$24 sps:$4 sm:$0xff]  }
 0xafd   :  { %13285 = vmatprep.subr.bf16.mxu0 %v18811_v35  ;;  %v18866_v41 = vld [vmem:[%s24860_s15 + $0x220] ss:$24 sps:$4 sm:$0xff]   ;;  %v12852_v35 = vsel %vm12844_vm15, %v18877_v38, 0 }
 0xafe   :  { %v18911_v38 = vld [vmem:[%s24860_s15 + $0x4c0] ss:$24 sps:$4 sm:$0xff]  }
 0xaff   :  { %13358 = vmatpush1.bf16.msra.mxu1 %v18806_v57  ;;  %v18869_v57 = vld [vmem:[%s24860_s15 + $0x250] ss:$24 sps:$4 sm:$0xff]  }
 0xb00   :  { %13286 = vmatpush1.bf16.msra.mxu0 %v18809_v2  ;;  %13359 = vmatprep.subr.bf16.mxu1 %v18814_v12  ;;  %v18874_v2 = vld [vmem:[%s24860_s15 + $0x284] ss:$24 sps:$4 sm:$0xff]   ;;  %v18872_v12 = vld [vmem:[%s24860_s15 + $0x280] ss:$24 sps:$4 sm:$0xff]  }
 0xb01   :  { %13287 = vmatprep.subr.bf16.mxu0 %v18817_v59  ;;  %v18880_v59 = vld [vmem:[%s24860_s15 + $0x2b4] ss:$24 sps:$4 sm:$0xff]  }
 0xb03   :  { %13360 = vmatpush1.bf16.msra.mxu1 %v18812_v17  ;;  %v18878_v17 = vld [vmem:[%s24860_s15 + $0x2b0] ss:$24 sps:$4 sm:$0xff]  }
 0xb04   :  { %13288 = vmatpush1.bf16.msra.mxu0 %v18815_v56  ;;  %13361 = vmatprep.subr.bf16.mxu1 %v18820_v50  ;;  %v18883_v56 = vld [vmem:[%s24860_s15 + $0x2e4] ss:$24 sps:$4 sm:$0xff]   ;;  %v18881_v50 = vld [vmem:[%s24860_s15 + $0x2e0] ss:$24 sps:$4 sm:$0xff]  }
 0xb05   :  { %13289 = vmatprep.subr.bf16.mxu0 %v18823_v55  ;;  %v18886_v55 = vld [vmem:[%s24860_s15 + $0x314] ss:$24 sps:$4 sm:$0xff]  }
 0xb07   :  { %13362 = vmatpush1.bf16.msra.mxu1 %v18818_v6  ;;  %v18980_v6 = vld [vmem:[%s24862_s17 + $0x40] sm:$0xff]  }
 0xb08   :  { %13290 = vmatpush1.bf16.msra.mxu0 %v18821_v31  ;;  %13363 = vmatprep.subr.bf16.mxu1 %v18826_v19  ;;  %v18884_v31 = vld [vmem:[%s24860_s15 + $0x310] ss:$24 sps:$4 sm:$0xff]   ;;  %v18981_v19 = vld [vmem:[%s24862_s17] sm:$0xff]  }
 0xb09   :  { %13291 = vmatprep.subr.bf16.mxu0 %v18829_v0  ;;  %v18889_v0 = vld [vmem:[%s24860_s15 + $0x344] ss:$24 sps:$4 sm:$0xff]  }
 0xb0b   :  { %13364 = vmatpush1.bf16.msra.mxu1 %v18824_v29  ;;  %v18985_v29 = vld [vmem:[%s24862_s17 + $0x48] sm:$0xff]  }
 0xb0c   :  { %13292 = vmatpush1.bf16.msra.mxu0 %v18827_v3  ;;  %13365 = vmatprep.subr.bf16.mxu1 %v18832_v22  ;;  %v18887_v3 = vld [vmem:[%s24860_s15 + $0x340] ss:$24 sps:$4 sm:$0xff]   ;;  %v18986_v22 = vld [vmem:[%s24862_s17 + $0x8] sm:$0xff]  }
 0xb0d   :  { %13293 = vmatprep.subr.bf16.mxu0 %v18835_v1  ;;  %v18990_v1 = vld [vmem:[%s24862_s17 + $0x50] sm:$0xff]  }
 0xb0f   :  { %13366 = vmatpush1.bf16.msra.mxu1 %v18830_v53  ;;  %v18991_v53 = vld [vmem:[%s24862_s17 + $0x10] sm:$0xff]  }
 0xb10   :  { %13294 = vmatpush1.bf16.msra.mxu0 %v18833_v48  ;;  %13367 = vmatprep.subr.bf16.mxu1 %v18838_v11  ;;  %v18895_v48 = vld [vmem:[%s24860_s15 + $0x3a4] ss:$24 sps:$4 sm:$0xff]  }
 0xb11   :  { %13295 = vmatprep.subr.bf16.mxu0 %v18841_v40  ;;  %v18995_v11 = vld [vmem:[%s24862_s17 + $0x58] sm:$0xff]  }
 0xb12   :  { %v18893_v40 = vld [vmem:[%s24860_s15 + $0x3a0] ss:$24 sps:$4 sm:$0xff]  }
 0xb13   :  { %13368 = vmatpush1.bf16.msra.mxu1 %v18836_v24  ;;  %v18996_v24 = vld [vmem:[%s24862_s17 + $0x18] sm:$0xff]  }
 0xb14   :  { %13296 = vmatpush1.bf16.msra.mxu0 %v18839_v25  ;;  %13369 = vmatprep.subr.bf16.mxu1 %v18844_v42  ;;  %v18898_v25 = vld [vmem:[%s24860_s15 + $0x3d4] ss:$24 sps:$4 sm:$0xff]   ;;  %v19000_v42 = vld [vmem:[%s24862_s17 + $0x60] sm:$0xff]  }
 0xb15   :  { %13297 = vmatprep.subr.bf16.mxu0 %v18847_v26  ;;  %v18896_v26 = vld [vmem:[%s24860_s15 + $0x3d0] ss:$24 sps:$4 sm:$0xff]  }
 0xb17   :  { %13370 = vmatpush1.bf16.msra.mxu1 %v18842_v34  ;;  %v19001_v34 = vld [vmem:[%s24862_s17 + $0x20] sm:$0xff]  }
 0xb18   :  { %13298 = vmatpush1.bf16.msra.mxu0 %v18845_v21  ;;  %13371 = vmatprep.subr.bf16.mxu1 %v18850_v58  ;;  %v18901_v21 = vld [vmem:[%s24860_s15 + $0x404] ss:$24 sps:$4 sm:$0xff]   ;;  %v19005_v58 = vld [vmem:[%s24862_s17 + $0x68] sm:$0xff]  }
 0xb19   :  { %13299 = vmatprep.subr.bf16.mxu0 %v18853_v20  ;;  %v18899_v20 = vld [vmem:[%s24860_s15 + $0x400] ss:$24 sps:$4 sm:$0xff]  }
 0xb1b   :  { %13372 = vmatpush1.bf16.msra.mxu1 %v18848_v23  ;;  %v19006_v23 = vld [vmem:[%s24862_s17 + $0x28] sm:$0xff]  }
 0xb1c   :  { %13300 = vmatpush1.bf16.msra.mxu0 %v18851_v46  ;;  %13373 = vmatprep.subr.bf16.mxu1 %v18856_v47  ;;  %v18904_v46 = vld [vmem:[%s24860_s15 + $0x434] ss:$24 sps:$4 sm:$0xff]  }
 0xb1d   :  { %13301 = vmatprep.subr.bf16.mxu0 %v18859_v13  ;;  %v19010_v47 = vld [vmem:[%s24862_s17 + $0x70] sm:$0xff]  }
 0xb1e   :  { %v18902_v13 = vld [vmem:[%s24860_s15 + $0x430] ss:$24 sps:$4 sm:$0xff]  }
 0xb1f   :  { %13374 = vmatpush1.bf16.msra.mxu1 %v18854_v49  ;;  %v19011_v49 = vld [vmem:[%s24862_s17 + $0x30] sm:$0xff]  }
 0xb20   :  { %13302 = vmatpush1.bf16.msra.mxu0 %v18857_v4  ;;  %13375 = vmatprep.subr.bf16.mxu1 %v18862_v30  ;;  %v18907_v4 = vld [vmem:[%s24860_s15 + $0x464] ss:$24 sps:$4 sm:$0xff]  }
 0xb21   :  { %13303 = vmatprep.subr.bf16.mxu0 %v18865_v15  ;;  %v19015_v30 = vld [vmem:[%s24862_s17 + $0x78] sm:$0xff]  }
 0xb22   :  { %v18905_v15 = vld [vmem:[%s24860_s15 + $0x460] ss:$24 sps:$4 sm:$0xff]  }
 0xb23   :  { %13376 = vmatpush1.bf16.msra.mxu1 %v18860_v51  ;;  %v19016_v51 = vld [vmem:[%s24862_s17 + $0x38] sm:$0xff]  }
 0xb24   :  { %13304 = vmatpush1.bf16.msra.mxu0 %v18863_v14  ;;  %13377 = vmatprep.subr.bf16.mxu1 %v18868_v5  ;;  %v18910_v14 = vld [vmem:[%s24860_s15 + $0x494] ss:$24 sps:$4 sm:$0xff]   ;;  %v18908_v5 = vld [vmem:[%s24860_s15 + $0x490] ss:$24 sps:$4 sm:$0xff]  }
 0xb25   :  { %16594 = vmatprep.subr.msk.bf16.mxu0 %vm12844_vm15, %v18875_v52  ;;  %v18913_v52 = vld [vmem:[%s24860_s15 + $0x4c4] ss:$24 sps:$4 sm:$0xff]  }
 0xb27   :  { %13306 = vmatmul.mubr.bf16.vlgmr.msra.gmra.mrb[160].mxu0 %v24068_v33  ;;  %13378 = vmatpush1.bf16.msra.mxu1 %v18866_v41  ;;  %v18916_v41 = vld [vmem:[%s24860_s15 + $0x4f4] ss:$24 sps:$4 sm:$0xff]  }
 0xb28   :  { %13379 = vmatprep.subr.bf16.mxu1 %v18871_v39  ;;  %13315 = vmatpush1.bf16.msra.mxu0 %v12852_v35  ;;  %v18914_v39 = vld [vmem:[%s24860_s15 + $0x4f0] ss:$24 sps:$4 sm:$0xff]   ;;  %v18919_v35 = vld [vmem:[%s24860_s15 + $0x524] ss:$24 sps:$4 sm:$0xff]  }
 0xb29   :  { %13346 = vmatprep.mubr.bf16.mxu0 %v19144_v60  ;;  %16704 = vmatprep.subr.bf16.mxu0 %v18980_v6  ;;  %v18931_v6 = vld [vmem:[%s24860_s15 + $0x5e4] ss:$24 sps:$4 sm:$0xff]  }
 0xb2b   :  { %13380 = vmatpush1.bf16.msra.mxu1 %v18869_v57  ;;  %v18917_v57 = vld [vmem:[%s24860_s15 + $0x520] ss:$24 sps:$4 sm:$0xff]  }
 0xb2c   :  { %13381 = vmatprep.subr.bf16.mxu1 %v18874_v2  ;;  %v18922_v2 = vld [vmem:[%s24860_s15 + $0x554] ss:$24 sps:$4 sm:$0xff]  }
 0xb2f   :  { %13382 = vmatpush1.bf16.msra.mxu1 %v18872_v12  ;;  %v18920_v12 = vld [vmem:[%s24860_s15 + $0x550] ss:$24 sps:$4 sm:$0xff]  }
 0xb30   :  { %13383 = vmatprep.subr.bf16.mxu1 %v18880_v59  ;;  %v18925_v59 = vld [vmem:[%s24860_s15 + $0x584] ss:$24 sps:$4 sm:$0xff]  }
 0xb33   :  { %16595 = vmatmul.mubr.msk.bf16.vlgmr.msra.gmra.mrb[160].mxu0 %vm12840_vm1, %v24101_v18  ;;  %13384 = vmatpush1.bf16.msra.mxu1 %v18878_v17  ;;  %v18923_v17 = vld [vmem:[%s24860_s15 + $0x580] ss:$24 sps:$4 sm:$0xff]  }
 0xb34   :  { %13385 = vmatprep.subr.bf16.mxu1 %v18883_v56  ;;  %16705 = vmatpush3.bf16.msra.mxu0 %v18981_v19  ;;  %v18928_v56 = vld [vmem:[%s24860_s15 + $0x5b4] ss:$24 sps:$4 sm:$0xff]  }
 0xb35   :  { %16706 = vmatprep.subr.bf16.mxu0 %v18985_v29  ;;  %v18934_v19 = vld [vmem:[%s24860_s15 + $0x614] ss:$24 sps:$4 sm:$0xff]   ;;  %v18937_v29 = vld [vmem:[%s24860_s15 + $0x644] ss:$24 sps:$4 sm:$0xff]  }
 0xb37   :  { %13386 = vmatpush1.bf16.msra.mxu1 %v18881_v50  ;;  %v19038_v50 = vld [vmem:[%s24862_s17 + $0xc0] sm:$0xff]  }
 0xb38   :  { %13396 = vmatprep.subr.bf16.mxu1 %v18886_v55  ;;  %16707 = vmatpush3.bf16.msra.mxu0 %v18986_v22  ;;  %v18926_v55 = vld [vmem:[%s24860_s15 + $0x5b0] ss:$24 sps:$4 sm:$0xff]   ;;  %v18940_v22 = vld [vmem:[%s24860_s15 + $0x674] ss:$24 sps:$4 sm:$0xff]  }
 0xb39   :  { %16708 = vmatprep.subr.bf16.mxu0 %v18990_v1  ;;  %v18946_v1 = vld [vmem:[%s24860_s15 + $0x6d4] ss:$24 sps:$4 sm:$0xff]  }
 0xb3a   :  { %13388 = vmatmul.mubr.bf16.vlgmr.msra.gmra.mrb[140].mxu1 %v23287_v16  ;;  %v18892_v16 = vld [vmem:[%s24860_s15 + $0x374] ss:$24 sps:$4 sm:$0xff]  }
 0xb3b   :  { %13397 = vmatpush1.bf16.msra.mxu1 %v18884_v31  ;;  %13428 = vmatprep.mubr.bf16.mxu1 %v23426_v32  ;;  %v18890_v32 = vld [vmem:[%s24860_s15 + $0x370] ss:$24 sps:$4 sm:$0xff]   ;;  %v18929_v31 = vld [vmem:[%s24860_s15 + $0x5e0] ss:$24 sps:$4 sm:$0xff]  }
 0xb3c   :  { %13398 = vmatprep.subr.bf16.mxu1 %v18889_v0  ;;  %16709 = vmatpush3.bf16.msra.mxu0 %v18991_v53  ;;  %v18932_v0 = vld [vmem:[%s24860_s15 + $0x610] ss:$24 sps:$4 sm:$0xff]   ;;  %v18949_v53 = vld [vmem:[%s24860_s15 + $0x704] ss:$24 sps:$4 sm:$0xff]  }
 0xb3d   :  { %16710 = vmatprep.subr.bf16.mxu0 %v18995_v11  ;;  %v18952_v11 = vld [vmem:[%s24860_s15 + $0x734] ss:$24 sps:$4 sm:$0xff]  }
 0xb3f   :  { %13399 = vmatpush1.bf16.msra.mxu1 %v18887_v3  ;;  %v18935_v3 = vld [vmem:[%s24860_s15 + $0x640] ss:$24 sps:$4 sm:$0xff]  }
 0xb40   :  { %13400 = vmatprep.subr.bf16.mxu1 %v18892_v16  ;;  %16711 = vmatpush3.bf16.msra.mxu0 %v18996_v24  ;;  %v18938_v16 = vld [vmem:[%s24860_s15 + $0x670] ss:$24 sps:$4 sm:$0xff]   ;;  %v18955_v24 = vld [vmem:[%s24860_s15 + $0x764] ss:$24 sps:$4 sm:$0xff]  }
 0xb41   :  { %16712 = vmatprep.subr.bf16.mxu0 %v19000_v42  ;;  %v18958_v42 = vld [vmem:[%s24860_s15 + $0x794] ss:$24 sps:$4 sm:$0xff]  }
 0xb43   :  { %13401 = vmatpush1.bf16.msra.mxu1 %v18890_v32  ;;  %v18944_v32 = vld [vmem:[%s24860_s15 + $0x6d0] ss:$24 sps:$4 sm:$0xff]  }
 0xb44   :  { %13402 = vmatprep.subr.bf16.mxu1 %v18895_v48  ;;  %16713 = vmatpush3.bf16.msra.mxu0 %v19001_v34  ;;  %v18947_v48 = vld [vmem:[%s24860_s15 + $0x700] ss:$24 sps:$4 sm:$0xff]   ;;  %v18961_v34 = vld [vmem:[%s24860_s15 + $0x7c4] ss:$24 sps:$4 sm:$0xff]  }
 0xb45   :  { %16714 = vmatprep.subr.bf16.mxu0 %v19005_v58  ;;  %v18964_v58 = vld [vmem:[%s24860_s15 + $0x7f4] ss:$24 sps:$4 sm:$0xff]  }
 0xb47   :  { %13403 = vmatpush1.bf16.msra.mxu1 %v18893_v40  ;;  %v18950_v40 = vld [vmem:[%s24860_s15 + $0x730] ss:$24 sps:$4 sm:$0xff]  }
 0xb48   :  { %13404 = vmatprep.subr.bf16.mxu1 %v18898_v25  ;;  %16715 = vmatpush3.bf16.msra.mxu0 %v19006_v23  ;;  %v18953_v25 = vld [vmem:[%s24860_s15 + $0x760] ss:$24 sps:$4 sm:$0xff]   ;;  %v18967_v23 = vld [vmem:[%s24860_s15 + $0x824] ss:$24 sps:$4 sm:$0xff]  }
 0xb49   :  { %16716 = vmatprep.subr.bf16.mxu0 %v19010_v47  ;;  %v18970_v47 = vld [vmem:[%s24860_s15 + $0x854] ss:$24 sps:$4 sm:$0xff]  }
 0xb4b   :  { %13405 = vmatpush1.bf16.msra.mxu1 %v18896_v26  ;;  %v18956_v26 = vld [vmem:[%s24860_s15 + $0x790] ss:$24 sps:$4 sm:$0xff]  }
 0xb4c   :  { %13406 = vmatprep.subr.bf16.mxu1 %v18901_v21  ;;  %16717 = vmatpush3.bf16.msra.mxu0 %v19011_v49  ;;  %v18959_v21 = vld [vmem:[%s24860_s15 + $0x7c0] ss:$24 sps:$4 sm:$0xff]   ;;  %v18973_v49 = vld [vmem:[%s24860_s15 + $0x884] ss:$24 sps:$4 sm:$0xff]  }
 0xb4d   :  { %16718 = vmatprep.subr.bf16.mxu0 %v19015_v30  ;;  %v18976_v30 = vld [vmem:[%s24860_s15 + $0x8b4] ss:$24 sps:$4 sm:$0xff]  }
 0xb4f   :  { %13407 = vmatpush1.bf16.msra.mxu1 %v18899_v20  ;;  %v18962_v20 = vld [vmem:[%s24860_s15 + $0x7f0] ss:$24 sps:$4 sm:$0xff]  }
 0xb50   :  { %13408 = vmatprep.subr.bf16.mxu1 %v18904_v46  ;;  %16719 = vmatpush3.bf16.msra.mxu0 %v19016_v51  ;;  %v18965_v46 = vld [vmem:[%s24860_s15 + $0x820] ss:$24 sps:$4 sm:$0xff]   ;;  %v18979_v51 = vld [vmem:[%s24860_s15 + $0x8e4] ss:$24 sps:$4 sm:$0xff]  }
 0xb51   :  { %16726 = vmatprep.subr.bf16.mxu0 %v19038_v50  ;;  %v19007_v50 = vld [vmem:[%s24860_s15 + $0xa00] ss:$24 sps:$4 sm:$0xff]  }
 0xb53   :  { %13409 = vmatpush1.bf16.msra.mxu1 %v18902_v13  ;;  %v18968_v13 = vld [vmem:[%s24860_s15 + $0x850] ss:$24 sps:$4 sm:$0xff]  }
 0xb54   :  { %13410 = vmatprep.subr.bf16.mxu1 %v18907_v4  ;;  %v18971_v4 = vld [vmem:[%s24860_s15 + $0x880] ss:$24 sps:$4 sm:$0xff]  }
 0xb57   :  { %13411 = vmatpush1.bf16.msra.mxu1 %v18905_v15  ;;  %v18974_v15 = vld [vmem:[%s24860_s15 + $0x8b0] ss:$24 sps:$4 sm:$0xff]  }
 0xb58   :  { %13412 = vmatprep.subr.bf16.mxu1 %v18910_v14  ;;  %v18977_v14 = vld [vmem:[%s24860_s15 + $0x8e0] ss:$24 sps:$4 sm:$0xff]  }
 0xb5b   :  { %13413 = vmatpush1.bf16.msra.mxu1 %v18908_v5  ;;  %v18984_v5 = vld [vmem:[%s24860_s15 + $0x914] ss:$24 sps:$4 sm:$0xff]  }
 0xb5c   :  { %13414 = vmatprep.subr.bf16.mxu1 %v18913_v52  ;;  %v18982_v52 = vld [vmem:[%s24860_s15 + $0x910] ss:$24 sps:$4 sm:$0xff]  }
 0xb5f   :  { %13415 = vmatpush1.bf16.msra.mxu1 %v18911_v38  ;;  %v18989_v38 = vld [vmem:[%s24860_s15 + $0x944] ss:$24 sps:$4 sm:$0xff]  }
 0xb60   :  { %13416 = vmatprep.subr.bf16.mxu1 %v18916_v41  ;;  %v18987_v41 = vld [vmem:[%s24860_s15 + $0x940] ss:$24 sps:$4 sm:$0xff]  }
 0xb63   :  { %13417 = vmatpush1.bf16.msra.mxu1 %v18914_v39  ;;  %v18994_v39 = vld [vmem:[%s24860_s15 + $0x974] ss:$24 sps:$4 sm:$0xff]  }
 0xb64   :  { %13418 = vmatprep.subr.bf16.mxu1 %v18919_v35  ;;  %v18992_v35 = vld [vmem:[%s24860_s15 + $0x970] ss:$24 sps:$4 sm:$0xff]  }
 0xb67   :  { %13419 = vmatpush1.bf16.msra.mxu1 %v18917_v57  ;;  %v19004_v57 = vld [vmem:[%s24860_s15 + $0x9d4] ss:$24 sps:$4 sm:$0xff]  }
 0xb68   :  { %13420 = vmatprep.subr.bf16.mxu1 %v18922_v2  ;;  %v24550_v2 = vld [vmem:[%s24861_s16] sm:$0x3f] }
 0xb6b   :  { %13421 = vmatpush1.bf16.msra.mxu1 %v18920_v12  ;;  %v19002_v12 = vld [vmem:[%s24860_s15 + $0x9d0] ss:$24 sps:$4 sm:$0xff]  }
 0xb6c   :  { %13422 = vmatprep.subr.bf16.mxu1 %v18925_v59  ;;  %v12813_v59 = vrot.slane %v24550_v2, %v19634_v8  ;;  %v19014_v8 = vld [vmem:[%s24860_s15 + $0xa34] ss:$24 sps:$4 sm:$0xff]  }
 0xb6f   :  { %13423 = vmatpush1.bf16.msra.mxu1 %v18923_v17  ;;  %v19009_v17 = vld [vmem:[%s24860_s15 + $0xa04] ss:$24 sps:$4 sm:$0xff]  }
 0xb70   :  { %13424 = vmatprep.subr.bf16.mxu1 %v18928_v56  ;;  %v12817_v56 = vrot.slane %v24550_v2, %v19640_v10 }
 0xb73   :  { %13425 = vmatpush1.bf16.msra.mxu1 %v18926_v55  ;;  %v12898_v55 = vadd.f32 %v23912_v62, %v12813_v59  ;;  %v19019_v62 = vld [vmem:[%s24860_s15 + $0xa64] ss:$24 sps:$4 sm:$0xff]  }
 0xb74   :  { %13426 = vmatprep.subr.bf16.mxu1 %v18931_v6  ;;  %v12900_v6 = vadd.f32 %v23914_v44, %v12817_v56  ;;  %v19017_v44 = vld [vmem:[%s24860_s15 + $0xa60] ss:$24 sps:$4 sm:$0xff]   ;;  %v19057_v59 = vld [vmem:[%s24860_s15 + $0xc44] ss:$24 sps:$4 sm:$0xff]   ;;  %v19062_v56 = vld [vmem:[%s24860_s15 + $0xc74] ss:$24 sps:$4 sm:$0xff]  }
 0xb77   :  { %13427 = vmatpush1.bf16.msra.mxu1 %v18929_v31 }
 0xb78   :  { %13437 = vmatprep.subr.bf16.mxu1 %v18934_v19 }
 0xb7a   :  { %13429 = vmatmul.mubr.bf16.vlgmr.msra.gmra.mrb[140].mxu1 %v23431_v37  ;;  %v18943_v37 = vld [vmem:[%s24860_s15 + $0x6a4] ss:$24 sps:$4 sm:$0xff]  }
 0xb7b   :  { %13438 = vmatpush1.bf16.msra.mxu1 %v18932_v0  ;;  %13469 = vmatprep.mubr.bf16.mxu1 %v23439_v61  ;;  %v18941_v61 = vld [vmem:[%s24860_s15 + $0x6a0] ss:$24 sps:$4 sm:$0xff]  }
 0xb7c   :  { %13439 = vmatprep.subr.bf16.mxu1 %v18937_v29 }
 0xb7f   :  { %13440 = vmatpush1.bf16.msra.mxu1 %v18935_v3  ;;  %v19012_v3 = vld [vmem:[%s24860_s15 + $0xa30] ss:$24 sps:$4 sm:$0xff]  }
 0xb80   :  { %13441 = vmatprep.subr.bf16.mxu1 %v18940_v22 }
 0xb83   :  { %13442 = vmatpush1.bf16.msra.mxu1 %v18938_v16 }
 0xb84   :  { %13443 = vmatprep.subr.bf16.mxu1 %v18943_v37 }
 0xb87   :  { %13444 = vmatpush1.bf16.msra.mxu1 %v18941_v61 }
 0xb88   :  { %13445 = vmatprep.subr.bf16.mxu1 %v18946_v1  ;;  %v19039_v1 = vld [vmem:[%s24862_s17 + $0x80] sm:$0xff]  }
 0xb8b   :  { %13446 = vmatpush1.bf16.msra.mxu1 %v18944_v32 }
 0xb8c   :  { %13447 = vmatprep.subr.bf16.mxu1 %v18949_v53  ;;  %v19022_v53 = vld [vmem:[%s24860_s15 + $0xa94] ss:$24 sps:$4 sm:$0xff]  }
 0xb8f   :  { %13448 = vmatpush1.bf16.msra.mxu1 %v18947_v48  ;;  %v19043_v48 = vld [vmem:[%s24862_s17 + $0xc8] sm:$0xff]  }
 0xb90   :  { %13449 = vmatprep.subr.bf16.mxu1 %v18952_v11  ;;  %v19020_v11 = vld [vmem:[%s24860_s15 + $0xa90] ss:$24 sps:$4 sm:$0xff]  }
 0xb93   :  { %13450 = vmatpush1.bf16.msra.mxu1 %v18950_v40  ;;  %v19044_v40 = vld [vmem:[%s24862_s17 + $0x88] sm:$0xff]  }
 0xb94   :  { %13451 = vmatprep.subr.bf16.mxu1 %v18955_v24  ;;  %v19025_v24 = vld [vmem:[%s24860_s15 + $0xac4] ss:$24 sps:$4 sm:$0xff]  }
 0xb97   :  { %13452 = vmatpush1.bf16.msra.mxu1 %v18953_v25  ;;  %v19048_v25 = vld [vmem:[%s24862_s17 + $0xd0] sm:$0xff]  }
 0xb98   :  { %13453 = vmatprep.subr.bf16.mxu1 %v18958_v42  ;;  %v19023_v42 = vld [vmem:[%s24860_s15 + $0xac0] ss:$24 sps:$4 sm:$0xff]  }
 0xb9b   :  { %13454 = vmatpush1.bf16.msra.mxu1 %v18956_v26  ;;  %v19049_v26 = vld [vmem:[%s24862_s17 + $0x90] sm:$0xff]  }
 0xb9c   :  { %13455 = vmatprep.subr.bf16.mxu1 %v18961_v34  ;;  %v19028_v34 = vld [vmem:[%s24860_s15 + $0xaf4] ss:$24 sps:$4 sm:$0xff]  }
 0xb9f   :  { %13456 = vmatpush1.bf16.msra.mxu1 %v18959_v21  ;;  %v19053_v21 = vld [vmem:[%s24862_s17 + $0xd8] sm:$0xff]  }
 0xba0   :  { %13457 = vmatprep.subr.bf16.mxu1 %v18964_v58  ;;  %v19026_v58 = vld [vmem:[%s24860_s15 + $0xaf0] ss:$24 sps:$4 sm:$0xff]  }
 0xba3   :  { %13458 = vmatpush1.bf16.msra.mxu1 %v18962_v20  ;;  %v19054_v20 = vld [vmem:[%s24862_s17 + $0x98] sm:$0xff]  }
 0xba4   :  { %13459 = vmatprep.subr.bf16.mxu1 %v18967_v23  ;;  %v19031_v23 = vld [vmem:[%s24860_s15 + $0xb24] ss:$24 sps:$4 sm:$0xff]  }
 0xba7   :  { %13460 = vmatpush1.bf16.msra.mxu1 %v18965_v46  ;;  %v19058_v46 = vld [vmem:[%s24862_s17 + $0xe0] sm:$0xff]  }
 0xba8   :  { %13461 = vmatprep.subr.bf16.mxu1 %v18970_v47  ;;  %v19029_v47 = vld [vmem:[%s24860_s15 + $0xb20] ss:$24 sps:$4 sm:$0xff]  }
 0xbab   :  { %13462 = vmatpush1.bf16.msra.mxu1 %v18968_v13  ;;  %v19059_v13 = vld [vmem:[%s24862_s17 + $0xa0] sm:$0xff]  }
 0xbac   :  { %13463 = vmatprep.subr.bf16.mxu1 %v18973_v49  ;;  %v19034_v49 = vld [vmem:[%s24860_s15 + $0xb54] ss:$24 sps:$4 sm:$0xff]  }
 0xbaf   :  { %13464 = vmatpush1.bf16.msra.mxu1 %v18971_v4  ;;  %v19063_v4 = vld [vmem:[%s24862_s17 + $0xe8] sm:$0xff]  }
 0xbb0   :  { %13465 = vmatprep.subr.bf16.mxu1 %v18976_v30  ;;  %v19032_v30 = vld [vmem:[%s24860_s15 + $0xb50] ss:$24 sps:$4 sm:$0xff]  }
 0xbb3   :  { %13466 = vmatpush1.bf16.msra.mxu1 %v18974_v15  ;;  %v19064_v15 = vld [vmem:[%s24862_s17 + $0xa8] sm:$0xff]  }
 0xbb4   :  { %13467 = vmatprep.subr.bf16.mxu1 %v18979_v51  ;;  %v19037_v51 = vld [vmem:[%s24860_s15 + $0xb84] ss:$24 sps:$4 sm:$0xff]  }
 0xbb7   :  { %13468 = vmatpush1.bf16.msra.mxu1 %v18977_v14  ;;  %v19068_v14 = vld [vmem:[%s24862_s17 + $0xf0] sm:$0xff]  }
 0xbb8   :  { %13478 = vmatprep.subr.bf16.mxu1 %v18984_v5  ;;  %v19035_v5 = vld [vmem:[%s24860_s15 + $0xb80] ss:$24 sps:$4 sm:$0xff]  }
 0xbba   :  { %13470 = vmatmul.mubr.bf16.vlgmr.msra.gmra.mrb[140].mxu1 %v23647_v43  ;;  %v18999_v43 = vld [vmem:[%s24860_s15 + $0x9a4] ss:$24 sps:$4 sm:$0xff]  }
 0xbbb   :  { %13479 = vmatpush1.bf16.msra.mxu1 %v18982_v52  ;;  %13510 = vmatprep.mubr.bf16.mxu1 %v23658_v9  ;;  %v18997_v9 = vld [vmem:[%s24860_s15 + $0x9a0] ss:$24 sps:$4 sm:$0xff]   ;;  %v19069_v52 = vld [vmem:[%s24862_s17 + $0xb0] sm:$0xff]  }
 0xbbc   :  { %13480 = vmatprep.subr.bf16.mxu1 %v18989_v38  ;;  %v19042_v38 = vld [vmem:[%s24860_s15 + $0xbb4] ss:$24 sps:$4 sm:$0xff]  }
 0xbbf   :  { %13481 = vmatpush1.bf16.msra.mxu1 %v18987_v41  ;;  %v19073_v41 = vld [vmem:[%s24862_s17 + $0xf8] sm:$0xff]  }
 0xbc0   :  { %13482 = vmatprep.subr.bf16.mxu1 %v18994_v39  ;;  %v19040_v39 = vld [vmem:[%s24860_s15 + $0xbb0] ss:$24 sps:$4 sm:$0xff]  }
 0xbc3   :  { %13483 = vmatpush1.bf16.msra.mxu1 %v18992_v35  ;;  %v19074_v35 = vld [vmem:[%s24862_s17 + $0xb8] sm:$0xff]  }
 0xbc4   :  { %13484 = vmatprep.subr.bf16.mxu1 %v18999_v43  ;;  %v19047_v43 = vld [vmem:[%s24860_s15 + $0xbe4] ss:$24 sps:$4 sm:$0xff]  }
 0xbc7   :  { %13485 = vmatpush1.bf16.msra.mxu1 %v18997_v9  ;;  %v19045_v9 = vld [vmem:[%s24860_s15 + $0xbe0] ss:$24 sps:$4 sm:$0xff]  }
 0xbc8   :  { %13486 = vmatprep.subr.bf16.mxu1 %v19004_v57  ;;  %v19052_v57 = vld [vmem:[%s24860_s15 + $0xc14] ss:$24 sps:$4 sm:$0xff]  }
 0xbcb   :  { %13487 = vmatpush1.bf16.msra.mxu1 %v19002_v12  ;;  %v19050_v12 = vld [vmem:[%s24860_s15 + $0xc10] ss:$24 sps:$4 sm:$0xff]  }
 0xbcc   :  { %13488 = vmatprep.subr.bf16.mxu1 %v19009_v17  ;;  %v19055_v17 = vld [vmem:[%s24860_s15 + $0xc40] ss:$24 sps:$4 sm:$0xff]  }
 0xbcd   :  { %v13102_v31 = vpop.f32.mrb[136].mxu1 }
 0xbce   :  { %v16892_v19 = vadd.f32 %v13102_v31, %v12898_v55  ;;  %v13104_v0 = vpop.f32.mrb[137].mxu1  ;;  %v19065_v55 = vld [vmem:[%s24860_s15 + $0xca0] ss:$24 sps:$4 sm:$0xff]  }
 0xbcf   :  { %v16894_v29 = vadd.f32 %v13104_v0, %v12900_v6  ;;  %13489 = vmatpush1.bf16.msra.mxu1 %v19007_v50  ;;  %v13106_v10 = vpop.f32.mrb[138].mxu1  ;;  %v19060_v50 = vld [vmem:[%s24860_s15 + $0xc70] ss:$24 sps:$4 sm:$0xff]   ;;  %v19072_v6 = vld [vmem:[%s24860_s15 + $0xcd4] ss:$24 sps:$4 sm:$0xff]  }
 0xbd0   :  { %v13601_v22 = vmax.f32 %v16892_v19, 0.0  ;;  %v13107_v16 = vpop.f32.mrb[139].mxu1  ;;  %13490 = vmatprep.subr.bf16.mxu1 %v19014_v8  ;;  %v12825_v8 = vrot.slane %v24550_v2, %v9824_v54 }
 0xbd1   :  { %v13602_v37 = vmax.f32 %v16894_v29, 0.0 }
 0xbd2   :  { %v13607_v32 = vpack.c.bf16 %v13601_v22, %v13601_v22 }
 0xbd3   :  { %v13608_v61 = vpack.c.bf16 %v13602_v37, %v13602_v37  ;;  %13491 = vmatpush1.bf16.msra.mxu1 %v19012_v3  ;;  %v19077_v3 = vld [vmem:[%s24860_s15 + $0xd04] ss:$24 sps:$4 sm:$0xff]  }
 0xbd4   :  { %13492 = vmatprep.subr.bf16.mxu1 %v19019_v62  ;;  %v19075_v62 = vld [vmem:[%s24860_s15 + $0xd00] ss:$24 sps:$4 sm:$0xff]  }
 0xbd5   :  { %13980 = vmatprep.mubr.bf16.mxu0 %v13608_v61  ;;  %v19080_v61 = vld [vmem:[%s24860_s15 + $0xd34] ss:$24 sps:$4 sm:$0xff]  }
 0xbd6   :  { %13981 = vmatmul.mubr.bf16.vlgmr.msra.gmra.mrb[164].mxu0 %v13607_v32  ;;  %v19083_v32 = vld [vmem:[%s24860_s15 + $0xd64] ss:$24 sps:$4 sm:$0xff]  }
 0xbd7   :  { %13493 = vmatpush1.bf16.msra.mxu1 %v19017_v44  ;;  %16727 = vmatpush3.bf16.msra.mxu0 %v19039_v1  ;;  %v19078_v1 = vld [vmem:[%s24860_s15 + $0xd30] ss:$24 sps:$4 sm:$0xff]  }
 0xbd8   :  { %13494 = vmatprep.subr.bf16.mxu1 %v19022_v53  ;;  %16728 = vmatprep.subr.bf16.mxu0 %v19043_v48  ;;  %v19081_v53 = vld [vmem:[%s24860_s15 + $0xd60] ss:$24 sps:$4 sm:$0xff]   ;;  %v19086_v48 = vld [vmem:[%s24860_s15 + $0xd94] ss:$24 sps:$4 sm:$0xff]  }
 0xbdb   :  { %13495 = vmatpush1.bf16.msra.mxu1 %v19020_v11  ;;  %16729 = vmatpush3.bf16.msra.mxu0 %v19044_v40  ;;  %v19084_v11 = vld [vmem:[%s24860_s15 + $0xd90] ss:$24 sps:$4 sm:$0xff]   ;;  %v19089_v40 = vld [vmem:[%s24860_s15 + $0xdc4] ss:$24 sps:$4 sm:$0xff]  }
 0xbdc   :  { %13496 = vmatprep.subr.bf16.mxu1 %v19025_v24  ;;  %16730 = vmatprep.subr.bf16.mxu0 %v19048_v25  ;;  %v19087_v24 = vld [vmem:[%s24860_s15 + $0xdc0] ss:$24 sps:$4 sm:$0xff]   ;;  %v19092_v25 = vld [vmem:[%s24860_s15 + $0xdf4] ss:$24 sps:$4 sm:$0xff]  }
 0xbdf   :  { %13497 = vmatpush1.bf16.msra.mxu1 %v19023_v42  ;;  %16731 = vmatpush3.bf16.msra.mxu0 %v19049_v26  ;;  %v19090_v42 = vld [vmem:[%s24860_s15 + $0xdf0] ss:$24 sps:$4 sm:$0xff]   ;;  %v19095_v26 = vld [vmem:[%s24860_s15 + $0xe24] ss:$24 sps:$4 sm:$0xff]  }
 0xbe0   :  { %13498 = vmatprep.subr.bf16.mxu1 %v19028_v34  ;;  %16732 = vmatprep.subr.bf16.mxu0 %v19053_v21  ;;  %v19093_v34 = vld [vmem:[%s24860_s15 + $0xe20] ss:$24 sps:$4 sm:$0xff]   ;;  %v19098_v21 = vld [vmem:[%s24860_s15 + $0xe54] ss:$24 sps:$4 sm:$0xff]  }
 0xbe3   :  { %13499 = vmatpush1.bf16.msra.mxu1 %v19026_v58  ;;  %16733 = vmatpush3.bf16.msra.mxu0 %v19054_v20  ;;  %v19096_v58 = vld [vmem:[%s24860_s15 + $0xe50] ss:$24 sps:$4 sm:$0xff]   ;;  %v19101_v20 = vld [vmem:[%s24860_s15 + $0xe84] ss:$24 sps:$4 sm:$0xff]  }
 0xbe4   :  { %13500 = vmatprep.subr.bf16.mxu1 %v19031_v23  ;;  %16734 = vmatprep.subr.bf16.mxu0 %v19058_v46  ;;  %v19099_v23 = vld [vmem:[%s24860_s15 + $0xe80] ss:$24 sps:$4 sm:$0xff]   ;;  %v19104_v46 = vld [vmem:[%s24860_s15 + $0xeb4] ss:$24 sps:$4 sm:$0xff]  }
 0xbe7   :  { %13501 = vmatpush1.bf16.msra.mxu1 %v19029_v47  ;;  %16735 = vmatpush3.bf16.msra.mxu0 %v19059_v13  ;;  %v19102_v47 = vld [vmem:[%s24860_s15 + $0xeb0] ss:$24 sps:$4 sm:$0xff]   ;;  %v19107_v13 = vld [vmem:[%s24860_s15 + $0xee4] ss:$24 sps:$4 sm:$0xff]  }
 0xbe8   :  { %13502 = vmatprep.subr.bf16.mxu1 %v19034_v49  ;;  %16736 = vmatprep.subr.bf16.mxu0 %v19063_v4  ;;  %v19105_v49 = vld [vmem:[%s24860_s15 + $0xee0] ss:$24 sps:$4 sm:$0xff]   ;;  %v19108_v4 = vld [vmem:[%s24860_s15 + $0xf14] ss:$24 sps:$4 sm:$0x1f]  }
 0xbeb   :  { %13503 = vmatpush1.bf16.msra.mxu1 %v19032_v30  ;;  %16737 = vmatpush3.bf16.msra.mxu0 %v19064_v15  ;;  %v19110_v30 = vld [vmem:[%s24860_s15 + $0xf10] ss:$24 sps:$4 sm:$0x1f]  }
 0xbec   :  { %13504 = vmatprep.subr.bf16.mxu1 %v19037_v51  ;;  %16738 = vmatprep.subr.bf16.mxu0 %v19068_v14  ;;  %v12858_v15 = vsel %vm12844_vm15, %v19110_v30, 0  ;;  %v19111_v51 = vld [vmem:[%s24862_s17 + $0x100] sm:$0xff]   ;;  %v19112_v14 = vld [vmem:[%s24862_s17 + $0x108] sm:$0xff]  }
 0xbef   :  { %13505 = vmatpush1.bf16.msra.mxu1 %v19035_v5  ;;  %16739 = vmatpush3.bf16.msra.mxu0 %v19069_v52  ;;  %v19115_v5 = vld [vmem:[%s24862_s17 + $0x120] sm:$0xff]   ;;  %v19116_v52 = vld [vmem:[%s24862_s17 + $0x128] sm:$0xff]  }
 0xbf0   :  { %13506 = vmatprep.subr.bf16.mxu1 %v19042_v38  ;;  %16740 = vmatprep.subr.bf16.mxu0 %v19073_v41  ;;  %v19117_v38 = vld [vmem:[%s24862_s17 + $0x130] sm:$0xff]   ;;  %v19145_v41 = vmov 65535  }
 0xbf3   :  { %13507 = vmatpush1.bf16.msra.mxu1 %v19040_v39  ;;  %16741 = vmatpush3.bf16.msra.mxu0 %v19074_v35  ;;  %v13943_v39 = vsel %vm13942_vm2, 4294967295, %v19145_v41  ;;  %v16959_v35 = vld [vmem:[%s24862_s17 + $0x140] ss:$0 sps:$4 sm:$0x77]  }
 0xbf4   :  { %13508 = vmatprep.subr.bf16.mxu1 %v19047_v43  ;;  %14028 = vmatprep.subr.bf16.mxu0 %v19144_v60  ;;  %v13944_v43 = vsel %vm153_vm0, %v13943_v39, 0  ;;  %vm13938_vm0 = vcmask 39936  }
 0xbf7   :  { %13509 = vmatpush1.bf16.msra.mxu1 %v19045_v9  ;;  %v19118_v9 = vld [vmem:[%s24862_s17 + $0x138] sm:$0xff]  }
 0xbf8   :  { %13519 = vmatprep.subr.bf16.mxu1 %v19052_v57  ;;  %v13946_v57 = vand.u32 %v16959_v35, %v13944_v43 }
 0xbfa   :  { %13511 = vmatmul.mubr.bf16.vlgmr.msra.gmra.mrb[140].mxu1 %v23861_v27  ;;  %v19067_v27 = vld [vmem:[%s24860_s15 + $0xca4] ss:$24 sps:$4 sm:$0xff]  }
 0xbfb   :  { %13520 = vmatpush1.bf16.msra.mxu1 %v19050_v12  ;;  %13551 = vmatprep.mubr.bf16.mxu1 %v23869_v45  ;;  %v12821_v45 = vrot.slane %v24550_v2, %v23388_v28  ;;  %v19070_v28 = vld [vmem:[%s24860_s15 + $0xcd0] ss:$24 sps:$4 sm:$0xff]  }
 0xbfc   :  { %13521 = vmatprep.subr.bf16.mxu1 %v19057_v59 }
 0xbff   :  { %13522 = vmatpush1.bf16.msra.mxu1 %v19055_v17 }
 0xc00   :  { %13523 = vmatprep.subr.bf16.mxu1 %v19062_v56 }
 0xc03   :  { %13524 = vmatpush1.bf16.msra.mxu1 %v19060_v50 }
 0xc04   :  { %13525 = vmatprep.subr.bf16.mxu1 %v19067_v27  ;;  %v13694_v27 = vld [vmem:[%s24863_s18] sm:$0x1] }
 0xc06   :  { %v13348_v31 = vpop.f32.mrb[160].mxu0 }
 0xc07   :  { %v16895_v19 = vadd.f32 %v13348_v31, %v12821_v45  ;;  %v13350_v0 = vpop.f32.mrb[161].mxu0  ;;  %13526 = vmatpush1.bf16.msra.mxu1 %v19065_v55 }
 0xc08   :  { %v16896_v29 = vadd.f32 %v13350_v0, %v12825_v8  ;;  %v13352_v10 = vpop.f32.mrb[162].mxu0  ;;  %13527 = vmatprep.subr.bf16.mxu1 %v19072_v6 }
 0xc09   :  { %v13603_v54 = vmax.f32 %v16895_v19, 0.0  ;;  %v13353_v22 = vpop.f32.mrb[163].mxu0 }
 0xc0a   :  { %v13604_v16 = vmax.f32 %v16896_v29, 0.0 }
 0xc0b   :  { %13528 = vmatpush1.bf16.msra.mxu1 %v19070_v28  ;;  %v13609_v44 = vpack.c.bf16 %v13603_v54, %v13603_v54  ;;  %v12833_v28 = vrot.slane %v24550_v2, %v9832_v63 }
 0xc0c   :  { %v13610_v37 = vpack.c.bf16 %v13604_v16, %v13604_v16  ;;  %13529 = vmatprep.subr.bf16.mxu1 %v19077_v3 }
 0xc0e   :  { %14020 = vmatprep.mubr.bf16.mxu0 %v13610_v37 }
 0xc0f   :  { %13530 = vmatpush1.bf16.msra.mxu1 %v19075_v62  ;;  %14021 = vmatmul.mubr.bf16.vlgmr.msra.gmra.mrb[168].mxu0 %v13609_v44 }
 0xc10   :  { %13531 = vmatprep.subr.bf16.mxu1 %v19080_v61  ;;  %14029 = vmatpush1.bf16.msra.mxu0 %v19111_v51 }
 0xc11   :  { %14030 = vmatprep.subr.bf16.mxu0 %v19144_v60 }
 0xc13   :  { %13532 = vmatpush1.bf16.msra.mxu1 %v19078_v1 }
 0xc14   :  { %13533 = vmatprep.subr.bf16.mxu1 %v19083_v32  ;;  %14031 = vmatpush1.bf16.msra.mxu0 %v19112_v14 }
 0xc15   :  { %14032 = vmatprep.subr.bf16.mxu0 %v19144_v60 }
 0xc17   :  { %13534 = vmatpush1.bf16.msra.mxu1 %v19081_v53 }
 0xc18   :  { %13535 = vmatprep.subr.bf16.mxu1 %v19086_v48 }
 0xc1b   :  { %13536 = vmatpush1.bf16.msra.mxu1 %v19084_v11 }
 0xc1c   :  { %13537 = vmatprep.subr.bf16.mxu1 %v19089_v40 }
 0xc1f   :  { %13538 = vmatpush1.bf16.msra.mxu1 %v19087_v24 }
 0xc20   :  { %13539 = vmatprep.subr.bf16.mxu1 %v19092_v25 }
 0xc23   :  { %13540 = vmatpush1.bf16.msra.mxu1 %v19090_v42 }
 0xc24   :  { %13541 = vmatprep.subr.bf16.mxu1 %v19095_v26 }
 0xc27   :  { %13542 = vmatpush1.bf16.msra.mxu1 %v19093_v34 }
 0xc28   :  { %13543 = vmatprep.subr.bf16.mxu1 %v19098_v21 }
 0xc2b   :  { %13544 = vmatpush1.bf16.msra.mxu1 %v19096_v58 }
 0xc2c   :  { %13545 = vmatprep.subr.bf16.mxu1 %v19101_v20 }
 0xc2f   :  { %13546 = vmatpush1.bf16.msra.mxu1 %v19099_v23 }
 0xc30   :  { %13547 = vmatprep.subr.bf16.mxu1 %v19104_v46 }
 0xc33   :  { %13548 = vmatpush1.bf16.msra.mxu1 %v19102_v47 }
 0xc34   :  { %13549 = vmatprep.subr.bf16.mxu1 %v19107_v13 }
 0xc37   :  { %13550 = vmatpush1.bf16.msra.mxu1 %v19105_v49 }
 0xc38   :  { %16596 = vmatprep.subr.msk.bf16.mxu1 %vm12844_vm15, %v19108_v4 }
 0xc3a   :  { %13552 = vmatmul.mubr.bf16.vlgmr.msra.gmra.mrb[140].mxu1 %v24068_v33  ;;  %v19113_v33 = vld [vmem:[%s24862_s17 + $0x110] sm:$0xff]  }
 0xc3b   :  { %13561 = vmatpush1.bf16.msra.mxu1 %v12858_v15  ;;  %13592 = vmatprep.mubr.bf16.mxu1 %v19144_v60 }
 0xc3c   :  { %14033 = vmatpush1.bf16.msra.mxu0 %v19113_v33 }
 0xc3d   :  { %14034 = vmatprep.subr.bf16.mxu0 %v19144_v60 }
 0xc46   :  { %16597 = vmatmul.mubr.msk.bf16.vlgmr.msra.gmra.mrb[140].mxu1 %vm12840_vm1, %v24101_v18  ;;  %v19114_v18 = vld [vmem:[%s24862_s17 + $0x118] sm:$0xff]   ;;  %s19146_s17 = smov [#allocation2]  }
 0xc47   :  { %14035 = vmatpush1.bf16.msra.mxu0 %v19114_v18  ;;  %s14076_s18 = sshll.u32 %s19146_s17, 4  ;;  %s14077_s18 = int_to_ptr.vmem [resolvable:$true] %s14076_s18 }
 0xc48   :  { %14036 = vmatprep.subr.bf16.mxu0 %v19144_v60  ;;  %s19119_s23 = scalar_lea.vmem %s14077_s18, 16  ;;  %s19123_s22 = scalar_lea.vmem %s14077_s18, 32 }
 0xc49   :  { %p19120_p0 = scmp.ne.s32.totalorder %s14077_s18, %s19119_s23  ;;  %p19124_p1 = scmp.lt.s32.totalorder %s14077_s18, %s14077_s18 }
 0xc4a   :  { %p19125_p2 = scmp.lt.s32.totalorder %s19123_s22, %s19119_s23 }
 0xc4b   :  { %14037 = vmatpush1.bf16.msra.mxu0 %v19115_v5 }
 0xc4c   :  { %14038 = vmatprep.subr.bf16.mxu0 %v19144_v60  ;;  %p19126_p3 = por %p19125_p2, %p19124_p1 }
 0xc4e   :  { %p19127_p4 = pnand %p19126_p3, %p19120_p0 }
 0xc4f   :  { %14039 = vmatpush1.bf16.msra.mxu0 %v19116_v52 }
 0xc50   :  { %14040 = vmatprep.subr.bf16.mxu0 %v19144_v60 }
 0xc53   :  { %14041 = vmatpush1.bf16.msra.mxu0 %v19117_v38 }
 0xc54   :  { %14042 = vmatprep.subr.bf16.mxu0 %v19144_v60 }
 0xc57   :  { %14043 = vmatpush1.bf16.msra.mxu0 %v19118_v9 }
 0xc58   :  { %14044 = vmatprep.subr.bf16.mxu0 %v19144_v60  ;;  %v12829_v60 = vrot.slane %v24550_v2, %v9828_v36 }
 0xc5b   :  { %14045 = vmatpush1.bf16.msra.mxu0 %v13946_v57 }
 0xca9   :  { %v16720_v12 = vpop.f32.mrb[164].mxu0 }
 0xcaa   :  { %v16721_v59 = vpop.f32.mrb[165].mxu0 }
 0xcab   :  { %v16722_v17 = vadd.f32 %v16721_v59, %v16720_v12  ;;  %v16723_v56 = vpop.f32.mrb[166].mxu0 }
 0xcac   :  { %v16724_v50 = vpop.f32.mrb[167].mxu0 }
 0xcad   :  { %v13983_v8 = vadd.f32 %v16722_v17, %v13694_v27 }
 0xce2   :  { %v16742_v45 = vpop.f32.mrb[168].mxu0 }
 0xce3   :  { %v16743_v55 = vpop.f32.mrb[169].mxu0 }
 0xce4   :  { %v16744_v6 = vadd.f32 %v16743_v55, %v16742_v45  ;;  %v16745_v31 = vpop.f32.mrb[170].mxu0 }
 0xce5   :  { %v16746_v19 = vpop.f32.mrb[171].mxu0 }
 0xce6   :  { %v14023_v0 = vadd.f32 %v16744_v6, %v13983_v8 }
 0xd19   :  { %v13594_v29 = vpop.f32.mrb[140].mxu1 }
 0xd1a   :  { %v16897_v10 = vadd.f32 %v13594_v29, %v12829_v60  ;;  %v13596_v3 = vpop.f32.mrb[141].mxu1 }
 0xd1b   :  { %v16898_v54 = vadd.f32 %v13596_v3, %v12833_v28  ;;  %v13598_v22 = vpop.f32.mrb[142].mxu1 }
 0xd1c   :  { %v13605_v16 = vmax.f32 %v16897_v10, 0.0  ;;  %v13599_v62 = vpop.f32.mrb[143].mxu1 }
 0xd1d   :  { %v13606_v37 = vmax.f32 %v16898_v54, 0.0 }
 0xd1e   :  { %v13611_v44 = vpack.c.bf16 %v13605_v16, %v13605_v16 }
 0xd1f   :  { %v13612_v61 = vpack.c.bf16 %v13606_v37, %v13606_v37 }
 0xd21   :  { %16639 = vmatprep.mubr.msk.bf16.mxu0 %vm13938_vm0, %v13612_v61 }
 0xd22   :  { %14061 = vmatmul.mubr.bf16.vlgmr.msra.gmra.mrb[172].mxu0 %v13611_v44 }
 0xdf5   :  { %v14062_v36 = vpop.f32.mrb[172].mxu0 }
 0xdf6   :  { %v14063_v7 = vadd.f32 %v14062_v36, %v14023_v0  ;;  %v14064_v1 = vpop.f32.mrb[173].mxu0 }
 0xdf7   :  { %v14065_v63 = vpop.f32.mrb[174].mxu0 }
 0xdf8   :  { %v14066_v2 = vpop.f32.mrb[175].mxu0  ;;  %14069 = vst.msk [vmem:[#allocation2] sm:$0x1] %vm14068_vm3, %v14063_v7 }
 0xdf9   :  { %19130 = shalt.err (!%p19127_p4)
}
 0xdfa   :  { %s19131_s16 = scalar_lea.hbm %s24864_s19, 16 }
 0xdfb   :  { %p19132_p5 = scmp.ne.s32.totalorder %s24864_s19, %s19131_s16  ;;  %p19135_p6 = scmp.lt.u32.totalorder %s19131_s16, %s24864_s19 }
 0xdfd   :  { %p19137_p7 = pnand %p19135_p6, %p19132_p5 }
 0xdff   :  { %19140 = shalt.err (!%p19137_p7)
}
 0xe00   :  { %14079 = dma.vmem_to_hbm [thread:$0]  %s14077_s18, 16, %s24864_s19, [#allocation3]  }
 0xe01   :  { %19141 = dma.done.wait [#allocation3], 16  }
 0xe02   :  { %19142 = vsyncadd [#allocation3], 4294967280 }
 0xe03   :  { %14083 = vsyncpa [#allocation3], 1 }

</bundles_post_ra>
